<compile_context>
chip_gen: v7x
topology: tpu7x:2x2x1
jax: 0.10.0
libtpu: 0.0.40
codegen_flags: <defaults>
</compile_context>

<pallas_src>
import math

import jax
import jax.numpy as jnp
from jax.experimental import pallas as pl
from jax.experimental.pallas import tpu as pltpu


def _round_up(x: int, m: int) -> int:
    return ((x + m - 1) // m) * m


def _pos_emb_kernel_split(t_ref, f_ref, out_ref):
    # t_ref:   (TILE_B, 1)     float32 timesteps
    # f_ref:   (1, half_dim)   float32 precomputed log-spaced frequencies
    # out_ref: (TILE_B, dim)   out_dtype, half_dim % 128 == 0
    half_dim = f_ref.shape[1]
    args = t_ref[...] * f_ref[...]                       # (TILE_B, half_dim), VPU broadcast mul
    out_ref[:, :half_dim] = jnp.sin(args).astype(out_ref.dtype)   # lane-dense unmasked store
    out_ref[:, half_dim:] = jnp.cos(args).astype(out_ref.dtype)   # lane-dense unmasked store


def _pos_emb_kernel_concat(t_ref, f_ref, out_ref):
    # Fallback for half_dim not a multiple of 128: one full-width store of the
    # concatenated row (block covers the full `dim`, so the store is still a
    # single full-block write).
    args = t_ref[...] * f_ref[...]
    row = jnp.concatenate([jnp.sin(args), jnp.cos(args)], axis=-1)
    out_ref[...] = row.astype(out_ref.dtype)


def positional_embeddings(time_vec: jax.Array, dim: int, *,
                          out_dtype=jnp.float32,
                          max_tile_bytes: int = 4 << 20) -> jax.Array:
    """time_vec: (B,) array of timesteps. Returns (B, dim) embeddings."""
    assert dim % 2 == 0 and dim >= 4, "dim must be even and >= 4 (half_dim - 1 > 0)"
    B = time_vec.shape[0]
    half_dim = dim // 2

    # Host-side frequency table: identical math to the PyTorch module / reference.
    scale = math.log(1000.0) / (half_dim - 1)
    freqs2d = jnp.exp(jnp.arange(half_dim, dtype=jnp.float32) * (-scale)).reshape(1, half_dim)

    # ---- batch tile selection -------------------------------------------------
    # Largest 8-multiple tile whose output block stays under the byte budget;
    # this keeps 2x double-buffered output + intermediates well inside v7x's
    # scoped VMEM even for very large dim.
    out_itemsize = jnp.dtype(out_dtype).itemsize
    b8 = _round_up(B, 8)
    tile_cap = max(8, (max_tile_bytes // (dim * out_itemsize)) // 8 * 8)
    if b8 <= tile_cap:
        tile_b = b8                       # single grid step, zero padded rows
    else:
        tile_b = tile_cap
        for cand in range(tile_cap, 7, -8):   # prefer a tile that divides b8 -> no padded rows
            if b8 % cand == 0:
                tile_b = cand
                break
    b_pad = _round_up(b8, tile_b)
    num_steps = b_pad // tile_b

    t2d = time_vec.astype(jnp.float32).reshape(B, 1)
    if b_pad != B:
        t2d = jnp.pad(t2d, ((0, b_pad - B), (0, 0)))

    kernel = _pos_emb_kernel_split if half_dim % 128 == 0 else _pos_emb_kernel_concat

    out = pl.pallas_call(
        kernel,
        out_shape=jax.ShapeDtypeStruct((b_pad, dim), out_dtype),
        grid_spec=pl.GridSpec(
            grid=(num_steps,),
            in_specs=[
                pl.BlockSpec((tile_b, 1), lambda i: (i, 0)),        # timesteps, tiled over batch
                pl.BlockSpec((1, half_dim), lambda i: (0, 0)),      # freqs, same block every step
            ],
            out_specs=pl.BlockSpec((tile_b, dim), lambda i: (i, 0)),
        ),
        compiler_params=pltpu.CompilerParams(
            # Only meaningful on v7x (2 TCs) and only if there is >1 grid step.
            dimension_semantics=("parallel",) if num_steps > 1 else ("arbitrary",),
        ),
    )(t2d, freqs2d)

    return out[:B]


def _reference(time_vec: jax.Array, dim: int) -> jax.Array:
    half_dim = dim // 2
    scale = math.log(1000.0) / (half_dim - 1)
    freqs = jnp.exp(jnp.arange(half_dim, dtype=jnp.float32) * (-scale))
    emb = time_vec.astype(jnp.float32)[:, None] * freqs[None, :]
    return jnp.concatenate([jnp.sin(emb), jnp.cos(emb)], axis=-1)


if __name__ == "__main__":
    key = jax.random.PRNGKey(0)
    B = 384     # round_up(384, 8) = 384 -> single 384-row grid step, no padded rows
    DIM = 256   # half_dim = 128 -> lane-aligned sin/cos halves, two unmasked stores

    # Deterministic diffusion-style timesteps.
    time_vec = jax.random.uniform(key, (B,), dtype=jnp.float32) * 100.0

    out = positional_embeddings(time_vec, DIM)
    out = jax.block_until_ready(out)

    ref = _reference(time_vec, DIM)
    assert out.shape == (B, DIM)
    # freqs and the t*freqs products are bit-identical to the reference; the
    # only remaining delta is Mosaic's vs XLA's sin/cos polynomial at |args|
    # up to ~100 rad, so allow a small absolute slack.
    err = float(jnp.max(jnp.abs(out - ref)))
    assert err < 5e-4, f"mismatch vs reference, max abs err = {err}"

    print("KERNEL_OK")
</pallas_src>

<mosaic_0001>
module attributes {stable_mosaic.version = 11 : i64} {
  func.func @_pos_emb_kernel_split(%arg0: i32, %arg1: memref<384x1xf32, #tpu.memory_space<vmem>>, %arg2: memref<1x128xf32, #tpu.memory_space<vmem>>, %arg3: memref<384x256xf32, #tpu.memory_space<vmem>>) attributes {dimension_semantics = [#tpu.dimension_semantics<arbitrary>], iteration_bounds = array<i64: 1>, scalar_prefetch = 0 : i64, scratch_operands = 0 : i64, tpu.core_type = #tpu.core_type<tc>, window_params = [{transform_indices = @transform_0, window_bounds = array<i64: 384, 1>}, {pipeline_mode = #tpu.pipeline_mode<synchronous>, transform_indices = @transform_1, window_bounds = array<i64: 1, 128>}, {transform_indices = @transform_2, window_bounds = array<i64: 384, 256>}]} {
    %c0 = arith.constant 0 : index
    %c0_0 = arith.constant 0 : index
    %0 = vector.load %arg1[%c0, %c0_0] : memref<384x1xf32, #tpu.memory_space<vmem>>, vector<384x1xf32>
    %c0_1 = arith.constant 0 : index
    %c0_2 = arith.constant 0 : index
    %1 = vector.load %arg2[%c0_1, %c0_2] : memref<1x128xf32, #tpu.memory_space<vmem>>, vector<1x128xf32>
    %2 = vector.broadcast %0 : vector<384x1xf32> to vector<384x128xf32>
    %3 = vector.broadcast %1 : vector<1x128xf32> to vector<384x128xf32>
    %4 = arith.mulf %2, %3 : vector<384x128xf32>
    %5 = math.sin %4 : vector<384x128xf32>
    %c0_3 = arith.constant 0 : index
    %c0_4 = arith.constant 0 : index
    %6 = vector.load %arg3[%c0_3, %c0_4] : memref<384x256xf32, #tpu.memory_space<vmem>>, vector<384x128xf32>
    tpu.vector_store %arg3[%c0_3, %c0_4], %5 {strides = array<i32>} : memref<384x256xf32, #tpu.memory_space<vmem>>, vector<384x128xf32>,
    %7 = math.cos %4 : vector<384x128xf32>
    %c0_5 = arith.constant 0 : index
    %c128 = arith.constant 128 : index
    %8 = vector.load %arg3[%c0_5, %c128] : memref<384x256xf32, #tpu.memory_space<vmem>>, vector<384x128xf32>
    tpu.vector_store %arg3[%c0_5, %c128], %7 {strides = array<i32>} : memref<384x256xf32, #tpu.memory_space<vmem>>, vector<384x128xf32>,
    return
  }
  func.func @transform_0(%arg0: i32) -> (i32, i32) {
    %c0_i32 = arith.constant 0 : i32
    %c0_i32_0 = arith.constant 0 : i32
    return %arg0, %c0_i32 : i32, i32
  }
  func.func @transform_1(%arg0: i32) -> (i32, i32) {
    %c0_i32 = arith.constant 0 : i32
    %c0_i32_0 = arith.constant 0 : i32
    %c0_i32_1 = arith.constant 0 : i32
    return %c0_i32, %c0_i32_0 : i32, i32
  }
  func.func @transform_2(%arg0: i32) -> (i32, i32) {
    %c0_i32 = arith.constant 0 : i32
    %c0_i32_0 = arith.constant 0 : i32
    return %arg0, %c0_i32 : i32, i32
  }
}

</mosaic_0001>

<bundles_post_ra>
// kernel: tpu_custom_call.1
= control target key start
LH: loop header
LB: loop body
LE: loop exit
PB: predicated region body
PF: predicated region fallthrough
CT: control target
= control target key end

     0   :  { %v11216_v2 = vmov 0   ;;  %s16163_s0 = inlined_call_operand.vmem [shape: f32[384,1], index: 0, kind: input, shape index: {}]   ;;  %s16164_s1 = inlined_call_operand.vmem [shape: f32[1,128], index: 1, kind: input, shape index: {}]   ;;  %s16165_s2 = inlined_call_operand.hbm [shape: f32[384,256], index: 2, kind: output, shape index: {}]  }
   0x1   :  { %v14_v0 = vld [vmem:[%s16163_s0 + $0x10] sm:$0xff]  ;;  %v12_v1 = vld [vmem:[%s16163_s0] sm:$0xff]  ;;  %10991 = vset.pattern.permute.xlu1 %v11216_v2  ;;  %10990 = vset.pattern.permute.xlu0 %v11216_v2  ;;  %v15_v3 = vld [vmem:[%s16163_s0 + $0x18] sm:$0xff] }
   0x2   :  { %73 = vperm.xlu1 %10991, %v14_v0   ;;  %63 = vperm.xlu0 %10990, %v12_v1   ;;  %v13_v4 = vld [vmem:[%s16163_s0 + $0x8] sm:$0xff]  ;;  %v16_v6 = vld [vmem:[%s16163_s0 + $0x20] sm:$0xff]  ;;  %v19_v7 = vld [vmem:[%s16163_s0 + $0x38] sm:$0xff] }
   0x3   :  { %v17_v5 = vld [vmem:[%s16163_s0 + $0x28] sm:$0xff]  ;;  %v18_v8 = vld [vmem:[%s16163_s0 + $0x30] sm:$0xff]  ;;  %v20_v10 = vld [vmem:[%s16163_s0 + $0x40] sm:$0xff] }
   0x4   :  { %v21_v9 = vld [vmem:[%s16163_s0 + $0x48] sm:$0xff] }
   0x6   :  { %78 = vperm.xlu1 %10991, %v15_v3   ;;  %68 = vperm.xlu0 %10990, %v13_v4  }
   0xa   :  { %88 = vperm.xlu1 %10991, %v17_v5   ;;  %83 = vperm.xlu0 %10990, %v16_v6  }
   0xe   :  { %98 = vperm.xlu1 %10991, %v19_v7   ;;  %93 = vperm.xlu0 %10990, %v18_v8  }
   0xf   :  { %7 = vsyncpa [#allocation3], 0  ;;  %v23_v11 = vld [vmem:[%s16163_s0 + $0x58] sm:$0xff]  ;;  %v22_v12 = vld [vmem:[%s16163_s0 + $0x50] sm:$0xff] }
  0x10   :  { %v25_v13 = vld [vmem:[%s16163_s0 + $0x68] sm:$0xff]  ;;  %v24_v14 = vld [vmem:[%s16163_s0 + $0x60] sm:$0xff]  ;;  %v27_v15 = vld [vmem:[%s16163_s0 + $0x78] sm:$0xff] }
  0x11   :  { %v26_v16 = vld [vmem:[%s16163_s0 + $0x70] sm:$0xff]  ;;  %v29_v17 = vld [vmem:[%s16163_s0 + $0x88] sm:$0xff]  ;;  %v28_v18 = vld [vmem:[%s16163_s0 + $0x80] sm:$0xff] }
  0x12   :  { %108 = vperm.xlu1 %10991, %v21_v9   ;;  %103 = vperm.xlu0 %10990, %v20_v10   ;;  %v31_v19 = vld [vmem:[%s16163_s0 + $0x98] sm:$0xff]  ;;  %v30_v20 = vld [vmem:[%s16163_s0 + $0x90] sm:$0xff]  ;;  %v33_v21 = vld [vmem:[%s16163_s0 + $0xa8] sm:$0xff] }
  0x13   :  { %v32_v22 = vld [vmem:[%s16163_s0 + $0xa0] sm:$0xff]  ;;  %v35_v23 = vld [vmem:[%s16163_s0 + $0xb8] sm:$0xff]  ;;  %v34_v24 = vld [vmem:[%s16163_s0 + $0xb0] sm:$0xff] }
  0x14   :  { %v37_v25 = vld [vmem:[%s16163_s0 + $0xc8] sm:$0xff]  ;;  %v36_v26 = vld [vmem:[%s16163_s0 + $0xc0] sm:$0xff]  ;;  %v39_v27 = vld [vmem:[%s16163_s0 + $0xd8] sm:$0xff] }
  0x15   :  { %v38_v28 = vld [vmem:[%s16163_s0 + $0xd0] sm:$0xff]  ;;  %v41_v29 = vld [vmem:[%s16163_s0 + $0xe8] sm:$0xff]  ;;  %v40_v30 = vld [vmem:[%s16163_s0 + $0xe0] sm:$0xff] }
  0x16   :  { %118 = vperm.xlu1 %10991, %v23_v11   ;;  %113 = vperm.xlu0 %10990, %v22_v12   ;;  %v43_v31 = vld [vmem:[%s16163_s0 + $0xf8] sm:$0xff]  ;;  %v42_v32 = vld [vmem:[%s16163_s0 + $0xf0] sm:$0xff]  ;;  %v45_v33 = vld [vmem:[%s16163_s0 + $0x108] sm:$0xff] }
  0x17   :  { %v44_v34 = vld [vmem:[%s16163_s0 + $0x100] sm:$0xff]  ;;  %v47_v35 = vld [vmem:[%s16163_s0 + $0x118] sm:$0xff]  ;;  %v46_v36 = vld [vmem:[%s16163_s0 + $0x110] sm:$0xff] }
  0x18   :  { %v49_v37 = vld [vmem:[%s16163_s0 + $0x128] sm:$0xff]  ;;  %v48_v38 = vld [vmem:[%s16163_s0 + $0x120] sm:$0xff]  ;;  %v51_v39 = vld [vmem:[%s16163_s0 + $0x138] sm:$0xff] }
  0x19   :  { %v50_v40 = vld [vmem:[%s16163_s0 + $0x130] sm:$0xff]  ;;  %v53_v41 = vld [vmem:[%s16163_s0 + $0x148] sm:$0xff]  ;;  %v52_v42 = vld [vmem:[%s16163_s0 + $0x140] sm:$0xff] }
  0x1a   :  { %128 = vperm.xlu1 %10991, %v25_v13   ;;  %123 = vperm.xlu0 %10990, %v24_v14   ;;  %v55_v43 = vld [vmem:[%s16163_s0 + $0x158] sm:$0xff]  ;;  %v54_v44 = vld [vmem:[%s16163_s0 + $0x150] sm:$0xff]  ;;  %v57_v45 = vld [vmem:[%s16163_s0 + $0x168] sm:$0xff] }
  0x1b   :  { %v56_v46 = vld [vmem:[%s16163_s0 + $0x160] sm:$0xff]  ;;  %v59_v47 = vld [vmem:[%s16163_s0 + $0x178] sm:$0xff]  ;;  %v58_v48 = vld [vmem:[%s16163_s0 + $0x170] sm:$0xff] }
  0x1c   :  { %v11388_v49 = vld [vmem:[%s16164_s1] ss:$0 sm:$0xff] }
  0x1e   :  { %138 = vperm.xlu1 %10991, %v27_v15   ;;  %133 = vperm.xlu0 %10990, %v26_v16  }
  0x22   :  { %148 = vperm.xlu1 %10991, %v29_v17   ;;  %143 = vperm.xlu0 %10990, %v28_v18  }
  0x26   :  { %158 = vperm.xlu1 %10991, %v31_v19   ;;  %153 = vperm.xlu0 %10990, %v30_v20   ;;  %v11217_v20 = vmov 683565275  }
  0x2a   :  { %168 = vperm.xlu1 %10991, %v33_v21   ;;  %163 = vperm.xlu0 %10990, %v32_v22  }
  0x2e   :  { %178 = vperm.xlu1 %10991, %v35_v23   ;;  %173 = vperm.xlu0 %10990, %v34_v24   ;;  %v11218_v24 = vmov 2475754826  }
  0x32   :  { %188 = vperm.xlu1 %10991, %v37_v25   ;;  %183 = vperm.xlu0 %10990, %v36_v26   ;;  %v11219_v26 = vmov 2131351028  }
  0x36   :  { %198 = vperm.xlu1 %10991, %v39_v27   ;;  %193 = vperm.xlu0 %10990, %v38_v28   ;;  %v11220_v28 = vmov 2102212464  }
  0x3a   :  { %208 = vperm.xlu1 %10991, %v41_v29   ;;  %203 = vperm.xlu0 %10990, %v40_v30   ;;  %v11221_v30 = vmov 920167782  }
  0x3e   :  { %218 = vperm.xlu1 %10991, %v43_v31   ;;  %213 = vperm.xlu0 %10990, %v42_v32  }
  0x42   :  { %228 = vperm.xlu1 %10991, %v45_v33   ;;  %223 = vperm.xlu0 %10990, %v44_v34  }
  0x46   :  { %238 = vperm.xlu1 %10991, %v47_v35   ;;  %233 = vperm.xlu0 %10990, %v46_v36  }
  0x4a   :  { %248 = vperm.xlu1 %10991, %v49_v37   ;;  %243 = vperm.xlu0 %10990, %v48_v38   ;;  %v11222_v37 = vmov 1326507024  }
  0x4e   :  { %258 = vperm.xlu1 %10991, %v51_v39   ;;  %253 = vperm.xlu0 %10990, %v50_v40  }
  0x52   :  { %268 = vperm.xlu1 %10991, %v53_v41   ;;  %263 = vperm.xlu0 %10990, %v52_v42  }
  0x56   :  { %278 = vperm.xlu1 %10991, %v55_v43   ;;  %273 = vperm.xlu0 %10990, %v54_v44  }
  0x5a   :  { %288 = vperm.xlu1 %10991, %v57_v45   ;;  %283 = vperm.xlu0 %10990, %v56_v46  }
  0x5e   :  { %298 = vperm.xlu1 %10991, %v59_v47   ;;  %293 = vperm.xlu0 %10990, %v58_v48  }
  0x81   :  { %v74_v50 = vpop.permute.xlu1 %73  ;;  %v64_v51 = vpop.permute.xlu0 %63 }
  0x82   :  { %v11391_v52 = vmul.f32 %v11388_v49, %v74_v50  ;;  %v11394_v53 = vmul.f32 %v11388_v49, %v64_v51 }
  0x84   :  { %v563_v54 = vand.u32 2147483647, %v11391_v52  ;;  %v566_v55 = vand.u32 2139095040, %v11391_v52  ;;  %v355_v56 = vand.u32 2147483647, %v11394_v53  ;;  %v358_v57 = vand.u32 2139095040, %v11394_v53 }
  0x85   :  { %v79_v58 = vpop.permute.xlu1 %78  ;;  %v69_v8 = vpop.permute.xlu0 %68  ;;  %vm565_vm14 = vcmp.lt.s32.totalorder %v11391_v52, 0 }
  0x86   :  { %v567_v59 = vshrl.u32 %v566_v55, 23  ;;  %v11401_v60 = vmul.f32 %v11388_v49, %v79_v58  ;;  %v570_v61 = vand.u32 8388607, %v563_v54  ;;  %v359_v62 = vshrl.u32 %v358_v57, 23 }
  0x87   :  { %v362_v63 = vand.u32 8388607, %v355_v56  ;;  %v11409_v14 = vmul.f32 %v11388_v49, %v69_v8  ;;  %vm11492_vm13 = vcmp.le.f32.partialorder %v563_v54, 0.7853982 }
  0x88   :  { %v10412_v0 = vadd.s32 4294967169, %v567_v59  ;;  %v10404_v1 = vadd.s32 4294967169, %v359_v62  ;;  %v670_v2 = vand.u32 2139095040, %v11401_v60  ;;  %v571_v4 = vor.u32 8388608, %v570_v61 }
  0x89   :  { %v363_v5 = vor.u32 8388608, %v362_v63  ;;  %v667_v18 = vand.u32 2147483647, %v11401_v60 }
  0x8a   :  { %v573_v3 = vadd.s32 1, %v10412_v0  ;;  %v365_v6 = vadd.s32 1, %v10404_v1  ;;  %v671_v7 = vshrl.u32 %v670_v2, 23  ;;  %v11411_v15 = vshll.u32 %v571_v4, 8 }
  0x8b   :  { %v11415_v17 = vshll.u32 %v363_v5, 8 }
  0x8c   :  { %vm574_vm0 = vcmp.gt.s32.totalorder %v573_v3, 0  ;;  %vm366_vm1 = vcmp.gt.s32.totalorder %v365_v6, 0  ;;  %v10416_v10 = vadd.s32 4294967169, %v671_v7 }
  0x8d   :  { %v575_v9 = vsel %vm574_vm0, %v573_v3, 0  ;;  %v367_v13 = vsel %vm366_vm1, %v365_v6, 0  ;;  %vm357_vm0 = vcmp.lt.s32.totalorder %v11394_v53, 0 }
  0x8e   :  { %v576_v11 = vshrl.u32 %v575_v9, 5  ;;  %v577_v12 = vand.u32 31, %v575_v9  ;;  %v11413_v16 = vshrl.u32 %v367_v13, 5  ;;  %v369_v22 = vand.u32 31, %v367_v13 }
  0x8f   :  { %v11419_v23 = vadd.s32 1, %v10416_v10 }
  0x90   :  { %v578_v19 = vsub.s32 32, %v577_v12  ;;  %v580_v21 = vshll.u32 %v11217_v20, %v577_v12  ;;  %v583_v25 = vshll.u32 %v11218_v24, %v577_v12  ;;  %v586_v27 = vshll.u32 %v11219_v26, %v577_v12 }
  0x91   :  { %v589_v29 = vshll.u32 %v11220_v28, %v577_v12  ;;  %v592_v31 = vshll.u32 %v11221_v30, %v577_v12  ;;  %vm595_vm2 = vcmp.lt.s32.totalorder %v576_v11, 1  ;;  %vm596_vm3 = vcmp.lt.s32.totalorder %v576_v11, 2 }
  0x92   :  { %v581_v32 = vshrl.u32 %v11218_v24, %v578_v19  ;;  %v584_v33 = vshrl.u32 %v11219_v26, %v578_v19  ;;  %v587_v34 = vshrl.u32 %v11220_v28, %v578_v19  ;;  %v579_v35 = vshrl.u32 %v11217_v20, %v578_v19 }
  0x93   :  { %v590_v36 = vshrl.u32 %v11221_v30, %v578_v19  ;;  %v593_v38 = vshrl.u32 %v11222_v37, %v578_v19  ;;  %v370_v42 = vsub.s32 32, %v369_v22  ;;  %vm597_vm4 = vcmp.lt.s32.totalorder %v576_v11, 3 }
  0x94   :  { %v582_v39 = vor.u32 %v581_v32, %v580_v21  ;;  %v585_v40 = vor.u32 %v584_v33, %v583_v25  ;;  %v588_v41 = vor.u32 %v587_v34, %v586_v27  ;;  %vm598_vm5 = vcmp.lt.s32.totalorder %v576_v11, 4 }
  0x95   :  { %v591_v43 = vor.u32 %v590_v36, %v589_v29  ;;  %v594_v44 = vor.u32 %v593_v38, %v592_v31  ;;  %v372_v57 = vshll.u32 %v11217_v20, %v369_v22  ;;  %v373_v61 = vshrl.u32 %v11218_v24, %v370_v42 }
  0x96   :  { %v599_v45 = vsel %vm595_vm2, %v579_v35, %v582_v39  ;;  %v600_v46 = vsel %vm598_vm5, %v588_v41, 2102212464  ;;  %v603_v47 = vsel %vm595_vm2, %v582_v39, %v585_v40  ;;  %v607_v48 = vsel %vm595_vm2, %v585_v40, %v588_v41 }
  0x97   :  { %v601_v50 = vsel %vm597_vm4, %v585_v40, %v600_v46  ;;  %v604_v51 = vsel %vm598_vm5, %v591_v43, 920167782  ;;  %v608_v55 = vsel %vm598_vm5, %v594_v44, 1326507024  ;;  %v375_v62 = vshll.u32 %v11218_v24, %v369_v22 }
  0x98   :  { %v605_v58 = vsel %vm597_vm4, %v588_v41, %v604_v51  ;;  %v609_v59 = vsel %vm597_vm4, %v591_v43, %v608_v55  ;;  %v602_v63 = vsel %vm596_vm3, %v599_v45, %v601_v50  ;;  %v376_v2 = vshrl.u32 %v11219_v26, %v370_v42 }
  0x99   :  { %v606_v0 = vsel %vm596_vm3, %v603_v47, %v605_v58  ;;  %v610_v1 = vsel %vm596_vm3, %v607_v48, %v609_v59  ;;  %v374_v7 = vor.u32 %v373_v61, %v372_v57  ;;  %v378_v9 = vshll.u32 %v11219_v26, %v369_v22 }
  0x9a   :  { %v11442_v3 = vmul.u32.u64.low %v11411_v15, %v610_v1  ;;  %v11443_v4 = vmul.u32.u64.high %v11411_v15, %v610_v1, %v11442_v3  ;;  %v11446_v5 = vmul.u32.u64.low %v11411_v15, %v606_v0  ;;  %v11447_v6 = vmul.u32.u64.high %v11411_v15, %v606_v0, %v11446_v5 }
  0x9b   :  { %v377_v8 = vor.u32 %v376_v2, %v375_v62  ;;  %v379_v10 = vshrl.u32 %v11220_v28, %v370_v42  ;;  %v371_v11 = vshrl.u32 %v11217_v20, %v370_v42  ;;  %v381_v12 = vshll.u32 %v11220_v28, %v369_v22 }
  0x9c   :  { %v382_v13 = vshrl.u32 %v11221_v30, %v370_v42  ;;  %v385_v19 = vshrl.u32 %v11222_v37, %v370_v42  ;;  %v618_v21 = vmul.u32 %v11411_v15, %v602_v63  ;;  %v384_v27 = vshll.u32 %v11221_v30, %v369_v22 }
  0x9d   :  { %v380_v25 = vor.u32 %v379_v10, %v378_v9  ;;  %vm387_vm6 = vcmp.lt.s32.totalorder %v11413_v16, 1  ;;  %vm620_vm7 = vc.u32 %v11443_v4, %v11446_v5  ;;  %v621_v29 = vadd.s32 1, %v11447_v6 }
  0x9e   :  { %v383_v31 = vor.u32 %v382_v13, %v381_v12  ;;  %vm388_vm8 = vcmp.lt.s32.totalorder %v11413_v16, 2  ;;  %v386_v32 = vor.u32 %v385_v19, %v384_v27  ;;  %vm389_vm9 = vcmp.lt.s32.totalorder %v11413_v16, 3 }
  0x9f   :  { %vm390_vm10 = vcmp.lt.s32.totalorder %v11413_v16, 4  ;;  %v395_v33 = vsel %vm387_vm6, %v374_v7, %v377_v8  ;;  %v622_v15 = vsel %vm620_vm7, %v621_v29, %v11447_v6  ;;  %v399_v35 = vsel %vm387_vm6, %v377_v8, %v380_v25 }
  0xa0   :  { %v392_v34 = vsel %vm390_vm10, %v380_v25, 2102212464  ;;  %v396_v22 = vsel %vm390_vm10, %v383_v31, 920167782  ;;  %v623_v36 = vadd.s32 %v622_v15, %v618_v21  ;;  %v391_v38 = vsel %vm387_vm6, %v371_v11, %v374_v7 }
  0xa1   :  { %v397_v39 = vsel %vm389_vm9, %v380_v25, %v396_v22  ;;  %v400_v40 = vsel %vm390_vm10, %v386_v32, 1326507024  ;;  %v393_v41 = vsel %vm389_vm9, %v377_v8, %v392_v34  ;;  %vm678_vm11 = vcmp.gt.s32.totalorder %v11419_v23, 0 }
  0xa2   :  { %v398_v42 = vsel %vm388_vm8, %v395_v33, %v397_v39  ;;  %v401_v43 = vsel %vm389_vm9, %v383_v31, %v400_v40  ;;  %v624_v44 = vadd.s32 536870912, %v623_v36  ;;  %v394_v55 = vsel %vm388_vm8, %v391_v38, %v393_v41 }
  0xa3   :  { %v402_v45 = vsel %vm388_vm8, %v399_v35, %v401_v43  ;;  %v11472_v46 = vmul.u32.u64.low %v11415_v17, %v398_v42  ;;  %v11473_v47 = vmul.u32.u64.high %v11415_v17, %v398_v42, %v11472_v46  ;;  %v674_v57 = vand.u32 8388607, %v667_v18 }
  0xa4   :  { %v11476_v48 = vmul.u32.u64.low %v11415_v17, %v402_v45  ;;  %v11477_v50 = vmul.u32.u64.high %v11415_v17, %v402_v45, %v11476_v48  ;;  %v625_v51 = vshrl.u32 %v624_v44, 30  ;;  %v679_v58 = vsel %vm678_vm11, %v11419_v23, 0 }
  0xa5   :  { %v413_v61 = vadd.s32 1, %v11473_v47  ;;  %v462_v62 = vand.u32 2139095040, %v11409_v14  ;;  %v410_v63 = vmul.u32 %v11415_v17, %v394_v55  ;;  %v681_v2 = vand.u32 31, %v679_v58 }
  0xa6   :  { %v626_v59 = vshll.u32 %v625_v51, 30  ;;  %vm412_vm12 = vc.u32 %v11477_v50, %v11472_v46  ;;  %v675_v3 = vor.u32 8388608, %v674_v57  ;;  %v649_v8 = vsub.s32 4, %v625_v51 }
  0xa7   :  { %v414_v1 = vsel %vm412_vm12, %v413_v61, %v11473_v47  ;;  %v463_v7 = vshrl.u32 %v462_v62, 23  ;;  %v459_v23 = vand.u32 2147483647, %v11409_v14  ;;  %v682_v11 = vsub.s32 32, %v681_v2 }
  0xa8   :  { %v627_v0 = vsub.s32 %v623_v36, %v626_v59  ;;  %v415_v16 = vadd.s32 %v414_v1, %v410_v63  ;;  %v11499_v13 = vshll.u32 %v675_v3, 8  ;;  %v619_v19 = vadd.s32 %v11446_v5, %v11443_v4 }
  0xa9   :  { %v11503_v25 = vshrl.u32 %v679_v58, 5  ;;  %v11505_v27 = vadd.s32 4294967169, %v463_v7  ;;  %v650_v54 = vsel %vm565_vm14, %v649_v8, %v625_v51  ;;  %v11510_v29 = vadd.s32 %v11472_v46, %v11477_v50 }
  0xaa   :  { %v629_v6 = vsub.s32 0, %v627_v0  ;;  %v416_v9 = vadd.s32 536870912, %v415_v16  ;;  %v11515_v32 = vand.u32 8388607, %v459_v23  ;;  %v684_v4 = vshll.u32 %v11217_v20, %v681_v2 }
  0xab   :  { %v685_v5 = vshrl.u32 %v11218_v24, %v682_v11  ;;  %v687_v15 = vshll.u32 %v11218_v24, %v681_v2  ;;  %v688_v22 = vshrl.u32 %v11219_v26, %v682_v11  ;;  %v691_v35 = vshrl.u32 %v11220_v28, %v682_v11 }
  0xac   :  { %v10413_v10 = vmin.u32 %v629_v6, %v627_v0  ;;  %v11497_v12 = vshrl.u32 %v416_v9, 30  ;;  %v694_v36 = vshrl.u32 %v11221_v30, %v682_v11  ;;  %v11527_v38 = vsel %vm11492_vm13, 0, %v650_v54 }
  0xad   :  { %v683_v39 = vshrl.u32 %v11217_v20, %v682_v11  ;;  %v697_v40 = vshrl.u32 %v11222_v37, %v682_v11  ;;  %v690_v43 = vshll.u32 %v11219_v26, %v681_v2  ;;  %v693_v44 = vshll.u32 %v11220_v28, %v681_v2 }
  0xae   :  { %v631_v21 = vclz %v10413_v10  ;;  %v418_v31 = vshll.u32 %v11497_v12, 30  ;;  %v686_v47 = vor.u32 %v685_v5, %v684_v4  ;;  %v696_v48 = vshll.u32 %v11221_v30, %v681_v2 }
  0xaf   :  { %v689_v51 = vor.u32 %v688_v22, %v687_v15  ;;  %v692_v55 = vor.u32 %v691_v35, %v690_v43  ;;  %v695_v57 = vor.u32 %v694_v36, %v693_v44  ;;  %v441_v1 = vsub.s32 4, %v11497_v12 }
  0xb0   :  { %v10414_v33 = vadd.s32 4294967294, %v631_v21  ;;  %v11520_v34 = vsub.s32 %v415_v16, %v418_v31  ;;  %v698_v62 = vor.u32 %v697_v40, %v696_v48  ;;  %vm699_vm1 = vcmp.lt.s32.totalorder %v11503_v25, 1 }
  0xb1   :  { %vm700_vm2 = vcmp.lt.s32.totalorder %v11503_v25, 2  ;;  %vm701_vm3 = vcmp.lt.s32.totalorder %v11503_v25, 3  ;;  %vm702_vm4 = vcmp.lt.s32.totalorder %v11503_v25, 4  ;;  %v711_v7 = vsel %vm699_vm1, %v689_v51, %v692_v55 }
  0xb2   :  { %vm10415_vm15 = vcmp.lt.s32.totalorder %v10414_v33, 0  ;;  %v421_v42 = vsub.s32 0, %v11520_v34  ;;  %v708_v6 = vsel %vm702_vm4, %v695_v57, 920167782  ;;  %vm11548_vm5 = vcmp.le.f32.partialorder %v355_v56, 0.7853982 }
  0xb3   :  { %v634_v41 = vsel %vm10415_vm15, 0, %v10414_v33  ;;  %v704_v10 = vsel %vm702_vm4, %v692_v55, 2102212464  ;;  %v709_v11 = vsel %vm701_vm3, %v692_v55, %v708_v6  ;;  %v703_v54 = vsel %vm699_vm1, %v683_v39, %v686_v47 }
  0xb4   :  { %v635_v45 = vsub.s32 32, %v634_v41  ;;  %v639_v46 = vsub.s32 4294967266, %v634_v41  ;;  %v10405_v50 = vmin.u32 %v421_v42, %v11520_v34  ;;  %v636_v58 = vshll.u32 %v627_v0, %v634_v41 }
  0xb5   :  { %v707_v0 = vsel %vm699_vm1, %v686_v47, %v689_v51  ;;  %v705_v35 = vsel %vm701_vm3, %v689_v51, %v704_v10  ;;  %v469_v36 = vadd.s32 1, %v11505_v27  ;;  %v89_v47 = vpop.permute.xlu1 %88  ;;  %v442_v27 = vsel %vm357_vm0, %v441_v1, %v11497_v12 }
  0xb6   :  { %v637_v59 = vshrl.u32 %v619_v19, %v635_v45  ;;  %v640_v61 = vadd.s32 127, %v639_v46  ;;  %v423_v63 = vclz %v10405_v50  ;;  %v712_v19 = vsel %vm702_vm4, %v698_v62, 1326507024 }
  0xb7   :  { %v713_v31 = vsel %vm701_vm3, %v695_v57, %v712_v19  ;;  %v710_v56 = vsel %vm700_vm2, %v707_v0, %v709_v11  ;;  %v656_v50 = vadd.s32 3, %v11527_v38  ;;  %vm470_vm7 = vcmp.gt.s32.totalorder %v469_v36, 0 }
  0xb8   :  { %v638_v16 = vor.u32 %v637_v59, %v636_v58  ;;  %v641_v2 = vshll.u32 %v640_v61, 23  ;;  %v10406_v3 = vadd.s32 4294967294, %v423_v63  ;;  %v714_v5 = vsel %vm700_vm2, %v711_v7, %v713_v31 }
  0xb9   :  { %v11567_v41 = vmul.u32.u64.low %v11499_v13, %v714_v5  ;;  %v11568_v42 = vmul.u32.u64.high %v11499_v13, %v714_v5, %v11567_v41  ;;  %v11572_v45 = vmul.u32.u64.low %v11499_v13, %v710_v56  ;;  %v11573_v46 = vmul.u32.u64.high %v11499_v13, %v710_v56, %v11572_v45 }
  0xba   :  { %v642_v8 = vor.u32 4788187, %v641_v2  ;;  %v645_v21 = vcvt.s32.f32 %v638_v16  ;;  %vm10407_vm6 = vcmp.lt.s32.totalorder %v10406_v3, 0  ;;  %v471_v55 = vsel %vm470_vm7, %v469_v36, 0 }
  0xbb   :  { %v426_v4 = vsel %vm10407_vm6, 0, %v10406_v3  ;;  %v11585_v58 = vand.u32 3, %v11527_v38  ;;  %vm724_vm8 = vc.u32 %v11568_v42, %v11572_v45  ;;  %v11590_v59 = vmul.f32 %v11388_v49, %v89_v47 }
  0xbc   :  { %v643_v33 = vand.u32 2147483647, %v642_v8  ;;  %v427_v15 = vsub.s32 32, %v426_v4  ;;  %v431_v22 = vsub.s32 4294967266, %v426_v4  ;;  %v428_v39 = vshll.u32 %v11520_v34, %v426_v4 }
  0xbd   :  { %v444_v25 = vsel %vm11548_vm5, 0, %v442_v27  ;;  %v725_v62 = vadd.s32 1, %v11573_v46  ;;  %v11598_v63 = vand.u32 3, %v656_v50  ;;  %v473_v1 = vand.u32 31, %v471_v55 }
  0xbe   :  { %v646_v40 = vmul.f32 %v645_v21, %v643_v33  ;;  %v429_v43 = vshrl.u32 %v11510_v29, %v427_v15  ;;  %v432_v44 = vadd.s32 127, %v431_v22  ;;  %v706_v29 = vsel %vm700_vm2, %v703_v54, %v705_v35 }
  0xbf   :  { %v722_v38 = vmul.u32 %v11499_v13, %v706_v29  ;;  %v726_v3 = vsel %vm724_vm8, %v725_v62, %v11573_v46  ;;  %v448_v0 = vadd.s32 3, %v444_v25  ;;  %v467_v6 = vor.u32 8388608, %v11515_v32 }
  0xc0   :  { %v647_v48 = vxor.u32 2147483648, %v646_v40  ;;  %v430_v34 = vor.u32 %v429_v43, %v428_v39  ;;  %v433_v51 = vshll.u32 %v432_v44, 23  ;;  %v474_v7 = vsub.s32 32, %v473_v1 }
  0xc1   :  { %v727_v17 = vadd.s32 %v726_v3, %v722_v38  ;;  %v11603_v10 = vand.u32 3, %v444_v25  ;;  %v11605_v11 = vshrl.u32 %v471_v55, 5  ;;  %v476_v19 = vshll.u32 %v11217_v20, %v473_v1 }
  0xc2   :  { %v648_v57 = vsel %vm565_vm14, %v647_v48, %v646_v40  ;;  %v434_v61 = vor.u32 4788187, %v433_v51  ;;  %v437_v2 = vcvt.s32.f32 %v430_v34  ;;  %vm662_vm9 = vcmp.eq.s32.totalorder %v11598_v63, 2 }
  0xc3   :  { %v651_v12 = vsel %vm11492_vm13, %v11391_v52, %v648_v57  ;;  %vm5699_vm10 = vcmp.eq.s32.totalorder %v11585_v58, 2  ;;  %v728_v13 = vadd.s32 536870912, %v727_v17  ;;  %v477_v21 = vshrl.u32 %v11218_v24, %v474_v7 }
  0xc4   :  { %10992 = vcosq.f32 %v651_v12  ;;  %v435_v16 = vand.u32 2147483647, %v434_v61  ;;  %v480_v54 = vshrl.u32 %v11219_v26, %v474_v7  ;;  %v482_v31 = vshll.u32 %v11219_v26, %v473_v1 }
  0xc5   :  { %10994 = vsinq.f32 %v651_v12  ;;  %vm659_vm11 = vcmp.eq.s32.totalorder %v11598_v63, 0  ;;  %vm5696_vm12 = vcmp.eq.s32.totalorder %v11585_v58, 0  ;;  %v483_v33 = vshrl.u32 %v11220_v28, %v474_v7 }
  0xc6   :  { %v438_v8 = vmul.f32 %v437_v2, %v435_v16  ;;  %v485_v4 = vshll.u32 %v11220_v28, %v473_v1  ;;  %v486_v56 = vshrl.u32 %v11221_v30, %v474_v7  ;;  %vm658_vm13 = vcmp.lt.s32.totalorder %v11598_v63, 2 }
  0xc7   :  { %vm5695_vm14 = vcmp.lt.s32.totalorder %v11585_v58, 2  ;;  %v11620_v5 = vand.u32 3, %v448_v0  ;;  %v11622_v15 = vshrl.u32 %v728_v13, 30  ;;  %v479_v22 = vshll.u32 %v11218_v24, %v473_v1 }
  0xc8   :  { %v439_v32 = vxor.u32 2147483648, %v438_v8  ;;  %v11625_v35 = vshll.u32 %v467_v6, 8  ;;  %vm655_vm15 = vweird.f32 %v11391_v52  ;;  %v478_v40 = vor.u32 %v477_v21, %v476_v19 }
  0xc9   :  { %v484_v39 = vor.u32 %v483_v33, %v482_v31  ;;  %v487_v41 = vor.u32 %v486_v56, %v485_v4  ;;  %v730_v44 = vshll.u32 %v11622_v15, 30  ;;  %v481_v46 = vor.u32 %v480_v54, %v479_v22 }
  0xca   :  { %v440_v36 = vsel %vm357_vm0, %v439_v32, %v438_v8  ;;  %vm494_vm1 = vcmp.lt.s32.totalorder %v11605_v11, 4  ;;  %v489_v47 = vshrl.u32 %v11222_v37, %v474_v7  ;;  %vm491_vm2 = vcmp.lt.s32.totalorder %v11605_v11, 1 }
  0xcb   :  { %v443_v43 = vsel %vm11548_vm5, %v11394_v53, %v440_v36  ;;  %v500_v48 = vsel %vm494_vm1, %v487_v41, 920167782  ;;  %v11639_v27 = vsub.s32 %v727_v17, %v730_v44  ;;  %vm492_vm0 = vcmp.lt.s32.totalorder %v11605_v11, 2 }
  0xcc   :  { %10996 = vcosq.f32 %v443_v43  ;;  %vm493_vm3 = vcmp.lt.s32.totalorder %v11605_v11, 3  ;;  %v475_v51 = vshrl.u32 %v11217_v20, %v474_v7  ;;  %v488_v29 = vshll.u32 %v11221_v30, %v473_v1 }
  0xcd   :  { %10998 = vsinq.f32 %v443_v43  ;;  %v496_v55 = vsel %vm494_vm1, %v484_v39, 2102212464  ;;  %vm669_vm4 = vcmp.lt.s32.totalorder %v11401_v60, 0  ;;  %v733_v12 = vsub.s32 0, %v11639_v27 }
  0xce   :  { %v10993_v50 = vpop.eup %10992  ;;  %v499_v61 = vsel %vm491_vm2, %v478_v40, %v481_v46  ;;  %v501_v25 = vsel %vm493_vm3, %v484_v39, %v500_v48  ;;  %vm5493_vm5 = vcmp.eq.s32.totalorder %v11603_v10, 2  ;;  %v490_v1 = vor.u32 %v489_v47, %v488_v29 }
  0xcf   :  { %v10995_v9 = vpop.eup %10994  ;;  %v663_v34 = vxor.u32 2147483648, %v10993_v50  ;;  %v495_v16 = vsel %vm491_vm2, %v475_v51, %v478_v40  ;;  %vm5490_vm6 = vcmp.eq.s32.totalorder %v11603_v10, 0  ;;  %v10417_v0 = vmin.u32 %v733_v12, %v11639_v27 }
  0xd0   :  { %v660_v57 = vxor.u32 2147483648, %v10995_v9  ;;  %v497_v17 = vsel %vm493_vm3, %v481_v46, %v496_v55  ;;  %vm450_vm7 = vcmp.lt.s32.totalorder %v11620_v5, 2  ;;  %vm5489_vm8 = vcmp.lt.s32.totalorder %v11603_v10, 2 }
  0xd1   :  { %v664_v62 = vsel %vm662_vm9, %v663_v34, %v10995_v9  ;;  %v5701_v38 = vsel %vm5699_vm10, %v663_v34, %v10995_v9  ;;  %v502_v8 = vsel %vm492_vm0, %v499_v61, %v501_v25  ;;  %v878_v19 = vand.u32 2139095040, %v11590_v59 }
  0xd2   :  { %v661_v2 = vsel %vm659_vm11, %v10993_v50, %v660_v57  ;;  %v5698_v3 = vsel %vm5696_vm12, %v10993_v50, %v660_v57  ;;  %vm447_vm9 = vweird.f32 %v11394_v53  ;;  %v735_v63 = vclz %v10417_v0 }
  0xd3   :  { %v665_v6 = vsel %vm658_vm13, %v661_v2, %v664_v62  ;;  %v5702_v7 = vsel %vm5695_vm14, %v5698_v3, %v5701_v38  ;;  %v503_v58 = vsel %vm491_vm2, %v481_v46, %v484_v39  ;;  %vm451_vm10 = vcmp.eq.s32.totalorder %v11620_v5, 0 }
  0xd4   :  { %v666_v13 = vsel %vm655_vm15, nan, %v665_v6  ;;  %v5703_v21 = vsel %vm655_vm15, nan, %v5702_v7  ;;  %v753_v54 = vsub.s32 4, %v11622_v15  ;;  %v498_v31 = vsel %vm492_vm0, %v495_v16, %v497_v17 }
  0xd5   :  { %5349 = vst [vmem:[#allocation2 + $0x20] sm:$0xff] %v666_v13  ;;  %10341 = vst [vmem:[#allocation2 + $0x28] sm:$0xff] %v5703_v21  ;;  %v504_v32 = vsel %vm494_vm1, %v490_v1, 1326507024  ;;  %v10418_v52 = vadd.s32 4294967294, %v735_v63  ;;  %v11693_v4 = vmul.u32.u64.low %v11625_v35, %v502_v8  ;;  %v11694_v56 = vmul.u32.u64.high %v11625_v35, %v502_v8, %v11693_v4 }
  0xd6   :  { %v505_v33 = vsel %vm493_vm3, %v487_v41, %v504_v32  ;;  %v10997_v22 = vpop.eup %10996  ;;  %vm454_vm11 = vcmp.eq.s32.totalorder %v11620_v5, 2  ;;  %v723_v36 = vadd.s32 %v11572_v45, %v11568_v42  ;;  %v879_v39 = vshrl.u32 %v878_v19, 23  ;;  %v84_v19 = vpop.permute.xlu0 %83 }
  0xd7   :  { %v506_v40 = vsel %vm492_vm0, %v503_v58, %v505_v33  ;;  %v10999_v43 = vpop.eup %10998  ;;  %v455_v44 = vxor.u32 2147483648, %v10997_v22  ;;  %vm10419_vm12 = vcmp.lt.s32.totalorder %v10418_v52, 0  ;;  %v754_v50 = vsel %vm669_vm4, %v753_v54, %v11622_v15 }
  0xd8   :  { %v11703_v41 = vmul.u32.u64.low %v11625_v35, %v506_v40  ;;  %v11704_v46 = vmul.u32.u64.high %v11625_v35, %v506_v40, %v11703_v41  ;;  %v452_v47 = vxor.u32 2147483648, %v10999_v43  ;;  %v738_v48 = vsel %vm10419_vm12, 0, %v10418_v52 }
  0xd9   :  { %v514_v9 = vmul.u32 %v11625_v35, %v498_v31  ;;  %v456_v42 = vsel %vm454_vm11, %v455_v44, %v10999_v43  ;;  %v5495_v45 = vsel %vm5493_vm5, %v455_v44, %v10999_v43  ;;  %v739_v11 = vsub.s32 32, %v738_v48 }
  0xda   :  { %v10424_v34 = vadd.s32 4294967169, %v879_v39  ;;  %v453_v51 = vsel %vm451_vm10, %v10997_v22, %v452_v47  ;;  %v5492_v29 = vsel %vm5490_vm6, %v10997_v22, %v452_v47  ;;  %v743_v55 = vsub.s32 4294967266, %v738_v48 }
  0xdb   :  { %v517_v57 = vadd.s32 1, %v11694_v56  ;;  %v457_v15 = vsel %vm450_vm7, %v453_v51, %v456_v42  ;;  %v5496_v35 = vsel %vm5489_vm8, %v5492_v29, %v5495_v45  ;;  %v740_v12 = vshll.u32 %v11639_v27, %v738_v48 }
  0xdc   :  { %v741_v61 = vshrl.u32 %v723_v36, %v739_v11  ;;  %v458_v25 = vsel %vm447_vm9, nan, %v457_v15  ;;  %v5497_v62 = vsel %vm447_vm9, nan, %v5496_v35  ;;  %v744_v38 = vadd.s32 127, %v743_v55 }
  0xdd   :  { %vm516_vm13 = vc.u32 %v11704_v46, %v11693_v4  ;;  %5347 = vst [vmem:[#allocation2] sm:$0xff] %v458_v25  ;;  %10339 = vst [vmem:[#allocation2 + $0x8] sm:$0xff] %v5497_v62  ;;  %vm11730_vm14 = vcmp.le.f32.partialorder %v667_v18, 0.7853982  ;;  %v875_v27 = vand.u32 2147483647, %v11590_v59  ;;  %v11744_v52 = vmul.f32 %v11388_v49, %v84_v19 }
  0xde   :  { %v518_v5 = vsel %vm516_vm13, %v517_v57, %v11694_v56  ;;  %v885_v1 = vadd.s32 1, %v10424_v34  ;;  %v742_v16 = vor.u32 %v741_v61, %v740_v12  ;;  %v745_v53 = vshll.u32 %v744_v38, 23 }
  0xdf   :  { %v756_v2 = vsel %vm11730_vm14, 0, %v754_v50  ;;  %v519_v3 = vadd.s32 %v518_v5, %v514_v9  ;;  %v882_v18 = vand.u32 8388607, %v875_v27  ;;  %vm461_vm1 = vcmp.lt.s32.totalorder %v11409_v14, 0 }
  0xe0   :  { %vm886_vm15 = vcmp.gt.s32.totalorder %v885_v1, 0  ;;  %v746_v0 = vor.u32 4788187, %v745_v53  ;;  %v760_v7 = vadd.s32 3, %v756_v2  ;;  %v749_v21 = vcvt.s32.f32 %v742_v16 }
  0xe1   :  { %v520_v17 = vadd.s32 536870912, %v519_v3  ;;  %v887_v6 = vsel %vm886_vm15, %v885_v1, 0  ;;  %v11740_v31 = vand.u32 3, %v756_v2  ;;  %v883_v56 = vor.u32 8388608, %v882_v18 }
  0xe2   :  { %v889_v8 = vand.u32 31, %v887_v6  ;;  %v747_v13 = vand.u32 2147483647, %v746_v0  ;;  %v11746_v33 = vand.u32 3, %v760_v7  ;;  %v888_v22 = vshrl.u32 %v887_v6, 5 }
  0xe3   :  { %v521_v63 = vshrl.u32 %v520_v17, 30  ;;  %vm11761_vm2 = vcmp.le.f32.partialorder %v459_v23, 0.7853982  ;;  %v515_v12 = vadd.s32 %v11693_v4, %v11704_v46  ;;  %v11776_v10 = vshll.u32 %v883_v56, 8 }
  0xe4   :  { %v890_v58 = vsub.s32 32, %v889_v8  ;;  %v750_v54 = vmul.f32 %v749_v21, %v747_v13  ;;  %v892_v41 = vshll.u32 %v11217_v20, %v889_v8  ;;  %v895_v47 = vshll.u32 %v11218_v24, %v889_v8 }
  0xe5   :  { %v522_v32 = vshll.u32 %v521_v63, 30  ;;  %v898_v48 = vshll.u32 %v11219_v26, %v889_v8  ;;  %v545_v11 = vsub.s32 4, %v521_v63  ;;  %v901_v34 = vshll.u32 %v11220_v28, %v889_v8 }
  0xe6   :  { %v893_v36 = vshrl.u32 %v11218_v24, %v890_v58  ;;  %v751_v40 = vxor.u32 2147483648, %v750_v54  ;;  %v896_v43 = vshrl.u32 %v11219_v26, %v890_v58  ;;  %v899_v44 = vshrl.u32 %v11220_v28, %v890_v58 }
  0xe7   :  { %v11749_v39 = vsub.s32 %v519_v3, %v522_v32  ;;  %v902_v50 = vshrl.u32 %v11221_v30, %v890_v58  ;;  %v904_v55 = vshll.u32 %v11221_v30, %v889_v8  ;;  %v905_v57 = vshrl.u32 %v11222_v37, %v890_v58 }
  0xe8   :  { %v752_v9 = vsel %vm669_vm4, %v751_v40, %v750_v54  ;;  %v894_v29 = vor.u32 %v893_v36, %v892_v41  ;;  %v897_v15 = vor.u32 %v896_v43, %v895_v47  ;;  %v900_v35 = vor.u32 %v899_v44, %v898_v48 }
  0xe9   :  { %v525_v45 = vsub.s32 0, %v11749_v39  ;;  %v755_v51 = vsel %vm11730_vm14, %v11401_v60, %v752_v9  ;;  %v903_v61 = vor.u32 %v902_v50, %v901_v34  ;;  %v906_v25 = vor.u32 %v905_v57, %v904_v55 }
  0xea   :  { %11000 = vcosq.f32 %v755_v51  ;;  %v891_v38 = vshrl.u32 %v11217_v20, %v890_v58  ;;  %v774_v5 = vand.u32 2139095040, %v11744_v52  ;;  %v546_v1 = vsel %vm461_vm1, %v545_v11, %v521_v63 }
  0xeb   :  { %v10409_v23 = vmin.u32 %v525_v45, %v11749_v39  ;;  %11002 = vsinq.f32 %v755_v51  ;;  %vm907_vm0 = vcmp.lt.s32.totalorder %v888_v22, 1  ;;  %vm909_vm3 = vcmp.lt.s32.totalorder %v888_v22, 3 }
  0xec   :  { %vm910_vm4 = vcmp.lt.s32.totalorder %v888_v22, 4  ;;  %vm766_vm5 = vcmp.eq.s32.totalorder %v11746_v33, 2  ;;  %v911_v53 = vsel %vm907_vm0, %v891_v38, %v894_v29  ;;  %v915_v46 = vsel %vm907_vm0, %v894_v29, %v897_v15 }
  0xed   :  { %v527_v62 = vclz %v10409_v23  ;;  %v912_v4 = vsel %vm910_vm4, %v900_v35, 2102212464  ;;  %vm763_vm6 = vcmp.eq.s32.totalorder %v11746_v33, 0  ;;  %vm5799_vm7 = vcmp.eq.s32.totalorder %v11740_v31, 0 }
  0xee   :  { %v913_v2 = vsel %vm909_vm3, %v897_v15, %v912_v4  ;;  %v916_v3 = vsel %vm910_vm4, %v903_v61, 920167782  ;;  %v919_v0 = vsel %vm907_vm0, %v897_v15, %v900_v35  ;;  %v920_v17 = vsel %vm910_vm4, %v906_v25, 1326507024 }
  0xef   :  { %v10410_v16 = vadd.s32 4294967294, %v527_v62  ;;  %vm762_vm8 = vcmp.lt.s32.totalorder %v11746_v33, 2  ;;  %vm5798_vm9 = vcmp.lt.s32.totalorder %v11740_v31, 2  ;;  %vm908_vm11 = vcmp.lt.s32.totalorder %v888_v22, 2 }
  0xf0   :  { %v917_v6 = vsel %vm909_vm3, %v900_v35, %v916_v3  ;;  %v921_v7 = vsel %vm909_vm3, %v903_v61, %v920_v17  ;;  %vm759_vm12 = vweird.f32 %v11401_v60  ;;  %v548_v8 = vsel %vm11761_vm2, 0, %v546_v1 }
  0xf1   :  { %vm10411_vm10 = vcmp.lt.s32.totalorder %v10410_v16, 0  ;;  %v918_v19 = vsel %vm908_vm11, %v915_v46, %v917_v6  ;;  %v922_v13 = vsel %vm908_vm11, %v919_v0, %v921_v7  ;;  %v914_v58 = vsel %vm908_vm11, %v911_v53, %v913_v2 }
  0xf2   :  { %v530_v18 = vsel %vm10411_vm10, 0, %v10410_v16  ;;  %v775_v54 = vshrl.u32 %v774_v5, 23  ;;  %v11793_v32 = vmul.u32.u64.low %v11776_v10, %v922_v13  ;;  %v11794_v56 = vmul.u32.u64.high %v11776_v10, %v922_v13, %v11793_v32  ;;  %v99_v16 = vpop.permute.xlu1 %98 }
  0xf3   :  { %v531_v21 = vsub.s32 32, %v530_v18  ;;  %v535_v63 = vsub.s32 4294967266, %v530_v18  ;;  %v11797_v36 = vmul.u32.u64.low %v11776_v10, %v918_v19  ;;  %v11798_v22 = vmul.u32.u64.high %v11776_v10, %v918_v19, %v11797_v36 }
  0xf4   :  { %v11001_v40 = vpop.eup %11000  ;;  %v532_v43 = vshll.u32 %v11749_v39, %v530_v18  ;;  %v10420_v47 = vadd.s32 4294967169, %v775_v54  ;;  %vm5802_vm13 = vcmp.eq.s32.totalorder %v11740_v31, 2  ;;  %v552_v9 = vadd.s32 3, %v548_v8 }
  0xf5   :  { %v533_v44 = vshrl.u32 %v515_v12, %v531_v21  ;;  %v536_v41 = vadd.s32 127, %v535_v63  ;;  %v11003_v48 = vpop.eup %11002  ;;  %v767_v50 = vxor.u32 2147483648, %v11001_v40  ;;  %v771_v45 = vand.u32 2147483647, %v11744_v52 }
  0xf6   :  { %v764_v11 = vxor.u32 2147483648, %v11003_v48  ;;  %v781_v29 = vadd.s32 1, %v10420_v47  ;;  %v930_v39 = vmul.u32 %v11776_v10, %v914_v58  ;;  %vm932_vm14 = vc.u32 %v11794_v56, %v11797_v36 }
  0xf7   :  { %v534_v34 = vor.u32 %v533_v44, %v532_v43  ;;  %v537_v51 = vshll.u32 %v536_v41, 23  ;;  %v768_v55 = vsel %vm766_vm5, %v767_v50, %v11003_v48  ;;  %v5804_v57 = vsel %vm5802_vm13, %v767_v50, %v11003_v48 }
  0xf8   :  { %v765_v23 = vsel %vm763_vm6, %v11001_v40, %v764_v11  ;;  %v5801_v15 = vsel %vm5799_vm7, %v11001_v40, %v764_v11  ;;  %v933_v62 = vadd.s32 1, %v11798_v22  ;;  %vm782_vm15 = vcmp.gt.s32.totalorder %v781_v29, 0 }
  0xf9   :  { %v538_v35 = vor.u32 4788187, %v537_v51  ;;  %v541_v12 = vcvt.s32.f32 %v534_v34  ;;  %v769_v61 = vsel %vm762_vm8, %v765_v23, %v768_v55  ;;  %v5805_v25 = vsel %vm5798_vm9, %v5801_v15, %v5804_v57 }
  0xfa   :  { %v770_v38 = vsel %vm759_vm12, nan, %v769_v61  ;;  %v5806_v10 = vsel %vm759_vm12, nan, %v5805_v25  ;;  %v783_v1 = vsel %vm782_vm15, %v781_v29, 0  ;;  %v934_v31 = vsel %vm932_vm14, %v933_v62, %v11798_v22 }
  0xfb   :  { %v539_v5 = vand.u32 2147483647, %v538_v35  ;;  %5350 = vst [vmem:[#allocation2 + $0x30] sm:$0xff] %v770_v38  ;;  %10342 = vst [vmem:[#allocation2 + $0x38] sm:$0xff] %v5806_v10  ;;  %v785_v33 = vand.u32 31, %v783_v1  ;;  %v935_v4 = vadd.s32 %v934_v31, %v930_v39  ;;  %v11829_v60 = vmul.f32 %v11388_v49, %v99_v16 }
  0xfc   :  { %v778_v46 = vand.u32 8388607, %v771_v45  ;;  %v11831_v0 = vand.u32 3, %v552_v9  ;;  %v11833_v17 = vand.u32 3, %v548_v8  ;;  %v11835_v7 = vshrl.u32 %v783_v1, 5 }
  0xfd   :  { %v542_v53 = vmul.f32 %v541_v12, %v539_v5  ;;  %v786_v2 = vsub.s32 32, %v785_v33  ;;  %v936_v6 = vadd.s32 536870912, %v935_v4  ;;  %v788_v54 = vshll.u32 %v11217_v20, %v785_v33 }
  0xfe   :  { %v797_v32 = vshll.u32 %v11220_v28, %v785_v33  ;;  %v800_v22 = vshll.u32 %v11221_v30, %v785_v33  ;;  %v791_v43 = vshll.u32 %v11218_v24, %v785_v33  ;;  %v794_v44 = vshll.u32 %v11219_v26, %v785_v33 }
  0xff   :  { %v543_v3 = vxor.u32 2147483648, %v542_v53  ;;  %v789_v18 = vshrl.u32 %v11218_v24, %v786_v2  ;;  %v792_v19 = vshrl.u32 %v11219_v26, %v786_v2  ;;  %v795_v13 = vshrl.u32 %v11220_v28, %v786_v2 }
 0x100   :  { %v11842_v63 = vshrl.u32 %v936_v6, 30  ;;  %v798_v49 = vshrl.u32 %v11221_v30, %v786_v2  ;;  %v801_v58 = vshrl.u32 %v11222_v37, %v786_v2  ;;  %v1086_v48 = vand.u32 2139095040, %v11829_v60 }
 0x101   :  { %v544_v21 = vsel %vm461_vm1, %v543_v3, %v542_v53  ;;  %v790_v50 = vor.u32 %v789_v18, %v788_v54  ;;  %v793_v9 = vor.u32 %v792_v19, %v791_v43  ;;  %v796_v11 = vor.u32 %v795_v13, %v794_v44 }
 0x102   :  { %v547_v8 = vsel %vm11761_vm2, %v11409_v14, %v544_v21  ;;  %v938_v40 = vshll.u32 %v11842_v63, 30  ;;  %v799_v41 = vor.u32 %v798_v49, %v797_v32  ;;  %v802_v47 = vor.u32 %v801_v58, %v800_v22 }
 0x103   :  { %11004 = vcosq.f32 %v547_v8  ;;  %vm5596_vm1 = vcmp.eq.s32.totalorder %v11833_v17, 2  ;;  %v779_v51 = vor.u32 8388608, %v778_v46  ;;  %vm806_vm2 = vcmp.lt.s32.totalorder %v11835_v7, 4 }
 0x104   :  { %11006 = vsinq.f32 %v547_v8  ;;  %v11856_v42 = vsub.s32 %v935_v4, %v938_v40  ;;  %vm5593_vm0 = vcmp.eq.s32.totalorder %v11833_v17, 0  ;;  %vm877_vm3 = vcmp.lt.s32.totalorder %v11590_v59, 0 }
 0x105   :  { %vm803_vm4 = vcmp.lt.s32.totalorder %v11835_v7, 1  ;;  %v812_v29 = vsel %vm806_vm2, %v799_v41, 920167782  ;;  %v816_v55 = vsel %vm806_vm2, %v802_v47, 1326507024  ;;  %v1087_v57 = vshrl.u32 %v1086_v48, 23 }
 0x106   :  { %v941_v34 = vsub.s32 0, %v11856_v42  ;;  %vm554_vm5 = vcmp.lt.s32.totalorder %v11831_v0, 2  ;;  %vm5592_vm6 = vcmp.lt.s32.totalorder %v11833_v17, 2  ;;  %vm805_vm7 = vcmp.lt.s32.totalorder %v11835_v7, 3 }
 0x107   :  { %v811_v23 = vsel %vm803_vm4, %v790_v50, %v793_v9  ;;  %v815_v15 = vsel %vm803_vm4, %v793_v9, %v796_v11  ;;  %vm551_vm8 = vweird.f32 %v11409_v14  ;;  %vm555_vm9 = vcmp.eq.s32.totalorder %v11831_v0, 0 }
 0x108   :  { %v10425_v39 = vmin.u32 %v941_v34, %v11856_v42  ;;  %vm558_vm10 = vcmp.eq.s32.totalorder %v11831_v0, 2  ;;  %v813_v35 = vsel %vm805_vm7, %v796_v11, %v812_v29  ;;  %v817_v12 = vsel %vm805_vm7, %v799_v41, %v816_v55  ;;  %v94_v34 = vpop.permute.xlu0 %93 }
 0x109   :  { %v787_v25 = vshrl.u32 %v11217_v20, %v786_v2  ;;  %vm804_vm11 = vcmp.lt.s32.totalorder %v11835_v7, 2  ;;  %v819_v62 = vshll.u32 %v779_v51, 8  ;;  %v808_v38 = vsel %vm806_vm2, %v796_v11, 2102212464 }
 0x10a   :  { %v943_v61 = vclz %v10425_v39  ;;  %v814_v10 = vsel %vm804_vm11, %v811_v23, %v813_v35  ;;  %v818_v5 = vsel %vm804_vm11, %v815_v15, %v817_v12  ;;  %v10432_v1 = vadd.s32 4294967169, %v1087_v57 }
 0x10b   :  { %v961_v33 = vsub.s32 4, %v11842_v63  ;;  %v11892_v53 = vmul.u32.u64.low %v819_v62, %v818_v5  ;;  %v11893_v4 = vmul.u32.u64.high %v819_v62, %v818_v5, %v11892_v53  ;;  %v931_v3 = vadd.s32 %v11797_v36, %v11794_v56 }
 0x10c   :  { %v10426_v31 = vadd.s32 4294967294, %v943_v61  ;;  %v11897_v6 = vmul.u32.u64.low %v819_v62, %v814_v10  ;;  %v11898_v18 = vmul.u32.u64.high %v819_v62, %v814_v10, %v11897_v6  ;;  %v807_v13 = vsel %vm803_vm4, %v787_v25, %v790_v50 }
 0x10d   :  { %v11005_v16 = vpop.eup %11004  ;;  %v809_v21 = vsel %vm805_vm7, %v793_v9, %v808_v38  ;;  %v1093_v56 = vadd.s32 1, %v10432_v1  ;;  %v962_v22 = vsel %vm877_vm3, %v961_v33, %v11842_v63  ;;  %vm11932_vm15 = vcmp.le.f32.partialorder %v875_v27, 0.7853982  ;;  %v11943_v27 = vld [vmem:[%s16164_s1] ss:$0 sm:$0xff] }
 0x10e   :  { %v11007_v46 = vpop.eup %11006  ;;  %v559_v2 = vxor.u32 2147483648, %v11005_v16  ;;  %vm10427_vm12 = vcmp.lt.s32.totalorder %v10426_v31, 0  ;;  %v810_v41 = vsel %vm804_vm11, %v807_v13, %v809_v21  ;;  %vm828_vm13 = vc.u32 %v11893_v4, %v11897_v6 }
 0x10f   :  { %v556_v19 = vxor.u32 2147483648, %v11007_v46  ;;  %v946_v8 = vsel %vm10427_vm12, 0, %v10426_v31  ;;  %v829_v63 = vadd.s32 1, %v11898_v18  ;;  %vm1094_vm14 = vcmp.gt.s32.totalorder %v1093_v56, 0 }
 0x110   :  { %v560_v49 = vsel %vm558_vm10, %v559_v2, %v11007_v46  ;;  %v5598_v58 = vsel %vm5596_vm1, %v559_v2, %v11007_v46  ;;  %v947_v32 = vsub.s32 32, %v946_v8  ;;  %v951_v44 = vsub.s32 4294967266, %v946_v8 }
 0x111   :  { %v557_v36 = vsel %vm555_vm9, %v11005_v16, %v556_v19  ;;  %v5595_v54 = vsel %vm5593_vm0, %v11005_v16, %v556_v19  ;;  %v948_v0 = vshll.u32 %v11856_v42, %v946_v8  ;;  %v826_v14 = vmul.u32 %v819_v62, %v810_v41 }
 0x112   :  { %v561_v40 = vsel %vm554_vm5, %v557_v36, %v560_v49  ;;  %v5599_v43 = vsel %vm5592_vm6, %v5595_v54, %v5598_v58  ;;  %v949_v50 = vshrl.u32 %v931_v3, %v947_v32  ;;  %v952_v17 = vadd.s32 127, %v951_v44 }
 0x113   :  { %v562_v47 = vsel %vm551_vm8, nan, %v561_v40  ;;  %v5600_v48 = vsel %vm551_vm8, nan, %v5599_v43  ;;  %v1083_v9 = vand.u32 2147483647, %v11829_v60  ;;  %v1095_v11 = vsel %vm1094_vm14, %v1093_v56, 0 }
 0x114   :  { %5348 = vst [vmem:[#allocation2 + $0x10] sm:$0xff] %v562_v47  ;;  %10340 = vst [vmem:[#allocation2 + $0x18] sm:$0xff] %v5600_v48  ;;  %v950_v51 = vor.u32 %v949_v50, %v948_v0  ;;  %v953_v29 = vshll.u32 %v952_v17, 23  ;;  %v830_v55 = vsel %vm828_vm13, %v829_v63, %v11898_v18  ;;  %v1097_v42 = vand.u32 31, %v1095_v11 }
 0x115   :  { %v964_v57 = vsel %vm11932_vm15, 0, %v962_v22  ;;  %v831_v39 = vadd.s32 %v830_v55, %v826_v14  ;;  %v11946_v35 = vmul.f32 %v11943_v27, %v94_v34  ;;  %v1090_v38 = vand.u32 8388607, %v1083_v9 }
 0x116   :  { %v954_v23 = vor.u32 4788187, %v953_v29  ;;  %v1098_v15 = vsub.s32 32, %v1097_v42  ;;  %v957_v25 = vcvt.s32.f32 %v950_v51  ;;  %v968_v62 = vadd.s32 3, %v964_v57 }
 0x117   :  { %v832_v12 = vadd.s32 536870912, %v831_v39  ;;  %v1109_v53 = vshll.u32 %v11220_v28, %v1097_v42  ;;  %v982_v46 = vand.u32 2139095040, %v11946_v35  ;;  %v11959_v3 = vshrl.u32 %v1095_v11, 5 }
 0x118   :  { %v955_v61 = vand.u32 2147483647, %v954_v23  ;;  %v1101_v5 = vshrl.u32 %v11218_v24, %v1098_v15  ;;  %v1104_v1 = vshrl.u32 %v11219_v26, %v1098_v15  ;;  %v1110_v16 = vshrl.u32 %v11221_v30, %v1098_v15 }
 0x119   :  { %v11950_v10 = vshrl.u32 %v832_v12, 30  ;;  %v1107_v33 = vshrl.u32 %v11220_v28, %v1098_v15  ;;  %v1100_v18 = vshll.u32 %v11217_v20, %v1097_v42  ;;  %v1103_v19 = vshll.u32 %v11218_v24, %v1097_v42 }
 0x11a   :  { %v958_v31 = vmul.f32 %v957_v25, %v955_v61  ;;  %v1106_v21 = vshll.u32 %v11219_v26, %v1097_v42  ;;  %v1111_v49 = vor.u32 %v1110_v16, %v1109_v53  ;;  %v1113_v58 = vshrl.u32 %v11222_v37, %v1098_v15 }
 0x11b   :  { %v834_v2 = vshll.u32 %v11950_v10, 30  ;;  %v11965_v8 = vand.u32 3, %v964_v57  ;;  %v1102_v36 = vor.u32 %v1101_v5, %v1100_v18  ;;  %v1105_v54 = vor.u32 %v1104_v1, %v1103_v19 }
 0x11c   :  { %v959_v13 = vxor.u32 2147483648, %v958_v31  ;;  %v1091_v22 = vor.u32 8388608, %v1090_v38  ;;  %v1108_v40 = vor.u32 %v1107_v33, %v1106_v21  ;;  %v1112_v43 = vshll.u32 %v11221_v30, %v1097_v42 }
 0x11d   :  { %v11967_v56 = vsub.s32 %v831_v39, %v834_v2  ;;  %vm1118_vm1 = vcmp.lt.s32.totalorder %v11959_v3, 4  ;;  %v983_v47 = vshrl.u32 %v982_v46, 23  ;;  %vm773_vm2 = vcmp.lt.s32.totalorder %v11744_v52, 0 }
 0x11e   :  { %v960_v32 = vsel %vm877_vm3, %v959_v13, %v958_v31  ;;  %v1114_v48 = vor.u32 %v1113_v58, %v1112_v43  ;;  %vm1115_vm0 = vcmp.lt.s32.totalorder %v11959_v3, 1  ;;  %v1124_v50 = vsel %vm1118_vm1, %v1111_v49, 920167782 }
 0x11f   :  { %v963_v44 = vsel %vm11932_vm15, %v11590_v59, %v960_v32  ;;  %v837_v41 = vsub.s32 0, %v11967_v56  ;;  %vm1117_vm3 = vcmp.lt.s32.totalorder %v11959_v3, 3  ;;  %v1123_v17 = vsel %vm1115_vm0, %v1102_v36, %v1105_v54 }
 0x120   :  { %11008 = vcosq.f32 %v963_v44  ;;  %v969_v63 = vand.u32 3, %v968_v62  ;;  %v1099_v7 = vshrl.u32 %v11217_v20, %v1098_v15  ;;  %v1125_v14 = vsel %vm1117_vm3, %v1108_v40, %v1124_v50 }
 0x121   :  { %11010 = vsinq.f32 %v963_v44  ;;  %v10421_v0 = vmin.u32 %v837_v41, %v11967_v56  ;;  %v11988_v11 = vshll.u32 %v1091_v22, 8  ;;  %vm11992_vm4 = vcmp.le.f32.partialorder %v771_v45, 0.7853982 }
 0x122   :  { %v857_v29 = vsub.s32 4, %v11950_v10  ;;  %vm1116_vm5 = vcmp.lt.s32.totalorder %v11959_v3, 2  ;;  %v1127_v55 = vsel %vm1115_vm0, %v1105_v54, %v1108_v40  ;;  %vm6008_vm6 = vcmp.eq.s32.totalorder %v11965_v8, 2 }
 0x123   :  { %v839_v51 = vclz %v10421_v0  ;;  %v1120_v42 = vsel %vm1118_vm1, %v1108_v40, 2102212464  ;;  %v1126_v57 = vsel %vm1116_vm5, %v1123_v17, %v1125_v14  ;;  %v1128_v45 = vsel %vm1118_vm1, %v1114_v48, 1326507024 }
 0x124   :  { %v10428_v39 = vadd.s32 4294967169, %v983_v47  ;;  %vm6005_vm7 = vcmp.eq.s32.totalorder %v11965_v8, 0  ;;  %v1129_v15 = vsel %vm1117_vm3, %v1111_v49, %v1128_v45  ;;  %vm970_vm8 = vcmp.lt.s32.totalorder %v969_v63, 2 }
 0x125   :  { %v10422_v23 = vadd.s32 4294967294, %v839_v51  ;;  %v12011_v12 = vmul.u32.u64.low %v11988_v11, %v1126_v57  ;;  %v12012_v61 = vmul.u32.u64.high %v11988_v11, %v1126_v57, %v12011_v12  ;;  %vm6004_vm9 = vcmp.lt.s32.totalorder %v11965_v8, 2 }
 0x126   :  { %v1119_v25 = vsel %vm1115_vm0, %v1099_v7, %v1102_v36  ;;  %v1130_v62 = vsel %vm1116_vm5, %v1127_v55, %v1129_v15  ;;  %v989_v38 = vadd.s32 1, %v10428_v39  ;;  %vm967_vm10 = vweird.f32 %v11590_v59 }
 0x127   :  { %vm10423_vm11 = vcmp.lt.s32.totalorder %v10422_v23, 0  ;;  %v1121_v5 = vsel %vm1117_vm3, %v1105_v54, %v1120_v42  ;;  %v12024_v1 = vmul.u32.u64.low %v11988_v11, %v1130_v62  ;;  %v12025_v16 = vmul.u32.u64.high %v11988_v11, %v1130_v62, %v12024_v1 }
 0x128   :  { %vm971_vm12 = vcmp.eq.s32.totalorder %v969_v63, 0  ;;  %vm974_vm13 = vcmp.eq.s32.totalorder %v969_v63, 2  ;;  %v842_v31 = vsel %vm10423_vm11, 0, %v10422_v23  ;;  %vm990_vm14 = vcmp.gt.s32.totalorder %v989_v38, 0 }
 0x129   :  { %v827_v33 = vadd.s32 %v11897_v6, %v11893_v4  ;;  %v843_v53 = vsub.s32 32, %v842_v31  ;;  %v847_v46 = vsub.s32 4294967266, %v842_v31  ;;  %v858_v2 = vsel %vm773_vm2, %v857_v29, %v11950_v10 }
 0x12a   :  { %v11009_v18 = vpop.eup %11008  ;;  %v1122_v19 = vsel %vm1116_vm5, %v1119_v25, %v1121_v5  ;;  %v1141_v13 = vadd.s32 1, %v12012_v61  ;;  %v979_v21 = vand.u32 2147483647, %v11946_v35  ;;  %v991_v49 = vsel %vm990_vm14, %v989_v38, 0 }
 0x12b   :  { %v11011_v58 = vpop.eup %11010  ;;  %v975_v36 = vxor.u32 2147483648, %v11009_v18  ;;  %v844_v54 = vshll.u32 %v11967_v56, %v842_v31  ;;  %v845_v4 = vshrl.u32 %v827_v33, %v843_v53  ;;  %v848_v6 = vadd.s32 127, %v847_v46 }
 0x12c   :  { %v972_v32 = vxor.u32 2147483648, %v11011_v58  ;;  %v860_v22 = vsel %vm11992_vm4, 0, %v858_v2  ;;  %vm1140_vm15 = vc.u32 %v12025_v16, %v12011_v12  ;;  %v993_v10 = vand.u32 31, %v991_v49 }
 0x12d   :  { %v976_v3 = vsel %vm974_vm13, %v975_v36, %v11011_v58  ;;  %v6010_v40 = vsel %vm6008_vm6, %v975_v36, %v11011_v58  ;;  %v846_v43 = vor.u32 %v845_v4, %v844_v54  ;;  %v849_v44 = vshll.u32 %v848_v6, 23 }
 0x12e   :  { %v973_v41 = vsel %vm971_vm12, %v11009_v18, %v972_v32  ;;  %v6007_v56 = vsel %vm6005_vm7, %v11009_v18, %v972_v32  ;;  %v1138_v47 = vmul.u32 %v11988_v11, %v1122_v19  ;;  %v1142_v48 = vsel %vm1140_vm15, %v1141_v13, %v12012_v61  ;;  %v109_v18 = vpop.permute.xlu1 %108 }
 0x12f   :  { %v977_v50 = vsel %vm970_vm8, %v973_v41, %v976_v3  ;;  %v6011_v0 = vsel %vm6004_vm9, %v6007_v56, %v6010_v40  ;;  %v850_v17 = vor.u32 4788187, %v849_v44  ;;  %v994_v7 = vsub.s32 32, %v993_v10 }
 0x130   :  { %v978_v14 = vsel %vm967_vm10, nan, %v977_v50  ;;  %v6012_v51 = vsel %vm967_vm10, nan, %v6011_v0  ;;  %v1143_v29 = vadd.s32 %v1142_v48, %v1138_v47  ;;  %v853_v11 = vcvt.s32.f32 %v846_v43 }
 0x131   :  { %5352 = vst [vmem:[#allocation2 + $0x50] sm:$0xff] %v978_v14  ;;  %10344 = vst [vmem:[#allocation2 + $0x58] sm:$0xff] %v6012_v51  ;;  %v851_v55 = vand.u32 2147483647, %v850_v17  ;;  %v864_v42 = vadd.s32 3, %v860_v22  ;;  %v12056_v57 = vand.u32 3, %v860_v22  ;;  %v1003_v23 = vshrl.u32 %v11220_v28, %v994_v7 }
 0x132   :  { %v1144_v63 = vadd.s32 536870912, %v1143_v29  ;;  %v986_v8 = vand.u32 8388607, %v979_v21  ;;  %v992_v39 = vshrl.u32 %v991_v49, 5  ;;  %v1006_v15 = vshrl.u32 %v11221_v30, %v994_v7 }
 0x133   :  { %v854_v45 = vmul.f32 %v853_v11, %v851_v55  ;;  %v997_v61 = vshrl.u32 %v11218_v24, %v994_v7  ;;  %v1000_v25 = vshrl.u32 %v11219_v26, %v994_v7  ;;  %v1002_v62 = vshll.u32 %v11219_v26, %v993_v10 }
 0x134   :  { %v1145_v59 = vshrl.u32 %v1144_v63, 30  ;;  %v1005_v5 = vshll.u32 %v11220_v28, %v993_v10  ;;  %v1008_v1 = vshll.u32 %v11221_v30, %v993_v10  ;;  %v1009_v31 = vshrl.u32 %v11222_v37, %v994_v7 }
 0x135   :  { %v855_v38 = vxor.u32 2147483648, %v854_v45  ;;  %v12068_v33 = vand.u32 3, %v864_v42  ;;  %v996_v46 = vshll.u32 %v11217_v20, %v993_v10  ;;  %v999_v2 = vshll.u32 %v11218_v24, %v993_v10 }
 0x136   :  { %v1146_v53 = vshll.u32 %v1145_v59, 30  ;;  %vm1085_vm1 = vcmp.lt.s32.totalorder %v11829_v60, 0  ;;  %v1004_v13 = vor.u32 %v1003_v23, %v1002_v62  ;;  %v1007_v49 = vor.u32 %v1006_v15, %v1005_v5 }
 0x137   :  { %v856_v19 = vsel %vm773_vm2, %v855_v38, %v854_v45  ;;  %v1010_v58 = vor.u32 %v1009_v31, %v1008_v1  ;;  %v998_v4 = vor.u32 %v997_v61, %v996_v46  ;;  %v1001_v6 = vor.u32 %v1000_v25, %v999_v2 }
 0x138   :  { %v859_v36 = vsel %vm11992_vm4, %v11744_v52, %v856_v19  ;;  %v12078_v54 = vsub.s32 %v1143_v29, %v1146_v53  ;;  %v987_v32 = vor.u32 8388608, %v986_v8  ;;  %vm1011_vm0 = vcmp.lt.s32.totalorder %v992_v39, 1 }
 0x139   :  { %11012 = vcosq.f32 %v859_v36  ;;  %v12081_v22 = vmul.f32 %v11943_v27, %v109_v18  ;;  %vm12085_vm2 = vcmp.le.f32.partialorder %v1083_v9, 0.7853982  ;;  %v1169_v3 = vsub.s32 4, %v1145_v59 }
 0x13a   :  { %11014 = vsinq.f32 %v859_v36  ;;  %v1149_v34 = vsub.s32 0, %v12078_v54  ;;  %vm1014_vm3 = vcmp.lt.s32.totalorder %v992_v39, 4  ;;  %v995_v40 = vshrl.u32 %v11217_v20, %v994_v7 }
 0x13b   :  { %v1016_v43 = vsel %vm1014_vm3, %v1004_v13, 2102212464  ;;  %v1020_v44 = vsel %vm1014_vm3, %v1007_v49, 920167782  ;;  %v1024_v41 = vsel %vm1014_vm3, %v1010_v58, 1326507024  ;;  %v1019_v47 = vsel %vm1011_vm0, %v998_v4, %v1001_v6 }
 0x13c   :  { %v10433_v56 = vmin.u32 %v1149_v34, %v12078_v54  ;;  %vm1013_vm4 = vcmp.lt.s32.totalorder %v992_v39, 3  ;;  %v1023_v48 = vsel %vm1011_vm0, %v1001_v6, %v1004_v13  ;;  %vm5905_vm5 = vcmp.eq.s32.totalorder %v12056_v57, 2 }
 0x13d   :  { %v1021_v9 = vsel %vm1013_vm4, %v1004_v13, %v1020_v44  ;;  %v1025_v50 = vsel %vm1013_vm4, %v1007_v49, %v1024_v41  ;;  %v1027_v0 = vshll.u32 %v987_v32, 8  ;;  %vm5902_vm6 = vcmp.eq.s32.totalorder %v12056_v57, 0  ;;  %v104_v32 = vpop.permute.xlu0 %103 }
 0x13e   :  { %v1151_v17 = vclz %v10433_v56  ;;  %vm1012_vm7 = vcmp.lt.s32.totalorder %v992_v39, 2  ;;  %v1015_v7 = vsel %vm1011_vm0, %v995_v40, %v998_v4  ;;  %v1017_v14 = vsel %vm1013_vm4, %v1001_v6, %v1016_v43 }
 0x13f   :  { %vm866_vm8 = vcmp.lt.s32.totalorder %v12068_v33, 2  ;;  %vm5901_vm9 = vcmp.lt.s32.totalorder %v12056_v57, 2  ;;  %v1022_v51 = vsel %vm1012_vm7, %v1019_v47, %v1021_v9  ;;  %v1026_v29 = vsel %vm1012_vm7, %v1023_v48, %v1025_v50 }
 0x140   :  { %v1294_v55 = vand.u32 2139095040, %v12081_v22  ;;  %vm863_vm10 = vweird.f32 %v11744_v52  ;;  %v10434_v11 = vadd.s32 4294967294, %v1151_v17  ;;  %v1170_v42 = vsel %vm1085_vm1, %v1169_v3, %v1145_v59 }
 0x141   :  { %v12103_v63 = vmul.u32.u64.low %v1027_v0, %v1026_v29  ;;  %v12104_v8 = vmul.u32.u64.high %v1027_v0, %v1026_v29, %v12103_v63  ;;  %v1018_v45 = vsel %vm1012_vm7, %v1015_v7, %v1017_v14  ;;  %vm867_vm11 = vcmp.eq.s32.totalorder %v12068_v33, 0 }
 0x142   :  { %v12106_v39 = vmul.u32.u64.low %v1027_v0, %v1022_v51  ;;  %v12107_v23 = vmul.u32.u64.high %v1027_v0, %v1022_v51, %v12106_v39  ;;  %v1295_v15 = vshrl.u32 %v1294_v55, 23  ;;  %vm870_vm12 = vcmp.eq.s32.totalorder %v12068_v33, 2 }
 0x143   :  { %vm10435_vm13 = vcmp.lt.s32.totalorder %v10434_v11, 0  ;;  %v1291_v61 = vand.u32 2147483647, %v12081_v22  ;;  %v11013_v25 = vpop.eup %11012  ;;  %v1139_v59 = vadd.s32 %v12011_v12, %v12025_v16  ;;  %v1172_v38 = vsel %vm12085_vm2, 0, %v1170_v42 }
 0x144   :  { %v1154_v62 = vsel %vm10435_vm13, 0, %v10434_v11  ;;  %v10440_v5 = vadd.s32 4294967169, %v1295_v15  ;;  %v11015_v1 = vpop.eup %11014  ;;  %v871_v31 = vxor.u32 2147483648, %v11013_v25  ;;  %v1034_v2 = vmul.u32 %v1027_v0, %v1018_v45 }
 0x145   :  { %v1155_v53 = vsub.s32 32, %v1154_v62  ;;  %v1159_v46 = vsub.s32 4294967266, %v1154_v62  ;;  %v868_v18 = vxor.u32 2147483648, %v11015_v1  ;;  %v1156_v19 = vshll.u32 %v12078_v54, %v1154_v62 }
 0x146   :  { %vm1036_vm14 = vc.u32 %v12104_v8, %v12106_v39  ;;  %v1037_v13 = vadd.s32 1, %v12107_v23  ;;  %v872_v12 = vsel %vm870_vm12, %v871_v31, %v11015_v1  ;;  %v5907_v16 = vsel %vm5905_vm5, %v871_v31, %v11015_v1 }
 0x147   :  { %v1157_v49 = vshrl.u32 %v1139_v59, %v1155_v53  ;;  %v1160_v58 = vadd.s32 127, %v1159_v46  ;;  %v869_v36 = vsel %vm867_vm11, %v11013_v25, %v868_v18  ;;  %v5904_v4 = vsel %vm5902_vm6, %v11013_v25, %v868_v18 }
 0x148   :  { %v1038_v54 = vsel %vm1036_vm14, %v1037_v13, %v12107_v23  ;;  %v1301_v6 = vadd.s32 1, %v10440_v5  ;;  %v873_v34 = vsel %vm866_vm8, %v869_v36, %v872_v12  ;;  %v5908_v3 = vsel %vm5901_vm9, %v5904_v4, %v5907_v16 }
 0x149   :  { %v1158_v40 = vor.u32 %v1157_v49, %v1156_v19  ;;  %v1161_v43 = vshll.u32 %v1160_v58, 23  ;;  %v874_v44 = vsel %vm863_vm10, nan, %v873_v34  ;;  %v5909_v41 = vsel %vm863_vm10, nan, %v5908_v3 }
 0x14a   :  { %v1039_v56 = vadd.s32 %v1038_v54, %v1034_v2  ;;  %vm1302_vm15 = vcmp.gt.s32.totalorder %v1301_v6, 0  ;;  %5351 = vst [vmem:[#allocation2 + $0x40] sm:$0xff] %v874_v44  ;;  %10343 = vst [vmem:[#allocation2 + $0x48] sm:$0xff] %v5909_v41  ;;  %v12139_v33 = vmul.f32 %v11943_v27, %v104_v32  ;;  %v1176_v9 = vadd.s32 3, %v1172_v38 }
 0x14b   :  { %v1162_v47 = vor.u32 4788187, %v1161_v43  ;;  %v1303_v48 = vsel %vm1302_vm15, %v1301_v6, 0  ;;  %v1298_v50 = vand.u32 8388607, %v1291_v61  ;;  %v1165_v7 = vcvt.s32.f32 %v1158_v40 }
 0x14c   :  { %v1040_v57 = vadd.s32 536870912, %v1039_v56  ;;  %v1305_v0 = vand.u32 31, %v1303_v48  ;;  %v12145_v29 = vand.u32 3, %v1172_v38  ;;  %v12147_v55 = vand.u32 3, %v1176_v9 }
 0x14d   :  { %v1163_v17 = vand.u32 2147483647, %v1162_v47  ;;  %v1299_v42 = vor.u32 8388608, %v1298_v50  ;;  %v1187_v63 = vand.u32 2147483647, %v12139_v33  ;;  %v1190_v25 = vand.u32 2139095040, %v12139_v33 }
 0x14e   :  { %v12143_v14 = vshrl.u32 %v1040_v57, 30  ;;  %v1306_v52 = vsub.s32 32, %v1305_v0  ;;  %v12156_v62 = vshrl.u32 %v1303_v48, 5  ;;  %vm981_vm0 = vcmp.lt.s32.totalorder %v11946_v35, 0 }
 0x14f   :  { %v1166_v51 = vmul.f32 %v1165_v7, %v1163_v17  ;;  %v1308_v31 = vshll.u32 %v11217_v20, %v1305_v0  ;;  %v1311_v53 = vshll.u32 %v11218_v24, %v1305_v0  ;;  %v1314_v19 = vshll.u32 %v11219_v26, %v1305_v0 }
 0x150   :  { %v1042_v11 = vshll.u32 %v12143_v14, 30  ;;  %v1309_v23 = vshrl.u32 %v11218_v24, %v1306_v52  ;;  %v1312_v15 = vshrl.u32 %v11219_v26, %v1306_v52  ;;  %v1315_v38 = vshrl.u32 %v11220_v28, %v1306_v52 }
 0x151   :  { %v1167_v45 = vxor.u32 2147483648, %v1166_v51  ;;  %v1318_v5 = vshrl.u32 %v11221_v30, %v1306_v52  ;;  %v1321_v46 = vshrl.u32 %v11222_v37, %v1306_v52  ;;  %v1317_v13 = vshll.u32 %v11220_v28, %v1305_v0 }
 0x152   :  { %v12154_v59 = vsub.s32 %v1039_v56, %v1042_v11  ;;  %v1310_v12 = vor.u32 %v1309_v23, %v1308_v31  ;;  %v1313_v16 = vor.u32 %v1312_v15, %v1311_v53  ;;  %v1320_v49 = vshll.u32 %v11221_v30, %v1305_v0 }
 0x153   :  { %v1168_v1 = vsel %vm1085_vm1, %v1167_v45, %v1166_v51  ;;  %vm12175_vm1 = vcmp.le.f32.partialorder %v979_v21, 0.7853982  ;;  %v1316_v36 = vor.u32 %v1315_v38, %v1314_v19  ;;  %v1319_v4 = vor.u32 %v1318_v5, %v1317_v13 }
 0x154   :  { %v1171_v2 = vsel %vm12085_vm2, %v11829_v60, %v1168_v1  ;;  %v1045_v18 = vsub.s32 0, %v12154_v59  ;;  %v1035_v54 = vadd.s32 %v12106_v39, %v12104_v8  ;;  %v1322_v6 = vor.u32 %v1321_v46, %v1320_v49 }
 0x155   :  { %11016 = vcosq.f32 %v1171_v2  ;;  %v12182_v32 = vshll.u32 %v1299_v42, 8  ;;  %v1191_v34 = vshrl.u32 %v1190_v25, 23  ;;  %v1065_v40 = vsub.s32 4, %v12143_v14 }
 0x156   :  { %11018 = vsinq.f32 %v1171_v2  ;;  %v10429_v10 = vmin.u32 %v1045_v18, %v12154_v59  ;;  %vm1323_vm2 = vcmp.lt.s32.totalorder %v12156_v62, 1  ;;  %v12188_v21 = vand.u32 8388607, %v1187_v63 }
 0x157   :  { %vm1182_vm3 = vcmp.eq.s32.totalorder %v12147_v55, 2  ;;  %vm6214_vm4 = vcmp.eq.s32.totalorder %v12145_v29, 2  ;;  %v1307_v43 = vshrl.u32 %v11217_v20, %v1306_v52  ;;  %vm1324_vm5 = vcmp.lt.s32.totalorder %v12156_v62, 2 }
 0x158   :  { %v1047_v3 = vclz %v10429_v10  ;;  %vm1326_vm6 = vcmp.lt.s32.totalorder %v12156_v62, 4  ;;  %v1331_v8 = vsel %vm1323_vm2, %v1310_v12, %v1313_v16  ;;  %vm1179_vm7 = vcmp.eq.s32.totalorder %v12147_v55, 0 }
 0x159   :  { %vm6211_vm8 = vcmp.eq.s32.totalorder %v12145_v29, 0  ;;  %vm1325_vm9 = vcmp.lt.s32.totalorder %v12156_v62, 3  ;;  %v1332_v44 = vsel %vm1326_vm6, %v1319_v4, 920167782  ;;  %v1335_v41 = vsel %vm1323_vm2, %v1313_v16, %v1316_v36 }
 0x15a   :  { %v10430_v39 = vadd.s32 4294967294, %v1047_v3  ;;  %vm1178_vm10 = vcmp.lt.s32.totalorder %v12147_v55, 2  ;;  %vm6210_vm11 = vcmp.lt.s32.totalorder %v12145_v29, 2  ;;  %v1328_v56 = vsel %vm1326_vm6, %v1316_v36, 2102212464  ;;  %v119_v3 = vpop.permute.xlu1 %118 }
 0x15b   :  { %v1333_v47 = vsel %vm1325_vm9, %v1316_v36, %v1332_v44  ;;  %v1336_v48 = vsel %vm1326_vm6, %v1322_v6, 1326507024  ;;  %v10436_v9 = vadd.s32 4294967169, %v1191_v34  ;;  %vm1175_vm12 = vweird.f32 %v11829_v60 }
 0x15c   :  { %vm10431_vm13 = vcmp.lt.s32.totalorder %v10430_v39, 0  ;;  %v1066_v57 = vsel %vm981_vm0, %v1065_v40, %v12143_v14  ;;  %v1334_v50 = vsel %vm1324_vm5, %v1331_v8, %v1333_v47  ;;  %v1337_v0 = vsel %vm1325_vm9, %v1319_v4, %v1336_v48 }
 0x15d   :  { %v1050_v17 = vsel %vm10431_vm13, 0, %v10430_v39  ;;  %v1338_v7 = vsel %vm1324_vm5, %v1335_v41, %v1337_v0  ;;  %v12217_v52 = vmul.u32.u64.low %v12182_v32, %v1334_v50  ;;  %v12218_v51 = vmul.u32.u64.high %v12182_v32, %v1334_v50, %v12217_v52 }
 0x15e   :  { %v1051_v11 = vsub.s32 32, %v1050_v17  ;;  %v1055_v42 = vsub.s32 4294967266, %v1050_v17  ;;  %v1327_v14 = vsel %vm1323_vm2, %v1307_v43, %v1310_v12  ;;  %v1329_v45 = vsel %vm1325_vm9, %v1313_v16, %v1328_v56 }
 0x15f   :  { %v11017_v23 = vpop.eup %11016  ;;  %v1068_v15 = vsel %vm12175_vm1, 0, %v1066_v57  ;;  %v12228_v25 = vmul.u32.u64.low %v12182_v32, %v1338_v7  ;;  %v12229_v38 = vmul.u32.u64.high %v12182_v32, %v1338_v7, %v12228_v25  ;;  %v1197_v5 = vadd.s32 1, %v10436_v9 }
 0x160   :  { %v11019_v1 = vpop.eup %11018  ;;  %v1183_v31 = vxor.u32 2147483648, %v11017_v23  ;;  %v1052_v53 = vshll.u32 %v12154_v59, %v1050_v17  ;;  %v1053_v46 = vshrl.u32 %v1035_v54, %v1051_v11  ;;  %v1056_v2 = vadd.s32 127, %v1055_v42 }
 0x161   :  { %v1180_v18 = vxor.u32 2147483648, %v11019_v1  ;;  %v1330_v19 = vsel %vm1324_vm5, %v1327_v14, %v1329_v45  ;;  %v1349_v13 = vadd.s32 1, %v12218_v51  ;;  %vm1198_vm14 = vcmp.gt.s32.totalorder %v1197_v5, 0 }
 0x162   :  { %v1184_v12 = vsel %vm1182_vm3, %v1183_v31, %v11019_v1  ;;  %v6216_v16 = vsel %vm6214_vm4, %v1183_v31, %v11019_v1  ;;  %v1054_v49 = vor.u32 %v1053_v46, %v1052_v53  ;;  %v1057_v10 = vshll.u32 %v1056_v2, 23 }
 0x163   :  { %v1181_v59 = vsel %vm1179_vm7, %v11017_v23, %v1180_v18  ;;  %v6213_v36 = vsel %vm6211_vm8, %v11017_v23, %v1180_v18  ;;  %v1072_v4 = vadd.s32 3, %v1068_v15  ;;  %vm1348_vm15 = vc.u32 %v12229_v38, %v12217_v52 }
 0x164   :  { %v1185_v62 = vsel %vm1178_vm10, %v1181_v59, %v1184_v12  ;;  %v6217_v54 = vsel %vm6210_vm11, %v6213_v36, %v6216_v16  ;;  %v1058_v6 = vor.u32 4788187, %v1057_v10  ;;  %v1346_v34 = vmul.u32 %v12182_v32, %v1330_v19 }
 0x165   :  { %v1186_v40 = vsel %vm1175_vm12, nan, %v1185_v62  ;;  %v6218_v43 = vsel %vm1175_vm12, nan, %v6217_v54  ;;  %v1350_v8 = vsel %vm1348_vm15, %v1349_v13, %v12218_v51  ;;  %v1199_v39 = vsel %vm1198_vm14, %v1197_v5, 0 }
 0x166   :  { %5354 = vst [vmem:[#allocation2 + $0x70] sm:$0xff] %v1186_v40  ;;  %10346 = vst [vmem:[#allocation2 + $0x78] sm:$0xff] %v6218_v43  ;;  %v1059_v55 = vand.u32 2147483647, %v1058_v6  ;;  %v1061_v44 = vcvt.s32.f32 %v1054_v49  ;;  %v1351_v29 = vadd.s32 %v1350_v8, %v1346_v34  ;;  %v1201_v41 = vand.u32 31, %v1199_v39 }
 0x167   :  { %v12257_v56 = vmul.f32 %v11943_v27, %v119_v3  ;;  %v12259_v9 = vand.u32 3, %v1072_v4  ;;  %v12261_v60 = vand.u32 3, %v1068_v15  ;;  %v1195_v57 = vor.u32 8388608, %v12188_v21 }
 0x168   :  { %v1062_v32 = vmul.f32 %v1061_v44, %v1059_v55  ;;  %v1352_v47 = vadd.s32 536870912, %v1351_v29  ;;  %v1202_v48 = vsub.s32 32, %v1201_v41  ;;  %v12264_v17 = vshrl.u32 %v1199_v39, 5 }
 0x169   :  { %v1502_v14 = vand.u32 2139095040, %v12257_v56  ;;  %v1204_v21 = vshll.u32 %v11217_v20, %v1201_v41  ;;  %v1207_v15 = vshll.u32 %v11218_v24, %v1201_v41  ;;  %v1210_v5 = vshll.u32 %v11219_v26, %v1201_v41 }
 0x16a   :  { %v1063_v50 = vxor.u32 2147483648, %v1062_v32  ;;  %v1353_v0 = vshrl.u32 %v1352_v47, 30  ;;  %v1205_v7 = vshrl.u32 %v11218_v24, %v1202_v48  ;;  %v1208_v51 = vshrl.u32 %v11219_v26, %v1202_v48 }
 0x16b   :  { %v1211_v11 = vshrl.u32 %v11220_v28, %v1202_v48  ;;  %v1214_v42 = vshrl.u32 %v11221_v30, %v1202_v48  ;;  %v1213_v1 = vshll.u32 %v11220_v28, %v1201_v41  ;;  %v1217_v31 = vshrl.u32 %v11222_v37, %v1202_v48 }
 0x16c   :  { %v1064_v45 = vsel %vm981_vm0, %v1063_v50, %v1062_v32  ;;  %v1354_v23 = vshll.u32 %v1353_v0, 30  ;;  %v1206_v46 = vor.u32 %v1205_v7, %v1204_v21  ;;  %v1216_v2 = vshll.u32 %v11221_v30, %v1201_v41 }
 0x16d   :  { %v1067_v25 = vsel %vm12175_vm1, %v11946_v35, %v1064_v45  ;;  %v1209_v18 = vor.u32 %v1208_v51, %v1207_v15  ;;  %v1212_v19 = vor.u32 %v1211_v11, %v1210_v5  ;;  %v1215_v13 = vor.u32 %v1214_v42, %v1213_v1 }
 0x16e   :  { %11020 = vcosq.f32 %v1067_v25  ;;  %v12281_v53 = vsub.s32 %v1351_v29, %v1354_v23  ;;  %vm1293_vm0 = vcmp.lt.s32.totalorder %v12081_v22, 0  ;;  %v1203_v12 = vshrl.u32 %v11217_v20, %v1202_v48 }
 0x16f   :  { %11022 = vsinq.f32 %v1067_v25  ;;  %v1218_v16 = vor.u32 %v1217_v31, %v1216_v2  ;;  %v12287_v49 = vshll.u32 %v1195_v57, 8  ;;  %v1499_v10 = vand.u32 2147483647, %v12257_v56 }
 0x170   :  { %v1357_v58 = vsub.s32 0, %v12281_v53  ;;  %vm1078_vm1 = vcmp.eq.s32.totalorder %v12259_v9, 2  ;;  %vm6111_vm2 = vcmp.eq.s32.totalorder %v12261_v60, 2  ;;  %v1377_v36 = vsub.s32 4, %v1353_v0 }
 0x171   :  { %vm1219_vm3 = vcmp.lt.s32.totalorder %v12264_v17, 1  ;;  %vm1222_vm4 = vcmp.lt.s32.totalorder %v12264_v17, 4  ;;  %vm1075_vm5 = vcmp.eq.s32.totalorder %v12259_v9, 0  ;;  %vm6108_vm6 = vcmp.eq.s32.totalorder %v12261_v60, 0 }
 0x172   :  { %v10441_v59 = vmin.u32 %v1357_v58, %v12281_v53  ;;  %v1224_v4 = vsel %vm1222_vm4, %v1212_v19, 2102212464  ;;  %v1227_v62 = vsel %vm1219_vm3, %v1206_v46, %v1209_v18  ;;  %v1228_v54 = vsel %vm1222_vm4, %v1215_v13, 920167782 }
 0x173   :  { %v1503_v6 = vshrl.u32 %v1502_v14, 23  ;;  %vm1074_vm7 = vcmp.lt.s32.totalorder %v12259_v9, 2  ;;  %vm6107_vm8 = vcmp.lt.s32.totalorder %v12261_v60, 2  ;;  %vm1220_vm9 = vcmp.lt.s32.totalorder %v12264_v17, 2 }
 0x174   :  { %v1359_v34 = vclz %v10441_v59  ;;  %vm1221_vm10 = vcmp.lt.s32.totalorder %v12264_v17, 3  ;;  %v1231_v3 = vsel %vm1219_vm3, %v1209_v18, %v1212_v19  ;;  %vm1071_vm11 = vweird.f32 %v11946_v35 }
 0x175   :  { %v1223_v40 = vsel %vm1219_vm3, %v1203_v12, %v1206_v46  ;;  %v1229_v43 = vsel %vm1221_vm10, %v1212_v19, %v1228_v54  ;;  %v1232_v8 = vsel %vm1222_vm4, %v1218_v16, 1326507024  ;;  %v10448_v39 = vadd.s32 4294967169, %v1503_v6  ;;  %v114_v54 = vpop.permute.xlu0 %113 }
 0x176   :  { %v10442_v55 = vadd.s32 4294967294, %v1359_v34  ;;  %v1225_v44 = vsel %vm1221_vm10, %v1209_v18, %v1224_v4  ;;  %v1230_v29 = vsel %vm1220_vm9, %v1227_v62, %v1229_v43  ;;  %v1233_v41 = vsel %vm1221_vm10, %v1215_v13, %v1232_v8 }
 0x177   :  { %v1347_v32 = vadd.s32 %v12217_v52, %v12229_v38  ;;  %v1234_v47 = vsel %vm1220_vm9, %v1231_v3, %v1233_v41  ;;  %v12315_v48 = vmul.u32.u64.low %v12287_v49, %v1230_v29  ;;  %v12316_v57 = vmul.u32.u64.high %v12287_v49, %v1230_v29, %v12315_v48 }
 0x178   :  { %v11021_v50 = vpop.eup %11020  ;;  %vm10443_vm12 = vcmp.lt.s32.totalorder %v10442_v55, 0  ;;  %v1378_v7 = vsel %vm1293_vm0, %v1377_v36, %v1353_v0  ;;  %v12322_v51 = vmul.u32.u64.low %v12287_v49, %v1234_v47  ;;  %v12323_v11 = vmul.u32.u64.high %v12287_v49, %v1234_v47, %v12322_v51 }
 0x179   :  { %v11023_v42 = vpop.eup %11022  ;;  %v1079_v14 = vxor.u32 2147483648, %v11021_v50  ;;  %v1362_v52 = vsel %vm10443_vm12, 0, %v10442_v55  ;;  %v1226_v38 = vsel %vm1220_vm9, %v1223_v40, %v1225_v44  ;;  %v1509_v45 = vadd.s32 1, %v10448_v39 }
 0x17a   :  { %v1076_v23 = vxor.u32 2147483648, %v11023_v42  ;;  %v1363_v21 = vsub.s32 32, %v1362_v52  ;;  %v1364_v15 = vshll.u32 %v12281_v53, %v1362_v52  ;;  %v1367_v25 = vsub.s32 4294967266, %v1362_v52 }
 0x17b   :  { %v1080_v5 = vsel %vm1078_vm1, %v1079_v14, %v11023_v42  ;;  %v6113_v0 = vsel %vm6111_vm2, %v1079_v14, %v11023_v42  ;;  %v1245_v1 = vadd.s32 1, %v12316_v57  ;;  %vm1510_vm13 = vcmp.gt.s32.totalorder %v1509_v45, 0 }
 0x17c   :  { %v1077_v31 = vsel %vm1075_vm5, %v11021_v50, %v1076_v23  ;;  %v6110_v17 = vsel %vm6108_vm6, %v11021_v50, %v1076_v23  ;;  %v1365_v46 = vshrl.u32 %v1347_v32, %v1363_v21  ;;  %v1368_v2 = vadd.s32 127, %v1367_v25 }
 0x17d   :  { %v1081_v53 = vsel %vm1074_vm7, %v1077_v31, %v1080_v5  ;;  %v6114_v18 = vsel %vm6107_vm8, %v6110_v17, %v6113_v0  ;;  %v1242_v19 = vmul.u32 %v12287_v49, %v1226_v38  ;;  %vm1244_vm14 = vc.u32 %v12323_v11, %v12315_v48 }
 0x17e   :  { %v1082_v13 = vsel %vm1071_vm11, nan, %v1081_v53  ;;  %v6115_v58 = vsel %vm1071_vm11, nan, %v6114_v18  ;;  %v1366_v12 = vor.u32 %v1365_v46, %v1364_v15  ;;  %v1369_v16 = vshll.u32 %v1368_v2, 23 }
 0x17f   :  { %5353 = vst [vmem:[#allocation2 + $0x60] sm:$0xff] %v1082_v13  ;;  %10345 = vst [vmem:[#allocation2 + $0x68] sm:$0xff] %v6115_v58  ;;  %vm12350_vm15 = vcmp.le.f32.partialorder %v1291_v61, 0.7853982  ;;  %v1246_v60 = vsel %vm1244_vm14, %v1245_v1, %v12316_v57  ;;  %v1511_v49 = vsel %vm1510_vm13, %v1509_v45, 0  ;;  %v12363_v44 = vmul.f32 %v11943_v27, %v114_v54 }
 0x180   :  { %v1370_v59 = vor.u32 4788187, %v1369_v16  ;;  %v1380_v36 = vsel %vm12350_vm15, 0, %v1378_v7  ;;  %v1247_v35 = vadd.s32 %v1246_v60, %v1242_v19  ;;  %v1506_v4 = vand.u32 8388607, %v1499_v10 }
 0x181   :  { %v1513_v62 = vand.u32 31, %v1511_v49  ;;  %v1373_v34 = vcvt.s32.f32 %v1366_v12  ;;  %v1384_v3 = vadd.s32 3, %v1380_v36  ;;  %v12360_v40 = vand.u32 3, %v1380_v36 }
 0x182   :  { %v1371_v6 = vand.u32 2147483647, %v1370_v59  ;;  %v1248_v61 = vadd.s32 536870912, %v1247_v35  ;;  %v1507_v55 = vor.u32 8388608, %v1506_v4  ;;  %v1512_v29 = vshrl.u32 %v1511_v49, 5 }
 0x183   :  { %v1514_v43 = vsub.s32 32, %v1513_v62  ;;  %v1516_v7 = vshll.u32 %v11217_v20, %v1513_v62  ;;  %vm1189_vm1 = vcmp.lt.s32.totalorder %v12139_v33, 0  ;;  %v1519_v42 = vshll.u32 %v11218_v24, %v1513_v62 }
 0x184   :  { %v1374_v8 = vmul.f32 %v1373_v34, %v1371_v6  ;;  %v1249_v39 = vshrl.u32 %v1248_v61, 30  ;;  %v1522_v27 = vshll.u32 %v11219_v26, %v1513_v62  ;;  %v1525_v14 = vshll.u32 %v11220_v28, %v1513_v62 }
 0x185   :  { %v1517_v41 = vshrl.u32 %v11218_v24, %v1514_v43  ;;  %v1520_v32 = vshrl.u32 %v11219_v26, %v1514_v43  ;;  %v1523_v47 = vshrl.u32 %v11220_v28, %v1514_v43  ;;  %v1526_v51 = vshrl.u32 %v11221_v30, %v1514_v43 }
 0x186   :  { %v1375_v57 = vxor.u32 2147483648, %v1374_v8  ;;  %v1250_v50 = vshll.u32 %v1249_v39, 30  ;;  %v1529_v52 = vshrl.u32 %v11222_v37, %v1514_v43  ;;  %v1528_v21 = vshll.u32 %v11221_v30, %v1513_v62 }
 0x187   :  { %v1518_v23 = vor.u32 %v1517_v41, %v1516_v7  ;;  %v1521_v25 = vor.u32 %v1520_v32, %v1519_v42  ;;  %v1524_v5 = vor.u32 %v1523_v47, %v1522_v27  ;;  %v1527_v0 = vor.u32 %v1526_v51, %v1525_v14 }
 0x188   :  { %v1376_v38 = vsel %vm1293_vm0, %v1375_v57, %v1374_v8  ;;  %v12377_v45 = vsub.s32 %v1247_v35, %v1250_v50  ;;  %v12383_v1 = vand.u32 3, %v1384_v3  ;;  %v12386_v17 = vshll.u32 %v1507_v55, 8 }
 0x189   :  { %v1379_v15 = vsel %vm12350_vm15, %v12081_v22, %v1376_v38  ;;  %v1530_v46 = vor.u32 %v1529_v52, %v1528_v21  ;;  %vm1531_vm0 = vcmp.lt.s32.totalorder %v1512_v29, 1  ;;  %v1398_v2 = vand.u32 2139095040, %v12363_v44 }
 0x18a   :  { %11024 = vcosq.f32 %v1379_v15  ;;  %v1253_v31 = vsub.s32 0, %v12377_v45  ;;  %vm12391_vm2 = vcmp.le.f32.partialorder %v1187_v63, 0.7853982  ;;  %v1273_v19 = vsub.s32 4, %v1249_v39 }
 0x18b   :  { %11026 = vsinq.f32 %v1379_v15  ;;  %v1515_v13 = vshrl.u32 %v11217_v20, %v1514_v43  ;;  %vm1534_vm3 = vcmp.lt.s32.totalorder %v1512_v29, 4  ;;  %vm1532_vm4 = vcmp.lt.s32.totalorder %v1512_v29, 2 }
 0x18c   :  { %v10437_v18 = vmin.u32 %v1253_v31, %v12377_v45  ;;  %v1536_v58 = vsel %vm1534_vm3, %v1524_v5, 2102212464  ;;  %v1539_v12 = vsel %vm1531_vm0, %v1518_v23, %v1521_v25  ;;  %v1540_v16 = vsel %vm1534_vm3, %v1527_v0, 920167782 }
 0x18d   :  { %vm6420_vm5 = vcmp.eq.s32.totalorder %v12360_v40, 2  ;;  %vm1533_vm6 = vcmp.lt.s32.totalorder %v1512_v29, 3  ;;  %v1535_v60 = vsel %vm1531_vm0, %v1515_v13, %v1518_v23  ;;  %v1543_v49 = vsel %vm1531_vm0, %v1521_v25, %v1524_v5 }
 0x18e   :  { %v1255_v9 = vclz %v10437_v18  ;;  %vm6417_vm7 = vcmp.eq.s32.totalorder %v12360_v40, 0  ;;  %v1537_v63 = vsel %vm1533_vm6, %v1521_v25, %v1536_v58  ;;  %v1541_v59 = vsel %vm1533_vm6, %v1524_v5, %v1540_v16  ;;  %v129_v58 = vpop.permute.xlu1 %128 }
 0x18f   :  { %v1544_v36 = vsel %vm1534_vm3, %v1530_v46, 1326507024  ;;  %v1399_v35 = vshrl.u32 %v1398_v2, 23  ;;  %vm1386_vm8 = vcmp.lt.s32.totalorder %v12383_v1, 2  ;;  %vm6416_vm9 = vcmp.lt.s32.totalorder %v12360_v40, 2 }
 0x190   :  { %v10438_v4 = vadd.s32 4294967294, %v1255_v9  ;;  %v1274_v62 = vsel %vm1189_vm1, %v1273_v19, %v1249_v39  ;;  %v1542_v54 = vsel %vm1532_vm4, %v1539_v12, %v1541_v59  ;;  %v1545_v6 = vsel %vm1533_vm6, %v1527_v0, %v1544_v36  ;;  %v12450_v59 = vld [vmem:[%s16164_s1] ss:$0 sm:$0xff] }
 0x191   :  { %vm1383_vm10 = vweird.f32 %v12081_v22  ;;  %v1538_v34 = vsel %vm1532_vm4, %v1535_v60, %v1537_v63  ;;  %v1546_v61 = vsel %vm1532_vm4, %v1543_v49, %v1545_v6  ;;  %v10444_v39 = vadd.s32 4294967169, %v1399_v35 }
 0x192   :  { %v12408_v3 = vmul.u32.u64.low %v12386_v17, %v1542_v54  ;;  %v12409_v43 = vmul.u32.u64.high %v12386_v17, %v1542_v54, %v12408_v3  ;;  %vm10439_vm11 = vcmp.lt.s32.totalorder %v10438_v4, 0  ;;  %vm1387_vm12 = vcmp.eq.s32.totalorder %v12383_v1, 0 }
 0x193   :  { %v12413_v8 = vmul.u32.u64.low %v12386_v17, %v1546_v61  ;;  %v12414_v55 = vmul.u32.u64.high %v12386_v17, %v1546_v61, %v12413_v8  ;;  %vm1390_vm13 = vcmp.eq.s32.totalorder %v12383_v1, 2  ;;  %v1243_v41 = vadd.s32 %v12315_v48, %v12323_v11 }
 0x194   :  { %v1258_v29 = vsel %vm10439_vm11, 0, %v10438_v4  ;;  %v11025_v32 = vpop.eup %11024  ;;  %v1395_v50 = vand.u32 2147483647, %v12363_v44  ;;  %v1405_v7 = vadd.s32 1, %v10444_v39  ;;  %v1276_v27 = vsel %vm12391_vm2, 0, %v1274_v62 }
 0x195   :  { %v1259_v47 = vsub.s32 32, %v1258_v29  ;;  %v1263_v57 = vsub.s32 4294967266, %v1258_v29  ;;  %v11027_v51 = vpop.eup %11026  ;;  %v1391_v42 = vxor.u32 2147483648, %v11025_v32  ;;  %v1554_v14 = vmul.u32 %v12386_v17, %v1538_v34 }
 0x196   :  { %v1557_v52 = vadd.s32 1, %v12409_v43  ;;  %v1388_v38 = vxor.u32 2147483648, %v11027_v51  ;;  %v1260_v23 = vshll.u32 %v12377_v45, %v1258_v29  ;;  %vm1556_vm14 = vc.u32 %v12414_v55, %v12408_v3 }
 0x197   :  { %v1261_v48 = vshrl.u32 %v1243_v41, %v1259_v47  ;;  %v1264_v11 = vadd.s32 127, %v1263_v57  ;;  %v1392_v21 = vsel %vm1390_vm13, %v1391_v42, %v11027_v51  ;;  %v6422_v15 = vsel %vm6420_vm5, %v1391_v42, %v11027_v51 }
 0x198   :  { %vm1406_vm15 = vcmp.gt.s32.totalorder %v1405_v7, 0  ;;  %v1389_v25 = vsel %vm1387_vm12, %v11025_v32, %v1388_v38  ;;  %v6419_v5 = vsel %vm6417_vm7, %v11025_v32, %v1388_v38  ;;  %v1558_v46 = vsel %vm1556_vm14, %v1557_v52, %v12409_v43 }
 0x199   :  { %v1262_v0 = vor.u32 %v1261_v48, %v1260_v23  ;;  %v1265_v45 = vshll.u32 %v1264_v11, 23  ;;  %v1393_v31 = vsel %vm1386_vm8, %v1389_v25, %v1392_v21  ;;  %v6423_v17 = vsel %vm6416_vm9, %v6419_v5, %v6422_v15 }
 0x19a   :  { %v1407_v2 = vsel %vm1406_vm15, %v1405_v7, 0  ;;  %v1394_v18 = vsel %vm1383_vm10, nan, %v1393_v31  ;;  %v6424_v19 = vsel %vm1383_vm10, nan, %v6423_v17  ;;  %v1280_v12 = vadd.s32 3, %v1276_v27 }
 0x19b   :  { %v1266_v13 = vor.u32 4788187, %v1265_v45  ;;  %5356 = vst [vmem:[#allocation2 + $0x90] sm:$0xff] %v1394_v18  ;;  %10348 = vst [vmem:[#allocation2 + $0x98] sm:$0xff] %v6424_v19  ;;  %v1559_v16 = vadd.s32 %v1558_v46, %v1554_v14  ;;  %v1402_v1 = vand.u32 8388607, %v1395_v50  ;;  %v1269_v60 = vcvt.s32.f32 %v1262_v0 }
 0x19c   :  { %v1409_v40 = vand.u32 31, %v1407_v2  ;;  %v12453_v22 = vmul.f32 %v12450_v59, %v129_v58  ;;  %v12455_v35 = vand.u32 3, %v1276_v27  ;;  %v12457_v4 = vand.u32 3, %v1280_v12 }
 0x19d   :  { %v1267_v9 = vand.u32 2147483647, %v1266_v13  ;;  %v1560_v49 = vadd.s32 536870912, %v1559_v16  ;;  %v1403_v54 = vor.u32 8388608, %v1402_v1  ;;  %v12461_v6 = vshrl.u32 %v1407_v2, 5 }
 0x19e   :  { %v1410_v63 = vsub.s32 32, %v1409_v40  ;;  %v1412_v41 = vshll.u32 %v11217_v20, %v1409_v40  ;;  %v1710_v32 = vand.u32 2139095040, %v12453_v22  ;;  %v1415_v57 = vshll.u32 %v11218_v24, %v1409_v40 }
 0x19f   :  { %v1270_v36 = vmul.f32 %v1269_v60, %v1267_v9  ;;  %v12459_v62 = vshrl.u32 %v1560_v49, 30  ;;  %v1421_v7 = vshll.u32 %v11220_v28, %v1409_v40  ;;  %v1418_v14 = vshll.u32 %v11219_v26, %v1409_v40 }
 0x1a0   :  { %v1413_v61 = vshrl.u32 %v11218_v24, %v1410_v63  ;;  %v1416_v43 = vshrl.u32 %v11219_v26, %v1410_v63  ;;  %v1422_v8 = vshrl.u32 %v11221_v30, %v1410_v63  ;;  %v1419_v29 = vshrl.u32 %v11220_v28, %v1410_v63 }
 0x1a1   :  { %v1271_v34 = vxor.u32 2147483648, %v1270_v36  ;;  %v1562_v39 = vshll.u32 %v12459_v62, 30  ;;  %v1425_v51 = vshrl.u32 %v11222_v37, %v1410_v63  ;;  %v1424_v52 = vshll.u32 %v11221_v30, %v1409_v40 }
 0x1a2   :  { %v1414_v38 = vor.u32 %v1413_v61, %v1412_v41  ;;  %v1417_v23 = vor.u32 %v1416_v43, %v1415_v57  ;;  %v1423_v48 = vor.u32 %v1422_v8, %v1421_v7  ;;  %v1420_v21 = vor.u32 %v1419_v29, %v1418_v14 }
 0x1a3   :  { %v1272_v47 = vsel %vm1189_vm1, %v1271_v34, %v1270_v36  ;;  %v12478_v27 = vsub.s32 %v1559_v16, %v1562_v39  ;;  %vm1501_vm1 = vcmp.lt.s32.totalorder %v12257_v56, 0  ;;  %v1426_v15 = vor.u32 %v1425_v51, %v1424_v52 }
 0x1a4   :  { %v1275_v42 = vsel %vm12391_vm2, %v12139_v33, %v1272_v47  ;;  %v12484_v25 = vshll.u32 %v1403_v54, 8  ;;  %v1411_v5 = vshrl.u32 %v11217_v20, %v1410_v63  ;;  %vm1427_vm0 = vcmp.lt.s32.totalorder %v12461_v6, 1 }
 0x1a5   :  { %11028 = vcosq.f32 %v1275_v42  ;;  %v1565_v11 = vsub.s32 0, %v12478_v27  ;;  %vm1430_vm2 = vcmp.lt.s32.totalorder %v12461_v6, 4  ;;  %vm1286_vm3 = vcmp.eq.s32.totalorder %v12457_v4, 2 }
 0x1a6   :  { %11030 = vsinq.f32 %v1275_v42  ;;  %vm6317_vm4 = vcmp.eq.s32.totalorder %v12455_v35, 2  ;;  %v1585_v0 = vsub.s32 4, %v12459_v62  ;;  %v1435_v45 = vsel %vm1427_vm0, %v1414_v38, %v1417_v23 }
 0x1a7   :  { %v10449_v53 = vmin.u32 %v1565_v11, %v12478_v27  ;;  %v1436_v31 = vsel %vm1430_vm2, %v1423_v48, 920167782  ;;  %v1711_v17 = vshrl.u32 %v1710_v32, 23  ;;  %vm1283_vm5 = vcmp.eq.s32.totalorder %v12457_v4, 0 }
 0x1a8   :  { %vm6314_vm6 = vcmp.eq.s32.totalorder %v12455_v35, 0  ;;  %vm1429_vm7 = vcmp.lt.s32.totalorder %v12461_v6, 3  ;;  %v1432_v2 = vsel %vm1430_vm2, %v1420_v21, 2102212464  ;;  %v1439_v18 = vsel %vm1427_vm0, %v1417_v23, %v1420_v21 }
 0x1a9   :  { %v1567_v46 = vclz %v10449_v53  ;;  %vm1282_vm8 = vcmp.lt.s32.totalorder %v12457_v4, 2  ;;  %vm6313_vm9 = vcmp.lt.s32.totalorder %v12455_v35, 2  ;;  %vm1428_vm10 = vcmp.lt.s32.totalorder %v12461_v6, 2 }
 0x1aa   :  { %v1437_v19 = vsel %vm1429_vm7, %v1420_v21, %v1436_v31  ;;  %v1440_v13 = vsel %vm1430_vm2, %v1426_v15, 1326507024  ;;  %v10456_v58 = vadd.s32 4294967169, %v1711_v17  ;;  %vm1279_vm11 = vweird.f32 %v12139_v33 }
 0x1ab   :  { %v10450_v12 = vadd.s32 4294967294, %v1567_v46  ;;  %v1431_v16 = vsel %vm1427_vm0, %v1411_v5, %v1414_v38  ;;  %v1438_v1 = vsel %vm1428_vm10, %v1435_v45, %v1437_v19  ;;  %v1441_v40 = vsel %vm1429_vm7, %v1423_v48, %v1440_v13 }
 0x1ac   :  { %v1433_v9 = vsel %vm1429_vm7, %v1417_v23, %v1432_v2  ;;  %v1442_v60 = vsel %vm1428_vm10, %v1439_v18, %v1441_v40  ;;  %v12517_v49 = vmul.u32.u64.low %v12484_v25, %v1438_v1  ;;  %v12518_v63 = vmul.u32.u64.high %v12484_v25, %v1438_v1, %v12517_v49 }
 0x1ad   :  { %vm10451_vm12 = vcmp.lt.s32.totalorder %v10450_v12, 0  ;;  %v12522_v36 = vmul.u32.u64.low %v12484_v25, %v1442_v60  ;;  %v12523_v54 = vmul.u32.u64.high %v12484_v25, %v1442_v60, %v12522_v36  ;;  %v1707_v34 = vand.u32 2147483647, %v12453_v22 }
 0x1ae   :  { %v1555_v43 = vadd.s32 %v12408_v3, %v12414_v55  ;;  %v1570_v8 = vsel %vm10451_vm12, 0, %v10450_v12  ;;  %v1586_v39 = vsel %vm1501_vm1, %v1585_v0, %v12459_v62  ;;  %v1717_v41 = vadd.s32 1, %v10456_v58 }
 0x1af   :  { %v11029_v61 = vpop.eup %11028  ;;  %v1571_v47 = vsub.s32 32, %v1570_v8  ;;  %v1575_v57 = vsub.s32 4294967266, %v1570_v8  ;;  %v1434_v7 = vsel %vm1428_vm10, %v1431_v16, %v1433_v9  ;;  %v1572_v42 = vshll.u32 %v12478_v27, %v1570_v8 }
 0x1b0   :  { %v11031_v29 = vpop.eup %11030  ;;  %v1287_v32 = vxor.u32 2147483648, %v11029_v61  ;;  %v1453_v14 = vadd.s32 1, %v12518_v63  ;;  %vm1718_vm13 = vcmp.gt.s32.totalorder %v1717_v41, 0  ;;  %v1450_v23 = vmul.u32 %v12484_v25, %v1434_v7 }
 0x1b1   :  { %v1284_v51 = vxor.u32 2147483648, %v11031_v29  ;;  %v1573_v62 = vshrl.u32 %v1555_v43, %v1571_v47  ;;  %v1576_v52 = vadd.s32 127, %v1575_v57  ;;  %vm1452_vm14 = vc.u32 %v12523_v54, %v12517_v49  ;;  %v124_v57 = vpop.permute.xlu0 %123 }
 0x1b2   :  { %v1288_v3 = vsel %vm1286_vm3, %v1287_v32, %v11031_v29  ;;  %v6319_v55 = vsel %vm6317_vm4, %v1287_v32, %v11031_v29  ;;  %v1454_v5 = vsel %vm1452_vm14, %v1453_v14, %v12518_v63  ;;  %v1719_v25 = vsel %vm1718_vm13, %v1717_v41, 0 }
 0x1b3   :  { %v1285_v38 = vsel %vm1283_vm5, %v11029_v61, %v1284_v51  ;;  %v6316_v6 = vsel %vm6314_vm6, %v11029_v61, %v1284_v51  ;;  %v1574_v11 = vor.u32 %v1573_v62, %v1572_v42  ;;  %v1577_v21 = vshll.u32 %v1576_v52, 23 }
 0x1b4   :  { %v1289_v27 = vsel %vm1282_vm8, %v1285_v38, %v1288_v3  ;;  %v6320_v48 = vsel %vm6313_vm9, %v6316_v6, %v6319_v55  ;;  %vm12558_vm15 = vcmp.le.f32.partialorder %v1499_v10, 0.7853982  ;;  %v1455_v0 = vadd.s32 %v1454_v5, %v1450_v23 }
 0x1b5   :  { %v1290_v15 = vsel %vm1279_vm11, nan, %v1289_v27  ;;  %v6321_v53 = vsel %vm1279_vm11, nan, %v6320_v48  ;;  %v1578_v35 = vor.u32 4788187, %v1577_v21  ;;  %v1714_v45 = vand.u32 8388607, %v1707_v34 }
 0x1b6   :  { %5355 = vst [vmem:[#allocation2 + $0x80] sm:$0xff] %v1290_v15  ;;  %10347 = vst [vmem:[#allocation2 + $0x88] sm:$0xff] %v6321_v53  ;;  %v1588_v33 = vsel %vm12558_vm15, 0, %v1586_v39  ;;  %v1721_v31 = vand.u32 31, %v1719_v25  ;;  %v1581_v46 = vcvt.s32.f32 %v1574_v11  ;;  %v1456_v2 = vadd.s32 536870912, %v1455_v0 }
 0x1b7   :  { %v1579_v17 = vand.u32 2147483647, %v1578_v35  ;;  %v1592_v13 = vadd.s32 3, %v1588_v33  ;;  %v1715_v10 = vor.u32 8388608, %v1714_v45  ;;  %v1720_v12 = vshrl.u32 %v1719_v25, 5 }
 0x1b8   :  { %v1722_v18 = vsub.s32 32, %v1721_v31  ;;  %v1457_v58 = vshrl.u32 %v1456_v2, 30  ;;  %v1724_v63 = vshll.u32 %v11217_v20, %v1721_v31  ;;  %vm1397_vm0 = vcmp.lt.s32.totalorder %v12363_v44, 0 }
 0x1b9   :  { %v1582_v19 = vmul.f32 %v1581_v46, %v1579_v17  ;;  %v1727_v61 = vshll.u32 %v11218_v24, %v1721_v31  ;;  %v1730_v43 = vshll.u32 %v11219_v26, %v1721_v31  ;;  %v1733_v8 = vshll.u32 %v11220_v28, %v1721_v31 }
 0x1ba   :  { %v1725_v16 = vshrl.u32 %v11218_v24, %v1722_v18  ;;  %v1728_v1 = vshrl.u32 %v11219_v26, %v1722_v18  ;;  %v1731_v40 = vshrl.u32 %v11220_v28, %v1722_v18  ;;  %v1458_v60 = vshll.u32 %v1457_v58, 30 }
 0x1bb   :  { %v1583_v9 = vxor.u32 2147483648, %v1582_v19  ;;  %v1734_v36 = vshrl.u32 %v11221_v30, %v1722_v18  ;;  %v1737_v39 = vshrl.u32 %v11222_v37, %v1722_v18  ;;  %v1736_v47 = vshll.u32 %v11221_v30, %v1721_v31 }
 0x1bc   :  { %v12578_v29 = vsub.s32 %v1455_v0, %v1458_v60  ;;  %v1726_v32 = vor.u32 %v1725_v16, %v1724_v63  ;;  %v1729_v51 = vor.u32 %v1728_v1, %v1727_v61  ;;  %v1732_v42 = vor.u32 %v1731_v40, %v1730_v43 }
 0x1bd   :  { %v1584_v41 = vsel %vm1501_vm1, %v1583_v9, %v1582_v19  ;;  %v1735_v14 = vor.u32 %v1734_v36, %v1733_v8  ;;  %v12584_v3 = vand.u32 3, %v1592_v13  ;;  %v12586_v55 = vand.u32 3, %v1588_v33 }
 0x1be   :  { %v1587_v7 = vsel %vm12558_vm15, %v12257_v56, %v1584_v41  ;;  %v1461_v62 = vsub.s32 0, %v12578_v29  ;;  %v1738_v52 = vor.u32 %v1737_v39, %v1736_v47  ;;  %vm1739_vm1 = vcmp.lt.s32.totalorder %v1720_v12, 1 }
 0x1bf   :  { %11032 = vcosq.f32 %v1587_v7  ;;  %v12590_v38 = vmul.f32 %v12450_v59, %v124_v57  ;;  %vm12594_vm2 = vcmp.le.f32.partialorder %v1395_v50, 0.7853982  ;;  %v1481_v27 = vsub.s32 4, %v1457_v58 }
 0x1c0   :  { %11034 = vsinq.f32 %v1587_v7  ;;  %v10445_v23 = vmin.u32 %v1461_v62, %v12578_v29  ;;  %v1723_v48 = vshrl.u32 %v11217_v20, %v1722_v18  ;;  %vm1742_vm3 = vcmp.lt.s32.totalorder %v1720_v12, 4 }
 0x1c1   :  { %v1744_v11 = vsel %vm1742_vm3, %v1732_v42, 2102212464  ;;  %v1747_v21 = vsel %vm1739_vm1, %v1726_v32, %v1729_v51  ;;  %v1748_v15 = vsel %vm1742_vm3, %v1735_v14, 920167782  ;;  %v12600_v53 = vshll.u32 %v1715_v10, 8 }
 0x1c2   :  { %vm6626_vm4 = vcmp.eq.s32.totalorder %v12586_v55, 2  ;;  %v1463_v5 = vclz %v10445_v23  ;;  %vm1741_vm5 = vcmp.lt.s32.totalorder %v1720_v12, 3  ;;  %v1743_v25 = vsel %vm1739_vm1, %v1723_v48, %v1726_v32 }
 0x1c3   :  { %v1751_v50 = vsel %vm1739_vm1, %v1729_v51, %v1732_v42  ;;  %vm6623_vm6 = vcmp.eq.s32.totalorder %v12586_v55, 0  ;;  %vm1740_vm7 = vcmp.lt.s32.totalorder %v1720_v12, 2  ;;  %v1745_v4 = vsel %vm1741_vm5, %v1729_v51, %v1744_v11 }
 0x1c4   :  { %v1749_v35 = vsel %vm1741_vm5, %v1732_v42, %v1748_v15  ;;  %v1752_v0 = vsel %vm1742_vm3, %v1738_v52, 1326507024  ;;  %vm1594_vm8 = vcmp.lt.s32.totalorder %v12584_v3, 2  ;;  %vm6622_vm9 = vcmp.lt.s32.totalorder %v12586_v55, 2  ;;  %v139_v15 = vpop.permute.xlu1 %138 }
 0x1c5   :  { %v10446_v45 = vadd.s32 4294967294, %v1463_v5  ;;  %v1482_v33 = vsel %vm1397_vm0, %v1481_v27, %v1457_v58  ;;  %v1750_v31 = vsel %vm1740_vm7, %v1747_v21, %v1749_v35  ;;  %v1753_v17 = vsel %vm1741_vm5, %v1735_v14, %v1752_v0 }
 0x1c6   :  { %vm1591_vm10 = vweird.f32 %v12257_v56  ;;  %v1746_v46 = vsel %vm1740_vm7, %v1743_v25, %v1745_v4  ;;  %v1754_v2 = vsel %vm1740_vm7, %v1751_v50, %v1753_v17  ;;  %v1606_v12 = vand.u32 2139095040, %v12590_v38 }
 0x1c7   :  { %v12610_v18 = vmul.u32.u64.low %v12600_v53, %v1750_v31  ;;  %v12611_v19 = vmul.u32.u64.high %v12600_v53, %v1750_v31, %v12610_v18  ;;  %vm10447_vm11 = vcmp.lt.s32.totalorder %v10446_v45, 0  ;;  %vm1595_vm12 = vcmp.eq.s32.totalorder %v12584_v3, 0 }
 0x1c8   :  { %v12615_v13 = vmul.u32.u64.low %v12600_v53, %v1754_v2  ;;  %v12616_v10 = vmul.u32.u64.high %v12600_v53, %v1754_v2, %v12615_v13  ;;  %vm1598_vm13 = vcmp.eq.s32.totalorder %v12584_v3, 2  ;;  %v1451_v58 = vadd.s32 %v12517_v49, %v12523_v54 }
 0x1c9   :  { %v1466_v16 = vsel %vm10447_vm11, 0, %v10446_v45  ;;  %v11033_v1 = vpop.eup %11032  ;;  %v1603_v60 = vand.u32 2147483647, %v12590_v38  ;;  %v1607_v63 = vshrl.u32 %v1606_v12, 23  ;;  %v1484_v43 = vsel %vm12594_vm2, 0, %v1482_v33 }
 0x1ca   :  { %v1467_v40 = vsub.s32 32, %v1466_v16  ;;  %v1471_v9 = vsub.s32 4294967266, %v1466_v16  ;;  %v11035_v36 = vpop.eup %11034  ;;  %v1599_v61 = vxor.u32 2147483648, %v11033_v1  ;;  %v1762_v8 = vmul.u32 %v12600_v53, %v1746_v46 }
 0x1cb   :  { %v1765_v39 = vadd.s32 1, %v12611_v19  ;;  %v1596_v41 = vxor.u32 2147483648, %v11035_v36  ;;  %v1468_v32 = vshll.u32 %v12578_v29, %v1466_v16  ;;  %vm1764_vm14 = vc.u32 %v12616_v10, %v12610_v18 }
 0x1cc   :  { %v1469_v49 = vshrl.u32 %v1451_v58, %v1467_v40  ;;  %v1472_v54 = vadd.s32 127, %v1471_v9  ;;  %v1600_v47 = vsel %vm1598_vm13, %v1599_v61, %v11035_v36  ;;  %v6628_v57 = vsel %vm6626_vm4, %v1599_v61, %v11035_v36 }
 0x1cd   :  { %v10452_v7 = vadd.s32 4294967169, %v1607_v63  ;;  %v1597_v51 = vsel %vm1595_vm12, %v11033_v1, %v1596_v41  ;;  %v6625_v42 = vsel %vm6623_vm6, %v11033_v1, %v1596_v41  ;;  %v1766_v23 = vsel %vm1764_vm14, %v1765_v39, %v12611_v19 }
 0x1ce   :  { %v1470_v14 = vor.u32 %v1469_v49, %v1468_v32  ;;  %v1473_v29 = vshll.u32 %v1472_v54, 23  ;;  %v1601_v62 = vsel %vm1594_vm8, %v1597_v51, %v1600_v47  ;;  %v6629_v52 = vsel %vm6622_vm9, %v6625_v42, %v6628_v57 }
 0x1cf   :  { %v1613_v27 = vadd.s32 1, %v10452_v7  ;;  %v1602_v48 = vsel %vm1591_vm10, nan, %v1601_v62  ;;  %v6630_v11 = vsel %vm1591_vm10, nan, %v6629_v52  ;;  %v1488_v53 = vadd.s32 3, %v1484_v43 }
 0x1d0   :  { %v1474_v21 = vor.u32 4788187, %v1473_v29  ;;  %5358 = vst [vmem:[#allocation2 + $0xb0] sm:$0xff] %v1602_v48  ;;  %10350 = vst [vmem:[#allocation2 + $0xb8] sm:$0xff] %v6630_v11  ;;  %v1767_v5 = vadd.s32 %v1766_v23, %v1762_v8  ;;  %v1477_v25 = vcvt.s32.f32 %v1470_v14  ;;  %v1610_v55 = vand.u32 8388607, %v1603_v60 }
 0x1d1   :  { %vm1614_vm15 = vcmp.gt.s32.totalorder %v1613_v27, 0  ;;  %v12651_v0 = vmul.f32 %v12450_v59, %v139_v15  ;;  %vm1709_vm1 = vcmp.lt.s32.totalorder %v12453_v22, 0  ;;  %v12654_v17 = vand.u32 3, %v1488_v53 }
 0x1d2   :  { %v1475_v3 = vand.u32 2147483647, %v1474_v21  ;;  %v1615_v50 = vsel %vm1614_vm15, %v1613_v27, 0  ;;  %v1768_v4 = vadd.s32 536870912, %v1767_v5  ;;  %v12656_v46 = vand.u32 3, %v1484_v43 }
 0x1d3   :  { %v1617_v35 = vand.u32 31, %v1615_v50  ;;  %v1611_v2 = vor.u32 8388608, %v1610_v55  ;;  %v12658_v13 = vshrl.u32 %v1615_v50, 5  ;;  %v1918_v58 = vand.u32 2139095040, %v12651_v0 }
 0x1d4   :  { %v1478_v56 = vmul.f32 %v1477_v25, %v1475_v3  ;;  %v1769_v45 = vshrl.u32 %v1768_v4, 30  ;;  %v1915_v29 = vand.u32 2147483647, %v12651_v0  ;;  %vm6523_vm3 = vcmp.eq.s32.totalorder %v12656_v46, 2 }
 0x1d5   :  { %v1618_v33 = vsub.s32 32, %v1617_v35  ;;  %v1620_v61 = vshll.u32 %v11217_v20, %v1617_v35  ;;  %v1623_v43 = vshll.u32 %v11218_v24, %v1617_v35  ;;  %v1626_v39 = vshll.u32 %v11219_v26, %v1617_v35 }
 0x1d6   :  { %v1479_v31 = vxor.u32 2147483648, %v1478_v56  ;;  %v1770_v19 = vshll.u32 %v1769_v45, 30  ;;  %v1793_v8 = vsub.s32 4, %v1769_v45  ;;  %v1629_v41 = vshll.u32 %v11220_v28, %v1617_v35 }
 0x1d7   :  { %v1621_v12 = vshrl.u32 %v11218_v24, %v1618_v33  ;;  %v1624_v1 = vshrl.u32 %v11219_v26, %v1618_v33  ;;  %v1627_v40 = vshrl.u32 %v11220_v28, %v1618_v33  ;;  %v1630_v9 = vshrl.u32 %v11221_v30, %v1618_v33 }
 0x1d8   :  { %v1480_v16 = vsel %vm1397_vm0, %v1479_v31, %v1478_v56  ;;  %v12670_v36 = vsub.s32 %v1767_v5, %v1770_v19  ;;  %vm12678_vm0 = vcmp.le.f32.partialorder %v1707_v34, 0.7853982  ;;  %v1632_v54 = vshll.u32 %v11221_v30, %v1617_v35 }
 0x1d9   :  { %v1483_v63 = vsel %vm12594_vm2, %v12363_v44, %v1480_v16  ;;  %v1622_v49 = vor.u32 %v1621_v12, %v1620_v61  ;;  %v1625_v47 = vor.u32 %v1624_v1, %v1623_v43  ;;  %v1628_v57 = vor.u32 %v1627_v40, %v1626_v39 }
 0x1da   :  { %11036 = vcosq.f32 %v1483_v63  ;;  %v1773_v6 = vsub.s32 0, %v12670_v36  ;;  %v1631_v7 = vor.u32 %v1630_v9, %v1629_v41  ;;  %v1633_v51 = vshrl.u32 %v11222_v37, %v1618_v33 }
 0x1db   :  { %11038 = vsinq.f32 %v1483_v63  ;;  %v12686_v14 = vshll.u32 %v1611_v2, 8  ;;  %v1919_v34 = vshrl.u32 %v1918_v58, 23  ;;  %vm1494_vm2 = vcmp.eq.s32.totalorder %v12654_v17, 2 }
 0x1dc   :  { %v10457_v42 = vmin.u32 %v1773_v6, %v12670_v36  ;;  %v1794_v62 = vsel %vm1709_vm1, %v1793_v8, %v1769_v45  ;;  %v1619_v52 = vshrl.u32 %v11217_v20, %v1618_v33  ;;  %v1634_v23 = vor.u32 %v1633_v51, %v1632_v54 }
 0x1dd   :  { %vm1635_vm4 = vcmp.lt.s32.totalorder %v12658_v13, 1  ;;  %vm1491_vm5 = vcmp.eq.s32.totalorder %v12654_v17, 0  ;;  %vm6520_vm6 = vcmp.eq.s32.totalorder %v12656_v46, 0  ;;  %vm1636_vm7 = vcmp.lt.s32.totalorder %v12658_v13, 2 }
 0x1de   :  { %v1775_v27 = vclz %v10457_v42  ;;  %vm1637_vm8 = vcmp.lt.s32.totalorder %v12658_v13, 3  ;;  %vm1638_vm9 = vcmp.lt.s32.totalorder %v12658_v13, 4  ;;  %vm1490_vm10 = vcmp.lt.s32.totalorder %v12654_v17, 2 }
 0x1df   :  { %vm6519_vm11 = vcmp.lt.s32.totalorder %v12656_v46, 2  ;;  %v1639_v48 = vsel %vm1635_vm4, %v1619_v52, %v1622_v49  ;;  %v1640_v11 = vsel %vm1638_vm9, %v1628_v57, 2102212464  ;;  %v1643_v21 = vsel %vm1635_vm4, %v1622_v49, %v1625_v47 }
 0x1e0   :  { %v1644_v15 = vsel %vm1638_vm9, %v1631_v7, 920167782  ;;  %vm1487_vm12 = vweird.f32 %v12363_v44  ;;  %v10458_v53 = vadd.s32 4294967294, %v1775_v27  ;;  %v1641_v5 = vsel %vm1637_vm8, %v1625_v47, %v1640_v11  ;;  %v134_v11 = vpop.permute.xlu0 %133 }
 0x1e1   :  { %v1645_v3 = vsel %vm1637_vm8, %v1628_v57, %v1644_v15  ;;  %v1647_v25 = vsel %vm1635_vm4, %v1625_v47, %v1628_v57  ;;  %v1763_v55 = vadd.s32 %v12610_v18, %v12616_v10  ;;  %v1648_v4 = vsel %vm1638_vm9, %v1634_v23, 1326507024 }
 0x1e2   :  { %v1646_v50 = vsel %vm1636_vm7, %v1643_v21, %v1645_v3  ;;  %v10464_v35 = vadd.s32 4294967169, %v1919_v34  ;;  %vm10459_vm13 = vcmp.lt.s32.totalorder %v10458_v53, 0  ;;  %v1649_v56 = vsel %vm1637_vm8, %v1631_v7, %v1648_v4 }
 0x1e3   :  { %v12720_v45 = vmul.u32.u64.low %v12686_v14, %v1646_v50  ;;  %v12721_v33 = vmul.u32.u64.high %v12686_v14, %v1646_v50, %v12720_v45  ;;  %v1778_v2 = vsel %vm10459_vm13, 0, %v10458_v53  ;;  %v1796_v19 = vsel %vm12678_vm0, 0, %v1794_v62 }
 0x1e4   :  { %v11037_v31 = vpop.eup %11036  ;;  %v1642_v18 = vsel %vm1636_vm7, %v1639_v48, %v1641_v5  ;;  %v1650_v10 = vsel %vm1636_vm7, %v1647_v25, %v1649_v56  ;;  %v1779_v16 = vsub.s32 32, %v1778_v2  ;;  %v1780_v1 = vshll.u32 %v12670_v36, %v1778_v2 }
 0x1e5   :  { %v11039_v12 = vpop.eup %11038  ;;  %v1495_v58 = vxor.u32 2147483648, %v11037_v31  ;;  %v1783_v40 = vsub.s32 4294967266, %v1778_v2  ;;  %v12732_v63 = vmul.u32.u64.low %v12686_v14, %v1650_v10  ;;  %v12733_v61 = vmul.u32.u64.high %v12686_v14, %v1650_v10, %v12732_v63 }
 0x1e6   :  { %v1492_v9 = vxor.u32 2147483648, %v11039_v12  ;;  %v1925_v43 = vadd.s32 1, %v10464_v35  ;;  %v1781_v13 = vshrl.u32 %v1763_v55, %v1779_v16  ;;  %v1661_v49 = vadd.s32 1, %v12721_v33 }
 0x1e7   :  { %v1496_v8 = vsel %vm1494_vm2, %v1495_v58, %v11039_v12  ;;  %v6525_v39 = vsel %vm6523_vm3, %v1495_v58, %v11039_v12  ;;  %v1784_v41 = vadd.s32 127, %v1783_v40  ;;  %v1658_v34 = vmul.u32 %v12686_v14, %v1642_v18 }
 0x1e8   :  { %v1493_v6 = vsel %vm1491_vm5, %v11037_v31, %v1492_v9  ;;  %v6522_v36 = vsel %vm6520_vm6, %v11037_v31, %v1492_v9  ;;  %vm1926_vm14 = vcmp.gt.s32.totalorder %v1925_v43, 0  ;;  %v1782_v57 = vor.u32 %v1781_v13, %v1780_v1 }
 0x1e9   :  { %v1497_v54 = vsel %vm1490_vm10, %v1493_v6, %v1496_v8  ;;  %v6526_v47 = vsel %vm6519_vm11, %v6522_v36, %v6525_v39  ;;  %v1785_v7 = vshll.u32 %v1784_v41, 23  ;;  %vm1660_vm15 = vc.u32 %v12733_v61, %v12720_v45 }
 0x1ea   :  { %v1498_v51 = vsel %vm1487_vm12, nan, %v1497_v54  ;;  %v6527_v42 = vsel %vm1487_vm12, nan, %v6526_v47  ;;  %v1662_v62 = vsel %vm1660_vm15, %v1661_v49, %v12721_v33  ;;  %v1927_v46 = vsel %vm1926_vm14, %v1925_v43, 0 }
 0x1eb   :  { %5357 = vst [vmem:[#allocation2 + $0xa0] sm:$0xff] %v1498_v51  ;;  %10349 = vst [vmem:[#allocation2 + $0xa8] sm:$0xff] %v6527_v42  ;;  %v1786_v17 = vor.u32 4788187, %v1785_v7  ;;  %v1800_v52 = vadd.s32 3, %v1796_v19  ;;  %v1663_v23 = vadd.s32 %v1662_v62, %v1658_v34  ;;  %v1929_v48 = vand.u32 31, %v1927_v46 }
 0x1ec   :  { %v1922_v27 = vand.u32 8388607, %v1915_v29  ;;  %v1789_v21 = vcvt.s32.f32 %v1782_v57  ;;  %v12759_v5 = vmul.f32 %v12450_v59, %v134_v11  ;;  %v12763_v25 = vand.u32 3, %v1796_v19 }
 0x1ed   :  { %v1787_v44 = vand.u32 2147483647, %v1786_v17  ;;  %v1664_v15 = vadd.s32 536870912, %v1663_v23  ;;  %v1930_v14 = vsub.s32 32, %v1929_v48  ;;  %v12761_v3 = vand.u32 3, %v1800_v52 }
 0x1ee   :  { %v1923_v50 = vor.u32 8388608, %v1922_v27  ;;  %v12771_v2 = vshrl.u32 %v1927_v46, 5  ;;  %v1932_v18 = vshll.u32 %v11217_v20, %v1929_v48  ;;  %v1935_v12 = vshll.u32 %v11218_v24, %v1929_v48 }
 0x1ef   :  { %v1790_v53 = vmul.f32 %v1789_v21, %v1787_v44  ;;  %v12765_v55 = vshrl.u32 %v1664_v15, 30  ;;  %v1933_v35 = vshrl.u32 %v11218_v24, %v1930_v14  ;;  %v1936_v56 = vshrl.u32 %v11219_v26, %v1930_v14 }
 0x1f0   :  { %v1942_v33 = vshrl.u32 %v11221_v30, %v1930_v14  ;;  %v1939_v10 = vshrl.u32 %v11220_v28, %v1930_v14  ;;  %v1941_v58 = vshll.u32 %v11220_v28, %v1929_v48  ;;  %v1945_v16 = vshrl.u32 %v11222_v37, %v1930_v14 }
 0x1f1   :  { %v1791_v4 = vxor.u32 2147483648, %v1790_v53  ;;  %v1666_v31 = vshll.u32 %v12765_v55, 30  ;;  %v1938_v9 = vshll.u32 %v11219_v26, %v1929_v48  ;;  %v1944_v63 = vshll.u32 %v11221_v30, %v1929_v48 }
 0x1f2   :  { %v1934_v43 = vor.u32 %v1933_v35, %v1932_v18  ;;  %v1937_v8 = vor.u32 %v1936_v56, %v1935_v12  ;;  %v1943_v39 = vor.u32 %v1942_v33, %v1941_v58  ;;  %v1814_v6 = vand.u32 2139095040, %v12759_v5 }
 0x1f3   :  { %v1792_v19 = vsel %vm1709_vm1, %v1791_v4, %v1790_v53  ;;  %v12783_v40 = vsub.s32 %v1663_v23, %v1666_v31  ;;  %v1940_v41 = vor.u32 %v1939_v10, %v1938_v9  ;;  %vm1605_vm1 = vcmp.lt.s32.totalorder %v12590_v38, 0 }
 0x1f4   :  { %v1795_v1 = vsel %vm12678_vm0, %v12453_v22, %v1792_v19  ;;  %v1946_v32 = vor.u32 %v1945_v16, %v1944_v63  ;;  %vm1947_vm0 = vcmp.lt.s32.totalorder %v12771_v2, 1  ;;  %vm1950_vm2 = vcmp.lt.s32.totalorder %v12771_v2, 4 }
 0x1f5   :  { %11040 = vcosq.f32 %v1795_v1  ;;  %v1669_v13 = vsub.s32 0, %v12783_v40  ;;  %v12793_v49 = vshll.u32 %v1923_v50, 8  ;;  %vm1806_vm3 = vcmp.eq.s32.totalorder %v12761_v3, 2 }
 0x1f6   :  { %11042 = vsinq.f32 %v1795_v1  ;;  %vm6832_vm4 = vcmp.eq.s32.totalorder %v12763_v25, 2  ;;  %v1931_v54 = vshrl.u32 %v11217_v20, %v1930_v14  ;;  %vm1949_vm5 = vcmp.lt.s32.totalorder %v12771_v2, 3 }
 0x1f7   :  { %v10453_v36 = vmin.u32 %v1669_v13, %v12783_v40  ;;  %v1955_v47 = vsel %vm1947_vm0, %v1934_v43, %v1937_v8  ;;  %v1956_v57 = vsel %vm1950_vm2, %v1943_v39, 920167782  ;;  %vm1803_vm6 = vcmp.eq.s32.totalorder %v12761_v3, 0 }
 0x1f8   :  { %vm6829_vm7 = vcmp.eq.s32.totalorder %v12763_v25, 0  ;;  %v1952_v51 = vsel %vm1950_vm2, %v1940_v41, 2102212464  ;;  %v1959_v42 = vsel %vm1947_vm0, %v1937_v8, %v1940_v41  ;;  %v1815_v34 = vshrl.u32 %v1814_v6, 23 }
 0x1f9   :  { %v1671_v7 = vclz %v10453_v36  ;;  %vm1802_vm8 = vcmp.lt.s32.totalorder %v12761_v3, 2  ;;  %vm6828_vm9 = vcmp.lt.s32.totalorder %v12763_v25, 2  ;;  %v1689_v17 = vsub.s32 4, %v12765_v55 }
 0x1fa   :  { %vm1948_vm10 = vcmp.lt.s32.totalorder %v12771_v2, 2  ;;  %v1957_v62 = vsel %vm1949_vm5, %v1940_v41, %v1956_v57  ;;  %v1960_v46 = vsel %vm1950_vm2, %v1946_v32, 1326507024  ;;  %vm1799_vm11 = vweird.f32 %v12453_v22 }
 0x1fb   :  { %v10454_v52 = vadd.s32 4294967294, %v1671_v7  ;;  %v1951_v23 = vsel %vm1947_vm0, %v1931_v54, %v1934_v43  ;;  %v1958_v27 = vsel %vm1948_vm10, %v1955_v47, %v1957_v62  ;;  %v1961_v48 = vsel %vm1949_vm5, %v1943_v39, %v1960_v46 }
 0x1fc   :  { %v1953_v11 = vsel %vm1949_vm5, %v1937_v8, %v1952_v51  ;;  %v1962_v44 = vsel %vm1948_vm10, %v1959_v42, %v1961_v48  ;;  %v12829_v21 = vmul.u32.u64.low %v12793_v49, %v1958_v27  ;;  %v12830_v15 = vmul.u32.u64.high %v12793_v49, %v1958_v27, %v12829_v21 }
 0x1fd   :  { %vm10455_vm12 = vcmp.lt.s32.totalorder %v10454_v52, 0  ;;  %v12834_v14 = vmul.u32.u64.low %v12793_v49, %v1962_v44  ;;  %v12835_v53 = vmul.u32.u64.high %v12793_v49, %v1962_v44, %v12834_v14  ;;  %v10460_v50 = vadd.s32 4294967169, %v1815_v34 }
 0x1fe   :  { %v1659_v35 = vadd.s32 %v12720_v45, %v12733_v61  ;;  %v1674_v56 = vsel %vm10455_vm12, 0, %v10454_v52  ;;  %v1690_v33 = vsel %vm1605_vm1, %v1689_v17, %v12765_v55  ;;  %v1811_v31 = vand.u32 2147483647, %v12759_v5  ;;  %v149_v17 = vpop.permute.xlu1 %148 }
 0x1ff   :  { %v11041_v4 = vpop.eup %11040  ;;  %v1675_v19 = vsub.s32 32, %v1674_v56  ;;  %v1679_v12 = vsub.s32 4294967266, %v1674_v56  ;;  %v1954_v58 = vsel %vm1948_vm10, %v1951_v23, %v1953_v11  ;;  %v1676_v1 = vshll.u32 %v12783_v40, %v1674_v56 }
 0x200   :  { %v11043_v18 = vpop.eup %11042  ;;  %v1807_v10 = vxor.u32 2147483648, %v11041_v4  ;;  %v1973_v9 = vadd.s32 1, %v12830_v15  ;;  %v1821_v45 = vadd.s32 1, %v10460_v50  ;;  %v1970_v39 = vmul.u32 %v12793_v49, %v1954_v58 }
 0x201   :  { %v1804_v16 = vxor.u32 2147483648, %v11043_v18  ;;  %v1677_v63 = vshrl.u32 %v1659_v35, %v1675_v19  ;;  %v1680_v43 = vadd.s32 127, %v1679_v12  ;;  %vm1972_vm13 = vc.u32 %v12835_v53, %v12829_v21 }
 0x202   :  { %v1808_v61 = vsel %vm1806_vm3, %v1807_v10, %v11043_v18  ;;  %v6834_v55 = vsel %vm6832_vm4, %v1807_v10, %v11043_v18  ;;  %v1974_v54 = vsel %vm1972_vm13, %v1973_v9, %v12830_v15  ;;  %vm1822_vm14 = vcmp.gt.s32.totalorder %v1821_v45, 0 }
 0x203   :  { %v1805_v8 = vsel %vm1803_vm6, %v11041_v4, %v1804_v16  ;;  %v6831_v2 = vsel %vm6829_vm7, %v11041_v4, %v1804_v16  ;;  %v1678_v41 = vor.u32 %v1677_v63, %v1676_v1  ;;  %v1681_v6 = vshll.u32 %v1680_v43, 23 }
 0x204   :  { %v1809_v40 = vsel %vm1802_vm8, %v1805_v8, %v1808_v61  ;;  %v6835_v13 = vsel %vm6828_vm9, %v6831_v2, %v6834_v55  ;;  %vm12869_vm15 = vcmp.le.f32.partialorder %v1603_v60, 0.7853982  ;;  %v1975_v49 = vadd.s32 %v1974_v54, %v1970_v39 }
 0x205   :  { %v1810_v32 = vsel %vm1799_vm11, nan, %v1809_v40  ;;  %v6836_v36 = vsel %vm1799_vm11, nan, %v6835_v13  ;;  %v1682_v25 = vor.u32 4788187, %v1681_v6  ;;  %v1823_v47 = vsel %vm1822_vm14, %v1821_v45, 0 }
 0x206   :  { %5360 = vst [vmem:[#allocation2 + $0xd0] sm:$0xff] %v1810_v32  ;;  %10352 = vst [vmem:[#allocation2 + $0xd8] sm:$0xff] %v6836_v36  ;;  %v1692_v57 = vsel %vm12869_vm15, 0, %v1690_v33  ;;  %v1818_v22 = vand.u32 8388607, %v1811_v31  ;;  %v1825_v7 = vand.u32 31, %v1823_v47  ;;  %v1685_v42 = vcvt.s32.f32 %v1678_v41 }
 0x207   :  { %v1683_v51 = vand.u32 2147483647, %v1682_v25  ;;  %v1976_v34 = vadd.s32 536870912, %v1975_v49  ;;  %v1696_v60 = vadd.s32 3, %v1692_v57  ;;  %v12877_v23 = vand.u32 3, %v1692_v57 }
 0x208   :  { %v1826_v62 = vsub.s32 32, %v1825_v7  ;;  %v1819_v27 = vor.u32 8388608, %v1818_v22  ;;  %v12881_v11 = vmul.f32 %v12450_v59, %v149_v17  ;;  %v1824_v4 = vshrl.u32 %v1823_v47, 5 }
 0x209   :  { %v1686_v46 = vmul.f32 %v1685_v42, %v1683_v51  ;;  %v1977_v52 = vshrl.u32 %v1976_v34, 30  ;;  %v1834_v35 = vshll.u32 %v11219_v26, %v1825_v7  ;;  %vm1917_vm0 = vcmp.lt.s32.totalorder %v12651_v0, 0 }
 0x20a   :  { %v1835_v48 = vshrl.u32 %v11220_v28, %v1826_v62  ;;  %v1829_v14 = vshrl.u32 %v11218_v24, %v1826_v62  ;;  %v1832_v50 = vshrl.u32 %v11219_v26, %v1826_v62  ;;  %v1838_v56 = vshrl.u32 %v11221_v30, %v1826_v62 }
 0x20b   :  { %v1687_v44 = vxor.u32 2147483648, %v1686_v46  ;;  %v1978_v15 = vshll.u32 %v1977_v52, 30  ;;  %v1841_v33 = vshrl.u32 %v11222_v37, %v1826_v62  ;;  %v1828_v10 = vshll.u32 %v11217_v20, %v1825_v7 }
 0x20c   :  { %v1831_v19 = vshll.u32 %v11218_v24, %v1825_v7  ;;  %v1836_v58 = vor.u32 %v1835_v48, %v1834_v35  ;;  %v1837_v16 = vshll.u32 %v11220_v28, %v1825_v7  ;;  %v1840_v1 = vshll.u32 %v11221_v30, %v1825_v7 }
 0x20d   :  { %v1688_v18 = vsel %vm1605_vm1, %v1687_v44, %v1686_v46  ;;  %v12891_v59 = vsub.s32 %v1975_v49, %v1978_v15  ;;  %v1830_v45 = vor.u32 %v1829_v14, %v1828_v10  ;;  %v12901_v55 = vand.u32 3, %v1696_v60 }
 0x20e   :  { %v1691_v12 = vsel %vm12869_vm15, %v12590_v38, %v1688_v18  ;;  %v1833_v61 = vor.u32 %v1832_v50, %v1831_v19  ;;  %v1839_v63 = vor.u32 %v1838_v56, %v1837_v16  ;;  %v1842_v43 = vor.u32 %v1841_v33, %v1840_v1 }
 0x20f   :  { %11044 = vcosq.f32 %v1691_v12  ;;  %v1981_v9 = vsub.s32 0, %v12891_v59  ;;  %vm12905_vm1 = vcmp.le.f32.partialorder %v1915_v29, 0.7853982  ;;  %v1827_v39 = vshrl.u32 %v11217_v20, %v1826_v62 }
 0x210   :  { %11046 = vsinq.f32 %v1691_v12  ;;  %vm1846_vm2 = vcmp.lt.s32.totalorder %v1824_v4, 4  ;;  %v12911_v40 = vshll.u32 %v1819_v27, 8  ;;  %v2001_v13 = vsub.s32 4, %v1977_v52 }
 0x211   :  { %v10465_v2 = vmin.u32 %v1981_v9, %v12891_v59  ;;  %vm1843_vm3 = vcmp.lt.s32.totalorder %v1824_v4, 1  ;;  %v1848_v41 = vsel %vm1846_vm2, %v1836_v58, 2102212464  ;;  %v2126_v6 = vand.u32 2139095040, %v12881_v11 }
 0x212   :  { %vm6729_vm4 = vcmp.eq.s32.totalorder %v12877_v23, 2  ;;  %vm1845_vm5 = vcmp.lt.s32.totalorder %v1824_v4, 3  ;;  %v1847_v29 = vsel %vm1843_vm3, %v1827_v39, %v1830_v45  ;;  %v1851_v36 = vsel %vm1843_vm3, %v1830_v45, %v1833_v61 }
 0x213   :  { %v1983_v32 = vclz %v10465_v2  ;;  %vm1699_vm6 = vcmp.eq.s32.totalorder %v12901_v55, 0  ;;  %vm6726_vm7 = vcmp.eq.s32.totalorder %v12877_v23, 0  ;;  %v1849_v54 = vsel %vm1845_vm5, %v1833_v61, %v1848_v41  ;;  %v144_v41 = vpop.permute.xlu0 %143 }
 0x214   :  { %v1852_v3 = vsel %vm1846_vm2, %v1839_v63, 920167782  ;;  %v1855_v25 = vsel %vm1843_vm3, %v1833_v61, %v1836_v58  ;;  %v1856_v49 = vsel %vm1846_vm2, %v1842_v43, 1326507024  ;;  %vm1698_vm8 = vcmp.lt.s32.totalorder %v12901_v55, 2 }
 0x215   :  { %vm6725_vm9 = vcmp.lt.s32.totalorder %v12877_v23, 2  ;;  %v10466_v47 = vadd.s32 4294967294, %v1983_v32  ;;  %vm1844_vm10 = vcmp.lt.s32.totalorder %v1824_v4, 2  ;;  %v1853_v57 = vsel %vm1845_vm5, %v1836_v58, %v1852_v3 }
 0x216   :  { %v1857_v22 = vsel %vm1845_vm5, %v1839_v63, %v1856_v49  ;;  %vm1695_vm11 = vweird.f32 %v12590_v38  ;;  %v2002_v7 = vsel %vm1917_vm0, %v2001_v13, %v1977_v52  ;;  %v1850_v51 = vsel %vm1844_vm10, %v1847_v29, %v1849_v54  ;;  %v12967_v38 = vld [vmem:[%s16164_s1] ss:$0 sm:$0xff] }
 0x217   :  { %v1854_v42 = vsel %vm1844_vm10, %v1851_v36, %v1853_v57  ;;  %v1858_v34 = vsel %vm1844_vm10, %v1855_v25, %v1857_v22  ;;  %vm10467_vm12 = vcmp.lt.s32.totalorder %v10466_v47, 0  ;;  %v2127_v46 = vshrl.u32 %v2126_v6, 23 }
 0x218   :  { %v12926_v17 = vmul.u32.u64.low %v12911_v40, %v1858_v34  ;;  %v12927_v62 = vmul.u32.u64.high %v12911_v40, %v1858_v34, %v12926_v17  ;;  %vm1702_vm13 = vcmp.eq.s32.totalorder %v12901_v55, 2  ;;  %v1986_v60 = vsel %vm10467_vm12, 0, %v10466_v47 }
 0x219   :  { %v12931_v27 = vmul.u32.u64.low %v12911_v40, %v1854_v42  ;;  %v12932_v48 = vmul.u32.u64.high %v12911_v40, %v1854_v42, %v12931_v27  ;;  %v11045_v44 = vpop.eup %11044  ;;  %v1971_v52 = vadd.s32 %v12829_v21, %v12835_v53  ;;  %v1987_v15 = vsub.s32 32, %v1986_v60 }
 0x21a   :  { %v1991_v14 = vsub.s32 4294967266, %v1986_v60  ;;  %v2123_v50 = vand.u32 2147483647, %v12881_v11  ;;  %v11047_v4 = vpop.eup %11046  ;;  %v1703_v35 = vxor.u32 2147483648, %v11045_v44  ;;  %v2004_v56 = vsel %vm12905_vm1, 0, %v2002_v7 }
 0x21b   :  { %v1866_v33 = vmul.u32 %v12911_v40, %v1850_v51  ;;  %v10472_v18 = vadd.s32 4294967169, %v2127_v46  ;;  %v1700_v10 = vxor.u32 2147483648, %v11047_v4  ;;  %v1988_v19 = vshll.u32 %v12891_v59, %v1986_v60 }
 0x21c   :  { %v1989_v12 = vshrl.u32 %v1971_v52, %v1987_v15  ;;  %v1992_v58 = vadd.s32 127, %v1991_v14  ;;  %v1704_v21 = vsel %vm1702_vm13, %v1703_v35, %v11047_v4  ;;  %v6731_v53 = vsel %vm6729_vm4, %v1703_v35, %v11047_v4 }
 0x21d   :  { %vm1868_vm14 = vc.u32 %v12927_v62, %v12931_v27  ;;  %v1869_v16 = vadd.s32 1, %v12932_v48  ;;  %v1701_v1 = vsel %vm1699_vm6, %v11045_v44, %v1700_v10  ;;  %v6728_v9 = vsel %vm6726_vm7, %v11045_v44, %v1700_v10 }
 0x21e   :  { %v1990_v59 = vor.u32 %v1989_v12, %v1988_v19  ;;  %v1993_v45 = vshll.u32 %v1992_v58, 23  ;;  %v1705_v61 = vsel %vm1698_vm8, %v1701_v1, %v1704_v21  ;;  %v6732_v63 = vsel %vm6725_vm9, %v6728_v9, %v6731_v53 }
 0x21f   :  { %v1870_v43 = vsel %vm1868_vm14, %v1869_v16, %v12932_v48  ;;  %v2133_v2 = vadd.s32 1, %v10472_v18  ;;  %v1706_v39 = vsel %vm1695_vm11, nan, %v1705_v61  ;;  %v6733_v40 = vsel %vm1695_vm11, nan, %v6732_v63 }
 0x220   :  { %v1994_v13 = vor.u32 4788187, %v1993_v45  ;;  %5359 = vst [vmem:[#allocation2 + $0xc0] sm:$0xff] %v1706_v39  ;;  %10351 = vst [vmem:[#allocation2 + $0xc8] sm:$0xff] %v6733_v40  ;;  %v2008_v6 = vadd.s32 3, %v2004_v56  ;;  %v1871_v32 = vadd.s32 %v1870_v43, %v1866_v33  ;;  %v1997_v29 = vcvt.s32.f32 %v1990_v59 }
 0x221   :  { %vm2134_vm15 = vcmp.gt.s32.totalorder %v2133_v2, 0  ;;  %v2130_v23 = vand.u32 8388607, %v2123_v50  ;;  %v12970_v25 = vmul.f32 %v12967_v38, %v144_v41  ;;  %vm1813_vm2 = vcmp.lt.s32.totalorder %v12759_v5, 0 }
 0x222   :  { %v1995_v55 = vand.u32 2147483647, %v1994_v13  ;;  %v2135_v36 = vsel %vm2134_vm15, %v2133_v2, 0  ;;  %v1872_v54 = vadd.s32 536870912, %v1871_v32  ;;  %v12973_v7 = vand.u32 3, %v2008_v6 }
 0x223   :  { %v2137_v3 = vand.u32 31, %v2135_v36  ;;  %v12975_v51 = vand.u32 3, %v2004_v56  ;;  %v2131_v42 = vor.u32 8388608, %v2130_v23  ;;  %v12977_v17 = vshrl.u32 %v2135_v36, 5 }
 0x224   :  { %v1998_v49 = vmul.f32 %v1997_v29, %v1995_v55  ;;  %v1873_v47 = vshrl.u32 %v1872_v54, 30  ;;  %v2022_v60 = vand.u32 2139095040, %v12970_v25  ;;  %v1867_v9 = vadd.s32 %v12931_v27, %v12927_v62 }
 0x225   :  { %v2138_v57 = vsub.s32 32, %v2137_v3  ;;  %v2140_v35 = vshll.u32 %v11217_v20, %v2137_v3  ;;  %v2143_v56 = vshll.u32 %v11218_v24, %v2137_v3  ;;  %v2146_v18 = vshll.u32 %v11219_v26, %v2137_v3 }
 0x226   :  { %v1999_v22 = vxor.u32 2147483648, %v1998_v49  ;;  %v1874_v34 = vshll.u32 %v1873_v47, 30  ;;  %v1897_v33 = vsub.s32 4, %v1873_v47  ;;  %v2149_v10 = vshll.u32 %v11220_v28, %v2137_v3 }
 0x227   :  { %v2141_v46 = vshrl.u32 %v11218_v24, %v2138_v57  ;;  %v2144_v44 = vshrl.u32 %v11219_v26, %v2138_v57  ;;  %v2147_v52 = vshrl.u32 %v11220_v28, %v2138_v57  ;;  %v2150_v15 = vshrl.u32 %v11221_v30, %v2138_v57 }
 0x228   :  { %v2000_v48 = vsel %vm1917_vm0, %v1999_v22, %v1998_v49  ;;  %v12989_v4 = vsub.s32 %v1871_v32, %v1874_v34  ;;  %vm12997_vm0 = vcmp.le.f32.partialorder %v1811_v31, 0.7853982  ;;  %v2152_v58 = vshll.u32 %v11221_v30, %v2137_v3 }
 0x229   :  { %v2003_v14 = vsel %vm12905_vm1, %v12651_v0, %v2000_v48  ;;  %v2142_v12 = vor.u32 %v2141_v46, %v2140_v35  ;;  %v2145_v21 = vor.u32 %v2144_v44, %v2143_v56  ;;  %v2148_v53 = vor.u32 %v2147_v52, %v2146_v18 }
 0x22a   :  { %11048 = vcosq.f32 %v2003_v14  ;;  %v1877_v8 = vsub.s32 0, %v12989_v4  ;;  %v2151_v16 = vor.u32 %v2150_v15, %v2149_v10  ;;  %v2153_v1 = vshrl.u32 %v11222_v37, %v2138_v57 }
 0x22b   :  { %11050 = vsinq.f32 %v2003_v14  ;;  %v13007_v45 = vshll.u32 %v2131_v42, 8  ;;  %v2023_v31 = vshrl.u32 %v2022_v60, 23  ;;  %vm2014_vm1 = vcmp.eq.s32.totalorder %v12973_v7, 2 }
 0x22c   :  { %v10461_v59 = vmin.u32 %v1877_v8, %v12989_v4  ;;  %vm7038_vm3 = vcmp.eq.s32.totalorder %v12975_v51, 2  ;;  %v1898_v61 = vsel %vm1813_vm2, %v1897_v33, %v1873_v47  ;;  %v2139_v63 = vshrl.u32 %v11217_v20, %v2138_v57 }
 0x22d   :  { %v2154_v43 = vor.u32 %v2153_v1, %v2152_v58  ;;  %vm2155_vm4 = vcmp.lt.s32.totalorder %v12977_v17, 1  ;;  %vm2011_vm5 = vcmp.eq.s32.totalorder %v12973_v7, 0  ;;  %vm7035_vm6 = vcmp.eq.s32.totalorder %v12975_v51, 0 }
 0x22e   :  { %v1879_v62 = vclz %v10461_v59  ;;  %vm2156_vm7 = vcmp.lt.s32.totalorder %v12977_v17, 2  ;;  %vm2157_vm8 = vcmp.lt.s32.totalorder %v12977_v17, 3  ;;  %vm2158_vm9 = vcmp.lt.s32.totalorder %v12977_v17, 4 }
 0x22f   :  { %vm2010_vm10 = vcmp.lt.s32.totalorder %v12973_v7, 2  ;;  %vm7034_vm11 = vcmp.lt.s32.totalorder %v12975_v51, 2  ;;  %v2159_v27 = vsel %vm2155_vm4, %v2139_v63, %v2142_v12  ;;  %v2160_v2 = vsel %vm2158_vm9, %v2148_v53, 2102212464 }
 0x230   :  { %v2163_v39 = vsel %vm2155_vm4, %v2142_v12, %v2145_v21  ;;  %v2164_v40 = vsel %vm2158_vm9, %v2151_v16, 920167782  ;;  %vm2007_vm12 = vweird.f32 %v12651_v0  ;;  %v10462_v13 = vadd.s32 4294967294, %v1879_v62 }
 0x231   :  { %v2161_v41 = vsel %vm2157_vm8, %v2145_v21, %v2160_v2  ;;  %v2165_v6 = vsel %vm2157_vm8, %v2148_v53, %v2164_v40  ;;  %v2167_v32 = vsel %vm2155_vm4, %v2145_v21, %v2148_v53  ;;  %v2168_v29 = vsel %vm2158_vm9, %v2154_v43, 1326507024 }
 0x232   :  { %v2166_v55 = vsel %vm2156_vm7, %v2163_v39, %v2165_v6  ;;  %v2019_v23 = vand.u32 2147483647, %v12970_v25  ;;  %v10468_v36 = vadd.s32 4294967169, %v2023_v31  ;;  %vm10463_vm13 = vcmp.lt.s32.totalorder %v10462_v13, 0 }
 0x233   :  { %v2169_v54 = vsel %vm2157_vm8, %v2151_v16, %v2168_v29  ;;  %v13039_v3 = vmul.u32.u64.low %v13007_v45, %v2166_v55  ;;  %v13040_v49 = vmul.u32.u64.high %v13007_v45, %v2166_v55, %v13039_v3  ;;  %v1882_v57 = vsel %vm10463_vm13, 0, %v10462_v13 }
 0x234   :  { %v11049_v47 = vpop.eup %11048  ;;  %v1900_v22 = vsel %vm12997_vm0, 0, %v1898_v61  ;;  %v2162_v42 = vsel %vm2156_vm7, %v2159_v27, %v2161_v41  ;;  %v2170_v34 = vsel %vm2156_vm7, %v2167_v32, %v2169_v54  ;;  %v1883_v48 = vsub.s32 32, %v1882_v57 }
 0x235   :  { %v11051_v46 = vpop.eup %11050  ;;  %v2015_v60 = vxor.u32 2147483648, %v11049_v47  ;;  %v1884_v44 = vshll.u32 %v12989_v4, %v1882_v57  ;;  %v1887_v52 = vsub.s32 4294967266, %v1882_v57  ;;  %v2029_v56 = vadd.s32 1, %v10468_v36 }
 0x236   :  { %v2012_v15 = vxor.u32 2147483648, %v11051_v46  ;;  %v13051_v14 = vmul.u32.u64.low %v13007_v45, %v2170_v34  ;;  %v13052_v35 = vmul.u32.u64.high %v13007_v45, %v2170_v34, %v13051_v14  ;;  %v1885_v17 = vshrl.u32 %v1867_v9, %v1883_v48 }
 0x237   :  { %v2016_v33 = vsel %vm2014_vm1, %v2015_v60, %v11051_v46  ;;  %v7040_v18 = vsel %vm7038_vm3, %v2015_v60, %v11051_v46  ;;  %v1888_v10 = vadd.s32 127, %v1887_v52  ;;  %v2181_v12 = vadd.s32 1, %v13040_v49 }
 0x238   :  { %v2013_v8 = vsel %vm2011_vm5, %v11049_v47, %v2012_v15  ;;  %v7037_v4 = vsel %vm7035_vm6, %v11049_v47, %v2012_v15  ;;  %vm2030_vm14 = vcmp.gt.s32.totalorder %v2029_v56, 0  ;;  %v1886_v53 = vor.u32 %v1885_v17, %v1884_v44  ;;  %v159_v17 = vpop.permute.xlu1 %158 }
 0x239   :  { %v2017_v58 = vsel %vm2010_vm10, %v2013_v8, %v2016_v33  ;;  %v7041_v21 = vsel %vm7034_vm11, %v7037_v4, %v7040_v18  ;;  %v1889_v16 = vshll.u32 %v1888_v10, 23  ;;  %v2178_v59 = vmul.u32 %v13007_v45, %v2162_v42 }
 0x23a   :  { %v2018_v1 = vsel %vm2007_vm12, nan, %v2017_v58  ;;  %v7042_v9 = vsel %vm2007_vm12, nan, %v7041_v21  ;;  %vm2180_vm15 = vc.u32 %v13052_v35, %v13039_v3  ;;  %v2031_v51 = vsel %vm2030_vm14, %v2029_v56, 0 }
 0x23b   :  { %5362 = vst [vmem:[#allocation2 + $0xf0] sm:$0xff] %v2018_v1  ;;  %10354 = vst [vmem:[#allocation2 + $0xf8] sm:$0xff] %v7042_v9  ;;  %v1890_v7 = vor.u32 4788187, %v1889_v16  ;;  %v2182_v31 = vsel %vm2180_vm15, %v2181_v12, %v13040_v49  ;;  %v1904_v61 = vadd.s32 3, %v1900_v22  ;;  %v2033_v62 = vand.u32 31, %v2031_v51 }
 0x23c   :  { %v2183_v63 = vadd.s32 %v2182_v31, %v2178_v59  ;;  %v2026_v43 = vand.u32 8388607, %v2019_v23  ;;  %v1893_v0 = vcvt.s32.f32 %v1886_v53  ;;  %v13079_v13 = vand.u32 3, %v1900_v22 }
 0x23d   :  { %v1891_v27 = vand.u32 2147483647, %v1890_v7  ;;  %v2034_v39 = vsub.s32 32, %v2033_v62  ;;  %v13077_v40 = vand.u32 3, %v1904_v61  ;;  %v13087_v49 = vshrl.u32 %v2031_v51, 5 }
 0x23e   :  { %v2184_v2 = vadd.s32 536870912, %v2183_v63  ;;  %v2027_v6 = vor.u32 8388608, %v2026_v43  ;;  %v2036_v47 = vshll.u32 %v11217_v20, %v2033_v62  ;;  %v2039_v42 = vshll.u32 %v11218_v24, %v2033_v62 }
 0x23f   :  { %v1894_v45 = vmul.f32 %v1893_v0, %v1891_v27  ;;  %v2037_v55 = vshrl.u32 %v11218_v24, %v2034_v39  ;;  %v2040_v29 = vshrl.u32 %v11219_v26, %v2034_v39  ;;  %v2046_v36 = vshrl.u32 %v11221_v30, %v2034_v39 }
 0x240   :  { %v13081_v41 = vshrl.u32 %v2184_v2, 30  ;;  %v2043_v57 = vshrl.u32 %v11220_v28, %v2034_v39  ;;  %v2045_v34 = vshll.u32 %v11220_v28, %v2033_v62  ;;  %v2049_v46 = vshrl.u32 %v11222_v37, %v2034_v39 }
 0x241   :  { %v1895_v32 = vxor.u32 2147483648, %v1894_v45  ;;  %v2042_v44 = vshll.u32 %v11219_v26, %v2033_v62  ;;  %v2048_v52 = vshll.u32 %v11221_v30, %v2033_v62  ;;  %v2038_v15 = vor.u32 %v2037_v55, %v2036_v47 }
 0x242   :  { %v2186_v54 = vshll.u32 %v13081_v41, 30  ;;  %v2041_v14 = vor.u32 %v2040_v29, %v2039_v42  ;;  %v2047_v56 = vor.u32 %v2046_v36, %v2045_v34  ;;  %vm2054_vm1 = vcmp.lt.s32.totalorder %v13087_v49, 4 }
 0x243   :  { %v1896_v22 = vsel %vm1813_vm2, %v1895_v32, %v1894_v45  ;;  %v2044_v18 = vor.u32 %v2043_v57, %v2042_v44  ;;  %vm2125_vm2 = vcmp.lt.s32.totalorder %v12881_v11, 0  ;;  %v2050_v10 = vor.u32 %v2049_v46, %v2048_v52 }
 0x244   :  { %v1899_v60 = vsel %vm12997_vm0, %v12759_v5, %v1896_v22  ;;  %v13099_v48 = vsub.s32 %v2183_v63, %v2186_v54  ;;  %vm2051_vm0 = vcmp.lt.s32.totalorder %v13087_v49, 1  ;;  %v13108_v8 = vshll.u32 %v2027_v6, 8 }
 0x245   :  { %11052 = vcosq.f32 %v1899_v60  ;;  %vm1910_vm3 = vcmp.eq.s32.totalorder %v13077_v40, 2  ;;  %vm6935_vm4 = vcmp.eq.s32.totalorder %v13079_v13, 2  ;;  %v2035_v4 = vshrl.u32 %v11217_v20, %v2034_v39 }
 0x246   :  { %11054 = vsinq.f32 %v1899_v60  ;;  %v2189_v33 = vsub.s32 0, %v13099_v48  ;;  %v2059_v12 = vsel %vm2051_vm0, %v2038_v15, %v2041_v14  ;;  %v2060_v58 = vsel %vm2054_vm1, %v2047_v56, 920167782 }
 0x247   :  { %v13118_v21 = vmul.f32 %v12967_v38, %v159_v17  ;;  %vm1907_vm5 = vcmp.eq.s32.totalorder %v13077_v40, 0  ;;  %vm6932_vm6 = vcmp.eq.s32.totalorder %v13079_v13, 0  ;;  %vm2053_vm7 = vcmp.lt.s32.totalorder %v13087_v49, 3 }
 0x248   :  { %v10473_v19 = vmin.u32 %v2189_v33, %v13099_v48  ;;  %v2056_v16 = vsel %vm2054_vm1, %v2044_v18, 2102212464  ;;  %v2063_v1 = vsel %vm2051_vm0, %v2041_v14, %v2044_v18  ;;  %vm1906_vm8 = vcmp.lt.s32.totalorder %v13077_v40, 2 }
 0x249   :  { %vm6931_vm9 = vcmp.lt.s32.totalorder %v13079_v13, 2  ;;  %v2209_v9 = vsub.s32 4, %v13081_v41  ;;  %vm2052_vm10 = vcmp.lt.s32.totalorder %v13087_v49, 2  ;;  %v2061_v59 = vsel %vm2053_vm7, %v2044_v18, %v2060_v58 }
 0x24a   :  { %v2191_v53 = vclz %v10473_v19  ;;  %v2064_v7 = vsel %vm2054_vm1, %v2050_v10, 1326507024  ;;  %vm1903_vm11 = vweird.f32 %v12759_v5  ;;  %v2055_v51 = vsel %vm2051_vm0, %v2035_v4, %v2038_v15 }
 0x24b   :  { %v2062_v61 = vsel %vm2052_vm10, %v2059_v12, %v2061_v59  ;;  %v2065_v63 = vsel %vm2053_vm7, %v2047_v56, %v2064_v7  ;;  %vm13140_vm12 = vcmp.le.f32.partialorder %v2123_v50, 0.7853982  ;;  %v2057_v62 = vsel %vm2053_vm7, %v2041_v14, %v2056_v16 }
 0x24c   :  { %v10474_v31 = vadd.s32 4294967294, %v2191_v53  ;;  %v2066_v27 = vsel %vm2052_vm10, %v2063_v1, %v2065_v63  ;;  %v13147_v0 = vmul.u32.u64.low %v13108_v8, %v2062_v61  ;;  %v13148_v2 = vmul.u32.u64.high %v13108_v8, %v2062_v61, %v13147_v0 }
 0x24d   :  { %v2179_v39 = vadd.s32 %v13039_v3, %v13052_v35  ;;  %v13154_v45 = vmul.u32.u64.low %v13108_v8, %v2066_v27  ;;  %v13155_v6 = vmul.u32.u64.high %v13108_v8, %v2066_v27, %v13154_v45  ;;  %v2210_v55 = vsel %vm2125_vm2, %v2209_v9, %v13081_v41 }
 0x24e   :  { %vm10475_vm13 = vcmp.lt.s32.totalorder %v10474_v31, 0  ;;  %v2331_v29 = vand.u32 2147483647, %v13118_v21  ;;  %v2334_v36 = vand.u32 2139095040, %v13118_v21  ;;  %v2058_v3 = vsel %vm2052_vm10, %v2055_v51, %v2057_v62 }
 0x24f   :  { %v11053_v50 = vpop.eup %11052  ;;  %v2194_v32 = vsel %vm10475_vm13, 0, %v10474_v31  ;;  %v2077_v34 = vadd.s32 1, %v13148_v2  ;;  %v2074_v14 = vmul.u32 %v13108_v8, %v2058_v3  ;;  %vm2076_vm14 = vc.u32 %v13155_v6, %v13147_v0 }
 0x250   :  { %v11055_v54 = vpop.eup %11054  ;;  %v1911_v47 = vxor.u32 2147483648, %v11053_v50  ;;  %v2195_v57 = vsub.s32 32, %v2194_v32  ;;  %v2199_v22 = vsub.s32 4294967266, %v2194_v32  ;;  %v2196_v42 = vshll.u32 %v13099_v48, %v2194_v32  ;;  %v154_v48 = vpop.permute.xlu0 %153 }
 0x251   :  { %v1908_v35 = vxor.u32 2147483648, %v11055_v54  ;;  %v2335_v46 = vshrl.u32 %v2334_v36, 23  ;;  %v2078_v8 = vsel %vm2076_vm14, %v2077_v34, %v13148_v2  ;;  %v2212_v40 = vsel %vm13140_vm12, 0, %v2210_v55 }
 0x252   :  { %v1912_v41 = vsel %vm1910_vm3, %v1911_v47, %v11055_v54  ;;  %v6937_v60 = vsel %vm6935_vm4, %v1911_v47, %v11055_v54  ;;  %v2197_v44 = vshrl.u32 %v2179_v39, %v2195_v57  ;;  %v2200_v52 = vadd.s32 127, %v2199_v22 }
 0x253   :  { %v1909_v15 = vsel %vm1907_vm5, %v11053_v50, %v1908_v35  ;;  %v6934_v49 = vsel %vm6932_vm6, %v11053_v50, %v1908_v35  ;;  %v10480_v4 = vadd.s32 4294967169, %v2335_v46  ;;  %v2079_v58 = vadd.s32 %v2078_v8, %v2074_v14 }
 0x254   :  { %v1913_v56 = vsel %vm1906_vm8, %v1909_v15, %v1912_v41  ;;  %v6938_v33 = vsel %vm6931_vm9, %v6934_v49, %v6937_v60  ;;  %v2198_v18 = vor.u32 %v2197_v44, %v2196_v42  ;;  %v2201_v17 = vshll.u32 %v2200_v52, 23 }
 0x255   :  { %v1914_v10 = vsel %vm1903_vm11, nan, %v1913_v56  ;;  %v6939_v19 = vsel %vm1903_vm11, nan, %v6938_v33  ;;  %v13189_v13 = vmul.f32 %v12967_v38, %v154_v48  ;;  %v2341_v53 = vadd.s32 1, %v10480_v4 }
 0x256   :  { %5361 = vst [vmem:[#allocation2 + $0xe0] sm:$0xff] %v1914_v10  ;;  %10353 = vst [vmem:[#allocation2 + $0xe8] sm:$0xff] %v6939_v19  ;;  %v2202_v12 = vor.u32 4788187, %v2201_v17  ;;  %v2205_v1 = vcvt.s32.f32 %v2198_v18  ;;  %v2080_v9 = vadd.s32 536870912, %v2079_v58  ;;  %v2216_v59 = vadd.s32 3, %v2212_v40 }
 0x257   :  { %v2338_v5 = vand.u32 8388607, %v2331_v29  ;;  %vm2342_vm15 = vcmp.gt.s32.totalorder %v2341_v53, 0  ;;  %v2230_v61 = vand.u32 2139095040, %v13189_v13  ;;  %v13196_v39 = vand.u32 3, %v2212_v40 }
 0x258   :  { %v2203_v16 = vand.u32 2147483647, %v2202_v12  ;;  %v2081_v31 = vshrl.u32 %v2080_v9, 30  ;;  %v2343_v51 = vsel %vm2342_vm15, %v2341_v53, 0  ;;  %v13194_v2 = vand.u32 3, %v2216_v59 }
 0x259   :  { %v2345_v63 = vand.u32 31, %v2343_v51  ;;  %vm2021_vm0 = vcmp.lt.s32.totalorder %v12970_v25, 0  ;;  %v2339_v55 = vor.u32 8388608, %v2338_v5  ;;  %v2231_v36 = vshrl.u32 %v2230_v61, 23 }
 0x25a   :  { %v2206_v7 = vmul.f32 %v2205_v1, %v2203_v16  ;;  %v2082_v27 = vshll.u32 %v2081_v31, 30  ;;  %v2105_v47 = vsub.s32 4, %v2081_v31  ;;  %v13206_v57 = vshrl.u32 %v2343_v51, 5 }
 0x25b   :  { %v2346_v45 = vsub.s32 32, %v2345_v63  ;;  %v2348_v35 = vshll.u32 %v11217_v20, %v2345_v63  ;;  %v2351_v42 = vshll.u32 %v11218_v24, %v2345_v63  ;;  %v2354_v46 = vshll.u32 %v11219_v26, %v2345_v63 }
 0x25c   :  { %v2207_v62 = vxor.u32 2147483648, %v2206_v7  ;;  %v13201_v32 = vsub.s32 %v2079_v58, %v2082_v27  ;;  %v2075_v41 = vadd.s32 %v13147_v0, %v13155_v6  ;;  %v2357_v44 = vshll.u32 %v11220_v28, %v2345_v63 }
 0x25d   :  { %v2349_v22 = vshrl.u32 %v11218_v24, %v2346_v45  ;;  %v2352_v34 = vshrl.u32 %v11219_v26, %v2346_v45  ;;  %v2355_v43 = vshrl.u32 %v11220_v28, %v2346_v45  ;;  %v13219_v52 = vshll.u32 %v2339_v55, 8 }
 0x25e   :  { %v2208_v50 = vsel %vm2125_vm2, %v2207_v62, %v2206_v7  ;;  %v2085_v3 = vsub.s32 0, %v13201_v32  ;;  %v2358_v48 = vshrl.u32 %v11221_v30, %v2346_v45  ;;  %vm2222_vm2 = vcmp.eq.s32.totalorder %v13194_v2, 2 }
 0x25f   :  { %v2211_v54 = vsel %vm13140_vm12, %v12881_v11, %v2208_v50  ;;  %v2350_v15 = vor.u32 %v2349_v22, %v2348_v35  ;;  %v2353_v49 = vor.u32 %v2352_v34, %v2351_v42  ;;  %v2356_v14 = vor.u32 %v2355_v43, %v2354_v46  ;;  %v169_v34 = vpop.permute.xlu1 %168 }
 0x260   :  { %11056 = vcosq.f32 %v2211_v54  ;;  %v10469_v60 = vmin.u32 %v2085_v3, %v13201_v32  ;;  %vm7244_vm1 = vcmp.eq.s32.totalorder %v13196_v39, 2  ;;  %v2106_v33 = vsel %vm2021_vm0, %v2105_v47, %v2081_v31 }
 0x261   :  { %11058 = vsinq.f32 %v2211_v54  ;;  %v2347_v0 = vshrl.u32 %v11217_v20, %v2346_v45  ;;  %v13227_v6 = vadd.s32 4294967169, %v2231_v36  ;;  %vm2219_vm3 = vcmp.eq.s32.totalorder %v13194_v2, 0 }
 0x262   :  { %v2087_v56 = vclz %v10469_v60  ;;  %vm7241_vm4 = vcmp.eq.s32.totalorder %v13196_v39, 0  ;;  %v2359_v18 = vor.u32 %v2358_v48, %v2357_v44  ;;  %v2360_v17 = vshll.u32 %v11221_v30, %v2345_v63 }
 0x263   :  { %v2361_v10 = vshrl.u32 %v11222_v37, %v2346_v45  ;;  %vm2363_vm5 = vcmp.lt.s32.totalorder %v13206_v57, 1  ;;  %vm2218_vm6 = vcmp.lt.s32.totalorder %v13194_v2, 2  ;;  %vm7240_vm7 = vcmp.lt.s32.totalorder %v13196_v39, 2 }
 0x264   :  { %v10470_v19 = vadd.s32 4294967294, %v2087_v56  ;;  %vm2364_vm8 = vcmp.lt.s32.totalorder %v13206_v57, 2  ;;  %vm2365_vm9 = vcmp.lt.s32.totalorder %v13206_v57, 3  ;;  %vm2366_vm10 = vcmp.lt.s32.totalorder %v13206_v57, 4 }
 0x265   :  { %vm2215_vm11 = vweird.f32 %v12881_v11  ;;  %v2362_v8 = vor.u32 %v2361_v10, %v2360_v17  ;;  %v2367_v4 = vsel %vm2363_vm5, %v2347_v0, %v2350_v15  ;;  %v2368_v12 = vsel %vm2366_vm10, %v2356_v14, 2102212464 }
 0x266   :  { %v2371_v40 = vsel %vm2363_vm5, %v2350_v15, %v2353_v49  ;;  %vm13246_vm12 = vcmp.le.f32.partialorder %v2019_v23, 0.7853982  ;;  %vm10471_vm13 = vcmp.lt.s32.totalorder %v10470_v19, 0  ;;  %v2369_v53 = vsel %vm2365_vm9, %v2353_v49, %v2368_v12 }
 0x267   :  { %v2372_v16 = vsel %vm2366_vm10, %v2359_v18, 920167782  ;;  %v2375_v1 = vsel %vm2363_vm5, %v2353_v49, %v2356_v14  ;;  %v2090_v9 = vsel %vm10471_vm13, 0, %v10470_v19  ;;  %v2370_v59 = vsel %vm2364_vm8, %v2367_v4, %v2369_v53 }
 0x268   :  { %v2373_v5 = vsel %vm2365_vm9, %v2356_v14, %v2372_v16  ;;  %v2376_v7 = vsel %vm2366_vm10, %v2362_v8, 1326507024  ;;  %v2091_v31 = vsub.s32 32, %v2090_v9  ;;  %v2092_v51 = vshll.u32 %v13201_v32, %v2090_v9 }
 0x269   :  { %v2095_v61 = vsub.s32 4294967266, %v2090_v9  ;;  %v2374_v63 = vsel %vm2364_vm8, %v2371_v40, %v2373_v5  ;;  %v2377_v45 = vsel %vm2365_vm9, %v2359_v18, %v2376_v7  ;;  %v2227_v49 = vand.u32 2147483647, %v13189_v13 }
 0x26a   :  { %v11057_v23 = vpop.eup %11056  ;;  %v13264_v50 = vmul.u32.u64.low %v13219_v52, %v2374_v63  ;;  %v13265_v55 = vmul.u32.u64.high %v13219_v52, %v2374_v63, %v13264_v50  ;;  %v2093_v54 = vshrl.u32 %v2075_v41, %v2091_v31  ;;  %v2378_v22 = vsel %vm2364_vm8, %v2375_v1, %v2377_v45 }
 0x26b   :  { %v11059_v62 = vpop.eup %11058  ;;  %v2223_v27 = vxor.u32 2147483648, %v11057_v23  ;;  %v2096_v47 = vadd.s32 127, %v2095_v61  ;;  %v13274_v35 = vmul.u32.u64.low %v13219_v52, %v2378_v22  ;;  %v13275_v42 = vmul.u32.u64.high %v13219_v52, %v2378_v22, %v13274_v35 }
 0x26c   :  { %v2220_v36 = vxor.u32 2147483648, %v11059_v62  ;;  %v2094_v41 = vor.u32 %v2093_v54, %v2092_v51  ;;  %v2389_v15 = vadd.s32 1, %v13265_v55  ;;  %v13292_v0 = vmul.f32 %v12967_v38, %v169_v34 }
 0x26d   :  { %v2224_v32 = vsel %vm2222_vm2, %v2223_v27, %v11059_v62  ;;  %v7246_v3 = vsel %vm7244_vm1, %v2223_v27, %v11059_v62  ;;  %v2097_v57 = vshll.u32 %v2096_v47, 23  ;;  %v2108_v2 = vsel %vm13246_vm12, 0, %v2106_v33 }
 0x26e   :  { %v2221_v46 = vsel %vm2219_vm3, %v11057_v23, %v2220_v36  ;;  %v7243_v43 = vsel %vm7241_vm4, %v11057_v23, %v2220_v36  ;;  %v2386_v39 = vmul.u32 %v13219_v52, %v2370_v59  ;;  %vm2388_vm14 = vc.u32 %v13275_v42, %v13264_v50 }
 0x26f   :  { %v2225_v60 = vsel %vm2218_vm6, %v2221_v46, %v2224_v32  ;;  %v7247_v44 = vsel %vm7240_vm7, %v7243_v43, %v7246_v3  ;;  %v2098_v56 = vor.u32 4788187, %v2097_v57  ;;  %v2237_v18 = vadd.s32 1, %v13227_v6 }
 0x270   :  { %v2226_v14 = vsel %vm2215_vm11, nan, %v2225_v60  ;;  %v7248_v48 = vsel %vm2215_vm11, nan, %v7247_v44  ;;  %v2101_v10 = vcvt.s32.f32 %v2094_v41  ;;  %v2390_v11 = vsel %vm2388_vm14, %v2389_v15, %v13265_v55 }
 0x271   :  { %5364 = vst [vmem:[#allocation2 + $0x110] sm:$0xff] %v2226_v14  ;;  %10356 = vst [vmem:[#allocation2 + $0x118] sm:$0xff] %v7248_v48  ;;  %v2099_v17 = vand.u32 2147483647, %v2098_v56  ;;  %v2391_v19 = vadd.s32 %v2390_v11, %v2386_v39  ;;  %v2234_v8 = vand.u32 8388607, %v2227_v49  ;;  %v13311_v31 = vadd.s32 %v13264_v50, %v13275_v42 }
 0x272   :  { %vm2238_vm15 = vcmp.gt.s32.totalorder %v2237_v18, 0  ;;  %v2112_v12 = vadd.s32 3, %v2108_v2  ;;  %v2539_v52 = vand.u32 2147483647, %v13292_v0  ;;  %v2542_v16 = vand.u32 2139095040, %v13292_v0 }
 0x273   :  { %v2102_v4 = vmul.f32 %v2101_v10, %v2099_v17  ;;  %v2239_v40 = vsel %vm2238_vm15, %v2237_v18, 0  ;;  %v2392_v53 = vadd.s32 536870912, %v2391_v19  ;;  %v2235_v9 = vor.u32 8388608, %v2234_v8 }
 0x274   :  { %v2241_v33 = vand.u32 31, %v2239_v40  ;;  %v13306_v7 = vand.u32 3, %v2112_v12  ;;  %v13308_v23 = vand.u32 3, %v2108_v2  ;;  %v2543_v63 = vshrl.u32 %v2542_v16, 23 }
 0x275   :  { %v2103_v1 = vxor.u32 2147483648, %v2102_v4  ;;  %v2393_v6 = vshrl.u32 %v2392_v53, 30  ;;  %v13318_v62 = vand.u32 8388607, %v2539_v52  ;;  %v2240_v54 = vshrl.u32 %v2239_v40, 5 }
 0x276   :  { %v2242_v59 = vsub.s32 32, %v2241_v33  ;;  %v2244_v58 = vshll.u32 %v11217_v20, %v2241_v33  ;;  %v2247_v47 = vshll.u32 %v11218_v24, %v2241_v33  ;;  %v2250_v22 = vshll.u32 %v11219_v26, %v2241_v33 }
 0x277   :  { %v2104_v5 = vsel %vm2021_vm0, %v2103_v1, %v2102_v4  ;;  %v2394_v61 = vshll.u32 %v2393_v6, 30  ;;  %vm2333_vm0 = vcmp.lt.s32.totalorder %v13118_v21, 0  ;;  %v2253_v32 = vshll.u32 %v11220_v28, %v2241_v33 }
 0x278   :  { %v2107_v51 = vsel %vm13246_vm12, %v12970_v25, %v2104_v5  ;;  %v2245_v27 = vshrl.u32 %v11218_v24, %v2242_v59  ;;  %v2248_v45 = vshrl.u32 %v11219_v26, %v2242_v59  ;;  %v2251_v55 = vshrl.u32 %v11220_v28, %v2242_v59 }
 0x279   :  { %11060 = vcosq.f32 %v2107_v51  ;;  %v13324_v50 = vsub.s32 %v2391_v19, %v2394_v61  ;;  %v2254_v36 = vshrl.u32 %v11221_v30, %v2242_v59  ;;  %v2256_v42 = vshll.u32 %v11221_v30, %v2241_v33 }
 0x27a   :  { %11062 = vsinq.f32 %v2107_v51  ;;  %v2246_v35 = vor.u32 %v2245_v27, %v2244_v58  ;;  %v13333_v34 = vshll.u32 %v2235_v9, 8  ;;  %vm2118_vm2 = vcmp.eq.s32.totalorder %v13306_v7, 2 }
 0x27b   :  { %v2397_v3 = vsub.s32 0, %v13324_v50  ;;  %vm7141_vm1 = vcmp.eq.s32.totalorder %v13308_v23, 2  ;;  %v2249_v46 = vor.u32 %v2248_v45, %v2247_v47  ;;  %v2252_v43 = vor.u32 %v2251_v55, %v2250_v22 }
 0x27c   :  { %v2255_v41 = vor.u32 %v2254_v36, %v2253_v32  ;;  %v2257_v57 = vshrl.u32 %v11222_v37, %v2242_v59  ;;  %vm2115_vm3 = vcmp.eq.s32.totalorder %v13306_v7, 0  ;;  %vm7138_vm4 = vcmp.eq.s32.totalorder %v13308_v23, 0 }
 0x27d   :  { %v10481_v60 = vmin.u32 %v2397_v3, %v13324_v50  ;;  %v2243_v44 = vshrl.u32 %v11217_v20, %v2242_v59  ;;  %v10488_v15 = vadd.s32 4294967169, %v2543_v63  ;;  %v2547_v14 = vor.u32 8388608, %v13318_v62 }
 0x27e   :  { %vm2114_vm5 = vcmp.lt.s32.totalorder %v13306_v7, 2  ;;  %vm7137_vm6 = vcmp.lt.s32.totalorder %v13308_v23, 2  ;;  %v2417_v48 = vsub.s32 4, %v2393_v6  ;;  %v2258_v56 = vor.u32 %v2257_v57, %v2256_v42  ;;  %v164_v42 = vpop.permute.xlu0 %163 }
 0x27f   :  { %vm2259_vm7 = vcmp.lt.s32.totalorder %v2240_v54, 1  ;;  %vm2260_vm8 = vcmp.lt.s32.totalorder %v2240_v54, 2  ;;  %vm2111_vm9 = vweird.f32 %v12970_v25  ;;  %v2399_v2 = vclz %v10481_v60 }
 0x280   :  { %vm2261_vm10 = vcmp.lt.s32.totalorder %v2240_v54, 3  ;;  %vm2262_vm11 = vcmp.lt.s32.totalorder %v2240_v54, 4  ;;  %v2263_v39 = vsel %vm2259_vm7, %v2243_v44, %v2246_v35  ;;  %v2267_v17 = vsel %vm2259_vm7, %v2246_v35, %v2249_v46 }
 0x281   :  { %v2264_v18 = vsel %vm2262_vm11, %v2252_v43, 2102212464  ;;  %v2268_v10 = vsel %vm2262_vm11, %v2255_v41, 920167782  ;;  %v2271_v11 = vsel %vm2259_vm7, %v2249_v46, %v2252_v43  ;;  %vm13348_vm12 = vcmp.le.f32.partialorder %v2331_v29, 0.7853982 }
 0x282   :  { %v10482_v8 = vadd.s32 4294967294, %v2399_v2  ;;  %v2265_v4 = vsel %vm2261_vm10, %v2249_v46, %v2264_v18  ;;  %v2269_v12 = vsel %vm2261_vm10, %v2252_v43, %v2268_v10  ;;  %v2272_v40 = vsel %vm2262_vm11, %v2258_v56, 1326507024 }
 0x283   :  { %v11061_v53 = vpop.eup %11060  ;;  %v2418_v33 = vsel %vm2333_vm0, %v2417_v48, %v2393_v6  ;;  %v2266_v16 = vsel %vm2260_vm8, %v2263_v39, %v2265_v4  ;;  %v2273_v1 = vsel %vm2261_vm10, %v2255_v41, %v2272_v40  ;;  %v2549_v9 = vadd.s32 1, %v10488_v15 }
 0x284   :  { %v11063_v59 = vpop.eup %11062  ;;  %v2119_v5 = vxor.u32 2147483648, %v11061_v53  ;;  %vm10483_vm13 = vcmp.lt.s32.totalorder %v10482_v8, 0  ;;  %v2270_v29 = vsel %vm2260_vm8, %v2267_v17, %v2269_v12  ;;  %v2274_v51 = vsel %vm2260_vm8, %v2271_v11, %v2273_v1 }
 0x285   :  { %v2116_v61 = vxor.u32 2147483648, %v11063_v59  ;;  %v2402_v63 = vsel %vm10483_vm13, 0, %v10482_v8  ;;  %v13358_v62 = vmul.u32.u64.low %v13333_v34, %v2274_v51  ;;  %v13359_v27 = vmul.u32.u64.high %v13333_v34, %v2274_v51, %v13358_v62 }
 0x286   :  { %v2120_v6 = vsel %vm2118_vm2, %v2119_v5, %v11063_v59  ;;  %v7143_v45 = vsel %vm7141_vm1, %v2119_v5, %v11063_v59  ;;  %v2403_v55 = vsub.s32 32, %v2402_v63  ;;  %v2404_v58 = vshll.u32 %v13324_v50, %v2402_v63 }
 0x287   :  { %v2117_v36 = vsel %vm2115_vm3, %v11061_v53, %v2116_v61  ;;  %v7140_v54 = vsel %vm7138_vm4, %v11061_v53, %v2116_v61  ;;  %v2407_v47 = vsub.s32 4294967266, %v2402_v63  ;;  %vm2550_vm14 = vcmp.gt.s32.totalorder %v2549_v9, 0 }
 0x288   :  { %v2121_v22 = vsel %vm2114_vm5, %v2117_v36, %v2120_v6  ;;  %v7144_v32 = vsel %vm7137_vm6, %v7140_v54, %v7143_v45  ;;  %v2405_v3 = vshrl.u32 %v13311_v31, %v2403_v55  ;;  %v2551_v35 = vsel %vm2550_vm14, %v2549_v9, 0 }
 0x289   :  { %v2122_v50 = vsel %vm2111_vm9, nan, %v2121_v22  ;;  %v7145_v46 = vsel %vm2111_vm9, nan, %v7144_v32  ;;  %v2408_v43 = vadd.s32 127, %v2407_v47  ;;  %v13379_v41 = vshrl.u32 %v2551_v35, 5 }
 0x28a   :  { %5363 = vst [vmem:[#allocation2 + $0x100] sm:$0xff] %v2122_v50  ;;  %10355 = vst [vmem:[#allocation2 + $0x108] sm:$0xff] %v7145_v46  ;;  %v2406_v7 = vor.u32 %v2405_v3, %v2404_v58  ;;  %v13382_v57 = vmul.u32.u64.low %v13333_v34, %v2270_v29  ;;  %v13383_v23 = vmul.u32.u64.high %v13333_v34, %v2270_v29, %v13382_v57  ;;  %v2553_v31 = vand.u32 31, %v2551_v35 }
 0x28b   :  { %v2409_v60 = vshll.u32 %v2408_v43, 23  ;;  %v2420_v44 = vsel %vm13348_vm12, 0, %v2418_v33  ;;  %v13388_v15 = vshll.u32 %v2547_v14, 8  ;;  %v13391_v25 = vmul.f32 %v12967_v38, %v164_v42 }
 0x28c   :  { %v2413_v48 = vcvt.s32.f32 %v2406_v7  ;;  %v2282_v56 = vmul.u32 %v13333_v34, %v2266_v16  ;;  %v2554_v2 = vsub.s32 32, %v2553_v31  ;;  %vm2571_vm15 = vcmp.lt.s32.totalorder %v13379_v41, 1 }
 0x28d   :  { %v2410_v39 = vor.u32 4788187, %v2409_v60  ;;  %vm2284_vm2 = vc.u32 %v13359_v27, %v13382_v57  ;;  %v2556_v18 = vshll.u32 %v11217_v20, %v2553_v31  ;;  %v2559_v17 = vshll.u32 %v11218_v24, %v2553_v31 }
 0x28e   :  { %v2285_v14 = vadd.s32 1, %v13383_v23  ;;  %v2557_v10 = vshrl.u32 %v11218_v24, %v2554_v2  ;;  %v2560_v38 = vshrl.u32 %v11219_v26, %v2554_v2  ;;  %v2562_v11 = vshll.u32 %v11219_v26, %v2553_v31 }
 0x28f   :  { %v2411_v34 = vand.u32 2147483647, %v2410_v39  ;;  %v2563_v8 = vshrl.u32 %v11220_v28, %v2554_v2  ;;  %v2565_v4 = vshll.u32 %v11220_v28, %v2553_v31  ;;  %v2566_v12 = vshrl.u32 %v11221_v30, %v2554_v2 }
 0x290   :  { %v2286_v40 = vsel %vm2284_vm2, %v2285_v14, %v13383_v23  ;;  %v2558_v53 = vor.u32 %v2557_v10, %v2556_v18  ;;  %v2561_v33 = vor.u32 %v2560_v38, %v2559_v17  ;;  %vm2572_vm1 = vcmp.lt.s32.totalorder %v13379_v41, 2 }
 0x291   :  { %v2414_v16 = vmul.f32 %v2413_v48, %v2411_v34  ;;  %v2287_v1 = vadd.s32 %v2286_v40, %v2282_v56  ;;  %v2564_v9 = vor.u32 %v2563_v8, %v2562_v11  ;;  %v2567_v59 = vor.u32 %v2566_v12, %v2565_v4 }
 0x292   :  { %v2568_v5 = vshll.u32 %v11221_v30, %v2553_v31  ;;  %v2569_v29 = vshrl.u32 %v11222_v37, %v2554_v2  ;;  %vm2574_vm3 = vcmp.lt.s32.totalorder %v13379_v41, 4  ;;  %v2579_v51 = vsel %vm2571_vm15, %v2558_v53, %v2561_v33 }
 0x293   :  { %v2415_v61 = vxor.u32 2147483648, %v2414_v16  ;;  %v2288_v63 = vadd.s32 536870912, %v2287_v1  ;;  %vm2573_vm4 = vcmp.lt.s32.totalorder %v13379_v41, 3  ;;  %v2580_v62 = vsel %vm2574_vm3, %v2567_v59, 920167782 }
 0x294   :  { %v2555_v6 = vshrl.u32 %v11217_v20, %v2554_v2  ;;  %v2570_v45 = vor.u32 %v2569_v29, %v2568_v5  ;;  %v2576_v55 = vsel %vm2574_vm3, %v2564_v9, 2102212464  ;;  %v2581_v58 = vsel %vm2573_vm4, %v2564_v9, %v2580_v62 }
 0x295   :  { %v2416_v36 = vsel %vm2333_vm0, %v2415_v61, %v2414_v16  ;;  %v2289_v54 = vshrl.u32 %v2288_v63, 30  ;;  %v2582_v47 = vsel %vm2572_vm1, %v2579_v51, %v2581_v58  ;;  %v2583_v22 = vsel %vm2571_vm15, %v2561_v33, %v2564_v9 }
 0x296   :  { %v2419_v32 = vsel %vm13348_vm12, %v13118_v21, %v2416_v36  ;;  %v2584_v3 = vsel %vm2574_vm3, %v2570_v45, 1326507024  ;;  %v13427_v35 = vmul.u32.u64.low %v13388_v15, %v2582_v47  ;;  %v13428_v42 = vmul.u32.u64.high %v13388_v15, %v2582_v47, %v13427_v35 }
 0x297   :  { %11064 = vcosq.f32 %v2419_v32  ;;  %v2290_v50 = vshll.u32 %v2289_v54, 30  ;;  %v2585_v46 = vsel %vm2573_vm4, %v2567_v59, %v2584_v3  ;;  %v2424_v43 = vadd.s32 3, %v2420_v44 }
 0x298   :  { %11066 = vsinq.f32 %v2419_v32  ;;  %v2575_v7 = vsel %vm2571_vm15, %v2555_v6, %v2558_v53  ;;  %v2586_v19 = vsel %vm2572_vm1, %v2583_v22, %v2585_v46  ;;  %v2577_v31 = vsel %vm2573_vm4, %v2561_v33, %v2576_v55  ;;  %v179_v22 = vpop.permute.xlu1 %178 }
 0x299   :  { %v13437_v23 = vsub.s32 %v2287_v1, %v2290_v50  ;;  %v13442_v60 = vmul.u32.u64.low %v13388_v15, %v2586_v19  ;;  %v13443_v48 = vmul.u32.u64.high %v13388_v15, %v2586_v19, %v13442_v60  ;;  %v7445_v56 = vand.u32 3, %v2420_v44 }
 0x29a   :  { %v2438_v2 = vand.u32 2139095040, %v13391_v25  ;;  %v2313_v18 = vsub.s32 4, %v2289_v54  ;;  %v2425_v17 = vand.u32 3, %v2424_v43  ;;  %v2578_v14 = vsel %vm2572_vm1, %v2575_v7, %v2577_v31  ;;  %v13485_v60 = vld [vmem:[%s16164_s1] ss:$0 sm:$0xff] }
 0x29b   :  { %v2293_v39 = vsub.s32 0, %v13437_v23  ;;  %v2597_v10 = vadd.s32 1, %v13428_v42  ;;  %vm13452_vm0 = vcmp.le.f32.partialorder %v2227_v49, 0.7853982  ;;  %vm2229_vm5 = vcmp.lt.s32.totalorder %v13189_v13, 0 }
 0x29c   :  { %v2439_v38 = vshrl.u32 %v2438_v2, 23  ;;  %vm2423_vm6 = vweird.f32 %v13118_v21  ;;  %vm7446_vm7 = vcmp.lt.s32.totalorder %v7445_v56, 2  ;;  %vm2596_vm8 = vc.u32 %v13443_v48, %v13427_v35 }
 0x29d   :  { %v10477_v44 = vmin.u32 %v2293_v39, %v13437_v23  ;;  %v2435_v41 = vand.u32 2147483647, %v13391_v25  ;;  %vm7447_vm9 = vcmp.eq.s32.totalorder %v7445_v56, 0  ;;  %v2314_v49 = vsel %vm2229_vm5, %v2313_v18, %v2289_v54 }
 0x29e   :  { %v10484_v34 = vadd.s32 4294967169, %v2439_v38  ;;  %v2594_v4 = vmul.u32 %v13388_v15, %v2578_v14  ;;  %vm2426_vm10 = vcmp.lt.s32.totalorder %v2425_v17, 2  ;;  %vm7450_vm11 = vcmp.eq.s32.totalorder %v7445_v56, 2 }
 0x29f   :  { %v2295_v8 = vclz %v10477_v44  ;;  %v2598_v12 = vsel %vm2596_vm8, %v2597_v10, %v13428_v42  ;;  %vm2427_vm12 = vcmp.eq.s32.totalorder %v2425_v17, 0  ;;  %vm2430_vm13 = vcmp.eq.s32.totalorder %v2425_v17, 2 }
 0x2a0   :  { %v2445_v40 = vadd.s32 1, %v10484_v34  ;;  %v2599_v16 = vadd.s32 %v2598_v12, %v2594_v4  ;;  %v2283_v59 = vadd.s32 %v13382_v57, %v13359_v27  ;;  %v2316_v5 = vsel %vm13452_vm0, 0, %v2314_v49 }
 0x2a1   :  { %v11065_v53 = vpop.eup %11064  ;;  %v10478_v33 = vadd.s32 4294967294, %v2295_v8  ;;  %v2442_v51 = vand.u32 8388607, %v2435_v41  ;;  %v2320_v57 = vadd.s32 3, %v2316_v5  ;;  %v13488_v56 = vmul.f32 %v13485_v60, %v179_v22 }
 0x2a2   :  { %v11067_v1 = vpop.eup %11066  ;;  %v2431_v9 = vxor.u32 2147483648, %v11065_v53  ;;  %vm2446_vm14 = vcmp.gt.s32.totalorder %v2445_v40, 0  ;;  %v2600_v29 = vadd.s32 536870912, %v2599_v16  ;;  %vm2541_vm2 = vcmp.lt.s32.totalorder %v13292_v0, 0 }
 0x2a3   :  { %v2428_v15 = vxor.u32 2147483648, %v11067_v1  ;;  %vm10479_vm15 = vcmp.lt.s32.totalorder %v10478_v33, 0  ;;  %v2447_v6 = vsel %vm2446_vm14, %v2445_v40, 0  ;;  %v2443_v19 = vor.u32 8388608, %v2442_v51 }
 0x2a4   :  { %v2432_v61 = vsel %vm2430_vm13, %v2431_v9, %v11067_v1  ;;  %v7452_v63 = vsel %vm7450_vm11, %v2431_v9, %v11067_v1  ;;  %v2298_v62 = vsel %vm10479_vm15, 0, %v10478_v33  ;;  %v2601_v47 = vshrl.u32 %v2600_v29, 30 }
 0x2a5   :  { %v2429_v45 = vsel %vm2427_vm12, %v11065_v53, %v2428_v15  ;;  %v7449_v55 = vsel %vm7447_vm9, %v11065_v53, %v2428_v15  ;;  %v2299_v27 = vsub.s32 32, %v2298_v62  ;;  %v2303_v54 = vsub.s32 4294967266, %v2298_v62 }
 0x2a6   :  { %v2433_v58 = vsel %vm2426_vm10, %v2429_v45, %v2432_v61  ;;  %v7453_v36 = vsel %vm7446_vm7, %v7449_v55, %v7452_v63  ;;  %v2449_v50 = vand.u32 31, %v2447_v6  ;;  %v2300_v46 = vshll.u32 %v13437_v23, %v2298_v62 }
 0x2a7   :  { %v2434_v32 = vsel %vm2423_vm6, nan, %v2433_v58  ;;  %v7454_v3 = vsel %vm2423_vm6, nan, %v7453_v36  ;;  %v2301_v42 = vshrl.u32 %v2283_v59, %v2299_v27  ;;  %v2304_v43 = vadd.s32 127, %v2303_v54 }
 0x2a8   :  { %5366 = vst [vmem:[#allocation2 + $0x130] sm:$0xff] %v2434_v32  ;;  %10358 = vst [vmem:[#allocation2 + $0x138] sm:$0xff] %v7454_v3  ;;  %v2602_v7 = vshll.u32 %v2601_v47, 30  ;;  %v2450_v31 = vsub.s32 32, %v2449_v50  ;;  %v13491_v18 = vand.u32 3, %v2320_v57  ;;  %v13493_v23 = vand.u32 3, %v2316_v5 }
 0x2a9   :  { %v2302_v21 = vor.u32 %v2301_v42, %v2300_v46  ;;  %v2305_v2 = vshll.u32 %v2304_v43, 23  ;;  %v2625_v17 = vsub.s32 4, %v2601_v47  ;;  %v13495_v14 = vshrl.u32 %v2447_v6, 5 }
 0x2aa   :  { %v2603_v39 = vsub.s32 %v2599_v16, %v2602_v7  ;;  %v2595_v38 = vadd.s32 %v13427_v35, %v13443_v48  ;;  %v2453_v34 = vshrl.u32 %v11218_v24, %v2450_v31  ;;  %v2452_v8 = vshll.u32 %v11217_v20, %v2449_v50 }
 0x2ab   :  { %v2306_v10 = vor.u32 4788187, %v2305_v2  ;;  %v2456_v49 = vshrl.u32 %v11219_v26, %v2450_v31  ;;  %v13502_v4 = vshll.u32 %v2443_v19, 8  ;;  %v2750_v12 = vand.u32 2139095040, %v13488_v56  ;;  %v174_v2 = vpop.permute.xlu0 %173 }
 0x2ac   :  { %v2605_v44 = vsub.s32 0, %v2603_v39  ;;  %v2309_v53 = vcvt.s32.f32 %v2302_v21  ;;  %v2459_v16 = vshrl.u32 %v11220_v28, %v2450_v31  ;;  %v2626_v1 = vsel %vm2541_vm2, %v2625_v17, %v2601_v47 }
 0x2ad   :  { %v2307_v40 = vand.u32 2147483647, %v2306_v10  ;;  %v2455_v35 = vshll.u32 %v11218_v24, %v2449_v50  ;;  %v2458_v48 = vshll.u32 %v11219_v26, %v2449_v50  ;;  %vm2467_vm1 = vcmp.lt.s32.totalorder %v13495_v14, 1 }
 0x2ae   :  { %v10489_v33 = vmin.u32 %v2605_v44, %v2603_v39  ;;  %v2454_v5 = vor.u32 %v2453_v34, %v2452_v8  ;;  %v2461_v15 = vshll.u32 %v11220_v28, %v2449_v50  ;;  %v2462_v51 = vshrl.u32 %v11221_v30, %v2450_v31 }
 0x2af   :  { %v2310_v9 = vmul.f32 %v2309_v53, %v2307_v40  ;;  %v2457_v29 = vor.u32 %v2456_v49, %v2455_v35  ;;  %v2464_v61 = vshll.u32 %v11221_v30, %v2449_v50  ;;  %v2465_v63 = vshrl.u32 %v11222_v37, %v2450_v31 }
 0x2b0   :  { %v2607_v59 = vclz %v10489_v33  ;;  %v2451_v45 = vshrl.u32 %v11217_v20, %v2450_v31  ;;  %v2460_v55 = vor.u32 %v2459_v16, %v2458_v48  ;;  %v2463_v27 = vor.u32 %v2462_v51, %v2461_v15 }
 0x2b1   :  { %v2311_v62 = vxor.u32 2147483648, %v2310_v9  ;;  %v2466_v57 = vor.u32 %v2465_v63, %v2464_v61  ;;  %vm2468_vm3 = vcmp.lt.s32.totalorder %v13495_v14, 2  ;;  %vm2469_vm4 = vcmp.lt.s32.totalorder %v13495_v14, 3 }
 0x2b2   :  { %v10490_v6 = vadd.s32 4294967294, %v2607_v59  ;;  %vm2470_vm7 = vcmp.lt.s32.totalorder %v13495_v14, 4  ;;  %v2471_v36 = vsel %vm2467_vm1, %v2451_v45, %v2454_v5  ;;  %v2475_v22 = vsel %vm2467_vm1, %v2454_v5, %v2457_v29 }
 0x2b3   :  { %v2312_v58 = vsel %vm2229_vm5, %v2311_v62, %v2310_v9  ;;  %v2476_v32 = vsel %vm2470_vm7, %v2463_v27, 920167782  ;;  %v2472_v50 = vsel %vm2470_vm7, %v2460_v55, 2102212464  ;;  %v2479_v11 = vsel %vm2467_vm1, %v2457_v29, %v2460_v55 }
 0x2b4   :  { %vm10491_vm6 = vcmp.lt.s32.totalorder %v10490_v6, 0  ;;  %v2315_v54 = vsel %vm13452_vm0, %v13189_v13, %v2312_v58  ;;  %v2477_v43 = vsel %vm2469_vm4, %v2460_v55, %v2476_v32  ;;  %v2480_v21 = vsel %vm2470_vm7, %v2466_v57, 1326507024 }
 0x2b5   :  { %v2610_v47 = vsel %vm10491_vm6, 0, %v10490_v6  ;;  %11068 = vcosq.f32 %v2315_v54  ;;  %v2478_v31 = vsel %vm2468_vm3, %v2475_v22, %v2477_v43  ;;  %v2473_v17 = vsel %vm2469_vm4, %v2457_v29, %v2472_v50 }
 0x2b6   :  { %v2611_v3 = vsub.s32 32, %v2610_v47  ;;  %v2615_v42 = vsub.s32 4294967266, %v2610_v47  ;;  %11070 = vsinq.f32 %v2315_v54  ;;  %v2612_v46 = vshll.u32 %v2603_v39, %v2610_v47 }
 0x2b7   :  { %v2481_v39 = vsel %vm2469_vm4, %v2463_v27, %v2480_v21  ;;  %v13545_v10 = vmul.u32.u64.low %v13502_v4, %v2478_v31  ;;  %v13546_v44 = vmul.u32.u64.high %v13502_v4, %v2478_v31, %v13545_v10  ;;  %v2751_v49 = vshrl.u32 %v2750_v12, 23 }
 0x2b8   :  { %v2613_v7 = vshrl.u32 %v2595_v38, %v2611_v3  ;;  %v2616_v19 = vadd.s32 127, %v2615_v42  ;;  %v2482_v8 = vsel %vm2468_vm3, %v2479_v11, %v2481_v39  ;;  %vm13553_vm0 = vcmp.le.f32.partialorder %v2539_v52, 0.7853982 }
 0x2b9   :  { %v13558_v53 = vmul.u32.u64.low %v13502_v4, %v2482_v8  ;;  %v13559_v33 = vmul.u32.u64.high %v13502_v4, %v2482_v8, %v13558_v53  ;;  %v13562_v16 = vmul.f32 %v13485_v60, %v174_v2  ;;  %vm7343_vm5 = vcmp.lt.s32.totalorder %v13493_v23, 2 }
 0x2ba   :  { %v2614_v38 = vor.u32 %v2613_v7, %v2612_v46  ;;  %v2617_v34 = vshll.u32 %v2616_v19, 23  ;;  %v2628_v48 = vsel %vm13553_vm0, 0, %v2626_v1  ;;  %v2474_v12 = vsel %vm2468_vm3, %v2471_v36, %v2473_v17 }
 0x2bb   :  { %v10496_v52 = vadd.s32 4294967169, %v2751_v49  ;;  %vm2319_vm8 = vweird.f32 %v13189_v13  ;;  %vm7344_vm9 = vcmp.eq.s32.totalorder %v13493_v23, 0  ;;  %vm7347_vm10 = vcmp.eq.s32.totalorder %v13493_v23, 2 }
 0x2bc   :  { %v2618_v35 = vor.u32 4788187, %v2617_v34  ;;  %v2493_v9 = vadd.s32 1, %v13546_v44  ;;  %v2747_v59 = vand.u32 2147483647, %v13488_v56  ;;  %vm2322_vm11 = vcmp.lt.s32.totalorder %v13491_v18, 2 }
 0x2bd   :  { %v2621_v15 = vcvt.s32.f32 %v2614_v38  ;;  %v2757_v29 = vadd.s32 1, %v10496_v52  ;;  %vm2323_vm12 = vcmp.eq.s32.totalorder %v13491_v18, 0  ;;  %v2632_v14 = vadd.s32 3, %v2628_v48 }
 0x2be   :  { %v2619_v5 = vand.u32 2147483647, %v2618_v35  ;;  %v2490_v1 = vmul.u32 %v13502_v4, %v2474_v12  ;;  %vm2492_vm13 = vc.u32 %v13559_v33, %v13545_v10  ;;  %vm2326_vm14 = vcmp.eq.s32.totalorder %v13491_v18, 2 }
 0x2bf   :  { %v11069_v51 = vpop.eup %11068  ;;  %v2494_v63 = vsel %vm2492_vm13, %v2493_v9, %v13546_v44  ;;  %vm2758_vm15 = vcmp.gt.s32.totalorder %v2757_v29, 0  ;;  %v2754_v55 = vand.u32 8388607, %v2747_v59  ;;  %v13583_v4 = vand.u32 3, %v2628_v48 }
 0x2c0   :  { %v2622_v61 = vmul.f32 %v2621_v15, %v2619_v5  ;;  %v11071_v62 = vpop.eup %11070  ;;  %v2327_v6 = vxor.u32 2147483648, %v11069_v51  ;;  %v2495_v45 = vadd.s32 %v2494_v63, %v2490_v1  ;;  %v2759_v27 = vsel %vm2758_vm15, %v2757_v29, 0 }
 0x2c1   :  { %v2324_v57 = vxor.u32 2147483648, %v11071_v62  ;;  %v2761_v36 = vand.u32 31, %v2759_v27  ;;  %v13587_v22 = vand.u32 3, %v2632_v14  ;;  %v2646_v2 = vand.u32 2139095040, %v13562_v16 }
 0x2c2   :  { %v2623_v58 = vxor.u32 2147483648, %v2622_v61  ;;  %v2328_v54 = vsel %vm2326_vm14, %v2327_v6, %v11071_v62  ;;  %v7349_v47 = vsel %vm7347_vm10, %v2327_v6, %v11071_v62  ;;  %v2496_v32 = vadd.s32 536870912, %v2495_v45 }
 0x2c3   :  { %v2325_v3 = vsel %vm2323_vm12, %v11069_v51, %v2324_v57  ;;  %v7346_v42 = vsel %vm7344_vm9, %v11069_v51, %v2324_v57  ;;  %v2762_v46 = vsub.s32 32, %v2761_v36  ;;  %v2755_v23 = vor.u32 8388608, %v2754_v55 }
 0x2c4   :  { %v2624_v50 = vsel %vm2541_vm2, %v2623_v58, %v2622_v61  ;;  %v2329_v43 = vsel %vm2322_vm11, %v2325_v3, %v2328_v54  ;;  %v7350_v11 = vsel %vm7343_vm5, %v7346_v42, %v7349_v47  ;;  %v13602_v19 = vshrl.u32 %v2496_v32, 30 }
 0x2c5   :  { %v2627_v7 = vsel %vm13553_vm0, %v13292_v0, %v2624_v50  ;;  %v2330_v31 = vsel %vm2319_vm8, nan, %v2329_v43  ;;  %v7351_v21 = vsel %vm2319_vm8, nan, %v7350_v11  ;;  %v2765_v17 = vshrl.u32 %v11218_v24, %v2762_v46 }
 0x2c6   :  { %11072 = vcosq.f32 %v2627_v7  ;;  %5365 = vst [vmem:[#allocation2 + $0x120] sm:$0xff] %v2330_v31  ;;  %10357 = vst [vmem:[#allocation2 + $0x128] sm:$0xff] %v7351_v21  ;;  %v2498_v18 = vshll.u32 %v13602_v19, 30  ;;  %v2768_v44 = vshrl.u32 %v11219_v26, %v2762_v46  ;;  %vm2638_vm2 = vcmp.eq.s32.totalorder %v13587_v22, 2 }
 0x2c7   :  { %11074 = vsinq.f32 %v2627_v7  ;;  %vm7656_vm1 = vcmp.eq.s32.totalorder %v13583_v4, 2  ;;  %v2764_v13 = vshll.u32 %v11217_v20, %v2761_v36  ;;  %v2771_v38 = vshrl.u32 %v11220_v28, %v2762_v46 }
 0x2c8   :  { %v13611_v39 = vsub.s32 %v2495_v45, %v2498_v18  ;;  %v2774_v34 = vshrl.u32 %v11221_v30, %v2762_v46  ;;  %v2647_v8 = vshrl.u32 %v2646_v2, 23  ;;  %vm2635_vm3 = vcmp.eq.s32.totalorder %v13587_v22, 0 }
 0x2c9   :  { %vm7653_vm4 = vcmp.eq.s32.totalorder %v13583_v4, 0  ;;  %v13622_v40 = vshrl.u32 %v2759_v27, 5  ;;  %v2767_v53 = vshll.u32 %v11218_v24, %v2761_v36  ;;  %v2773_v35 = vshll.u32 %v11220_v28, %v2761_v36 }
 0x2ca   :  { %v2501_v49 = vsub.s32 0, %v13611_v39  ;;  %vm2634_vm6 = vcmp.lt.s32.totalorder %v13587_v22, 2  ;;  %vm7652_vm7 = vcmp.lt.s32.totalorder %v13583_v4, 2  ;;  %v2766_v48 = vor.u32 %v2765_v17, %v2764_v13 }
 0x2cb   :  { %v2770_v12 = vshll.u32 %v11219_v26, %v2761_v36  ;;  %v2777_v52 = vshrl.u32 %v11222_v37, %v2762_v46  ;;  %v13630_v9 = vshll.u32 %v2755_v23, 8  ;;  %vm2631_vm0 = vweird.f32 %v13292_v0 }
 0x2cc   :  { %v10485_v5 = vmin.u32 %v2501_v49, %v13611_v39  ;;  %v2769_v15 = vor.u32 %v2768_v44, %v2767_v53  ;;  %v2775_v29 = vor.u32 %v2774_v34, %v2773_v35  ;;  %v2776_v14 = vshll.u32 %v11221_v30, %v2761_v36 }
 0x2cd   :  { %v2491_v1 = vadd.s32 %v13545_v10, %v13559_v33  ;;  %v2763_v51 = vshrl.u32 %v11217_v20, %v2762_v46  ;;  %v2772_v61 = vor.u32 %v2771_v38, %v2770_v12  ;;  %v10492_v63 = vadd.s32 4294967169, %v2647_v8 }
 0x2ce   :  { %v2503_v62 = vclz %v10485_v5  ;;  %v2521_v6 = vsub.s32 4, %v13602_v19  ;;  %v2778_v45 = vor.u32 %v2777_v52, %v2776_v14  ;;  %vm2779_vm5 = vcmp.lt.s32.totalorder %v13622_v40, 1 }
 0x2cf   :  { %vm2780_vm8 = vcmp.lt.s32.totalorder %v13622_v40, 2  ;;  %vm2781_vm9 = vcmp.lt.s32.totalorder %v13622_v40, 3  ;;  %vm2782_vm10 = vcmp.lt.s32.totalorder %v13622_v40, 4  ;;  %v2783_v27 = vsel %vm2779_vm5, %v2763_v51, %v2766_v48 }
 0x2d0   :  { %v11073_v55 = vpop.eup %11072  ;;  %v10486_v33 = vadd.s32 4294967294, %v2503_v62  ;;  %v2787_v58 = vsel %vm2779_vm5, %v2766_v48, %v2769_v15  ;;  %v2788_v36 = vsel %vm2782_vm10, %v2775_v29, 920167782  ;;  %v2784_v47 = vsel %vm2782_vm10, %v2772_v61, 2102212464 }
 0x2d1   :  { %v11075_v57 = vpop.eup %11074  ;;  %v2639_v10 = vxor.u32 2147483648, %v11073_v55  ;;  %v2789_v32 = vsel %vm2781_vm9, %v2772_v61, %v2788_v36  ;;  %v2791_v3 = vsel %vm2779_vm5, %v2769_v15, %v2772_v61  ;;  %v2792_v46 = vsel %vm2782_vm10, %v2778_v45, 1326507024 }
 0x2d2   :  { %v2636_v54 = vxor.u32 2147483648, %v11075_v57  ;;  %vm10487_vm11 = vcmp.lt.s32.totalorder %v10486_v33, 0  ;;  %v2790_v31 = vsel %vm2780_vm8, %v2787_v58, %v2789_v32  ;;  %v2785_v23 = vsel %vm2781_vm9, %v2769_v15, %v2784_v47 }
 0x2d3   :  { %v2640_v42 = vsel %vm2638_vm2, %v2639_v10, %v11075_v57  ;;  %v7658_v50 = vsel %vm7656_vm1, %v2639_v10, %v11075_v57  ;;  %v2506_v7 = vsel %vm10487_vm11, 0, %v10486_v33  ;;  %v2793_v38 = vsel %vm2781_vm9, %v2775_v29, %v2792_v46 }
 0x2d4   :  { %v2637_v43 = vsel %vm2635_vm3, %v11073_v55, %v2636_v54  ;;  %v7655_v11 = vsel %vm7653_vm4, %v11073_v55, %v2636_v54  ;;  %v2507_v18 = vsub.s32 32, %v2506_v7  ;;  %v2511_v13 = vsub.s32 4294967266, %v2506_v7 }
 0x2d5   :  { %v2641_v21 = vsel %vm2634_vm6, %v2637_v43, %v2640_v42  ;;  %v7659_v2 = vsel %vm7652_vm7, %v7655_v11, %v7658_v50  ;;  %v2794_v4 = vsel %vm2780_vm8, %v2791_v3, %v2793_v38  ;;  %v2508_v49 = vshll.u32 %v13611_v39, %v2506_v7 }
 0x2d6   :  { %v2642_v17 = vsel %vm2631_vm0, nan, %v2641_v21  ;;  %v7660_v44 = vsel %vm2631_vm0, nan, %v7659_v2  ;;  %v2509_v22 = vshrl.u32 %v2491_v1, %v2507_v18  ;;  %v2512_v53 = vadd.s32 127, %v2511_v13 }
 0x2d7   :  { %5368 = vst [vmem:[#allocation2 + $0x150] sm:$0xff] %v2642_v17  ;;  %10360 = vst [vmem:[#allocation2 + $0x158] sm:$0xff] %v7660_v44  ;;  %v13670_v34 = vmul.u32.u64.low %v13630_v9, %v2790_v31  ;;  %v13671_v8 = vmul.u32.u64.high %v13630_v9, %v2790_v31, %v13670_v34  ;;  %v13676_v0 = vmul.u32.u64.low %v13630_v9, %v2794_v4  ;;  %v13677_v35 = vmul.u32.u64.high %v13630_v9, %v2794_v4, %v13676_v0 }
 0x2d8   :  { %vm2437_vm12 = vcmp.lt.s32.totalorder %v13391_v25, 0  ;;  %v2786_v48 = vsel %vm2780_vm8, %v2783_v27, %v2785_v23  ;;  %v2653_v12 = vadd.s32 1, %v10492_v63  ;;  %v2510_v52 = vor.u32 %v2509_v22, %v2508_v49  ;;  %v189_v63 = vpop.permute.xlu1 %188 }
 0x2d9   :  { %v2513_v5 = vshll.u32 %v2512_v53, 23  ;;  %v2522_v15 = vsel %vm2437_vm12, %v2521_v6, %v13602_v19  ;;  %vm13687_vm13 = vcmp.le.f32.partialorder %v2435_v41, 0.7853982  ;;  %v2805_v29 = vadd.s32 1, %v13671_v8 }
 0x2da   :  { %v2643_v14 = vand.u32 2147483647, %v13562_v16  ;;  %vm2654_vm14 = vcmp.gt.s32.totalorder %v2653_v12, 0  ;;  %v2802_v1 = vmul.u32 %v13630_v9, %v2786_v48  ;;  %vm2804_vm15 = vc.u32 %v13677_v35, %v13670_v34 }
 0x2db   :  { %v2514_v40 = vor.u32 4788187, %v2513_v5  ;;  %v2655_v51 = vsel %vm2654_vm14, %v2653_v12, 0  ;;  %v2524_v19 = vsel %vm13687_vm13, 0, %v2522_v15  ;;  %v2806_v41 = vsel %vm2804_vm15, %v2805_v29, %v13671_v8 }
 0x2dc   :  { %v2657_v61 = vand.u32 31, %v2655_v51  ;;  %v2517_v6 = vcvt.s32.f32 %v2510_v52  ;;  %v2807_v45 = vadd.s32 %v2806_v41, %v2802_v1  ;;  %v2650_v55 = vand.u32 8388607, %v2643_v14 }
 0x2dd   :  { %v2515_v62 = vand.u32 2147483647, %v2514_v40  ;;  %v2528_v9 = vadd.s32 3, %v2524_v19  ;;  %v13702_v33 = vmul.f32 %v13485_v60, %v189_v63  ;;  %v2656_v58 = vshrl.u32 %v2655_v51, 5 }
 0x2de   :  { %v2658_v27 = vsub.s32 32, %v2657_v61  ;;  %v2808_v10 = vadd.s32 536870912, %v2807_v45  ;;  %v2666_v54 = vshll.u32 %v11219_v26, %v2657_v61  ;;  %v2660_v46 = vshll.u32 %v11217_v20, %v2657_v61 }
 0x2df   :  { %v2518_v57 = vmul.f32 %v2517_v6, %v2515_v62  ;;  %v2669_v11 = vshll.u32 %v11220_v28, %v2657_v61  ;;  %v2663_v2 = vshll.u32 %v11218_v24, %v2657_v61  ;;  %v2958_v18 = vand.u32 2139095040, %v13702_v33 }
 0x2e0   :  { %v2661_v36 = vshrl.u32 %v11218_v24, %v2658_v27  ;;  %v2667_v47 = vshrl.u32 %v11220_v28, %v2658_v27  ;;  %v13707_v3 = vshrl.u32 %v2808_v10, 30  ;;  %v2664_v42 = vshrl.u32 %v11219_v26, %v2658_v27 }
 0x2e1   :  { %v2519_v32 = vxor.u32 2147483648, %v2518_v57  ;;  %v2670_v50 = vshrl.u32 %v11221_v30, %v2658_v27  ;;  %v2673_v7 = vshrl.u32 %v11222_v37, %v2658_v27  ;;  %v2672_v13 = vshll.u32 %v11221_v30, %v2657_v61 }
 0x2e2   :  { %v2668_v43 = vor.u32 %v2667_v47, %v2666_v54  ;;  %v2810_v21 = vshll.u32 %v13707_v3, 30  ;;  %v2662_v17 = vor.u32 %v2661_v36, %v2660_v46  ;;  %v2665_v22 = vor.u32 %v2664_v42, %v2663_v2 }
 0x2e3   :  { %v2520_v31 = vsel %vm2437_vm12, %v2519_v32, %v2518_v57  ;;  %v2671_v44 = vor.u32 %v2670_v50, %v2669_v11  ;;  %vm2678_vm2 = vcmp.lt.s32.totalorder %v2656_v58, 4  ;;  %v13725_v4 = vand.u32 3, %v2524_v19 }
 0x2e4   :  { %v2523_v23 = vsel %vm13687_vm13, %v13391_v25, %v2520_v31  ;;  %v13723_v38 = vsub.s32 %v2807_v45, %v2810_v21  ;;  %v2674_v8 = vor.u32 %v2673_v7, %v2672_v13  ;;  %v2680_v49 = vsel %vm2678_vm2, %v2668_v43, 2102212464  ;;  %v184_v13 = vpop.permute.xlu0 %183 }
 0x2e5   :  { %11076 = vcosq.f32 %v2523_v23  ;;  %v13728_v53 = vand.u32 3, %v2528_v9  ;;  %vm2749_vm1 = vcmp.lt.s32.totalorder %v13488_v56, 0  ;;  %v2651_v48 = vor.u32 8388608, %v2650_v55 }
 0x2e6   :  { %11078 = vsinq.f32 %v2523_v23  ;;  %v2813_v0 = vsub.s32 0, %v13723_v38  ;;  %v2659_v12 = vshrl.u32 %v11217_v20, %v2658_v27  ;;  %vm2675_vm3 = vcmp.lt.s32.totalorder %v2656_v58, 1 }
 0x2e7   :  { %vm2677_vm4 = vcmp.lt.s32.totalorder %v2656_v58, 3  ;;  %v2684_v52 = vsel %vm2678_vm2, %v2671_v44, 920167782  ;;  %v2959_v5 = vshrl.u32 %v2958_v18, 23  ;;  %v2683_v40 = vsel %vm2675_vm3, %v2662_v17, %v2665_v22 }
 0x2e8   :  { %v10497_v15 = vmin.u32 %v2813_v0, %v13723_v38  ;;  %v2679_v39 = vsel %vm2675_vm3, %v2659_v12, %v2662_v17  ;;  %v2681_v29 = vsel %vm2677_vm4, %v2665_v22, %v2680_v49  ;;  %vm7550_vm6 = vcmp.eq.s32.totalorder %v13725_v4, 0 }
 0x2e9   :  { %vm7553_vm7 = vcmp.eq.s32.totalorder %v13725_v4, 2  ;;  %v2685_v1 = vsel %vm2677_vm4, %v2668_v43, %v2684_v52  ;;  %v2687_v51 = vsel %vm2675_vm3, %v2665_v22, %v2668_v43  ;;  %v2688_v19 = vsel %vm2678_vm2, %v2674_v8, 1326507024 }
 0x2ea   :  { %vm2530_vm0 = vcmp.lt.s32.totalorder %v13728_v53, 2  ;;  %vm7549_vm5 = vcmp.lt.s32.totalorder %v13725_v4, 2  ;;  %v2815_v41 = vclz %v10497_v15  ;;  %v2833_v61 = vsub.s32 4, %v13707_v3 }
 0x2eb   :  { %vm2676_vm8 = vcmp.lt.s32.totalorder %v2656_v58, 2  ;;  %v2691_v63 = vshll.u32 %v2651_v48, 8  ;;  %vm2527_vm9 = vweird.f32 %v13391_v25  ;;  %v2689_v45 = vsel %vm2677_vm4, %v2671_v44, %v2688_v19 }
 0x2ec   :  { %v2682_v62 = vsel %vm2676_vm8, %v2679_v39, %v2681_v29  ;;  %v2686_v6 = vsel %vm2676_vm8, %v2683_v40, %v2685_v1  ;;  %v10504_v55 = vadd.s32 4294967169, %v2959_v5  ;;  %vm13747_vm10 = vcmp.le.f32.partialorder %v2747_v59, 0.7853982 }
 0x2ed   :  { %v10498_v57 = vadd.s32 4294967294, %v2815_v41  ;;  %v2690_v9 = vsel %vm2676_vm8, %v2687_v51, %v2689_v45  ;;  %v13751_v10 = vmul.u32.u64.low %v2691_v63, %v2686_v6  ;;  %v13752_v36 = vmul.u32.u64.high %v2691_v63, %v2686_v6, %v13751_v10 }
 0x2ee   :  { %vm2531_vm11 = vcmp.eq.s32.totalorder %v13728_v53, 0  ;;  %v13756_v54 = vmul.u32.u64.low %v2691_v63, %v2690_v9  ;;  %v13757_v47 = vmul.u32.u64.high %v2691_v63, %v2690_v9, %v13756_v54  ;;  %v2965_v58 = vadd.s32 1, %v10504_v55 }
 0x2ef   :  { %v11077_v32 = vpop.eup %11076  ;;  %vm2534_vm12 = vcmp.eq.s32.totalorder %v13728_v53, 2  ;;  %v2803_v59 = vadd.s32 %v13670_v34, %v13677_v35  ;;  %vm10499_vm13 = vcmp.lt.s32.totalorder %v10498_v57, 0  ;;  %v2955_v42 = vand.u32 2147483647, %v13702_v33 }
 0x2f0   :  { %v11079_v50 = vpop.eup %11078  ;;  %v2535_v46 = vxor.u32 2147483648, %v11077_v32  ;;  %v2818_v43 = vsel %vm10499_vm13, 0, %v10498_v57  ;;  %v2834_v11 = vsel %vm2749_vm1, %v2833_v61, %v13707_v3  ;;  %v2698_v7 = vmul.u32 %v2691_v63, %v2682_v62 }
 0x2f1   :  { %v2532_v31 = vxor.u32 2147483648, %v11079_v50  ;;  %v2819_v21 = vsub.s32 32, %v2818_v43  ;;  %v2823_v2 = vsub.s32 4294967266, %v2818_v43  ;;  %vm2966_vm14 = vcmp.gt.s32.totalorder %v2965_v58, 0 }
 0x2f2   :  { %v2536_v18 = vsel %vm2534_vm12, %v2535_v46, %v11079_v50  ;;  %v7555_v23 = vsel %vm7553_vm7, %v2535_v46, %v11079_v50  ;;  %v2820_v34 = vshll.u32 %v13723_v38, %v2818_v43  ;;  %vm2700_vm15 = vc.u32 %v13757_v47, %v13751_v10 }
 0x2f3   :  { %v2533_v35 = vsel %vm2531_vm11, %v11077_v32, %v2532_v31  ;;  %v7552_v3 = vsel %vm7550_vm6, %v11077_v32, %v2532_v31  ;;  %v2821_v17 = vshrl.u32 %v2803_v59, %v2819_v21  ;;  %v2824_v44 = vadd.s32 127, %v2823_v2 }
 0x2f4   :  { %v2537_v22 = vsel %vm2530_vm0, %v2533_v35, %v2536_v18  ;;  %v7556_v8 = vsel %vm7549_vm5, %v7552_v3, %v7555_v23  ;;  %v2701_v38 = vadd.s32 1, %v13752_v36  ;;  %v2967_v49 = vsel %vm2966_vm14, %v2965_v58, 0 }
 0x2f5   :  { %v2538_v0 = vsel %vm2527_vm9, nan, %v2537_v22  ;;  %v7557_v48 = vsel %vm2527_vm9, nan, %v7556_v8  ;;  %v2822_v12 = vor.u32 %v2821_v17, %v2820_v34  ;;  %v2825_v52 = vshll.u32 %v2824_v44, 23 }
 0x2f6   :  { %5367 = vst [vmem:[#allocation2 + $0x140] sm:$0xff] %v2538_v0  ;;  %10359 = vst [vmem:[#allocation2 + $0x148] sm:$0xff] %v7557_v48  ;;  %v2836_v53 = vsel %vm13747_vm10, 0, %v2834_v11  ;;  %v2702_v4 = vsel %vm2700_vm15, %v2701_v38, %v13752_v36  ;;  %v2969_v5 = vand.u32 31, %v2967_v49  ;;  %v13791_v15 = vmul.f32 %v13485_v60, %v184_v13 }
 0x2f7   :  { %v2826_v39 = vor.u32 4788187, %v2825_v52  ;;  %v2703_v29 = vadd.s32 %v2702_v4, %v2698_v7  ;;  %v2962_v25 = vand.u32 8388607, %v2955_v42  ;;  %v2829_v51 = vcvt.s32.f32 %v2822_v12 }
 0x2f8   :  { %v2970_v40 = vsub.s32 32, %v2969_v5  ;;  %v2840_v19 = vadd.s32 3, %v2836_v53  ;;  %v13795_v61 = vand.u32 3, %v2836_v53  ;;  %v2854_v6 = vand.u32 2139095040, %v13791_v15 }
 0x2f9   :  { %v2827_v1 = vand.u32 2147483647, %v2826_v39  ;;  %v2704_v41 = vadd.s32 536870912, %v2703_v29  ;;  %v2968_v36 = vshrl.u32 %v2967_v49, 5  ;;  %v2978_v54 = vshll.u32 %v11219_v26, %v2969_v5 }
 0x2fa   :  { %v2973_v63 = vshrl.u32 %v11218_v24, %v2970_v40  ;;  %v2979_v62 = vshrl.u32 %v11220_v28, %v2970_v40  ;;  %v2976_v57 = vshrl.u32 %v11219_v26, %v2970_v40  ;;  %v2982_v9 = vshrl.u32 %v11221_v30, %v2970_v40 }
 0x2fb   :  { %v2830_v45 = vmul.f32 %v2829_v51, %v2827_v1  ;;  %v2705_v55 = vshrl.u32 %v2704_v41, 30  ;;  %v2981_v58 = vshll.u32 %v11220_v28, %v2969_v5  ;;  %v2985_v32 = vshrl.u32 %v11222_v37, %v2970_v40 }
 0x2fc   :  { %vm2645_vm2 = vcmp.lt.s32.totalorder %v13562_v16, 0  ;;  %v2972_v46 = vshll.u32 %v11217_v20, %v2969_v5  ;;  %v2975_v43 = vshll.u32 %v11218_v24, %v2969_v5  ;;  %v13808_v11 = vand.u32 3, %v2840_v19 }
 0x2fd   :  { %v2831_v59 = vxor.u32 2147483648, %v2830_v45  ;;  %v2706_v50 = vshll.u32 %v2705_v55, 30  ;;  %v2980_v7 = vor.u32 %v2979_v62, %v2978_v54  ;;  %v2983_v31 = vor.u32 %v2982_v9, %v2981_v58 }
 0x2fe   :  { %v2984_v21 = vshll.u32 %v11221_v30, %v2969_v5  ;;  %v2974_v23 = vor.u32 %v2973_v63, %v2972_v46  ;;  %v2977_v34 = vor.u32 %v2976_v57, %v2975_v43  ;;  %v2963_v3 = vor.u32 8388608, %v2962_v25 }
 0x2ff   :  { %v2832_v2 = vsel %vm2749_vm1, %v2831_v59, %v2830_v45  ;;  %v13813_v18 = vsub.s32 %v2703_v29, %v2706_v50  ;;  %v2855_v44 = vshrl.u32 %v2854_v6, 23  ;;  %vm13820_vm3 = vcmp.le.f32.partialorder %v2643_v14, 0.7853982 }
 0x300   :  { %v2835_v35 = vsel %vm13747_vm10, %v13488_v56, %v2832_v2  ;;  %v2986_v17 = vor.u32 %v2985_v32, %v2984_v21  ;;  %vm2987_vm1 = vcmp.lt.s32.totalorder %v2968_v36, 1  ;;  %vm2990_vm4 = vcmp.lt.s32.totalorder %v2968_v36, 4 }
 0x301   :  { %11080 = vcosq.f32 %v2835_v35  ;;  %v2709_v22 = vsub.s32 0, %v13813_v18  ;;  %v2729_v8 = vsub.s32 4, %v2705_v55  ;;  %v2992_v38 = vsel %vm2990_vm4, %v2980_v7, 2102212464 }
 0x302   :  { %11082 = vsinq.f32 %v2835_v35  ;;  %v2996_v49 = vsel %vm2990_vm4, %v2983_v31, 920167782  ;;  %v2971_v0 = vshrl.u32 %v11217_v20, %v2970_v40  ;;  %vm2989_vm6 = vcmp.lt.s32.totalorder %v2968_v36, 3 }
 0x303   :  { %v10493_v27 = vmin.u32 %v2709_v22, %v13813_v18  ;;  %v2995_v48 = vsel %vm2987_vm1, %v2974_v23, %v2977_v34  ;;  %v2997_v12 = vsel %vm2989_vm6, %v2980_v7, %v2996_v49  ;;  %v2999_v14 = vsel %vm2987_vm1, %v2977_v34, %v2980_v7 }
 0x304   :  { %v3000_v52 = vsel %vm2990_vm4, %v2986_v17, 1326507024  ;;  %v3003_v53 = vshll.u32 %v2963_v3, 8  ;;  %vm7862_vm7 = vcmp.eq.s32.totalorder %v13795_v61, 2  ;;  %vm2988_vm0 = vcmp.lt.s32.totalorder %v2968_v36, 2 }
 0x305   :  { %v2711_v4 = vclz %v10493_v27  ;;  %v2991_v5 = vsel %vm2987_vm1, %v2971_v0, %v2974_v23  ;;  %v2993_v39 = vsel %vm2989_vm6, %v2977_v34, %v2992_v38  ;;  %vm7859_vm5 = vcmp.eq.s32.totalorder %v13795_v61, 0 }
 0x306   :  { %v2730_v29 = vsel %vm2645_vm2, %v2729_v8, %v2705_v55  ;;  %v2998_v25 = vsel %vm2988_vm0, %v2995_v48, %v2997_v12  ;;  %v3001_v40 = vsel %vm2989_vm6, %v2983_v31, %v3000_v52  ;;  %v10500_v1 = vadd.s32 4294967169, %v2855_v44 }
 0x307   :  { %vm7858_vm8 = vcmp.lt.s32.totalorder %v13795_v61, 2  ;;  %v10494_v51 = vadd.s32 4294967294, %v2711_v4  ;;  %v3002_v19 = vsel %vm2988_vm0, %v2999_v14, %v3001_v40  ;;  %vm2839_vm9 = vweird.f32 %v13488_v56  ;;  %v199_v61 = vpop.permute.xlu1 %198 }
 0x308   :  { %v13835_v41 = vmul.u32.u64.low %v3003_v53, %v2998_v25  ;;  %v13836_v63 = vmul.u32.u64.high %v3003_v53, %v2998_v25, %v13835_v41  ;;  %v2994_v62 = vsel %vm2988_vm0, %v2991_v5, %v2993_v39  ;;  %v2861_v57 = vadd.s32 1, %v10500_v1 }
 0x309   :  { %v13840_v6 = vmul.u32.u64.low %v3003_v53, %v3002_v19  ;;  %v13841_v45 = vmul.u32.u64.high %v3003_v53, %v3002_v19, %v13840_v6  ;;  %vm2842_vm10 = vcmp.lt.s32.totalorder %v13808_v11, 2  ;;  %vm2843_vm11 = vcmp.eq.s32.totalorder %v13808_v11, 0 }
 0x30a   :  { %vm2846_vm12 = vcmp.eq.s32.totalorder %v13808_v11, 2  ;;  %vm10495_vm13 = vcmp.lt.s32.totalorder %v10494_v51, 0  ;;  %v2699_v55 = vadd.s32 %v13751_v10, %v13757_v47  ;;  %v2732_v36 = vsel %vm13820_vm3, 0, %v2730_v29 }
 0x30b   :  { %v2714_v9 = vsel %vm10495_vm13, 0, %v10494_v51  ;;  %vm2862_vm14 = vcmp.gt.s32.totalorder %v2861_v57, 0  ;;  %v11081_v54 = vpop.eup %11080  ;;  %v3010_v59 = vmul.u32 %v3003_v53, %v2994_v62  ;;  %v3013_v50 = vadd.s32 1, %v13836_v63 }
 0x30c   :  { %v2715_v58 = vsub.s32 32, %v2714_v9  ;;  %v2719_v32 = vsub.s32 4294967266, %v2714_v9  ;;  %v11083_v46 = vpop.eup %11082  ;;  %v2847_v43 = vxor.u32 2147483648, %v11081_v54  ;;  %v2716_v7 = vshll.u32 %v13813_v18, %v2714_v9 }
 0x30d   :  { %vm3012_vm15 = vc.u32 %v13841_v45, %v13835_v41  ;;  %v2863_v31 = vsel %vm2862_vm14, %v2861_v57, 0  ;;  %v2844_v10 = vxor.u32 2147483648, %v11083_v46  ;;  %v2736_v35 = vadd.s32 3, %v2732_v36 }
 0x30e   :  { %v2717_v47 = vshrl.u32 %v2699_v55, %v2715_v58  ;;  %v2720_v21 = vadd.s32 127, %v2719_v32  ;;  %v3014_v2 = vsel %vm3012_vm15, %v3013_v50, %v13836_v63  ;;  %v2848_v23 = vsel %vm2846_vm12, %v2847_v43, %v11083_v46 }
 0x30f   :  { %v7864_v34 = vsel %vm7862_vm7, %v2847_v43, %v11083_v46  ;;  %v3015_v3 = vadd.s32 %v3014_v2, %v3010_v59  ;;  %v2845_v18 = vsel %vm2843_vm11, %v11081_v54, %v2844_v10  ;;  %v7861_v17 = vsel %vm7859_vm5, %v11081_v54, %v2844_v10 }
 0x310   :  { %v2718_v44 = vor.u32 %v2717_v47, %v2716_v7  ;;  %v2721_v22 = vshll.u32 %v2720_v21, 23  ;;  %v2849_v8 = vsel %vm2842_vm10, %v2845_v18, %v2848_v23  ;;  %v7865_v38 = vsel %vm7858_vm8, %v7861_v17, %v7864_v34 }
 0x311   :  { %v3016_v49 = vadd.s32 536870912, %v3015_v3  ;;  %v2865_v27 = vand.u32 31, %v2863_v31  ;;  %v2850_v0 = vsel %vm2839_vm9, nan, %v2849_v8  ;;  %v7866_v48 = vsel %vm2839_vm9, nan, %v7865_v38 }
 0x312   :  { %v2722_v12 = vor.u32 4788187, %v2721_v22  ;;  %v2851_v14 = vand.u32 2147483647, %v13791_v15  ;;  %5370 = vst [vmem:[#allocation2 + $0x170] sm:$0xff] %v2850_v0  ;;  %10362 = vst [vmem:[#allocation2 + $0x178] sm:$0xff] %v7866_v48  ;;  %v2725_v4 = vcvt.s32.f32 %v2718_v44  ;;  %v13888_v62 = vmul.f32 %v13485_v60, %v199_v61 }
 0x313   :  { %v13872_v52 = vshrl.u32 %v3016_v49, 30  ;;  %v2866_v11 = vsub.s32 32, %v2865_v27  ;;  %v13874_v5 = vand.u32 3, %v2736_v35  ;;  %v13876_v39 = vand.u32 3, %v2732_v36 }
 0x314   :  { %v2723_v53 = vand.u32 2147483647, %v2722_v12  ;;  %v2858_v56 = vand.u32 8388607, %v2851_v14  ;;  %v2868_v57 = vshll.u32 %v11217_v20, %v2865_v27  ;;  %v2871_v55 = vshll.u32 %v11218_v24, %v2865_v27 }
 0x315   :  { %v3018_v29 = vshll.u32 %v13872_v52, 30  ;;  %v2869_v40 = vshrl.u32 %v11218_v24, %v2866_v11  ;;  %v2872_v1 = vshrl.u32 %v11219_v26, %v2866_v11  ;;  %v2875_v19 = vshrl.u32 %v11220_v28, %v2866_v11 }
 0x316   :  { %v2726_v25 = vmul.f32 %v2725_v4, %v2723_v53  ;;  %v2878_v63 = vshrl.u32 %v11221_v30, %v2866_v11  ;;  %v2881_v9 = vshrl.u32 %v11222_v37, %v2866_v11  ;;  %v2864_v54 = vshrl.u32 %v2863_v31, 5 }
 0x317   :  { %v13883_v51 = vsub.s32 %v3015_v3, %v3018_v29  ;;  %v2874_v58 = vshll.u32 %v11219_v26, %v2865_v27  ;;  %v2877_v32 = vshll.u32 %v11220_v28, %v2865_v27  ;;  %vm2957_vm1 = vcmp.lt.s32.totalorder %v13702_v33, 0 }
 0x318   :  { %v2727_v6 = vxor.u32 2147483648, %v2726_v25  ;;  %v2870_v60 = vor.u32 %v2869_v40, %v2868_v57  ;;  %v2873_v50 = vor.u32 %v2872_v1, %v2871_v55  ;;  %v2880_v46 = vshll.u32 %v11221_v30, %v2865_v27 }
 0x319   :  { %v3021_v36 = vsub.s32 0, %v13883_v51  ;;  %v2876_v31 = vor.u32 %v2875_v19, %v2874_v58  ;;  %v2879_v10 = vor.u32 %v2878_v63, %v2877_v32  ;;  %v3041_v47 = vsub.s32 4, %v13872_v52 }
 0x31a   :  { %v2728_v59 = vsel %vm2645_vm2, %v2727_v6, %v2726_v25  ;;  %v2859_v21 = vor.u32 8388608, %v2858_v56  ;;  %v2882_v2 = vor.u32 %v2881_v9, %v2880_v46  ;;  %vm13907_vm2 = vcmp.le.f32.partialorder %v2955_v42, 0.7853982 }
 0x31b   :  { %v2731_v43 = vsel %vm13820_vm3, %v13562_v16, %v2728_v59  ;;  %v10505_v7 = vmin.u32 %v3021_v36, %v13883_v51  ;;  %v2867_v13 = vshrl.u32 %v11217_v20, %v2866_v11  ;;  %vm2883_vm3 = vcmp.lt.s32.totalorder %v2864_v54, 1 }
 0x31c   :  { %11084 = vcosq.f32 %v2731_v43  ;;  %vm2884_vm4 = vcmp.lt.s32.totalorder %v2864_v54, 2  ;;  %vm2885_vm6 = vcmp.lt.s32.totalorder %v2864_v54, 3  ;;  %vm2886_vm7 = vcmp.lt.s32.totalorder %v2864_v54, 4 }
 0x31d   :  { %11086 = vsinq.f32 %v2731_v43  ;;  %v3023_v34 = vclz %v10505_v7  ;;  %v2891_v35 = vsel %vm2883_vm3, %v2870_v60, %v2873_v50  ;;  %v2888_v18 = vsel %vm2886_vm7, %v2876_v31, 2102212464 }
 0x31e   :  { %v2892_v17 = vsel %vm2886_vm7, %v2879_v10, 920167782  ;;  %v2895_v44 = vsel %vm2883_vm3, %v2873_v50, %v2876_v31  ;;  %vm7759_vm0 = vcmp.eq.s32.totalorder %v13876_v39, 2  ;;  %v2887_v22 = vsel %vm2883_vm3, %v2867_v13, %v2870_v60 }
 0x31f   :  { %v10506_v3 = vadd.s32 4294967294, %v3023_v34  ;;  %v2893_v42 = vsel %vm2885_vm6, %v2876_v31, %v2892_v17  ;;  %v2896_v8 = vsel %vm2886_vm7, %v2882_v2, 1326507024  ;;  %v2899_v38 = vshll.u32 %v2859_v21, 8 }
 0x320   :  { %vm7756_vm5 = vcmp.eq.s32.totalorder %v13876_v39, 0  ;;  %v2889_v49 = vsel %vm2885_vm6, %v2873_v50, %v2888_v18  ;;  %v2894_v27 = vsel %vm2884_vm4, %v2891_v35, %v2893_v42  ;;  %v2897_v0 = vsel %vm2885_vm6, %v2879_v10, %v2896_v8 }
 0x321   :  { %vm10507_vm8 = vcmp.lt.s32.totalorder %v10506_v3, 0  ;;  %vm7755_vm9 = vcmp.lt.s32.totalorder %v13876_v39, 2  ;;  %v2898_v12 = vsel %vm2884_vm4, %v2895_v44, %v2897_v0  ;;  %vm2735_vm10 = vweird.f32 %v13562_v16  ;;  %v13965_v16 = vld [vmem:[%s16164_s1] ss:$0 sm:$0xff] }
 0x322   :  { %v3026_v48 = vsel %vm10507_vm8, 0, %v10506_v3  ;;  %v13920_v11 = vmul.u32.u64.low %v2899_v38, %v2894_v27  ;;  %v13921_v53 = vmul.u32.u64.high %v2899_v38, %v2894_v27, %v13920_v11  ;;  %v3011_v4 = vadd.s32 %v13835_v41, %v13841_v45 }
 0x323   :  { %v3027_v61 = vsub.s32 32, %v3026_v48  ;;  %v3031_v29 = vsub.s32 4294967266, %v3026_v48  ;;  %v3042_v25 = vsel %vm2957_vm1, %v3041_v47, %v13872_v52  ;;  %vm2738_vm11 = vcmp.lt.s32.totalorder %v13874_v5, 2 }
 0x324   :  { %v2890_v56 = vsel %vm2884_vm4, %v2887_v22, %v2889_v49  ;;  %v13932_v40 = vmul.u32.u64.low %v2899_v38, %v2898_v12  ;;  %v13933_v1 = vmul.u32.u64.high %v2899_v38, %v2898_v12, %v13932_v40  ;;  %v3028_v19 = vshll.u32 %v13883_v51, %v3026_v48  ;;  %v194_v22 = vpop.permute.xlu0 %193 }
 0x325   :  { %v3029_v63 = vshrl.u32 %v3011_v4, %v3027_v61  ;;  %v3032_v6 = vadd.s32 127, %v3031_v29  ;;  %v3166_v57 = vand.u32 2139095040, %v13888_v62  ;;  %vm2739_vm12 = vcmp.eq.s32.totalorder %v13874_v5, 0 }
 0x326   :  { %v11085_v41 = vpop.eup %11084  ;;  %vm2742_vm13 = vcmp.eq.s32.totalorder %v13874_v5, 2  ;;  %v3044_v45 = vsel %vm13907_vm2, 0, %v3042_v25  ;;  %v2909_v52 = vadd.s32 1, %v13921_v53  ;;  %v2906_v32 = vmul.u32 %v2899_v38, %v2890_v56 }
 0x327   :  { %v11087_v55 = vpop.eup %11086  ;;  %v2743_v9 = vxor.u32 2147483648, %v11085_v41  ;;  %v3030_v36 = vor.u32 %v3029_v63, %v3028_v19  ;;  %v3033_v54 = vshll.u32 %v3032_v6, 23  ;;  %v3167_v58 = vshrl.u32 %v3166_v57, 23 }
 0x328   :  { %v2740_v51 = vxor.u32 2147483648, %v11087_v55  ;;  %vm2908_vm14 = vc.u32 %v13933_v1, %v13920_v11  ;;  %v3163_v59 = vand.u32 2147483647, %v13888_v62  ;;  %v3048_v42 = vadd.s32 3, %v3044_v45 }
 0x329   :  { %v2744_v60 = vsel %vm2742_vm13, %v2743_v9, %v11087_v55  ;;  %v7761_v50 = vsel %vm7759_vm0, %v2743_v9, %v11087_v55  ;;  %v3034_v46 = vor.u32 4788187, %v3033_v54  ;;  %v3037_v43 = vcvt.s32.f32 %v3030_v36 }
 0x32a   :  { %v2741_v7 = vsel %vm2739_vm12, %v11085_v41, %v2740_v51  ;;  %v7758_v31 = vsel %vm7756_vm5, %v11085_v41, %v2740_v51  ;;  %v2910_v10 = vsel %vm2908_vm14, %v2909_v52, %v13921_v53  ;;  %v10512_v47 = vadd.s32 4294967169, %v3167_v58 }
 0x32b   :  { %v2745_v21 = vsel %vm2738_vm11, %v2741_v7, %v2744_v60  ;;  %v7762_v2 = vsel %vm7755_vm9, %v7758_v31, %v7761_v50  ;;  %v3035_v34 = vand.u32 2147483647, %v3034_v46  ;;  %v2911_v13 = vadd.s32 %v2910_v10, %v2906_v32 }
 0x32c   :  { %v2746_v35 = vsel %vm2735_vm10, nan, %v2745_v21  ;;  %v7763_v3 = vsel %vm2735_vm10, nan, %v7762_v2  ;;  %v3173_v18 = vadd.s32 1, %v10512_v47  ;;  %v3170_v39 = vand.u32 8388607, %v3163_v59 }
 0x32d   :  { %5369 = vst [vmem:[#allocation2 + $0x160] sm:$0xff] %v2746_v35  ;;  %10361 = vst [vmem:[#allocation2 + $0x168] sm:$0xff] %v7763_v3  ;;  %v3038_v17 = vmul.f32 %v3037_v43, %v3035_v34  ;;  %v2912_v44 = vadd.s32 536870912, %v2911_v13  ;;  %v13968_v27 = vmul.f32 %v13965_v16, %v194_v22  ;;  %v13975_v53 = vand.u32 3, %v3044_v45 }
 0x32e   :  { %vm3174_vm15 = vcmp.gt.s32.totalorder %v3173_v18, 0  ;;  %vm2853_vm3 = vcmp.lt.s32.totalorder %v13791_v15, 0  ;;  %v13978_v61 = vand.u32 3, %v3048_v42  ;;  %v3171_v25 = vor.u32 8388608, %v3170_v39 }
 0x32f   :  { %v3039_v5 = vxor.u32 2147483648, %v3038_v17  ;;  %v2913_v8 = vshrl.u32 %v2912_v44, 30  ;;  %v3175_v38 = vsel %vm3174_vm15, %v3173_v18, 0  ;;  %v3062_v19 = vand.u32 2139095040, %v13968_v27 }
 0x330   :  { %v3177_v49 = vand.u32 31, %v3175_v38  ;;  %v2907_v9 = vadd.s32 %v13920_v11, %v13933_v1  ;;  %v13997_v54 = vshrl.u32 %v3175_v38, 5  ;;  %vm3051_vm4 = vcmp.eq.s32.totalorder %v13978_v61, 0 }
 0x331   :  { %v3040_v0 = vsel %vm2957_vm1, %v3039_v5, %v3038_v17  ;;  %v2914_v48 = vshll.u32 %v2913_v8, 30  ;;  %v2937_v56 = vsub.s32 4, %v2913_v8  ;;  %vm3054_vm1 = vcmp.eq.s32.totalorder %v13978_v61, 2 }
 0x332   :  { %v3043_v12 = vsel %vm13907_vm2, %v13702_v33, %v3040_v0  ;;  %v3178_v4 = vsub.s32 32, %v3177_v49  ;;  %v3180_v63 = vshll.u32 %v11217_v20, %v3177_v49  ;;  %v3183_v6 = vshll.u32 %v11218_v24, %v3177_v49 }
 0x333   :  { %11088 = vcosq.f32 %v3043_v12  ;;  %v13980_v29 = vsub.s32 %v2911_v13, %v2914_v48  ;;  %v3186_v41 = vshll.u32 %v11219_v26, %v3177_v49  ;;  %v3189_v52 = vshll.u32 %v11220_v28, %v3177_v49 }
 0x334   :  { %11090 = vsinq.f32 %v3043_v12  ;;  %v3181_v40 = vshrl.u32 %v11218_v24, %v3178_v4  ;;  %v3184_v57 = vshrl.u32 %v11219_v26, %v3178_v4  ;;  %v3187_v45 = vshrl.u32 %v11220_v28, %v3178_v4 }
 0x335   :  { %v2917_v23 = vsub.s32 0, %v13980_v29  ;;  %v3190_v55 = vshrl.u32 %v11221_v30, %v3178_v4  ;;  %vm8068_vm2 = vcmp.eq.s32.totalorder %v13975_v53, 2  ;;  %vm8065_vm6 = vcmp.eq.s32.totalorder %v13975_v53, 0 }
 0x336   :  { %v3182_v58 = vor.u32 %v3181_v40, %v3180_v63  ;;  %v3185_v51 = vor.u32 %v3184_v57, %v3183_v6  ;;  %v3188_v32 = vor.u32 %v3187_v45, %v3186_v41  ;;  %vm3050_vm7 = vcmp.lt.s32.totalorder %v13978_v61, 2 }
 0x337   :  { %v10501_v36 = vmin.u32 %v2917_v23, %v13980_v29  ;;  %v3191_v60 = vor.u32 %v3190_v55, %v3189_v52  ;;  %vm8064_vm0 = vcmp.lt.s32.totalorder %v13975_v53, 2  ;;  %v14003_v46 = vshll.u32 %v3171_v25, 8 }
 0x338   :  { %v3059_v11 = vand.u32 2147483647, %v13968_v27  ;;  %v3063_v1 = vshrl.u32 %v3062_v19, 23  ;;  %vm3047_vm5 = vweird.f32 %v13702_v33  ;;  %v2938_v43 = vsel %vm2853_vm3, %v2937_v56, %v2913_v8 }
 0x339   :  { %v2919_v50 = vclz %v10501_v36  ;;  %v3179_v7 = vshrl.u32 %v11217_v20, %v3178_v4  ;;  %v3192_v31 = vshll.u32 %v11221_v30, %v3177_v49  ;;  %v3193_v10 = vshrl.u32 %v11222_v37, %v3178_v4 }
 0x33a   :  { %vm14014_vm8 = vcmp.le.f32.partialorder %v2851_v14, 0.7853982  ;;  %vm3195_vm9 = vcmp.lt.s32.totalorder %v13997_v54, 1  ;;  %vm3197_vm10 = vcmp.lt.s32.totalorder %v13997_v54, 3  ;;  %vm3198_vm11 = vcmp.lt.s32.totalorder %v13997_v54, 4 }
 0x33b   :  { %v10502_v21 = vadd.s32 4294967294, %v2919_v50  ;;  %v3194_v2 = vor.u32 %v3193_v10, %v3192_v31  ;;  %v3200_v34 = vsel %vm3198_vm11, %v3188_v32, 2102212464  ;;  %v3203_v13 = vsel %vm3195_vm9, %v3182_v58, %v3185_v51 }
 0x33c   :  { %v3204_v14 = vsel %vm3198_vm11, %v3191_v60, 920167782  ;;  %vm3196_vm13 = vcmp.lt.s32.totalorder %v13997_v54, 2  ;;  %v3199_v3 = vsel %vm3195_vm9, %v3179_v7, %v3182_v58  ;;  %v3201_v42 = vsel %vm3197_vm10, %v3185_v51, %v3200_v34 }
 0x33d   :  { %v11089_v35 = vpop.eup %11088  ;;  %vm10503_vm12 = vcmp.lt.s32.totalorder %v10502_v21, 0  ;;  %v3205_v18 = vsel %vm3197_vm10, %v3188_v32, %v3204_v14  ;;  %v3207_v5 = vsel %vm3195_vm9, %v3185_v51, %v3188_v32  ;;  %v3208_v4 = vsel %vm3198_vm11, %v3194_v2, 1326507024  ;;  %v209_v51 = vpop.permute.xlu1 %208 }
 0x33e   :  { %v11091_v17 = vpop.eup %11090  ;;  %v3055_v44 = vxor.u32 2147483648, %v11089_v35  ;;  %v2922_v22 = vsel %vm10503_vm12, 0, %v10502_v21  ;;  %v3206_v49 = vsel %vm3196_vm13, %v3203_v13, %v3205_v18  ;;  %v10508_v6 = vadd.s32 4294967169, %v3063_v1 }
 0x33f   :  { %v3052_v8 = vxor.u32 2147483648, %v11091_v17  ;;  %v2923_v39 = vsub.s32 32, %v2922_v22  ;;  %v2927_v38 = vsub.s32 4294967266, %v2922_v22  ;;  %v2924_v12 = vshll.u32 %v13980_v29, %v2922_v22 }
 0x340   :  { %v3056_v0 = vsel %vm3054_vm1, %v3055_v44, %v11091_v17  ;;  %v8070_v48 = vsel %vm8068_vm2, %v3055_v44, %v11091_v17  ;;  %v3209_v29 = vsel %vm3197_vm10, %v3191_v60, %v3208_v4  ;;  %v2940_v61 = vsel %vm14014_vm8, 0, %v2938_v43 }
 0x341   :  { %v3053_v25 = vsel %vm3051_vm4, %v11089_v35, %v3052_v8  ;;  %v8067_v56 = vsel %vm8065_vm6, %v11089_v35, %v3052_v8  ;;  %v2925_v40 = vshrl.u32 %v2907_v9, %v2923_v39  ;;  %v2928_v19 = vadd.s32 127, %v2927_v38 }
 0x342   :  { %v3057_v23 = vsel %vm3050_vm7, %v3053_v25, %v3056_v0  ;;  %v8071_v63 = vsel %vm8064_vm0, %v8067_v56, %v8070_v48  ;;  %v3210_v53 = vsel %vm3196_vm13, %v3207_v5, %v3209_v29  ;;  %v3202_v32 = vsel %vm3196_vm13, %v3199_v3, %v3201_v42  ;;  %v204_v56 = vpop.permute.xlu0 %203 }
 0x343   :  { %v3058_v57 = vsel %vm3047_vm5, nan, %v3057_v23  ;;  %v8072_v41 = vsel %vm3047_vm5, nan, %v8071_v63  ;;  %v2926_v45 = vor.u32 %v2925_v40, %v2924_v12  ;;  %v2929_v52 = vshll.u32 %v2928_v19, 23 }
 0x344   :  { %5372 = vst [vmem:[#allocation2 + $0x190] sm:$0xff] %v3058_v57  ;;  %10364 = vst [vmem:[#allocation2 + $0x198] sm:$0xff] %v8072_v41  ;;  %v14064_v55 = vmul.u32.u64.low %v14003_v46, %v3206_v49  ;;  %v14065_v9 = vmul.u32.u64.high %v14003_v46, %v3206_v49, %v14064_v55  ;;  %v14069_v58 = vmul.u32.u64.low %v14003_v46, %v3210_v53  ;;  %v14070_v33 = vmul.u32.u64.high %v14003_v46, %v3210_v53, %v14069_v58 }
 0x345   :  { %v2930_v36 = vor.u32 4788187, %v2929_v52  ;;  %v3069_v60 = vadd.s32 1, %v10508_v6  ;;  %v2933_v1 = vcvt.s32.f32 %v2926_v45  ;;  %v2944_v43 = vadd.s32 3, %v2940_v61 }
 0x346   :  { %v3221_v7 = vadd.s32 1, %v14065_v9  ;;  %v3066_v31 = vand.u32 8388607, %v3059_v11  ;;  %v14078_v10 = vmul.f32 %v13965_v16, %v209_v51  ;;  %v3218_v2 = vmul.u32 %v14003_v46, %v3202_v32 }
 0x347   :  { %v2931_v50 = vand.u32 2147483647, %v2930_v36  ;;  %vm3070_vm14 = vcmp.gt.s32.totalorder %v3069_v60, 0  ;;  %vm3220_vm15 = vc.u32 %v14070_v33, %v14064_v55  ;;  %v14084_v35 = vand.u32 3, %v2944_v43 }
 0x348   :  { %v3071_v54 = vsel %vm3070_vm14, %v3069_v60, 0  ;;  %v3222_v34 = vsel %vm3220_vm15, %v3221_v7, %v14065_v9  ;;  %v14086_v3 = vand.u32 3, %v2940_v61  ;;  %v3067_v17 = vor.u32 8388608, %v3066_v31 }
 0x349   :  { %v2934_v21 = vmul.f32 %v2933_v1, %v2931_v50  ;;  %v3073_v13 = vand.u32 31, %v3071_v54  ;;  %v3223_v18 = vadd.s32 %v3222_v34, %v3218_v2  ;;  %v14088_v44 = vshrl.u32 %v3071_v54, 5 }
 0x34a   :  { %v3374_v42 = vand.u32 2139095040, %v14078_v10  ;;  %v3371_v45 = vand.u32 2147483647, %v14078_v10  ;;  %v14108_v52 = vmul.f32 %v13965_v16, %v204_v56  ;;  %vm3165_vm1 = vcmp.lt.s32.totalorder %v13888_v62, 0 }
 0x34b   :  { %v2935_v14 = vxor.u32 2147483648, %v2934_v21  ;;  %v3074_v22 = vsub.s32 32, %v3073_v13  ;;  %v3224_v5 = vadd.s32 536870912, %v3223_v18  ;;  %v3076_v8 = vshll.u32 %v11217_v20, %v3073_v13 }
 0x34c   :  { %v3079_v39 = vshll.u32 %v11218_v24, %v3073_v13  ;;  %v3085_v48 = vshll.u32 %v11220_v28, %v3073_v13  ;;  %v3082_v40 = vshll.u32 %v11219_v26, %v3073_v13  ;;  %v3088_v19 = vshll.u32 %v11221_v30, %v3073_v13 }
 0x34d   :  { %v2936_v46 = vsel %vm2853_vm3, %v2935_v14, %v2934_v21  ;;  %v3077_v49 = vshrl.u32 %v11218_v24, %v3074_v22  ;;  %v3080_v0 = vshrl.u32 %v11219_v26, %v3074_v22  ;;  %v3225_v12 = vshrl.u32 %v3224_v5, 30 }
 0x34e   :  { %v2939_v38 = vsel %vm14014_vm8, %v13791_v15, %v2936_v46  ;;  %v3083_v4 = vshrl.u32 %v11220_v28, %v3074_v22  ;;  %v3086_v25 = vshrl.u32 %v11221_v30, %v3074_v22  ;;  %v3089_v47 = vshrl.u32 %v11222_v37, %v3074_v22 }
 0x34f   :  { %11092 = vcosq.f32 %v2939_v38  ;;  %v3226_v23 = vshll.u32 %v3225_v12, 30  ;;  %v3078_v63 = vor.u32 %v3077_v49, %v3076_v8  ;;  %v3081_v29 = vor.u32 %v3080_v0, %v3079_v39 }
 0x350   :  { %11094 = vsinq.f32 %v2939_v38  ;;  %v3087_v6 = vor.u32 %v3086_v25, %v3085_v48  ;;  %v3084_v57 = vor.u32 %v3083_v4, %v3082_v40  ;;  %v3090_v41 = vor.u32 %v3089_v47, %v3088_v19 }
 0x351   :  { %vm7965_vm3 = vcmp.eq.s32.totalorder %v14086_v3, 2  ;;  %v14112_v61 = vsub.s32 %v3223_v18, %v3226_v23  ;;  %vm3094_vm2 = vcmp.lt.s32.totalorder %v14088_v44, 4  ;;  %vm2947_vm4 = vcmp.eq.s32.totalorder %v14084_v35, 0 }
 0x352   :  { %vm2950_vm6 = vcmp.eq.s32.totalorder %v14084_v35, 2  ;;  %vm7962_vm7 = vcmp.eq.s32.totalorder %v14086_v3, 0  ;;  %vm3091_vm0 = vcmp.lt.s32.totalorder %v14088_v44, 1  ;;  %v3100_v53 = vsel %vm3094_vm2, %v3087_v6, 920167782 }
 0x353   :  { %v3375_v9 = vshrl.u32 %v3374_v42, 23  ;;  %vm2946_vm5 = vcmp.lt.s32.totalorder %v14084_v35, 2  ;;  %vm7961_vm8 = vcmp.lt.s32.totalorder %v14086_v3, 2  ;;  %v3229_v36 = vsub.s32 0, %v14112_v61 }
 0x354   :  { %vm3093_vm9 = vcmp.lt.s32.totalorder %v14088_v44, 3  ;;  %v3099_v58 = vsel %vm3091_vm0, %v3078_v63, %v3081_v29  ;;  %v3107_v51 = vshll.u32 %v3067_v17, 8  ;;  %vm2943_vm10 = vweird.f32 %v13791_v15 }
 0x355   :  { %vm14130_vm11 = vcmp.le.f32.partialorder %v3163_v59, 0.7853982  ;;  %v3096_v60 = vsel %vm3094_vm2, %v3084_v57, 2102212464  ;;  %v3101_v50 = vsel %vm3093_vm9, %v3084_v57, %v3100_v53  ;;  %v3104_v1 = vsel %vm3094_vm2, %v3090_v41, 1326507024 }
 0x356   :  { %v3378_v43 = vand.u32 8388607, %v3371_v45  ;;  %v10513_v7 = vmin.u32 %v3229_v36, %v14112_v61  ;;  %v3075_v31 = vshrl.u32 %v11217_v20, %v3074_v22  ;;  %vm3092_vm12 = vcmp.lt.s32.totalorder %v14088_v44, 2 }
 0x357   :  { %v3103_v59 = vsel %vm3091_vm0, %v3081_v29, %v3084_v57  ;;  %v3249_v21 = vsub.s32 4, %v3225_v12  ;;  %v3102_v2 = vsel %vm3092_vm12, %v3099_v58, %v3101_v50  ;;  %v3105_v54 = vsel %vm3093_vm9, %v3087_v6, %v3104_v1 }
 0x358   :  { %v10520_v34 = vadd.s32 4294967169, %v3375_v9  ;;  %v3219_v14 = vadd.s32 %v14064_v55, %v14070_v33  ;;  %v3231_v18 = vclz %v10513_v7  ;;  %v3095_v17 = vsel %vm3091_vm0, %v3075_v31, %v3078_v63 }
 0x359   :  { %v11093_v13 = vpop.eup %11092  ;;  %v3097_v22 = vsel %vm3093_vm9, %v3081_v29, %v3096_v60  ;;  %v3106_v5 = vsel %vm3092_vm12, %v3103_v59, %v3105_v54  ;;  %v14159_v8 = vmul.u32.u64.low %v3107_v51, %v3102_v2  ;;  %v14160_v39 = vmul.u32.u64.high %v3107_v51, %v3102_v2, %v14159_v8 }
 0x35a   :  { %v11095_v42 = vpop.eup %11094  ;;  %v2951_v46 = vxor.u32 2147483648, %v11093_v13  ;;  %v10514_v49 = vadd.s32 4294967294, %v3231_v18  ;;  %v14163_v0 = vmul.u32.u64.low %v3107_v51, %v3106_v5  ;;  %v14164_v55 = vmul.u32.u64.high %v3107_v51, %v3106_v5, %v14163_v0 }
 0x35b   :  { %v2948_v38 = vxor.u32 2147483648, %v11095_v42  ;;  %v3250_v4 = vsel %vm3165_vm1, %v3249_v21, %v3225_v12  ;;  %v3381_v25 = vadd.s32 1, %v10520_v34  ;;  %v3098_v19 = vsel %vm3092_vm12, %v3095_v17, %v3097_v22 }
 0x35c   :  { %v2952_v33 = vsel %vm2950_vm6, %v2951_v46, %v11095_v42  ;;  %v7967_v48 = vsel %vm7965_vm3, %v2951_v46, %v11095_v42  ;;  %vm10515_vm13 = vcmp.lt.s32.totalorder %v10514_v49, 0  ;;  %v3117_v12 = vadd.s32 1, %v14160_v39 }
 0x35d   :  { %v2949_v56 = vsel %vm2947_vm4, %v11093_v13, %v2948_v38  ;;  %v7964_v40 = vsel %vm7962_vm7, %v11093_v13, %v2948_v38  ;;  %v3234_v63 = vsel %vm10515_vm13, 0, %v10514_v49  ;;  %v3252_v44 = vsel %vm14130_vm11, 0, %v3250_v4 }
 0x35e   :  { %v2953_v47 = vsel %vm2946_vm5, %v2949_v56, %v2952_v33  ;;  %v7968_v23 = vsel %vm7961_vm8, %v7964_v40, %v7967_v48  ;;  %v3235_v57 = vsub.s32 32, %v3234_v63  ;;  %v3239_v35 = vsub.s32 4294967266, %v3234_v63 }
 0x35f   :  { %v2954_v29 = vsel %vm2943_vm10, nan, %v2953_v47  ;;  %v7969_v6 = vsel %vm2943_vm10, nan, %v7968_v23  ;;  %v3114_v41 = vmul.u32 %v3107_v51, %v3098_v19  ;;  %vm3116_vm14 = vc.u32 %v14164_v55, %v14159_v8 }
 0x360   :  { %5371 = vst [vmem:[#allocation2 + $0x180] sm:$0xff] %v2954_v29  ;;  %10363 = vst [vmem:[#allocation2 + $0x188] sm:$0xff] %v7969_v6  ;;  %vm3382_vm15 = vcmp.gt.s32.totalorder %v3381_v25, 0  ;;  %v3236_v3 = vshll.u32 %v14112_v61, %v3234_v63  ;;  %v3237_v53 = vshrl.u32 %v3219_v14, %v3235_v57  ;;  %v3118_v9 = vsel %vm3116_vm14, %v3117_v12, %v14160_v39 }
 0x361   :  { %v3383_v36 = vsel %vm3382_vm15, %v3381_v25, 0  ;;  %v3240_v15 = vadd.s32 127, %v3239_v35  ;;  %v3119_v58 = vadd.s32 %v3118_v9, %v3114_v41  ;;  %v3379_v60 = vor.u32 8388608, %v3378_v43 }
 0x362   :  { %v3385_v50 = vand.u32 31, %v3383_v36  ;;  %v3238_v1 = vor.u32 %v3237_v53, %v3236_v3  ;;  %v3256_v7 = vadd.s32 3, %v3252_v44  ;;  %v3270_v51 = vand.u32 2139095040, %v14108_v52 }
 0x363   :  { %v3241_v31 = vshll.u32 %v3240_v15, 23  ;;  %v3120_v59 = vadd.s32 536870912, %v3119_v58  ;;  %v14196_v34 = vshll.u32 %v3379_v60, 8  ;;  %v3267_v61 = vand.u32 2147483647, %v14108_v52 }
 0x364   :  { %v3386_v21 = vsub.s32 32, %v3385_v50  ;;  %v3245_v13 = vcvt.s32.f32 %v3238_v1  ;;  %v14199_v14 = vand.u32 3, %v3256_v7  ;;  %v14201_v18 = vand.u32 3, %v3252_v44 }
 0x365   :  { %v3242_v2 = vor.u32 4788187, %v3241_v31  ;;  %v14194_v54 = vshrl.u32 %v3120_v59, 30  ;;  %v3388_v5 = vshll.u32 %v11217_v20, %v3385_v50  ;;  %v3391_v39 = vshll.u32 %v11218_v24, %v3385_v50 }
 0x366   :  { %v3389_v43 = vshrl.u32 %v11218_v24, %v3386_v21  ;;  %v3392_v42 = vshrl.u32 %v11219_v26, %v3386_v21  ;;  %v3395_v46 = vshrl.u32 %v11220_v28, %v3386_v21  ;;  %v3398_v38 = vshrl.u32 %v11221_v30, %v3386_v21 }
 0x367   :  { %v3243_v17 = vand.u32 2147483647, %v3242_v2  ;;  %v3122_v22 = vshll.u32 %v14194_v54, 30  ;;  %v3271_v49 = vshrl.u32 %v3270_v51, 23  ;;  %v3394_v48 = vshll.u32 %v11219_v26, %v3385_v50 }
 0x368   :  { %v3401_v4 = vshrl.u32 %v11222_v37, %v3386_v21  ;;  %v3384_v25 = vshrl.u32 %v3383_v36, 5  ;;  %v3390_v56 = vor.u32 %v3389_v43, %v3388_v5  ;;  %v3397_v40 = vshll.u32 %v11220_v28, %v3385_v50 }
 0x369   :  { %v3246_v0 = vmul.f32 %v3245_v13, %v3243_v17  ;;  %v14210_v33 = vsub.s32 %v3119_v58, %v3122_v22  ;;  %v3400_v19 = vshll.u32 %v11221_v30, %v3385_v50  ;;  %v3393_v63 = vor.u32 %v3392_v42, %v3391_v39 }
 0x36a   :  { %v3396_v12 = vor.u32 %v3395_v46, %v3394_v48  ;;  %v3115_v29 = vadd.s32 %v14159_v8, %v14164_v55  ;;  %v3387_v6 = vshrl.u32 %v11217_v20, %v3386_v21  ;;  %v3399_v57 = vor.u32 %v3398_v38, %v3397_v40 }
 0x36b   :  { %v3247_v47 = vxor.u32 2147483648, %v3246_v0  ;;  %v3125_v23 = vsub.s32 0, %v14210_v33  ;;  %v10516_v44 = vadd.s32 4294967169, %v3271_v49  ;;  %v3145_v3 = vsub.s32 4, %v14194_v54 }
 0x36c   :  { %v3402_v53 = vor.u32 %v3401_v4, %v3400_v19  ;;  %vm3403_vm3 = vcmp.lt.s32.totalorder %v3384_v25, 1  ;;  %vm3404_vm2 = vcmp.lt.s32.totalorder %v3384_v25, 2  ;;  %vm3406_vm4 = vcmp.lt.s32.totalorder %v3384_v25, 4 }
 0x36d   :  { %v3248_v35 = vsel %vm3165_vm1, %v3247_v47, %v3246_v0  ;;  %v10509_v41 = vmin.u32 %v3125_v23, %v14210_v33  ;;  %vm3061_vm6 = vcmp.lt.s32.totalorder %v13968_v27, 0  ;;  %v3408_v55 = vsel %vm3406_vm4, %v3396_v12, 2102212464 }
 0x36e   :  { %v3251_v9 = vsel %vm14130_vm11, %v13888_v62, %v3248_v35  ;;  %v3411_v36 = vsel %vm3403_vm3, %v3390_v56, %v3393_v63  ;;  %vm3405_vm1 = vcmp.lt.s32.totalorder %v3384_v25, 3  ;;  %v3412_v15 = vsel %vm3406_vm4, %v3399_v57, 920167782 }
 0x36f   :  { %11096 = vcosq.f32 %v3251_v9  ;;  %v3127_v8 = vclz %v10509_v41  ;;  %v3415_v58 = vsel %vm3403_vm3, %v3393_v63, %v3396_v12  ;;  %v3407_v50 = vsel %vm3403_vm3, %v3387_v6, %v3390_v56 }
 0x370   :  { %11098 = vsinq.f32 %v3251_v9  ;;  %v3413_v1 = vsel %vm3405_vm1, %v3396_v12, %v3412_v15  ;;  %v3416_v7 = vsel %vm3406_vm4, %v3402_v53, 1326507024  ;;  %vm14230_vm7 = vcmp.le.f32.partialorder %v3059_v11, 0.7853982 }
 0x371   :  { %v10510_v60 = vadd.s32 4294967294, %v3127_v8  ;;  %v3409_v31 = vsel %vm3405_vm1, %v3393_v63, %v3408_v55  ;;  %v3414_v59 = vsel %vm3404_vm2, %v3411_v36, %v3413_v1  ;;  %v3417_v21 = vsel %vm3405_vm1, %v3399_v57, %v3416_v7 }
 0x372   :  { %v3277_v51 = vadd.s32 1, %v10516_v44  ;;  %v3418_v2 = vsel %vm3404_vm2, %v3415_v58, %v3417_v21  ;;  %v14237_v13 = vmul.u32.u64.low %v14196_v34, %v3414_v59  ;;  %v14238_v43 = vmul.u32.u64.high %v14196_v34, %v3414_v59, %v14237_v13 }
 0x373   :  { %vm10511_vm0 = vcmp.lt.s32.totalorder %v10510_v60, 0  ;;  %v14242_v22 = vmul.u32.u64.low %v14196_v34, %v3418_v2  ;;  %v14243_v11 = vmul.u32.u64.high %v14196_v34, %v3418_v2, %v14242_v22  ;;  %v3410_v5 = vsel %vm3404_vm2, %v3407_v50, %v3409_v31 }
 0x374   :  { %v3130_v17 = vsel %vm10511_vm0, 0, %v10510_v60  ;;  %vm3278_vm5 = vcmp.gt.s32.totalorder %v3277_v51, 0  ;;  %vm3255_vm8 = vweird.f32 %v13888_v62  ;;  %vm8270_vm9 = vcmp.lt.s32.totalorder %v14201_v18, 2 }
 0x375   :  { %v3131_v42 = vsub.s32 32, %v3130_v17  ;;  %v3135_v46 = vsub.s32 4294967266, %v3130_v17  ;;  %v3279_v39 = vsel %vm3278_vm5, %v3277_v51, 0  ;;  %vm8271_vm10 = vcmp.eq.s32.totalorder %v14201_v18, 0 }
 0x376   :  { %vm8274_vm11 = vcmp.eq.s32.totalorder %v14201_v18, 2  ;;  %v3132_v38 = vshll.u32 %v14210_v33, %v3130_v17  ;;  %v3429_v48 = vadd.s32 1, %v14238_v43  ;;  %v3281_v4 = vand.u32 31, %v3279_v39 }
 0x377   :  { %v3133_v49 = vshrl.u32 %v3115_v29, %v3131_v42  ;;  %v3136_v0 = vadd.s32 127, %v3135_v46  ;;  %v3146_v25 = vsel %vm3061_vm6, %v3145_v3, %v14194_v54  ;;  %v3426_v56 = vmul.u32 %v14196_v34, %v3410_v5 }
 0x378   :  { %vm3428_vm12 = vc.u32 %v14243_v11, %v14237_v13  ;;  %v14260_v40 = vand.u32 8388607, %v3267_v61  ;;  %vm3258_vm13 = vcmp.lt.s32.totalorder %v14199_v14, 2  ;;  %vm3259_vm14 = vcmp.eq.s32.totalorder %v14199_v14, 0 }
 0x379   :  { %v11097_v19 = vpop.eup %11096  ;;  %v3134_v33 = vor.u32 %v3133_v49, %v3132_v38  ;;  %v3137_v47 = vshll.u32 %v3136_v0, 23  ;;  %v3430_v23 = vsel %vm3428_vm12, %v3429_v48, %v14238_v43  ;;  %vm3262_vm15 = vcmp.eq.s32.totalorder %v14199_v14, 2 }
 0x37a   :  { %v11099_v63 = vpop.eup %11098  ;;  %v3263_v54 = vxor.u32 2147483648, %v11097_v19  ;;  %v3431_v34 = vadd.s32 %v3430_v23, %v3426_v56  ;;  %v3148_v6 = vsel %vm14230_vm7, 0, %v3146_v25  ;;  %v3282_v57 = vsub.s32 32, %v3281_v4 }
 0x37b   :  { %v3260_v12 = vxor.u32 2147483648, %v11099_v63  ;;  %v3138_v29 = vor.u32 4788187, %v3137_v47  ;;  %v3275_v3 = vor.u32 8388608, %v14260_v40  ;;  %v3141_v55 = vcvt.s32.f32 %v3134_v33  ;;  %v219_v40 = vpop.permute.xlu1 %218 }
 0x37c   :  { %v3264_v44 = vsel %vm3262_vm15, %v3263_v54, %v11099_v63  ;;  %v8276_v35 = vsel %vm8274_vm11, %v3263_v54, %v11099_v63  ;;  %v3432_v41 = vadd.s32 536870912, %v3431_v34  ;;  %v3152_v58 = vadd.s32 3, %v3148_v6 }
 0x37d   :  { %v3261_v53 = vsel %vm3259_vm14, %v11097_v19, %v3260_v12  ;;  %v8273_v9 = vsel %vm8271_vm10, %v11097_v19, %v3260_v12  ;;  %v3139_v8 = vand.u32 2147483647, %v3138_v29  ;;  %v3291_v31 = vshrl.u32 %v11220_v28, %v3282_v57 }
 0x37e   :  { %v3265_v36 = vsel %vm3258_vm13, %v3261_v53, %v3264_v44  ;;  %v8277_v15 = vsel %vm8270_vm9, %v8273_v9, %v8276_v35  ;;  %v14277_v60 = vshrl.u32 %v3432_v41, 30  ;;  %v14284_v59 = vand.u32 3, %v3148_v6 }
 0x37f   :  { %v3266_v50 = vsel %vm3255_vm8, nan, %v3265_v36  ;;  %v8278_v1 = vsel %vm3255_vm8, nan, %v8277_v15  ;;  %v3142_v7 = vmul.f32 %v3141_v55, %v3139_v8  ;;  %v3285_v18 = vshrl.u32 %v11218_v24, %v3282_v57 }
 0x380   :  { %5374 = vst [vmem:[#allocation2 + $0x1b0] sm:$0xff] %v3266_v50  ;;  %10366 = vst [vmem:[#allocation2 + $0x1b8] sm:$0xff] %v8278_v1  ;;  %v3434_v14 = vshll.u32 %v14277_v60, 30  ;;  %v3288_v21 = vshrl.u32 %v11219_v26, %v3282_v57  ;;  %v3290_v2 = vshll.u32 %v11219_v26, %v3281_v4  ;;  %v3294_v43 = vshrl.u32 %v11221_v30, %v3282_v57 }
 0x381   :  { %v3143_v51 = vxor.u32 2147483648, %v3142_v7  ;;  %v3297_v62 = vshrl.u32 %v11222_v37, %v3282_v57  ;;  %v3280_v22 = vshrl.u32 %v3279_v39, 5  ;;  %v3284_v42 = vshll.u32 %v11217_v20, %v3281_v4 }
 0x382   :  { %v14292_v17 = vsub.s32 %v3431_v34, %v3434_v14  ;;  %v3287_v46 = vshll.u32 %v11218_v24, %v3281_v4  ;;  %v3292_v38 = vor.u32 %v3291_v31, %v3290_v2  ;;  %v3293_v49 = vshll.u32 %v11220_v28, %v3281_v4 }
 0x383   :  { %v3144_v5 = vsel %vm3061_vm6, %v3143_v51, %v3142_v7  ;;  %v3296_v0 = vshll.u32 %v11221_v30, %v3281_v4  ;;  %v3286_v56 = vor.u32 %v3285_v18, %v3284_v42  ;;  %v14304_v19 = vand.u32 3, %v3152_v58 }
 0x384   :  { %v3147_v48 = vsel %vm14230_vm7, %v13968_v27, %v3144_v5  ;;  %v3437_v25 = vsub.s32 0, %v14292_v17  ;;  %v3289_v39 = vor.u32 %v3288_v21, %v3287_v46  ;;  %v3295_v33 = vor.u32 %v3294_v43, %v3293_v49 }
 0x385   :  { %11100 = vcosq.f32 %v3147_v48  ;;  %v3298_v47 = vor.u32 %v3297_v62, %v3296_v0  ;;  %vm3373_vm3 = vcmp.lt.s32.totalorder %v14078_v10, 0  ;;  %v3283_v4 = vshrl.u32 %v11217_v20, %v3282_v57  ;;  %v214_v0 = vpop.permute.xlu0 %213 }
 0x386   :  { %11102 = vsinq.f32 %v3147_v48  ;;  %v10521_v23 = vmin.u32 %v3437_v25, %v14292_v17  ;;  %vm3302_vm2 = vcmp.lt.s32.totalorder %v3280_v22, 4  ;;  %vm3299_vm4 = vcmp.lt.s32.totalorder %v3280_v22, 1 }
 0x387   :  { %v3304_v32 = vsel %vm3302_vm2, %v3292_v38, 2102212464  ;;  %v14309_v63 = vshll.u32 %v3275_v3, 8  ;;  %v14312_v54 = vmul.f32 %v13965_v16, %v219_v40  ;;  %vm3301_vm6 = vcmp.lt.s32.totalorder %v3280_v22, 3 }
 0x388   :  { %v3439_v34 = vclz %v10521_v23  ;;  %v3303_v12 = vsel %vm3299_vm4, %v3283_v4, %v3286_v56  ;;  %v3307_v29 = vsel %vm3299_vm4, %v3286_v56, %v3289_v39  ;;  %vm8171_vm1 = vcmp.eq.s32.totalorder %v14284_v59, 2 }
 0x389   :  { %v3305_v6 = vsel %vm3301_vm6, %v3289_v39, %v3304_v32  ;;  %v3308_v44 = vsel %vm3302_vm2, %v3295_v33, 920167782  ;;  %v3311_v35 = vsel %vm3299_vm4, %v3289_v39, %v3292_v38  ;;  %v3312_v41 = vsel %vm3302_vm2, %v3298_v47, 1326507024 }
 0x38a   :  { %vm8168_vm7 = vcmp.eq.s32.totalorder %v14284_v59, 0  ;;  %v10522_v57 = vadd.s32 4294967294, %v3439_v34  ;;  %vm3300_vm0 = vcmp.lt.s32.totalorder %v3280_v22, 2  ;;  %v3309_v53 = vsel %vm3301_vm6, %v3292_v38, %v3308_v44 }
 0x38b   :  { %v3313_v3 = vsel %vm3301_vm6, %v3295_v33, %v3312_v41  ;;  %vm3154_vm5 = vcmp.lt.s32.totalorder %v14304_v19, 2  ;;  %vm8167_vm8 = vcmp.lt.s32.totalorder %v14284_v59, 2  ;;  %v3457_v9 = vsub.s32 4, %v14277_v60 }
 0x38c   :  { %v3310_v8 = vsel %vm3300_vm0, %v3307_v29, %v3309_v53  ;;  %v3314_v55 = vsel %vm3300_vm0, %v3311_v35, %v3313_v3  ;;  %vm3151_vm9 = vweird.f32 %v13968_v27  ;;  %vm14322_vm10 = vcmp.le.f32.partialorder %v3371_v45, 0.7853982 }
 0x38d   :  { %vm10523_vm11 = vcmp.lt.s32.totalorder %v10522_v57, 0  ;;  %v3306_v15 = vsel %vm3300_vm0, %v3303_v12, %v3305_v6  ;;  %v14327_v58 = vmul.u32.u64.low %v14309_v63, %v3314_v55  ;;  %v14328_v50 = vmul.u32.u64.high %v14309_v63, %v3314_v55, %v14327_v58 }
 0x38e   :  { %vm3155_vm12 = vcmp.eq.s32.totalorder %v14304_v19, 0  ;;  %v3442_v1 = vsel %vm10523_vm11, 0, %v10522_v57  ;;  %v14332_v7 = vmul.u32.u64.low %v14309_v63, %v3310_v8  ;;  %v14333_v31 = vmul.u32.u64.high %v14309_v63, %v3310_v8, %v14332_v7 }
 0x38f   :  { %v3427_v45 = vadd.s32 %v14237_v13, %v14243_v11  ;;  %v3443_v14 = vsub.s32 32, %v3442_v1  ;;  %v3447_v18 = vsub.s32 4294967266, %v3442_v1  ;;  %v3582_v21 = vand.u32 2139095040, %v14312_v54  ;;  %v11101_v51 = vpop.eup %11100 }
 0x390   :  { %vm3158_vm13 = vcmp.eq.s32.totalorder %v14304_v19, 2  ;;  %v3458_v2 = vsel %vm3373_vm3, %v3457_v9, %v14277_v60  ;;  %v3322_v43 = vmul.u32 %v14309_v63, %v3306_v15  ;;  %v3579_v62 = vand.u32 2147483647, %v14312_v54  ;;  %v11103_v22 = vpop.eup %11102 }
 0x391   :  { %v3159_v42 = vxor.u32 2147483648, %v11101_v51  ;;  %v3444_v46 = vshll.u32 %v14292_v17, %v3442_v1  ;;  %v3445_v13 = vshrl.u32 %v3427_v45, %v3443_v14  ;;  %v3448_v11 = vadd.s32 127, %v3447_v18  ;;  %v229_v14 = vpop.permute.xlu1 %228 }
 0x392   :  { %v3156_v5 = vxor.u32 2147483648, %v11103_v22  ;;  %vm3324_vm14 = vc.u32 %v14328_v50, %v14332_v7  ;;  %v3325_v38 = vadd.s32 1, %v14333_v31  ;;  %v3583_v49 = vshrl.u32 %v3582_v21, 23 }
 0x393   :  { %v3160_v48 = vsel %vm3158_vm13, %v3159_v42, %v11103_v22  ;;  %v8173_v60 = vsel %vm8171_vm1, %v3159_v42, %v11103_v22  ;;  %v3446_v25 = vor.u32 %v3445_v13, %v3444_v46  ;;  %v3449_v56 = vshll.u32 %v3448_v11, 23 }
 0x394   :  { %v3157_v39 = vsel %vm3155_vm12, %v11101_v51, %v3156_v5  ;;  %v8170_v17 = vsel %vm8168_vm7, %v11101_v51, %v3156_v5  ;;  %v3326_v40 = vsel %vm3324_vm14, %v3325_v38, %v14333_v31  ;;  %v10528_v33 = vadd.s32 4294967169, %v3583_v49 }
 0x395   :  { %v3161_v47 = vsel %vm3154_vm5, %v3157_v39, %v3160_v48  ;;  %v8174_v23 = vsel %vm8167_vm8, %v8170_v17, %v8173_v60  ;;  %v3450_v4 = vor.u32 4788187, %v3449_v56  ;;  %v14361_v32 = vmul.f32 %v13965_v16, %v214_v0 }
 0x396   :  { %v3162_v63 = vsel %vm3151_vm9, nan, %v3161_v47  ;;  %v8175_v34 = vsel %vm3151_vm9, nan, %v8174_v23  ;;  %v3460_v12 = vsel %vm14322_vm10, 0, %v3458_v2  ;;  %v3327_v29 = vadd.s32 %v3326_v40, %v3322_v43 }
 0x397   :  { %5373 = vst [vmem:[#allocation2 + $0x1a0] sm:$0xff] %v3162_v63  ;;  %10365 = vst [vmem:[#allocation2 + $0x1a8] sm:$0xff] %v8175_v34  ;;  %v3451_v19 = vand.u32 2147483647, %v3450_v4  ;;  %v3453_v6 = vcvt.s32.f32 %v3446_v25  ;;  %v3586_v59 = vand.u32 8388607, %v3579_v62  ;;  %v14385_v51 = vadd.s32 %v14332_v7, %v14328_v50 }
 0x398   :  { %v3589_v44 = vadd.s32 1, %v10528_v33  ;;  %v3328_v35 = vadd.s32 536870912, %v3327_v29  ;;  %v3464_v57 = vadd.s32 3, %v3460_v12  ;;  %v3475_v27 = vand.u32 2147483647, %v14361_v32 }
 0x399   :  { %v3454_v41 = vmul.f32 %v3453_v6, %v3451_v19  ;;  %v3587_v8 = vor.u32 8388608, %v3586_v59  ;;  %v3478_v15 = vand.u32 2139095040, %v14361_v32  ;;  %v14375_v31 = vand.u32 3, %v3460_v12 }
 0x39a   :  { %vm3590_vm15 = vcmp.gt.s32.totalorder %v3589_v44, 0  ;;  %v3329_v53 = vshrl.u32 %v3328_v35, 30  ;;  %vm3269_vm2 = vcmp.lt.s32.totalorder %v14108_v52, 0  ;;  %v14381_v21 = vand.u32 3, %v3464_v57 }
 0x39b   :  { %v3591_v3 = vsel %vm3590_vm15, %v3589_v44, 0  ;;  %v3455_v9 = vxor.u32 2147483648, %v3454_v41  ;;  %v14389_v43 = vshll.u32 %v3587_v8, 8  ;;  %v3479_v22 = vshrl.u32 %v3478_v15, 23 }
 0x39c   :  { %v3593_v55 = vand.u32 31, %v3591_v3  ;;  %v3330_v58 = vshll.u32 %v3329_v53, 30  ;;  %v14393_v42 = vand.u32 8388607, %v3475_v27  ;;  %v14398_v13 = vmul.f32 %v13965_v16, %v229_v14 }
 0x39d   :  { %v3456_v1 = vsel %vm3373_vm3, %v3455_v9, %v3454_v41  ;;  %v3353_v50 = vsub.s32 4, %v3329_v53  ;;  %v14404_v49 = vshrl.u32 %v3591_v3, 5  ;;  %vm3470_vm3 = vcmp.eq.s32.totalorder %v14381_v21, 2 }
 0x39e   :  { %v3594_v45 = vsub.s32 32, %v3593_v55  ;;  %v3459_v18 = vsel %vm14322_vm10, %v14078_v10, %v3456_v1  ;;  %v14387_v2 = vsub.s32 %v3327_v29, %v3330_v58  ;;  %v3602_v11 = vshll.u32 %v11219_v26, %v3593_v55 }
 0x39f   :  { %11104 = vcosq.f32 %v3459_v18  ;;  %v3596_v0 = vshll.u32 %v11217_v20, %v3593_v55  ;;  %v3599_v48 = vshll.u32 %v11218_v24, %v3593_v55  ;;  %vm8480_vm4 = vcmp.eq.s32.totalorder %v14375_v31, 2 }
 0x3a0   :  { %11106 = vsinq.f32 %v3459_v18  ;;  %v3333_v36 = vsub.s32 0, %v14387_v2  ;;  %v3597_v46 = vshrl.u32 %v11218_v24, %v3594_v45  ;;  %v3600_v7 = vshrl.u32 %v11219_v26, %v3594_v45 }
 0x3a1   :  { %v3603_v5 = vshrl.u32 %v11220_v28, %v3594_v45  ;;  %v3605_v60 = vshll.u32 %v11220_v28, %v3593_v55  ;;  %v3606_v25 = vshrl.u32 %v11221_v30, %v3594_v45  ;;  %v3483_v56 = vor.u32 8388608, %v14393_v42 }
 0x3a2   :  { %v10517_v38 = vmin.u32 %v3333_v36, %v14387_v2  ;;  %vm3467_vm6 = vcmp.eq.s32.totalorder %v14381_v21, 0  ;;  %vm8477_vm1 = vcmp.eq.s32.totalorder %v14375_v31, 0  ;;  %v3598_v17 = vor.u32 %v3597_v46, %v3596_v0 }
 0x3a3   :  { %v3604_v16 = vor.u32 %v3603_v5, %v3602_v11  ;;  %v3601_v40 = vor.u32 %v3600_v7, %v3599_v48  ;;  %v10524_v33 = vadd.s32 4294967169, %v3479_v22  ;;  %vm3466_vm7 = vcmp.lt.s32.totalorder %v14381_v21, 2 }
 0x3a4   :  { %v3335_v39 = vclz %v10517_v38  ;;  %vm8476_vm0 = vcmp.lt.s32.totalorder %v14375_v31, 2  ;;  %v3354_v47 = vsel %vm3269_vm2, %v3353_v50, %v3329_v53  ;;  %v3607_v23 = vor.u32 %v3606_v25, %v3605_v60 }
 0x3a5   :  { %v3608_v4 = vshll.u32 %v11221_v30, %v3593_v55  ;;  %v3609_v63 = vshrl.u32 %v11222_v37, %v3594_v45  ;;  %vm3463_vm5 = vweird.f32 %v14078_v10  ;;  %v3595_v12 = vshrl.u32 %v11217_v20, %v3594_v45 }
 0x3a6   :  { %v10518_v34 = vadd.s32 4294967294, %v3335_v39  ;;  %vm3611_vm8 = vcmp.lt.s32.totalorder %v14404_v49, 1  ;;  %vm3614_vm9 = vcmp.lt.s32.totalorder %v14404_v49, 4  ;;  %vm14427_vm10 = vcmp.le.f32.partialorder %v3267_v61, 0.7853982 }
 0x3a7   :  { %v3610_v19 = vor.u32 %v3609_v63, %v3608_v4  ;;  %vm3612_vm11 = vcmp.lt.s32.totalorder %v14404_v49, 2  ;;  %vm3613_vm12 = vcmp.lt.s32.totalorder %v14404_v49, 3  ;;  %v3616_v6 = vsel %vm3614_vm9, %v3604_v16, 2102212464 }
 0x3a8   :  { %vm10519_vm13 = vcmp.lt.s32.totalorder %v10518_v34, 0  ;;  %v3615_v59 = vsel %vm3611_vm8, %v3595_v12, %v3598_v17  ;;  %v3619_v44 = vsel %vm3611_vm8, %v3598_v17, %v3601_v40  ;;  %v3620_v35 = vsel %vm3614_vm9, %v3607_v23, 920167782 }
 0x3a9   :  { %v11105_v41 = vpop.eup %11104  ;;  %v3338_v57 = vsel %vm10519_vm13, 0, %v10518_v34  ;;  %v3617_v61 = vsel %vm3613_vm12, %v3601_v40, %v3616_v6  ;;  %v3621_v53 = vsel %vm3613_vm12, %v3604_v16, %v3620_v35  ;;  %v3624_v3 = vsel %vm3614_vm9, %v3610_v19, 1326507024 }
 0x3aa   :  { %v11107_v9 = vpop.eup %11106  ;;  %v3471_v8 = vxor.u32 2147483648, %v11105_v41  ;;  %v3339_v55 = vsub.s32 32, %v3338_v57  ;;  %v3343_v15 = vsub.s32 4294967266, %v3338_v57  ;;  %v3623_v58 = vsel %vm3611_vm8, %v3601_v40, %v3604_v16 }
 0x3ab   :  { %v3468_v1 = vxor.u32 2147483648, %v11107_v9  ;;  %v3340_v45 = vshll.u32 %v14387_v2, %v3338_v57  ;;  %v3622_v14 = vsel %vm3612_vm11, %v3619_v44, %v3621_v53  ;;  %v3625_v18 = vsel %vm3613_vm12, %v3607_v23, %v3624_v3 }
 0x3ac   :  { %v3472_v22 = vsel %vm3470_vm3, %v3471_v8, %v11107_v9  ;;  %v8482_v36 = vsel %vm8480_vm4, %v3471_v8, %v11107_v9  ;;  %v3341_v46 = vshrl.u32 %v14385_v51, %v3339_v55  ;;  %v3344_v50 = vadd.s32 127, %v3343_v15 }
 0x3ad   :  { %v3469_v7 = vsel %vm3467_vm6, %v11105_v41, %v3468_v1  ;;  %v8479_v2 = vsel %vm8477_vm1, %v11105_v41, %v3468_v1  ;;  %v3626_v11 = vsel %vm3612_vm11, %v3623_v58, %v3625_v18  ;;  %v3485_v5 = vadd.s32 1, %v10524_v33 }
 0x3ae   :  { %v3473_v38 = vsel %vm3466_vm7, %v3469_v7, %v3472_v22  ;;  %v8483_v0 = vsel %vm8476_vm0, %v8479_v2, %v8482_v36  ;;  %v3342_v48 = vor.u32 %v3341_v46, %v3340_v45  ;;  %v3345_v16 = vshll.u32 %v3344_v50, 23 }
 0x3af   :  { %v3474_v51 = vsel %vm3463_vm5, nan, %v3473_v38  ;;  %v8484_v60 = vsel %vm3463_vm5, nan, %v8483_v0  ;;  %v14468_v25 = vmul.u32.u64.low %v14389_v43, %v3626_v11  ;;  %v14469_v39 = vmul.u32.u64.high %v14389_v43, %v3626_v11, %v14468_v25 }
 0x3b0   :  { %5376 = vst [vmem:[#allocation2 + $0x1d0] sm:$0xff] %v3474_v51  ;;  %10368 = vst [vmem:[#allocation2 + $0x1d8] sm:$0xff] %v8484_v60  ;;  %v3346_v17 = vor.u32 4788187, %v3345_v16  ;;  %v3356_v21 = vsel %vm14427_vm10, 0, %v3354_v47  ;;  %v14474_v31 = vmul.u32.u64.low %v14389_v43, %v3622_v14  ;;  %v14475_v40 = vmul.u32.u64.high %v14389_v43, %v3622_v14, %v14474_v31 }
 0x3b1   :  { %v3618_v33 = vsel %vm3612_vm11, %v3615_v59, %v3617_v61  ;;  %vm3486_vm14 = vcmp.gt.s32.totalorder %v3485_v5, 0  ;;  %v3349_v23 = vcvt.s32.f32 %v3342_v48  ;;  %v14482_v63 = vshll.u32 %v3483_v56, 8 }
 0x3b2   :  { %v3347_v10 = vand.u32 2147483647, %v3346_v17  ;;  %v3487_v4 = vsel %vm3486_vm14, %v3485_v5, 0  ;;  %v3360_v34 = vadd.s32 3, %v3356_v21  ;;  %v14484_v12 = vand.u32 3, %v3356_v21 }
 0x3b3   :  { %vm3636_vm15 = vc.u32 %v14469_v39, %v14474_v31  ;;  %v3489_v47 = vand.u32 31, %v3487_v4  ;;  %v3634_v6 = vmul.u32 %v14389_v43, %v3618_v33  ;;  %v3637_v49 = vadd.s32 1, %v14475_v40 }
 0x3b4   :  { %v3350_v19 = vmul.f32 %v3349_v23, %v3347_v10  ;;  %v3790_v59 = vand.u32 2139095040, %v14398_v13  ;;  %v14491_v44 = vshrl.u32 %v3487_v4, 5  ;;  %vm3581_vm3 = vcmp.lt.s32.totalorder %v14312_v54, 0 }
 0x3b5   :  { %v3490_v35 = vsub.s32 32, %v3489_v47  ;;  %v3492_v42 = vshll.u32 %v11217_v20, %v3489_v47  ;;  %v3495_v56 = vshll.u32 %v11218_v24, %v3489_v47  ;;  %v3638_v57 = vsel %vm3636_vm15, %v3637_v49, %v14475_v40 }
 0x3b6   :  { %v3351_v41 = vxor.u32 2147483648, %v3350_v19  ;;  %v3498_v61 = vshll.u32 %v11219_v26, %v3489_v47  ;;  %v3501_v53 = vshll.u32 %v11220_v28, %v3489_v47  ;;  %v3639_v3 = vadd.s32 %v3638_v57, %v3634_v6 }
 0x3b7   :  { %v3493_v43 = vshrl.u32 %v11218_v24, %v3490_v35  ;;  %v3496_v9 = vshrl.u32 %v11219_v26, %v3490_v35  ;;  %v3504_v8 = vshll.u32 %v11221_v30, %v3489_v47  ;;  %v3499_v15 = vshrl.u32 %v11220_v28, %v3490_v35 }
 0x3b8   :  { %v3352_v55 = vsel %vm3269_vm2, %v3351_v41, %v3350_v19  ;;  %v3502_v58 = vshrl.u32 %v11221_v30, %v3490_v35  ;;  %v3505_v1 = vshrl.u32 %v11222_v37, %v3490_v35  ;;  %v3640_v14 = vadd.s32 536870912, %v3639_v3 }
 0x3b9   :  { %v3355_v45 = vsel %vm14427_vm10, %v14108_v52, %v3352_v55  ;;  %v3494_v18 = vor.u32 %v3493_v43, %v3492_v42  ;;  %v3497_v22 = vor.u32 %v3496_v9, %v3495_v56  ;;  %v3500_v36 = vor.u32 %v3499_v15, %v3498_v61 }
 0x3ba   :  { %11108 = vcosq.f32 %v3355_v45  ;;  %v3503_v46 = vor.u32 %v3502_v58, %v3501_v53  ;;  %v3506_v50 = vor.u32 %v3505_v1, %v3504_v8  ;;  %v3361_v7 = vand.u32 3, %v3360_v34 }
 0x3bb   :  { %11110 = vsinq.f32 %v3355_v45  ;;  %v3641_v2 = vshrl.u32 %v3640_v14, 30  ;;  %vm3507_vm2 = vcmp.lt.s32.totalorder %v14491_v44, 1  ;;  %v3491_v11 = vshrl.u32 %v11217_v20, %v3490_v35 }
 0x3bc   :  { %vm3510_vm4 = vcmp.lt.s32.totalorder %v14491_v44, 4  ;;  %v3515_v29 = vsel %vm3507_vm2, %v3494_v18, %v3497_v22  ;;  %v3791_v5 = vshrl.u32 %v3790_v59, 23  ;;  %vm14517_vm6 = vcmp.le.f32.partialorder %v3579_v62, 0.7853982 }
 0x3bd   :  { %v3642_v0 = vshll.u32 %v3641_v2, 30  ;;  %vm3509_vm1 = vcmp.lt.s32.totalorder %v14491_v44, 3  ;;  %v3512_v48 = vsel %vm3510_vm4, %v3500_v36, 2102212464  ;;  %v3516_v16 = vsel %vm3510_vm4, %v3503_v46, 920167782 }
 0x3be   :  { %vm3508_vm7 = vcmp.lt.s32.totalorder %v14491_v44, 2  ;;  %v3517_v51 = vsel %vm3509_vm1, %v3500_v36, %v3516_v16  ;;  %v3519_v60 = vsel %vm3507_vm2, %v3497_v22, %v3500_v36  ;;  %v3520_v25 = vsel %vm3510_vm4, %v3506_v50, 1326507024 }
 0x3bf   :  { %v14525_v17 = vsub.s32 %v3639_v3, %v3642_v0  ;;  %v3665_v21 = vsub.s32 4, %v3641_v2  ;;  %v3511_v62 = vsel %vm3507_vm2, %v3491_v11, %v3494_v18  ;;  %v3518_v40 = vsel %vm3508_vm7, %v3515_v29, %v3517_v51 }
 0x3c0   :  { %v3513_v33 = vsel %vm3509_vm1, %v3497_v22, %v3512_v48  ;;  %v3521_v10 = vsel %vm3509_vm1, %v3503_v46, %v3520_v25  ;;  %v14532_v23 = vmul.u32.u64.low %v14482_v63, %v3518_v40  ;;  %v14533_v4 = vmul.u32.u64.high %v14482_v63, %v3518_v40, %v14532_v23 }
 0x3c1   :  { %vm3359_vm0 = vweird.f32 %v14108_v52  ;;  %vm8373_vm5 = vcmp.lt.s32.totalorder %v14484_v12, 2  ;;  %v3645_v34 = vsub.s32 0, %v14525_v17  ;;  %v3522_v47 = vsel %vm3508_vm7, %v3519_v60, %v3521_v10 }
 0x3c2   :  { %v3787_v19 = vand.u32 2147483647, %v14398_v13  ;;  %vm8374_vm8 = vcmp.eq.s32.totalorder %v14484_v12, 0  ;;  %v14544_v6 = vmul.u32.u64.low %v14482_v63, %v3522_v47  ;;  %v14545_v49 = vmul.u32.u64.high %v14482_v63, %v3522_v47, %v14544_v6 }
 0x3c3   :  { %v10536_v59 = vadd.s32 4294967169, %v3791_v5  ;;  %vm8377_vm9 = vcmp.eq.s32.totalorder %v14484_v12, 2  ;;  %v10529_v35 = vmin.u32 %v3645_v34, %v14525_v17  ;;  %v3666_v42 = vsel %vm3581_vm3, %v3665_v21, %v3641_v2 }
 0x3c4   :  { %v3514_v56 = vsel %vm3508_vm7, %v3511_v62, %v3513_v33  ;;  %v11109_v41 = vpop.eup %11108  ;;  %vm3362_vm10 = vcmp.lt.s32.totalorder %v3361_v7, 2  ;;  %vm3363_vm11 = vcmp.eq.s32.totalorder %v3361_v7, 0  ;;  %v3533_v57 = vadd.s32 1, %v14533_v4  ;;  %v224_v62 = vpop.permute.xlu0 %223 }
 0x3c5   :  { %v3797_v61 = vadd.s32 1, %v10536_v59  ;;  %v11111_v53 = vpop.eup %11110  ;;  %vm3366_vm12 = vcmp.eq.s32.totalorder %v3361_v7, 2  ;;  %v3367_v3 = vxor.u32 2147483648, %v11109_v41  ;;  %v3647_v43 = vclz %v10529_v35 }
 0x3c6   :  { %v3794_v9 = vand.u32 8388607, %v3787_v19  ;;  %v3364_v8 = vxor.u32 2147483648, %v11111_v53  ;;  %v3668_v55 = vsel %vm14517_vm6, 0, %v3666_v42  ;;  %v3530_v44 = vmul.u32 %v14482_v63, %v3514_v56 }
 0x3c7   :  { %vm3532_vm13 = vc.u32 %v14545_v49, %v14532_v23  ;;  %v3368_v15 = vsel %vm3366_vm12, %v3367_v3, %v11111_v53  ;;  %v8379_v58 = vsel %vm8377_vm9, %v3367_v3, %v11111_v53  ;;  %v10530_v1 = vadd.s32 4294967294, %v3647_v43 }
 0x3c8   :  { %v3534_v45 = vsel %vm3532_vm13, %v3533_v57, %v14533_v4  ;;  %v3365_v14 = vsel %vm3363_vm11, %v11109_v41, %v3364_v8  ;;  %v8376_v18 = vsel %vm8374_vm8, %v11109_v41, %v3364_v8  ;;  %vm3798_vm14 = vcmp.gt.s32.totalorder %v3797_v61, 0 }
 0x3c9   :  { %v3535_v22 = vadd.s32 %v3534_v45, %v3530_v44  ;;  %v3369_v36 = vsel %vm3362_vm10, %v3365_v14, %v3368_v15  ;;  %v8380_v63 = vsel %vm8373_vm5, %v8376_v18, %v8379_v58  ;;  %vm10531_vm15 = vcmp.lt.s32.totalorder %v10530_v1, 0 }
 0x3ca   :  { %v3799_v46 = vsel %vm3798_vm14, %v3797_v61, 0  ;;  %v3370_v50 = vsel %vm3359_vm0, nan, %v3369_v36  ;;  %v8381_v2 = vsel %vm3359_vm0, nan, %v8380_v63  ;;  %v3650_v11 = vsel %vm10531_vm15, 0, %v10530_v1 }
 0x3cb   :  { %v3536_v29 = vadd.s32 536870912, %v3535_v22  ;;  %5375 = vst [vmem:[#allocation2 + $0x1c0] sm:$0xff] %v3370_v50  ;;  %10367 = vst [vmem:[#allocation2 + $0x1c8] sm:$0xff] %v8381_v2  ;;  %v3635_v5 = vadd.s32 %v14474_v31, %v14469_v39  ;;  %v3651_v7 = vsub.s32 32, %v3650_v11  ;;  %v3655_v0 = vsub.s32 4294967266, %v3650_v11 }
 0x3cc   :  { %v3795_v12 = vor.u32 8388608, %v3794_v9  ;;  %v3801_v16 = vand.u32 31, %v3799_v46  ;;  %v3652_v51 = vshll.u32 %v14525_v17, %v3650_v11  ;;  %v3672_v21 = vadd.s32 3, %v3668_v55  ;;  %v14584_v39 = vld [vmem:[%s16164_s1] ss:$0 sm:$0xff] }
 0x3cd   :  { %v3537_v48 = vshrl.u32 %v3536_v29, 30  ;;  %v3653_v60 = vshrl.u32 %v3635_v5, %v3651_v7  ;;  %v3656_v25 = vadd.s32 127, %v3655_v0  ;;  %v14579_v34 = vshrl.u32 %v3799_v46, 5 }
 0x3ce   :  { %v3802_v40 = vsub.s32 32, %v3801_v16  ;;  %v14587_v31 = vmul.f32 %v14584_v39, %v224_v62  ;;  %v14589_v47 = vand.u32 3, %v3672_v21  ;;  %v14591_v6 = vand.u32 3, %v3668_v55 }
 0x3cf   :  { %v3538_v52 = vshll.u32 %v3537_v48, 30  ;;  %v3654_v33 = vor.u32 %v3653_v60, %v3652_v51  ;;  %v3657_v10 = vshll.u32 %v3656_v25, 23  ;;  %v14593_v59 = vshll.u32 %v3795_v12, 8 }
 0x3d0   :  { %vm3477_vm2 = vcmp.lt.s32.totalorder %v14361_v32, 0  ;;  %v3531_v35 = vadd.s32 %v14532_v23, %v14545_v49  ;;  %v3805_v56 = vshrl.u32 %v11218_v24, %v3802_v40  ;;  %v3808_v41 = vshrl.u32 %v11219_v26, %v3802_v40 }
 0x3d1   :  { %v14577_v4 = vsub.s32 %v3535_v22, %v3538_v52  ;;  %v3658_v17 = vor.u32 4788187, %v3657_v10  ;;  %v3661_v61 = vcvt.s32.f32 %v3654_v33  ;;  %v3810_v53 = vshll.u32 %v11219_v26, %v3801_v16 }
 0x3d2   :  { %v3811_v3 = vshrl.u32 %v11220_v28, %v3802_v40  ;;  %v3804_v9 = vshll.u32 %v11217_v20, %v3801_v16  ;;  %v3807_v8 = vshll.u32 %v11218_v24, %v3801_v16  ;;  %vm3819_vm4 = vcmp.lt.s32.totalorder %v14579_v34, 1 }
 0x3d3   :  { %v3541_v42 = vsub.s32 0, %v14577_v4  ;;  %v3659_v57 = vand.u32 2147483647, %v3658_v17  ;;  %v3813_v55 = vshll.u32 %v11220_v28, %v3801_v16  ;;  %v3814_v44 = vshrl.u32 %v11221_v30, %v3802_v40 }
 0x3d4   :  { %v3812_v49 = vor.u32 %v3811_v3, %v3810_v53  ;;  %v3561_v58 = vsub.s32 4, %v3537_v48  ;;  %v3806_v1 = vor.u32 %v3805_v56, %v3804_v9  ;;  %v3809_v45 = vor.u32 %v3808_v41, %v3807_v8 }
 0x3d5   :  { %v10525_v43 = vmin.u32 %v3541_v42, %v14577_v4  ;;  %v3662_v23 = vmul.f32 %v3661_v61, %v3659_v57  ;;  %v3815_v18 = vor.u32 %v3814_v44, %v3813_v55  ;;  %v3816_v22 = vshll.u32 %v11221_v30, %v3801_v16 }
 0x3d6   :  { %v3817_v36 = vshrl.u32 %v11222_v37, %v3802_v40  ;;  %v3803_v46 = vshrl.u32 %v11217_v20, %v3802_v40  ;;  %vm3820_vm1 = vcmp.lt.s32.totalorder %v14579_v34, 2  ;;  %vm3822_vm7 = vcmp.lt.s32.totalorder %v14579_v34, 4 }
 0x3d7   :  { %v3543_v15 = vclz %v10525_v43  ;;  %v3663_v14 = vxor.u32 2147483648, %v3662_v23  ;;  %vm3821_vm0 = vcmp.lt.s32.totalorder %v14579_v34, 3  ;;  %v3824_v11 = vsel %vm3822_vm7, %v3812_v49, 2102212464 }
 0x3d8   :  { %v3818_v2 = vor.u32 %v3817_v36, %v3816_v22  ;;  %v3827_v5 = vsel %vm3819_vm4, %v3806_v1, %v3809_v45  ;;  %v3828_v7 = vsel %vm3822_vm7, %v3815_v18, 920167782  ;;  %v3562_v12 = vsel %vm3477_vm2, %v3561_v58, %v3537_v48 }
 0x3d9   :  { %v10526_v63 = vadd.s32 4294967294, %v3543_v15  ;;  %v3664_v50 = vsel %vm3581_vm3, %v3663_v14, %v3662_v23  ;;  %v3829_v16 = vsel %vm3821_vm0, %v3812_v49, %v3828_v7  ;;  %v3823_v38 = vsel %vm3819_vm4, %v3803_v46, %v3806_v1 }
 0x3da   :  { %v3667_v29 = vsel %vm14517_vm6, %v14312_v54, %v3664_v50  ;;  %v3825_v25 = vsel %vm3821_vm0, %v3809_v45, %v3824_v11  ;;  %v3830_v21 = vsel %vm3820_vm1, %v3827_v5, %v3829_v16  ;;  %v3831_v62 = vsel %vm3819_vm4, %v3809_v45, %v3812_v49 }
 0x3db   :  { %vm10527_vm5 = vcmp.lt.s32.totalorder %v10526_v63, 0  ;;  %11112 = vcosq.f32 %v3667_v29  ;;  %v3832_v48 = vsel %vm3822_vm7, %v3818_v2, 1326507024  ;;  %v3686_v41 = vand.u32 2139095040, %v14587_v31 }
 0x3dc   :  { %v3546_v0 = vsel %vm10527_vm5, 0, %v10526_v63  ;;  %11114 = vsinq.f32 %v3667_v29  ;;  %v3833_v10 = vsel %vm3821_vm0, %v3815_v18, %v3832_v48  ;;  %vm8682_vm3 = vcmp.lt.s32.totalorder %v14591_v6, 2  ;;  %v239_v63 = vpop.permute.xlu1 %238 }
 0x3dd   :  { %v3547_v51 = vsub.s32 32, %v3546_v0  ;;  %v3551_v60 = vsub.s32 4294967266, %v3546_v0  ;;  %v3548_v52 = vshll.u32 %v14577_v4, %v3546_v0  ;;  %v3834_v17 = vsel %vm3820_vm1, %v3831_v62, %v3833_v10 }
 0x3de   :  { %v14646_v42 = vmul.u32.u64.low %v14593_v59, %v3830_v21  ;;  %v14647_v56 = vmul.u32.u64.high %v14593_v59, %v3830_v21, %v14646_v42  ;;  %v14652_v53 = vmul.u32.u64.low %v14593_v59, %v3834_v17  ;;  %v14653_v4 = vmul.u32.u64.high %v14593_v59, %v3834_v17, %v14652_v53 }
 0x3df   :  { %v3549_v40 = vshrl.u32 %v3531_v35, %v3547_v51  ;;  %v3552_v33 = vadd.s32 127, %v3551_v60  ;;  %vm14658_vm6 = vcmp.le.f32.partialorder %v3475_v27, 0.7853982  ;;  %v3826_v3 = vsel %vm3820_vm1, %v3823_v38, %v3825_v25 }
 0x3e0   :  { %v3687_v43 = vshrl.u32 %v3686_v41, 23  ;;  %vm3671_vm8 = vweird.f32 %v14312_v54  ;;  %vm3674_vm9 = vcmp.lt.s32.totalorder %v14589_v47, 2  ;;  %vm8683_vm10 = vcmp.eq.s32.totalorder %v14591_v6, 0 }
 0x3e1   :  { %v3550_v57 = vor.u32 %v3549_v40, %v3548_v52  ;;  %v3553_v61 = vshll.u32 %v3552_v33, 23  ;;  %vm8686_vm11 = vcmp.eq.s32.totalorder %v14591_v6, 2  ;;  %v3564_v8 = vsel %vm14658_vm6, 0, %v3562_v12 }
 0x3e2   :  { %v3845_v27 = vadd.s32 1, %v14647_v56  ;;  %v3683_v23 = vand.u32 2147483647, %v14587_v31  ;;  %v10532_v49 = vadd.s32 4294967169, %v3687_v43  ;;  %v3842_v44 = vmul.u32 %v14593_v59, %v3826_v3 }
 0x3e3   :  { %v3554_v9 = vor.u32 4788187, %v3553_v61  ;;  %v3557_v55 = vcvt.s32.f32 %v3550_v57  ;;  %vm3844_vm12 = vc.u32 %v14653_v4, %v14646_v42  ;;  %vm3675_vm13 = vcmp.eq.s32.totalorder %v14589_v47, 0 }
 0x3e4   :  { %vm3678_vm14 = vcmp.eq.s32.totalorder %v14589_v47, 2  ;;  %v3846_v58 = vsel %vm3844_vm12, %v3845_v27, %v14647_v56  ;;  %v3693_v1 = vadd.s32 1, %v10532_v49  ;;  %v3568_v22 = vadd.s32 3, %v3564_v8 }
 0x3e5   :  { %v3555_v34 = vand.u32 2147483647, %v3554_v9  ;;  %v11113_v15 = vpop.eup %11112  ;;  %v3847_v36 = vadd.s32 %v3846_v58, %v3842_v44  ;;  %v14678_v50 = vand.u32 3, %v3564_v8  ;;  %v3690_v59 = vand.u32 8388607, %v3683_v23 }
 0x3e6   :  { %v11115_v45 = vpop.eup %11114  ;;  %v3679_v14 = vxor.u32 2147483648, %v11113_v15  ;;  %vm3694_vm15 = vcmp.gt.s32.totalorder %v3693_v1, 0  ;;  %v14689_v16 = vmul.f32 %v14584_v39, %v239_v63  ;;  %v14704_v47 = vand.u32 3, %v3568_v22 }
 0x3e7   :  { %v3558_v18 = vmul.f32 %v3557_v55, %v3555_v34  ;;  %v3676_v46 = vxor.u32 2147483648, %v11115_v45  ;;  %v3848_v5 = vadd.s32 536870912, %v3847_v36  ;;  %v3695_v12 = vsel %vm3694_vm15, %v3693_v1, 0 }
 0x3e8   :  { %v3680_v2 = vsel %vm3678_vm14, %v3679_v14, %v11115_v45  ;;  %v8688_v11 = vsel %vm8686_vm11, %v3679_v14, %v11115_v45  ;;  %v3691_v52 = vor.u32 8388608, %v3690_v59  ;;  %v3697_v40 = vand.u32 31, %v3695_v12 }
 0x3e9   :  { %v3559_v29 = vxor.u32 2147483648, %v3558_v18  ;;  %v3677_v7 = vsel %vm3675_vm13, %v11113_v15, %v3676_v46  ;;  %v8685_v0 = vsel %vm8683_vm10, %v11113_v15, %v3676_v46  ;;  %v3849_v25 = vshrl.u32 %v3848_v5, 30 }
 0x3ea   :  { %v3681_v51 = vsel %vm3674_vm9, %v3677_v7, %v3680_v2  ;;  %v8689_v60 = vsel %vm8682_vm3, %v8685_v0, %v8688_v11  ;;  %v14708_v10 = vshrl.u32 %v3695_v12, 5  ;;  %v3698_v17 = vsub.s32 32, %v3697_v40 }
 0x3eb   :  { %v3560_v38 = vsel %vm3477_vm2, %v3559_v29, %v3558_v18  ;;  %v3682_v21 = vsel %vm3671_vm8, nan, %v3681_v51  ;;  %v8690_v62 = vsel %vm3671_vm8, nan, %v8689_v60  ;;  %v3850_v6 = vshll.u32 %v3849_v25, 30 }
 0x3ec   :  { %v3563_v48 = vsel %vm14658_vm6, %v14361_v32, %v3560_v38  ;;  %5378 = vst [vmem:[#allocation2 + $0x1f0] sm:$0xff] %v3682_v21  ;;  %10370 = vst [vmem:[#allocation2 + $0x1f8] sm:$0xff] %v8690_v62  ;;  %v3998_v54 = vand.u32 2139095040, %v14689_v16  ;;  %vm3789_vm2 = vcmp.lt.s32.totalorder %v14398_v13, 0  ;;  %v3843_v56 = vadd.s32 %v14646_v42, %v14653_v4 }
 0x3ed   :  { %11116 = vcosq.f32 %v3563_v48  ;;  %v14706_v33 = vsub.s32 %v3847_v36, %v3850_v6  ;;  %v14714_v41 = vshll.u32 %v3691_v52, 8  ;;  %vm3574_vm4 = vcmp.eq.s32.totalorder %v14704_v47, 2 }
 0x3ee   :  { %11118 = vsinq.f32 %v3563_v48  ;;  %vm8583_vm1 = vcmp.eq.s32.totalorder %v14678_v50, 2  ;;  %v3700_v61 = vshll.u32 %v11217_v20, %v3697_v40  ;;  %v3703_v53 = vshll.u32 %v11218_v24, %v3697_v40 }
 0x3ef   :  { %v3853_v57 = vsub.s32 0, %v14706_v33  ;;  %v3706_v35 = vshll.u32 %v11219_v26, %v3697_v40  ;;  %vm3571_vm7 = vcmp.eq.s32.totalorder %v14704_v47, 0  ;;  %vm8580_vm0 = vcmp.eq.s32.totalorder %v14678_v50, 0 }
 0x3f0   :  { %v3701_v42 = vshrl.u32 %v11218_v24, %v3698_v17  ;;  %v3704_v4 = vshrl.u32 %v11219_v26, %v3698_v17  ;;  %v3707_v3 = vshrl.u32 %v11220_v28, %v3698_v17  ;;  %v3710_v43 = vshrl.u32 %v11221_v30, %v3698_v17 }
 0x3f1   :  { %vm3570_vm5 = vcmp.lt.s32.totalorder %v14704_v47, 2  ;;  %vm8579_vm3 = vcmp.lt.s32.totalorder %v14678_v50, 2  ;;  %v10537_v9 = vmin.u32 %v3853_v57, %v14706_v33  ;;  %v3873_v8 = vsub.s32 4, %v3849_v25 }
 0x3f2   :  { %vm3715_vm6 = vcmp.lt.s32.totalorder %v14708_v10, 1  ;;  %v3999_v27 = vshrl.u32 %v3998_v54, 23  ;;  %vm3567_vm8 = vweird.f32 %v14361_v32  ;;  %v3702_v49 = vor.u32 %v3701_v42, %v3700_v61 }
 0x3f3   :  { %v3705_v34 = vor.u32 %v3704_v4, %v3703_v53  ;;  %v3708_v55 = vor.u32 %v3707_v3, %v3706_v35  ;;  %v3709_v44 = vshll.u32 %v11220_v28, %v3697_v40  ;;  %v3855_v15 = vclz %v10537_v9 }
 0x3f4   :  { %v3699_v58 = vshrl.u32 %v11217_v20, %v3698_v17  ;;  %vm3716_vm9 = vcmp.lt.s32.totalorder %v14708_v10, 2  ;;  %vm3717_vm10 = vcmp.lt.s32.totalorder %v14708_v10, 3  ;;  %vm14739_vm11 = vcmp.le.f32.partialorder %v3787_v19, 0.7853982 }
 0x3f5   :  { %v3711_v45 = vor.u32 %v3710_v43, %v3709_v44  ;;  %v3712_v14 = vshll.u32 %v11221_v30, %v3697_v40  ;;  %v3713_v18 = vshrl.u32 %v11222_v37, %v3698_v17  ;;  %vm3718_vm12 = vcmp.lt.s32.totalorder %v14708_v10, 4 }
 0x3f6   :  { %v10538_v36 = vadd.s32 4294967294, %v3855_v15  ;;  %v3874_v63 = vsel %vm3789_vm2, %v3873_v8, %v3849_v25  ;;  %v3720_v46 = vsel %vm3718_vm12, %v3708_v55, 2102212464  ;;  %v3723_v19 = vsel %vm3715_vm6, %v3702_v49, %v3705_v34 }
 0x3f7   :  { %v11117_v22 = vpop.eup %11116  ;;  %v3714_v11 = vor.u32 %v3713_v18, %v3712_v14  ;;  %v3719_v29 = vsel %vm3715_vm6, %v3699_v58, %v3702_v49  ;;  %v3724_v5 = vsel %vm3718_vm12, %v3711_v45, 920167782  ;;  %v3721_v0 = vsel %vm3717_vm10, %v3705_v34, %v3720_v46  ;;  %v234_v18 = vpop.permute.xlu0 %233 }
 0x3f8   :  { %v11119_v59 = vpop.eup %11118  ;;  %v3575_v2 = vxor.u32 2147483648, %v11117_v22  ;;  %vm10539_vm13 = vcmp.lt.s32.totalorder %v10538_v36, 0  ;;  %v3725_v12 = vsel %vm3717_vm10, %v3708_v55, %v3724_v5  ;;  %v3727_v54 = vsel %vm3715_vm6, %v3705_v34, %v3708_v55 }
 0x3f9   :  { %v3572_v7 = vxor.u32 2147483648, %v11119_v59  ;;  %v3858_v38 = vsel %vm10539_vm13, 0, %v10538_v36  ;;  %v3726_v25 = vsel %vm3716_vm9, %v3723_v19, %v3725_v12  ;;  %v3876_v4 = vsel %vm14739_vm11, 0, %v3874_v63 }
 0x3fa   :  { %v3576_v51 = vsel %vm3574_vm4, %v3575_v2, %v11119_v59  ;;  %v8585_v60 = vsel %vm8583_vm1, %v3575_v2, %v11119_v59  ;;  %v3859_v48 = vsub.s32 32, %v3858_v38  ;;  %v3860_v52 = vshll.u32 %v14706_v33, %v3858_v38 }
 0x3fb   :  { %v3573_v21 = vsel %vm3571_vm7, %v11117_v22, %v3572_v7  ;;  %v8582_v62 = vsel %vm8580_vm0, %v11117_v22, %v3572_v7  ;;  %v3863_v17 = vsub.s32 4294967266, %v3858_v38  ;;  %v3728_v33 = vsel %vm3718_vm12, %v3714_v11, 1326507024 }
 0x3fc   :  { %v3577_v6 = vsel %vm3570_vm5, %v3573_v21, %v3576_v51  ;;  %v8586_v40 = vsel %vm8579_vm3, %v8582_v62, %v8585_v60  ;;  %v3861_v53 = vshrl.u32 %v3843_v56, %v3859_v48  ;;  %v3729_v50 = vsel %vm3717_vm10, %v3711_v45, %v3728_v33 }
 0x3fd   :  { %v3578_v57 = vsel %vm3567_vm8, nan, %v3577_v6  ;;  %v8587_v61 = vsel %vm3567_vm8, nan, %v8586_v40  ;;  %v3864_v47 = vadd.s32 127, %v3863_v17  ;;  %v3722_v32 = vsel %vm3716_vm9, %v3719_v29, %v3721_v0 }
 0x3fe   :  { %5377 = vst [vmem:[#allocation2 + $0x1e0] sm:$0xff] %v3578_v57  ;;  %10369 = vst [vmem:[#allocation2 + $0x1e8] sm:$0xff] %v8587_v61  ;;  %v14786_v35 = vmul.u32.u64.low %v14714_v41, %v3726_v25  ;;  %v14787_v42 = vmul.u32.u64.high %v14714_v41, %v3726_v25, %v14786_v35  ;;  %v3730_v56 = vsel %vm3716_vm9, %v3727_v54, %v3729_v50  ;;  %v10544_v3 = vadd.s32 4294967169, %v3999_v27  ;;  %v249_v57 = vpop.permute.xlu1 %248 }
 0x3ff   :  { %v3862_v43 = vor.u32 %v3861_v53, %v3860_v52  ;;  %v3865_v9 = vshll.u32 %v3864_v47, 23  ;;  %v14797_v8 = vmul.u32.u64.low %v14714_v41, %v3730_v56  ;;  %v14798_v49 = vmul.u32.u64.high %v14714_v41, %v3730_v56, %v14797_v8 }
 0x400   :  { %v4005_v34 = vadd.s32 1, %v10544_v3  ;;  %v3741_v44 = vadd.s32 1, %v14787_v42  ;;  %v3880_v15 = vadd.s32 3, %v3876_v4  ;;  %v3738_v58 = vmul.u32 %v14714_v41, %v3722_v32 }
 0x401   :  { %v3866_v55 = vor.u32 4788187, %v3865_v9  ;;  %v3995_v45 = vand.u32 2147483647, %v14689_v16  ;;  %v3869_v10 = vcvt.s32.f32 %v3862_v43  ;;  %vm3740_vm15 = vc.u32 %v14798_v49, %v14786_v35 }
 0x402   :  { %vm4006_vm14 = vcmp.gt.s32.totalorder %v4005_v34, 0  ;;  %v3742_v22 = vsel %vm3740_vm15, %v3741_v44, %v14787_v42  ;;  %v14809_v41 = vmul.f32 %v14584_v39, %v234_v18  ;;  %v14811_v11 = vand.u32 3, %v3880_v15 }
 0x403   :  { %v3867_v14 = vand.u32 2147483647, %v3866_v55  ;;  %v4007_v27 = vsel %vm4006_vm14, %v4005_v34, 0  ;;  %v3743_v46 = vadd.s32 %v3742_v22, %v3738_v58  ;;  %v4002_v19 = vand.u32 8388607, %v3995_v45 }
 0x404   :  { %v4009_v36 = vand.u32 31, %v4007_v27  ;;  %v14813_v29 = vand.u32 3, %v3876_v4  ;;  %v14815_v7 = vshrl.u32 %v4007_v27, 5  ;;  %v3894_v1 = vand.u32 2139095040, %v14809_v41 }
 0x405   :  { %v3870_v63 = vmul.f32 %v3869_v10, %v3867_v14  ;;  %v3744_v5 = vadd.s32 536870912, %v3743_v46  ;;  %v14839_v4 = vmul.f32 %v14584_v39, %v249_v57  ;;  %v4003_v56 = vor.u32 8388608, %v4002_v19 }
 0x406   :  { %v4010_v59 = vsub.s32 32, %v4009_v36  ;;  %v4012_v48 = vshll.u32 %v11217_v20, %v4009_v36  ;;  %v4021_v52 = vshll.u32 %v11220_v28, %v4009_v36  ;;  %v4024_v6 = vshll.u32 %v11221_v30, %v4009_v36 }
 0x407   :  { %v3871_v2 = vxor.u32 2147483648, %v3870_v63  ;;  %v14822_v38 = vshrl.u32 %v3744_v5, 30  ;;  %v4015_v17 = vshll.u32 %v11218_v24, %v4009_v36  ;;  %v4018_v54 = vshll.u32 %v11219_v26, %v4009_v36 }
 0x408   :  { %v4013_v0 = vshrl.u32 %v11218_v24, %v4010_v59  ;;  %v4016_v12 = vshrl.u32 %v11219_v26, %v4010_v59  ;;  %v4019_v51 = vshrl.u32 %v11220_v28, %v4010_v59  ;;  %v4022_v25 = vshrl.u32 %v11221_v30, %v4010_v59 }
 0x409   :  { %v3872_v60 = vsel %vm3789_vm2, %v3871_v2, %v3870_v63  ;;  %v4025_v21 = vshrl.u32 %v11222_v37, %v4010_v59  ;;  %v3746_v40 = vshll.u32 %v14822_v38, 30  ;;  %vm8892_vm2 = vcmp.eq.s32.totalorder %v14813_v29, 2 }
 0x40a   :  { %v3875_v62 = vsel %vm14739_vm11, %v14398_v13, %v3872_v60  ;;  %v4023_v61 = vor.u32 %v4022_v25, %v4021_v52  ;;  %v4014_v47 = vor.u32 %v4013_v0, %v4012_v48  ;;  %v4017_v50 = vor.u32 %v4016_v12, %v4015_v17 }
 0x40b   :  { %11120 = vcosq.f32 %v3875_v62  ;;  %v4026_v53 = vor.u32 %v4025_v21, %v4024_v6  ;;  %v14836_v33 = vsub.s32 %v3743_v46, %v3746_v40  ;;  %v4020_v42 = vor.u32 %v4019_v51, %v4018_v54 }
 0x40c   :  { %11122 = vsinq.f32 %v3875_v62  ;;  %vm4030_vm4 = vcmp.lt.s32.totalorder %v14815_v7, 4  ;;  %vm3883_vm1 = vcmp.eq.s32.totalorder %v14811_v11, 0  ;;  %vm8889_vm7 = vcmp.eq.s32.totalorder %v14813_v29, 0 }
 0x40d   :  { %v3749_v32 = vsub.s32 0, %v14836_v33  ;;  %vm4027_vm0 = vcmp.lt.s32.totalorder %v14815_v7, 1  ;;  %v4036_v3 = vsel %vm4030_vm4, %v4023_v61, 920167782  ;;  %v4040_v43 = vsel %vm4030_vm4, %v4026_v53, 1326507024 }
 0x40e   :  { %v3895_v9 = vshrl.u32 %v3894_v1, 23  ;;  %vm3882_vm5 = vcmp.lt.s32.totalorder %v14811_v11, 2  ;;  %vm8888_vm3 = vcmp.lt.s32.totalorder %v14813_v29, 2  ;;  %vm4029_vm6 = vcmp.lt.s32.totalorder %v14815_v7, 3 }
 0x40f   :  { %v10533_v8 = vmin.u32 %v3749_v32, %v14836_v33  ;;  %v4035_v34 = vsel %vm4027_vm0, %v4014_v47, %v4017_v50  ;;  %v4039_v55 = vsel %vm4027_vm0, %v4017_v50, %v4020_v42  ;;  %vm3879_vm8 = vweird.f32 %v14398_v13 }
 0x410   :  { %v4011_v44 = vshrl.u32 %v11217_v20, %v4010_v59  ;;  %v4032_v15 = vsel %vm4030_vm4, %v4020_v42, 2102212464  ;;  %v4037_v58 = vsel %vm4029_vm6, %v4020_v42, %v4036_v3  ;;  %v4041_v14 = vsel %vm4029_vm6, %v4023_v61, %v4040_v43 }
 0x411   :  { %vm3886_vm9 = vcmp.eq.s32.totalorder %v14811_v11, 2  ;;  %v3751_v10 = vclz %v10533_v8  ;;  %vm4028_vm10 = vcmp.lt.s32.totalorder %v14815_v7, 2  ;;  %v4043_v27 = vshll.u32 %v4003_v56, 8 }
 0x412   :  { %vm3685_vm11 = vcmp.lt.s32.totalorder %v14587_v31, 0  ;;  %v4031_v18 = vsel %vm4027_vm0, %v4011_v44, %v4014_v47  ;;  %v4038_v22 = vsel %vm4028_vm10, %v4035_v34, %v4037_v58  ;;  %v4042_v36 = vsel %vm4028_vm10, %v4039_v55, %v4041_v14 }
 0x413   :  { %v10540_v63 = vadd.s32 4294967169, %v3895_v9  ;;  %v10534_v19 = vadd.s32 4294967294, %v3751_v10  ;;  %v4033_v59 = vsel %vm4029_vm6, %v4017_v50, %v4032_v15  ;;  %v3739_v62 = vadd.s32 %v14786_v35, %v14798_v49 }
 0x414   :  { %v14872_v2 = vmul.u32.u64.low %v4043_v27, %v4042_v36  ;;  %v14873_v5 = vmul.u32.u64.high %v4043_v27, %v4042_v36, %v14872_v2  ;;  %v14875_v51 = vmul.u32.u64.low %v4043_v27, %v4038_v22  ;;  %v14876_v60 = vmul.u32.u64.high %v4043_v27, %v4038_v22, %v14875_v51 }
 0x415   :  { %v11121_v46 = vpop.eup %11120  ;;  %v3901_v25 = vadd.s32 1, %v10540_v63  ;;  %vm10535_vm12 = vcmp.lt.s32.totalorder %v10534_v19, 0  ;;  %v3769_v48 = vsub.s32 4, %v14822_v38  ;;  %v4034_v17 = vsel %vm4028_vm10, %v4031_v18, %v4033_v59 }
 0x416   :  { %v11123_v0 = vpop.eup %11122  ;;  %v3887_v12 = vxor.u32 2147483648, %v11121_v46  ;;  %v3754_v40 = vsel %vm10535_vm12, 0, %v10534_v19  ;;  %vm4052_vm14 = vc.u32 %v14873_v5, %v14875_v51  ;;  %v4053_v42 = vadd.s32 1, %v14876_v60 }
 0x417   :  { %v3884_v21 = vxor.u32 2147483648, %v11123_v0  ;;  %v3755_v35 = vsub.s32 32, %v3754_v40  ;;  %vm3902_vm13 = vcmp.gt.s32.totalorder %v3901_v25, 0  ;;  %v3756_v53 = vshll.u32 %v14836_v33, %v3754_v40 }
 0x418   :  { %v3888_v52 = vsel %vm3886_vm9, %v3887_v12, %v11123_v0  ;;  %v8894_v6 = vsel %vm8892_vm2, %v3887_v12, %v11123_v0  ;;  %v3759_v1 = vsub.s32 4294967266, %v3754_v40  ;;  %v3891_v29 = vand.u32 2147483647, %v14809_v41 }
 0x419   :  { %v3885_v54 = vsel %vm3883_vm1, %v11121_v46, %v3884_v21  ;;  %v8891_v57 = vsel %vm8889_vm7, %v11121_v46, %v3884_v21  ;;  %v3757_v50 = vshrl.u32 %v3739_v62, %v3755_v35  ;;  %v3903_v32 = vsel %vm3902_vm13, %v3901_v25, 0 }
 0x41a   :  { %v3889_v49 = vsel %vm3882_vm5, %v3885_v54, %v3888_v52  ;;  %v8895_v61 = vsel %vm8888_vm3, %v8891_v57, %v8894_v6  ;;  %v3760_v11 = vadd.s32 127, %v3759_v1  ;;  %v3770_v56 = vsel %vm3685_vm11, %v3769_v48, %v14822_v38 }
 0x41b   :  { %v3890_v7 = vsel %vm3879_vm8, nan, %v3889_v49  ;;  %v8896_v47 = vsel %vm3879_vm8, nan, %v8895_v61  ;;  %v3758_v33 = vor.u32 %v3757_v50, %v3756_v53  ;;  %v4050_v3 = vmul.u32 %v4043_v27, %v4034_v17 }
 0x41c   :  { %5380 = vst [vmem:[#allocation2 + $0x210] sm:$0xff] %v3890_v7  ;;  %10372 = vst [vmem:[#allocation2 + $0x218] sm:$0xff] %v8896_v47  ;;  %v3905_v13 = vand.u32 31, %v3903_v32  ;;  %v3761_v43 = vshll.u32 %v3760_v11, 23  ;;  %v4054_v9 = vsel %vm4052_vm14, %v4053_v42, %v14876_v60  ;;  %vm14911_vm15 = vcmp.le.f32.partialorder %v3683_v23, 0.7853982 }
 0x41d   :  { %v4055_v34 = vadd.s32 %v4054_v9, %v4050_v3  ;;  %v3772_v15 = vsel %vm14911_vm15, 0, %v3770_v56  ;;  %v3898_v38 = vand.u32 8388607, %v3891_v29  ;;  %v4206_v58 = vand.u32 2139095040, %v14839_v4 }
 0x41e   :  { %v3906_v55 = vsub.s32 32, %v3905_v13  ;;  %v3762_v44 = vor.u32 4788187, %v3761_v43  ;;  %v3765_v14 = vcvt.s32.f32 %v3758_v33  ;;  %v3917_v36 = vshll.u32 %v11220_v28, %v3905_v13 }
 0x41f   :  { %v4056_v10 = vadd.s32 536870912, %v4055_v34  ;;  %v3904_v19 = vshrl.u32 %v3903_v32, 5  ;;  %v3908_v59 = vshll.u32 %v11217_v20, %v3905_v13  ;;  %v3911_v2 = vshll.u32 %v11218_v24, %v3905_v13 }
 0x420   :  { %v3909_v27 = vshrl.u32 %v11218_v24, %v3906_v55  ;;  %v3912_v23 = vshrl.u32 %v11219_v26, %v3906_v55  ;;  %v3763_v18 = vand.u32 2147483647, %v3762_v44  ;;  %v3915_v22 = vshrl.u32 %v11220_v28, %v3906_v55 }
 0x421   :  { %v3918_v63 = vshrl.u32 %v11221_v30, %v3906_v55  ;;  %v14925_v46 = vshrl.u32 %v4056_v10, 30  ;;  %v3914_v12 = vshll.u32 %v11219_v26, %v3905_v13  ;;  %v3921_v25 = vshrl.u32 %v11222_v37, %v3906_v55 }
 0x422   :  { %v3766_v0 = vmul.f32 %v3765_v14, %v3763_v18  ;;  %v3899_v62 = vor.u32 8388608, %v3898_v38  ;;  %v3910_v48 = vor.u32 %v3909_v27, %v3908_v59  ;;  %v3913_v52 = vor.u32 %v3912_v23, %v3911_v2 }
 0x423   :  { %v3919_v60 = vor.u32 %v3918_v63, %v3917_v36  ;;  %v4058_v21 = vshll.u32 %v14925_v46, 30  ;;  %v3916_v40 = vor.u32 %v3915_v22, %v3914_v12  ;;  %v3920_v17 = vshll.u32 %v11221_v30, %v3905_v13 }
 0x424   :  { %v3767_v6 = vxor.u32 2147483648, %v3766_v0  ;;  %v4207_v54 = vshrl.u32 %v4206_v58, 23  ;;  %v3776_v57 = vadd.s32 3, %v3772_v15  ;;  %v14933_v35 = vand.u32 3, %v3772_v15 }
 0x425   :  { %v14935_v49 = vsub.s32 %v4055_v34, %v4058_v21  ;;  %vm3926_vm2 = vcmp.lt.s32.totalorder %v3904_v19, 4  ;;  %v3922_v53 = vor.u32 %v3921_v25, %v3920_v17  ;;  %vm3923_vm4 = vcmp.lt.s32.totalorder %v3904_v19, 1 }
 0x426   :  { %v3768_v61 = vsel %vm3685_vm11, %v3767_v6, %v3766_v0  ;;  %v3932_v1 = vsel %vm3926_vm2, %v3919_v60, 920167782  ;;  %vm3925_vm1 = vcmp.lt.s32.totalorder %v3904_v19, 3  ;;  %v3931_v50 = vsel %vm3923_vm4, %v3910_v48, %v3913_v52 }
 0x427   :  { %v3771_v7 = vsel %vm14911_vm15, %v14587_v31, %v3768_v61  ;;  %v4061_v47 = vsub.s32 0, %v14935_v49  ;;  %v3907_v11 = vshrl.u32 %v11217_v20, %v3906_v55  ;;  %v3933_v42 = vsel %vm3925_vm1, %v3916_v40, %v3932_v1 }
 0x428   :  { %11124 = vcosq.f32 %v3771_v7  ;;  %v10552_v32 = vadd.s32 4294967169, %v4207_v54  ;;  %vm3924_vm7 = vcmp.lt.s32.totalorder %v3904_v19, 2  ;;  %v3928_v56 = vsel %vm3926_vm2, %v3916_v40, 2102212464 }
 0x429   :  { %11126 = vsinq.f32 %v3771_v7  ;;  %v10545_v33 = vmin.u32 %v4061_v47, %v14935_v49  ;;  %v3934_v3 = vsel %vm3924_vm7, %v3931_v50, %v3933_v42  ;;  %v3935_v13 = vsel %vm3923_vm4, %v3913_v52, %v3916_v40 }
 0x42a   :  { %v3936_v43 = vsel %vm3926_vm2, %v3922_v53, 1326507024  ;;  %v3939_v9 = vshll.u32 %v3899_v62, 8  ;;  %v3777_v8 = vand.u32 3, %v3776_v57  ;;  %vm3997_vm0 = vcmp.lt.s32.totalorder %v14689_v16, 0 }
 0x42b   :  { %v4063_v34 = vclz %v10545_v33  ;;  %v3927_v55 = vsel %vm3923_vm4, %v3907_v11, %v3910_v48  ;;  %v3929_v44 = vsel %vm3925_vm1, %v3913_v52, %v3928_v56  ;;  %v3937_v15 = vsel %vm3925_vm1, %v3919_v60, %v3936_v43 }
 0x42c   :  { %v14956_v38 = vmul.u32.u64.low %v3939_v9, %v3934_v3  ;;  %v14957_v58 = vmul.u32.u64.high %v3939_v9, %v3934_v3, %v14956_v38  ;;  %v3938_v10 = vsel %vm3924_vm7, %v3935_v13, %v3937_v15  ;;  %v4203_v27 = vand.u32 2147483647, %v14839_v4 }
 0x42d   :  { %v10546_v14 = vadd.s32 4294967294, %v4063_v34  ;;  %v4213_v23 = vadd.s32 1, %v10552_v32  ;;  %vm8785_vm5 = vcmp.lt.s32.totalorder %v14933_v35, 2  ;;  %vm8786_vm3 = vcmp.eq.s32.totalorder %v14933_v35, 0 }
 0x42e   :  { %vm8789_vm6 = vcmp.eq.s32.totalorder %v14933_v35, 2  ;;  %vm14967_vm8 = vcmp.le.f32.partialorder %v3995_v45, 0.7853982  ;;  %v14971_v22 = vmul.u32.u64.low %v3939_v9, %v3938_v10  ;;  %v14972_v36 = vmul.u32.u64.high %v3939_v9, %v3938_v10, %v14971_v22 }
 0x42f   :  { %vm3775_vm9 = vweird.f32 %v14587_v31  ;;  %vm3778_vm10 = vcmp.lt.s32.totalorder %v3777_v8, 2  ;;  %vm10547_vm11 = vcmp.lt.s32.totalorder %v10546_v14, 0  ;;  %v3930_v63 = vsel %vm3924_vm7, %v3927_v55, %v3929_v44 }
 0x430   :  { %vm4214_vm12 = vcmp.gt.s32.totalorder %v4213_v23, 0  ;;  %v4066_v59 = vsel %vm10547_vm11, 0, %v10546_v14  ;;  %v4081_v2 = vsub.s32 4, %v14925_v46  ;;  %v3949_v0 = vadd.s32 1, %v14957_v58 }
 0x431   :  { %v4215_v12 = vsel %vm4214_vm12, %v4213_v23, 0  ;;  %vm3779_vm13 = vcmp.eq.s32.totalorder %v3777_v8, 0  ;;  %v4051_v45 = vadd.s32 %v14875_v51, %v14873_v5  ;;  %v4067_v60 = vsub.s32 32, %v4066_v59 }
 0x432   :  { %v4071_v25 = vsub.s32 4294967266, %v4066_v59  ;;  %v11125_v21 = vpop.eup %11124  ;;  %v4068_v62 = vshll.u32 %v14935_v49, %v4066_v59  ;;  %v3946_v48 = vmul.u32 %v3939_v9, %v3930_v63  ;;  %vm3948_vm14 = vc.u32 %v14972_v36, %v14956_v38 }
 0x433   :  { %v4217_v19 = vand.u32 31, %v4215_v12  ;;  %v11127_v52 = vpop.eup %11126  ;;  %v3783_v6 = vxor.u32 2147483648, %v11125_v21  ;;  %v4069_v40 = vshrl.u32 %v4051_v45, %v4067_v60  ;;  %v3950_v54 = vsel %vm3948_vm14, %v3949_v0, %v14957_v58 }
 0x434   :  { %v4072_v17 = vadd.s32 127, %v4071_v25  ;;  %v3780_v57 = vxor.u32 2147483648, %v11127_v52  ;;  %vm3782_vm15 = vcmp.eq.s32.totalorder %v3777_v8, 2  ;;  %v4082_v5 = vsel %vm3997_vm0, %v4081_v2, %v14925_v46 }
 0x435   :  { %v3951_v51 = vadd.s32 %v3950_v54, %v3946_v48  ;;  %v3784_v61 = vsel %vm3782_vm15, %v3783_v6, %v11127_v52  ;;  %v8791_v49 = vsel %vm8789_vm6, %v3783_v6, %v11127_v52  ;;  %v4070_v53 = vor.u32 %v4069_v40, %v4068_v62  ;;  %v244_v62 = vpop.permute.xlu0 %243 }
 0x436   :  { %v4073_v1 = vshll.u32 %v4072_v17, 23  ;;  %v3781_v7 = vsel %vm3779_vm13, %v11125_v21, %v3780_v57  ;;  %v8788_v47 = vsel %vm8786_vm3, %v11125_v21, %v3780_v57  ;;  %v4218_v11 = vsub.s32 32, %v4217_v19 }
 0x437   :  { %v3952_v50 = vadd.s32 536870912, %v3951_v51  ;;  %v3785_v42 = vsel %vm3778_vm10, %v3781_v7, %v3784_v61  ;;  %v8792_v32 = vsel %vm8785_vm5, %v8788_v47, %v8791_v49  ;;  %v4084_v33 = vsel %vm14967_vm8, 0, %v4082_v5 }
 0x438   :  { %v4074_v46 = vor.u32 4788187, %v4073_v1  ;;  %v3786_v56 = vsel %vm3775_vm9, nan, %v3785_v42  ;;  %v8793_v3 = vsel %vm3775_vm9, nan, %v8792_v32  ;;  %v4210_v43 = vand.u32 8388607, %v4203_v27 }
 0x439   :  { %v15001_v13 = vshrl.u32 %v3952_v50, 30  ;;  %5379 = vst [vmem:[#allocation2 + $0x200] sm:$0xff] %v3786_v56  ;;  %10371 = vst [vmem:[#allocation2 + $0x208] sm:$0xff] %v8793_v3  ;;  %v4077_v35 = vcvt.s32.f32 %v4070_v53  ;;  %v4088_v8 = vadd.s32 3, %v4084_v33  ;;  %v4221_v55 = vshrl.u32 %v11218_v24, %v4218_v11 }
 0x43a   :  { %v4075_v9 = vand.u32 2147483647, %v4074_v46  ;;  %v15007_v15 = vand.u32 3, %v4084_v33  ;;  %v4224_v31 = vshrl.u32 %v11219_v26, %v4218_v11  ;;  %v4227_v58 = vshrl.u32 %v11220_v28, %v4218_v11 }
 0x43b   :  { %v3954_v34 = vshll.u32 %v15001_v13, 30  ;;  %v4211_v10 = vor.u32 8388608, %v4210_v43  ;;  %v4220_v23 = vshll.u32 %v11217_v20, %v4217_v19  ;;  %v4230_v22 = vshrl.u32 %v11221_v30, %v4218_v11 }
 0x43c   :  { %v4078_v44 = vmul.f32 %v4077_v35, %v4075_v9  ;;  %v4223_v59 = vshll.u32 %v11218_v24, %v4217_v19  ;;  %v4226_v2 = vshll.u32 %v11219_v26, %v4217_v19  ;;  %v4233_v0 = vshrl.u32 %v11222_v37, %v4218_v11 }
 0x43d   :  { %v15011_v14 = vsub.s32 %v3951_v51, %v3954_v34  ;;  %v4216_v60 = vshrl.u32 %v4215_v12, 5  ;;  %v4222_v25 = vor.u32 %v4221_v55, %v4220_v23  ;;  %v4229_v21 = vshll.u32 %v11220_v28, %v4217_v19 }
 0x43e   :  { %v4079_v63 = vxor.u32 2147483648, %v4078_v44  ;;  %v4225_v52 = vor.u32 %v4224_v31, %v4223_v59  ;;  %v4228_v6 = vor.u32 %v4227_v58, %v4226_v2  ;;  %v4232_v40 = vshll.u32 %v11221_v30, %v4217_v19 }
 0x43f   :  { %v3957_v45 = vsub.s32 0, %v15011_v14  ;;  %v15026_v54 = vand.u32 3, %v4088_v8  ;;  %vm3893_vm2 = vcmp.lt.s32.totalorder %v14809_v41, 0  ;;  %v4231_v57 = vor.u32 %v4230_v22, %v4229_v21 }
 0x440   :  { %v4080_v48 = vsel %vm3997_vm0, %v4079_v63, %v4078_v44  ;;  %v4234_v5 = vor.u32 %v4233_v0, %v4232_v40  ;;  %v15030_v51 = vshll.u32 %v4211_v10, 8  ;;  %v15033_v61 = vmul.f32 %v14584_v39, %v244_v62  ;;  %v259_v44 = vpop.permute.xlu1 %258 }
 0x441   :  { %v4083_v17 = vsel %vm14967_vm8, %v14689_v16, %v4080_v48  ;;  %v10541_v12 = vmin.u32 %v3957_v45, %v15011_v14  ;;  %vm4235_vm4 = vcmp.lt.s32.totalorder %v4216_v60, 1  ;;  %vm4238_vm1 = vcmp.lt.s32.totalorder %v4216_v60, 4 }
 0x442   :  { %11128 = vcosq.f32 %v4083_v17  ;;  %v3977_v18 = vsub.s32 4, %v15001_v13  ;;  %v4219_v49 = vshrl.u32 %v11217_v20, %v4218_v11  ;;  %v4240_v53 = vsel %vm4238_vm1, %v4228_v6, 2102212464 }
 0x443   :  { %11130 = vsinq.f32 %v4083_v17  ;;  %v3959_v19 = vclz %v10541_v12  ;;  %v4243_v1 = vsel %vm4235_vm4, %v4222_v25, %v4225_v52  ;;  %vm15039_vm7 = vcmp.le.f32.partialorder %v3891_v29, 0.7853982 }
 0x444   :  { %vm4237_vm0 = vcmp.lt.s32.totalorder %v4216_v60, 3  ;;  %v4244_v39 = vsel %vm4238_vm1, %v4231_v57, 920167782  ;;  %v4247_v50 = vsel %vm4235_vm4, %v4225_v52, %v4228_v6  ;;  %vm9098_vm5 = vcmp.eq.s32.totalorder %v15007_v15, 2 }
 0x445   :  { %v10542_v47 = vadd.s32 4294967294, %v3959_v19  ;;  %vm4236_vm3 = vcmp.lt.s32.totalorder %v4216_v60, 2  ;;  %v4239_v42 = vsel %vm4235_vm4, %v4219_v49, %v4222_v25  ;;  %v4245_v32 = vsel %vm4237_vm0, %v4228_v6, %v4244_v39 }
 0x446   :  { %v4248_v46 = vsel %vm4238_vm1, %v4234_v5, 1326507024  ;;  %vm4091_vm6 = vcmp.eq.s32.totalorder %v15026_v54, 0  ;;  %vm9095_vm8 = vcmp.eq.s32.totalorder %v15007_v15, 0  ;;  %v4241_v11 = vsel %vm4237_vm0, %v4225_v52, %v4240_v53 }
 0x447   :  { %vm10543_vm9 = vcmp.lt.s32.totalorder %v10542_v47, 0  ;;  %v4246_v29 = vsel %vm4236_vm3, %v4243_v1, %v4245_v32  ;;  %v4249_v33 = vsel %vm4237_vm0, %v4231_v57, %v4248_v46  ;;  %vm4090_vm10 = vcmp.lt.s32.totalorder %v15026_v54, 2 }
 0x448   :  { %vm9094_vm11 = vcmp.lt.s32.totalorder %v15007_v15, 2  ;;  %v3962_v56 = vsel %vm10543_vm9, 0, %v10542_v47  ;;  %v4250_v3 = vsel %vm4236_vm3, %v4247_v50, %v4249_v33  ;;  %vm4087_vm12 = vweird.f32 %v14689_v16 }
 0x449   :  { %v15051_v43 = vmul.u32.u64.low %v15030_v51, %v4246_v29  ;;  %v15052_v9 = vmul.u32.u64.high %v15030_v51, %v4246_v29, %v15051_v43  ;;  %v3947_v35 = vadd.s32 %v14956_v38, %v14972_v36  ;;  %v3963_v8 = vsub.s32 32, %v3962_v56 }
 0x44a   :  { %v3967_v34 = vsub.s32 4294967266, %v3962_v56  ;;  %v4102_v55 = vand.u32 2139095040, %v15033_v61  ;;  %v3978_v31 = vsel %vm3893_vm2, %v3977_v18, %v15001_v13  ;;  %v4242_v58 = vsel %vm4236_vm3, %v4239_v42, %v4241_v11  ;;  %v15074_v13 = vld [vmem:[%s16164_s1] ss:$0 sm:$0xff] }
 0x44b   :  { %v15064_v10 = vmul.u32.u64.low %v15030_v51, %v4250_v3  ;;  %v15065_v23 = vmul.u32.u64.high %v15030_v51, %v4250_v3, %v15064_v10  ;;  %v3964_v22 = vshll.u32 %v15011_v14, %v3962_v56  ;;  %v3965_v63 = vshrl.u32 %v3947_v35, %v3963_v8 }
 0x44c   :  { %v3968_v59 = vadd.s32 127, %v3967_v34  ;;  %v4103_v38 = vshrl.u32 %v4102_v55, 23  ;;  %v11129_v36 = vpop.eup %11128  ;;  %vm4094_vm13 = vcmp.eq.s32.totalorder %v15026_v54, 2  ;;  %v4261_v2 = vadd.s32 1, %v15052_v9 }
 0x44d   :  { %v4099_v0 = vand.u32 2147483647, %v15033_v61  ;;  %v15077_v45 = vmul.f32 %v15074_v13, %v259_v44  ;;  %v11131_v60 = vpop.eup %11130  ;;  %v4095_v14 = vxor.u32 2147483648, %v11129_v36  ;;  %v3966_v25 = vor.u32 %v3965_v63, %v3964_v22 }
 0x44e   :  { %v3969_v21 = vshll.u32 %v3968_v59, 23  ;;  %v10548_v62 = vadd.s32 4294967169, %v4103_v38  ;;  %v4092_v48 = vxor.u32 2147483648, %v11131_v60  ;;  %v3980_v52 = vsel %vm15039_vm7, 0, %v3978_v31 }
 0x44f   :  { %v4258_v6 = vmul.u32 %v15030_v51, %v4242_v58  ;;  %vm4260_vm14 = vc.u32 %v15065_v23, %v15051_v43  ;;  %v4096_v40 = vsel %vm4094_vm13, %v4095_v14, %v11131_v60  ;;  %v9100_v17 = vsel %vm9098_vm5, %v4095_v14, %v11131_v60 }
 0x450   :  { %v3970_v12 = vor.u32 4788187, %v3969_v21  ;;  %v3973_v57 = vcvt.s32.f32 %v3966_v25  ;;  %v4093_v5 = vsel %vm4091_vm6, %v11129_v36, %v4092_v48  ;;  %v9097_v19 = vsel %vm9095_vm8, %v11129_v36, %v4092_v48 }
 0x451   :  { %v4262_v18 = vsel %vm4260_vm14, %v4261_v2, %v15052_v9  ;;  %v4109_v49 = vadd.s32 1, %v10548_v62  ;;  %v4097_v51 = vsel %vm4090_vm10, %v4093_v5, %v4096_v40  ;;  %v9101_v53 = vsel %vm9094_vm11, %v9097_v19, %v9100_v17 }
 0x452   :  { %v3971_v1 = vand.u32 2147483647, %v3970_v12  ;;  %v4263_v47 = vadd.s32 %v4262_v18, %v4258_v6  ;;  %v4098_v39 = vsel %vm4087_vm12, nan, %v4097_v51  ;;  %v9102_v50 = vsel %vm4087_vm12, nan, %v9101_v53 }
 0x453   :  { %v3984_v42 = vadd.s32 3, %v3980_v52  ;;  %vm4110_vm15 = vcmp.gt.s32.totalorder %v4109_v49, 0  ;;  %5382 = vst [vmem:[#allocation2 + $0x230] sm:$0xff] %v4098_v39  ;;  %10374 = vst [vmem:[#allocation2 + $0x238] sm:$0xff] %v9102_v50  ;;  %v4106_v54 = vand.u32 8388607, %v4099_v0  ;;  %v4259_v40 = vadd.s32 %v15051_v43, %v15065_v23 }
 0x454   :  { %v3974_v32 = vmul.f32 %v3973_v57, %v3971_v1  ;;  %v4264_v46 = vadd.s32 536870912, %v4263_v47  ;;  %v4111_v11 = vsel %vm4110_vm15, %v4109_v49, 0  ;;  %v4414_v29 = vand.u32 2139095040, %v15077_v45 }
 0x455   :  { %v4113_v15 = vand.u32 31, %v4111_v11  ;;  %v15102_v3 = vand.u32 3, %v3980_v52  ;;  %vm4205_vm4 = vcmp.lt.s32.totalorder %v14839_v4, 0  ;;  %v15107_v35 = vand.u32 3, %v3984_v42 }
 0x456   :  { %v3975_v33 = vxor.u32 2147483648, %v3974_v32  ;;  %v4265_v56 = vshrl.u32 %v4264_v46, 30  ;;  %v4107_v34 = vor.u32 8388608, %v4106_v54  ;;  %v4415_v58 = vshrl.u32 %v4414_v29, 23 }
 0x457   :  { %v4114_v16 = vsub.s32 32, %v4113_v15  ;;  %vm15116_vm1 = vcmp.le.f32.partialorder %v4203_v27, 0.7853982  ;;  %v4116_v63 = vshll.u32 %v11217_v20, %v4113_v15  ;;  %v15124_v7 = vshrl.u32 %v4111_v11, 5 }
 0x458   :  { %v3976_v9 = vsel %vm3893_vm2, %v3975_v33, %v3974_v32  ;;  %v4266_v8 = vshll.u32 %v4265_v56, 30  ;;  %v4119_v38 = vshll.u32 %v11218_v24, %v4113_v15  ;;  %v4122_v36 = vshll.u32 %v11219_v26, %v4113_v15 }
 0x459   :  { %v3979_v55 = vsel %vm15039_vm7, %v14809_v41, %v3976_v9  ;;  %v4117_v44 = vshrl.u32 %v11218_v24, %v4114_v16  ;;  %v4120_v31 = vshrl.u32 %v11219_v26, %v4114_v16  ;;  %v4123_v59 = vshrl.u32 %v11220_v28, %v4114_v16 }
 0x45a   :  { %11132 = vcosq.f32 %v3979_v55  ;;  %v15120_v22 = vsub.s32 %v4263_v47, %v4266_v8  ;;  %v4289_v60 = vsub.s32 4, %v4265_v56  ;;  %v4125_v14 = vshll.u32 %v11220_v28, %v4113_v15 }
 0x45b   :  { %11134 = vsinq.f32 %v3979_v55  ;;  %v4118_v27 = vor.u32 %v4117_v44, %v4116_v63  ;;  %v4121_v25 = vor.u32 %v4120_v31, %v4119_v38  ;;  %v4126_v21 = vshrl.u32 %v11221_v30, %v4114_v16 }
 0x45c   :  { %v4269_v2 = vsub.s32 0, %v15120_v22  ;;  %v4128_v62 = vshll.u32 %v11221_v30, %v4113_v15  ;;  %v4129_v48 = vshrl.u32 %v11222_v37, %v4114_v16  ;;  %vm3990_vm2 = vcmp.eq.s32.totalorder %v15107_v35, 2 }
 0x45d   :  { %vm8995_vm7 = vcmp.eq.s32.totalorder %v15102_v3, 2  ;;  %v4124_v6 = vor.u32 %v4123_v59, %v4122_v36  ;;  %vm3987_vm0 = vcmp.eq.s32.totalorder %v15107_v35, 0  ;;  %vm8992_vm5 = vcmp.eq.s32.totalorder %v15102_v3, 0 }
 0x45e   :  { %v10553_v52 = vmin.u32 %v4269_v2, %v15120_v22  ;;  %v4127_v17 = vor.u32 %v4126_v21, %v4125_v14  ;;  %v4130_v12 = vor.u32 %v4129_v48, %v4128_v62  ;;  %v15140_v57 = vshll.u32 %v4107_v34, 8 }
 0x45f   :  { %vm3986_vm3 = vcmp.lt.s32.totalorder %v15107_v35, 2  ;;  %vm8991_vm6 = vcmp.lt.s32.totalorder %v15102_v3, 2  ;;  %v4290_v19 = vsel %vm4205_vm4, %v4289_v60, %v4265_v56  ;;  %vm4131_vm8 = vcmp.lt.s32.totalorder %v15124_v7, 1 }
 0x460   :  { %v4271_v5 = vclz %v10553_v52  ;;  %v10560_v18 = vadd.s32 4294967169, %v4415_v58  ;;  %vm3983_vm9 = vweird.f32 %v14809_v41  ;;  %v4115_v49 = vshrl.u32 %v11217_v20, %v4114_v16 }
 0x461   :  { %vm4133_vm10 = vcmp.lt.s32.totalorder %v15124_v7, 3  ;;  %vm4134_vm11 = vcmp.lt.s32.totalorder %v15124_v7, 4  ;;  %v4139_v43 = vsel %vm4131_vm8, %v4118_v27, %v4121_v25  ;;  %v4143_v1 = vsel %vm4131_vm8, %v4121_v25, %v4124_v6 }
 0x462   :  { %v10554_v23 = vadd.s32 4294967294, %v4271_v5  ;;  %v4136_v51 = vsel %vm4134_vm11, %v4124_v6, 2102212464  ;;  %v4140_v53 = vsel %vm4134_vm11, %v4127_v17, 920167782  ;;  %v4292_v47 = vsel %vm15116_vm1, 0, %v4290_v19  ;;  %v254_v19 = vpop.permute.xlu0 %253 }
 0x463   :  { %vm4132_vm12 = vcmp.lt.s32.totalorder %v15124_v7, 2  ;;  %v4141_v39 = vsel %vm4133_vm10, %v4124_v6, %v4140_v53  ;;  %v4144_v50 = vsel %vm4134_vm11, %v4130_v12, 1326507024  ;;  %v4135_v32 = vsel %vm4131_vm8, %v4115_v49, %v4118_v27 }
 0x464   :  { %v11133_v42 = vpop.eup %11132  ;;  %vm10555_vm13 = vcmp.lt.s32.totalorder %v10554_v23, 0  ;;  %v4137_v46 = vsel %vm4133_vm10, %v4121_v25, %v4136_v51  ;;  %v4145_v54 = vsel %vm4133_vm10, %v4127_v17, %v4144_v50  ;;  %v4142_v33 = vsel %vm4132_vm12, %v4139_v43, %v4141_v39 }
 0x465   :  { %v11135_v11 = vpop.eup %11134  ;;  %v3991_v15 = vxor.u32 2147483648, %v11133_v42  ;;  %v4274_v29 = vsel %vm10555_vm13, 0, %v10554_v23  ;;  %v4146_v56 = vsel %vm4132_vm12, %v4143_v1, %v4145_v54  ;;  %v4138_v35 = vsel %vm4132_vm12, %v4135_v32, %v4137_v46 }
 0x466   :  { %v3988_v16 = vxor.u32 2147483648, %v11135_v11  ;;  %v4275_v9 = vsub.s32 32, %v4274_v29  ;;  %v4276_v8 = vshll.u32 %v15120_v22, %v4274_v29  ;;  %v4279_v34 = vsub.s32 4294967266, %v4274_v29 }
 0x467   :  { %v3992_v55 = vsel %vm3990_vm2, %v3991_v15, %v11135_v11  ;;  %v8997_v44 = vsel %vm8995_vm7, %v3991_v15, %v11135_v11  ;;  %v15170_v31 = vmul.u32.u64.low %v15140_v57, %v4146_v56  ;;  %v15171_v58 = vmul.u32.u64.high %v15140_v57, %v4146_v56, %v15170_v31 }
 0x468   :  { %v3989_v63 = vsel %vm3987_vm0, %v11133_v42, %v3988_v16  ;;  %v8994_v59 = vsel %vm8992_vm5, %v11133_v42, %v3988_v16  ;;  %v4277_v38 = vshrl.u32 %v4259_v40, %v4275_v9  ;;  %v4280_v36 = vadd.s32 127, %v4279_v34 }
 0x469   :  { %v3993_v22 = vsel %vm3986_vm3, %v3989_v63, %v3992_v55  ;;  %v8998_v2 = vsel %vm8991_vm6, %v8994_v59, %v8997_v44  ;;  %v15182_v60 = vmul.u32.u64.low %v15140_v57, %v4142_v33  ;;  %v15183_v27 = vmul.u32.u64.high %v15140_v57, %v4142_v33, %v15182_v60 }
 0x46a   :  { %v3994_v14 = vsel %vm3983_vm9, nan, %v3993_v22  ;;  %v8999_v25 = vsel %vm3983_vm9, nan, %v8998_v2  ;;  %v4278_v21 = vor.u32 %v4277_v38, %v4276_v8  ;;  %v4281_v62 = vshll.u32 %v4280_v36, 23 }
 0x46b   :  { %5381 = vst [vmem:[#allocation2 + $0x220] sm:$0xff] %v3994_v14  ;;  %10373 = vst [vmem:[#allocation2 + $0x228] sm:$0xff] %v8999_v25  ;;  %v4421_v3 = vadd.s32 1, %v10560_v18  ;;  %vm4156_vm14 = vc.u32 %v15171_v58, %v15182_v60  ;;  %v4296_v52 = vadd.s32 3, %v4292_v47  ;;  %v4157_v6 = vadd.s32 1, %v15183_v27 }
 0x46c   :  { %v4282_v48 = vor.u32 4788187, %v4281_v62  ;;  %v4411_v40 = vand.u32 2147483647, %v15077_v45  ;;  %v4285_v17 = vcvt.s32.f32 %v4278_v21  ;;  %v4154_v12 = vmul.u32 %v15140_v57, %v4138_v35 }
 0x46d   :  { %vm4422_vm15 = vcmp.gt.s32.totalorder %v4421_v3, 0  ;;  %v4158_v7 = vsel %vm4156_vm14, %v4157_v6, %v15183_v27  ;;  %v15201_v53 = vmul.f32 %v15074_v13, %v254_v19  ;;  %v15203_v39 = vand.u32 3, %v4296_v52 }
 0x46e   :  { %v4283_v41 = vand.u32 2147483647, %v4282_v48  ;;  %v4423_v5 = vsel %vm4422_vm15, %v4421_v3, 0  ;;  %v4159_v43 = vadd.s32 %v4158_v7, %v4154_v12  ;;  %v4418_v23 = vand.u32 8388607, %v4411_v40 }
 0x46f   :  { %v4425_v49 = vand.u32 31, %v4423_v5  ;;  %v15205_v50 = vand.u32 3, %v4292_v47  ;;  %v15207_v42 = vshrl.u32 %v4423_v5, 5  ;;  %v4310_v63 = vand.u32 2139095040, %v15201_v53 }
 0x470   :  { %v4286_v18 = vmul.f32 %v4285_v17, %v4283_v41  ;;  %v4160_v57 = vadd.s32 536870912, %v4159_v43  ;;  %v4307_v22 = vand.u32 2147483647, %v15201_v53  ;;  %v4419_v27 = vor.u32 8388608, %v4418_v23 }
 0x471   :  { %v4426_v51 = vsub.s32 32, %v4425_v49  ;;  %v4428_v56 = vshll.u32 %v11217_v20, %v4425_v49  ;;  %v4437_v16 = vshll.u32 %v11220_v28, %v4425_v49  ;;  %v4440_v9 = vshll.u32 %v11221_v30, %v4425_v49 }
 0x472   :  { %v4287_v1 = vxor.u32 2147483648, %v4286_v18  ;;  %v15214_v15 = vshrl.u32 %v4160_v57, 30  ;;  %v4431_v34 = vshll.u32 %v11218_v24, %v4425_v49  ;;  %v4434_v55 = vshll.u32 %v11219_v26, %v4425_v49 }
 0x473   :  { %v4429_v32 = vshrl.u32 %v11218_v24, %v4426_v51  ;;  %v4432_v46 = vshrl.u32 %v11219_v26, %v4426_v51  ;;  %v4435_v54 = vshrl.u32 %v11220_v28, %v4426_v51  ;;  %v4438_v29 = vshrl.u32 %v11221_v30, %v4426_v51 }
 0x474   :  { %v4288_v11 = vsel %vm4205_vm4, %v4287_v1, %v4286_v18  ;;  %v4441_v33 = vshrl.u32 %v11222_v37, %v4426_v51  ;;  %v4162_v8 = vshll.u32 %v15214_v15, 30  ;;  %vm9304_vm4 = vcmp.eq.s32.totalorder %v15205_v50, 2 }
 0x475   :  { %v4291_v47 = vsel %vm15116_vm1, %v14839_v4, %v4288_v11  ;;  %v4439_v44 = vor.u32 %v4438_v29, %v4437_v16  ;;  %v4430_v59 = vor.u32 %v4429_v32, %v4428_v56  ;;  %v4433_v38 = vor.u32 %v4432_v46, %v4431_v34 }
 0x476   :  { %11136 = vcosq.f32 %v4291_v47  ;;  %v4442_v31 = vor.u32 %v4441_v33, %v4440_v9  ;;  %v15228_v10 = vsub.s32 %v4159_v43, %v4162_v8  ;;  %v4436_v36 = vor.u32 %v4435_v54, %v4434_v55 }
 0x477   :  { %11138 = vsinq.f32 %v4291_v47  ;;  %vm4446_vm1 = vcmp.lt.s32.totalorder %v15207_v42, 4  ;;  %vm4299_vm2 = vcmp.eq.s32.totalorder %v15203_v39, 0  ;;  %vm9301_vm7 = vcmp.eq.s32.totalorder %v15205_v50, 0 }
 0x478   :  { %v4165_v2 = vsub.s32 0, %v15228_v10  ;;  %vm4443_vm0 = vcmp.lt.s32.totalorder %v15207_v42, 1  ;;  %v4452_v14 = vsel %vm4446_vm1, %v4439_v44, 920167782  ;;  %v4456_v25 = vsel %vm4446_vm1, %v4442_v31, 1326507024 }
 0x479   :  { %v4311_v21 = vshrl.u32 %v4310_v63, 23  ;;  %vm4298_vm5 = vcmp.lt.s32.totalorder %v15203_v39, 2  ;;  %vm9300_vm3 = vcmp.lt.s32.totalorder %v15205_v50, 2  ;;  %vm4445_vm6 = vcmp.lt.s32.totalorder %v15207_v42, 3 }
 0x47a   :  { %v10549_v62 = vmin.u32 %v4165_v2, %v15228_v10  ;;  %v4451_v35 = vsel %vm4443_vm0, %v4430_v59, %v4433_v38  ;;  %v4455_v3 = vsel %vm4443_vm0, %v4433_v38, %v4436_v36  ;;  %vm4295_vm8 = vweird.f32 %v14839_v4 }
 0x47b   :  { %v4427_v48 = vshrl.u32 %v11217_v20, %v4426_v51  ;;  %v4448_v52 = vsel %vm4446_vm1, %v4436_v36, 2102212464  ;;  %v4453_v6 = vsel %vm4445_vm6, %v4436_v36, %v4452_v14  ;;  %v4457_v41 = vsel %vm4445_vm6, %v4439_v44, %v4456_v25 }
 0x47c   :  { %vm4302_vm9 = vcmp.eq.s32.totalorder %v15203_v39, 2  ;;  %v4167_v17 = vclz %v10549_v62  ;;  %vm4444_vm10 = vcmp.lt.s32.totalorder %v15207_v42, 2  ;;  %v4459_v12 = vshll.u32 %v4419_v27, 8 }
 0x47d   :  { %vm4101_vm11 = vcmp.lt.s32.totalorder %v15033_v61, 0  ;;  %v4447_v5 = vsel %vm4443_vm0, %v4427_v48, %v4430_v59  ;;  %v4454_v19 = vsel %vm4444_vm10, %v4451_v35, %v4453_v6  ;;  %v4458_v7 = vsel %vm4444_vm10, %v4455_v3, %v4457_v41 }
 0x47e   :  { %v10556_v49 = vadd.s32 4294967169, %v4311_v21  ;;  %v10550_v43 = vadd.s32 4294967294, %v4167_v17  ;;  %v4449_v23 = vsel %vm4445_vm6, %v4433_v38, %v4448_v52  ;;  %v4155_v33 = vadd.s32 %v15182_v60, %v15171_v58  ;;  %v269_v60 = vpop.permute.xlu1 %268 }
 0x47f   :  { %v15262_v51 = vmul.u32.u64.low %v4459_v12, %v4458_v7  ;;  %v15263_v1 = vmul.u32.u64.high %v4459_v12, %v4458_v7, %v15262_v51  ;;  %v15265_v46 = vmul.u32.u64.low %v4459_v12, %v4454_v19  ;;  %v15266_v54 = vmul.u32.u64.high %v4459_v12, %v4454_v19, %v15265_v46 }
 0x480   :  { %v11137_v18 = vpop.eup %11136  ;;  %v4317_v11 = vadd.s32 1, %v10556_v49  ;;  %vm10551_vm12 = vcmp.lt.s32.totalorder %v10550_v43, 0  ;;  %v4185_v47 = vsub.s32 4, %v15214_v15  ;;  %v4450_v8 = vsel %vm4444_vm10, %v4447_v5, %v4449_v23 }
 0x481   :  { %v11139_v57 = vpop.eup %11138  ;;  %v4303_v32 = vxor.u32 2147483648, %v11137_v18  ;;  %v4170_v9 = vsel %vm10551_vm12, 0, %v10550_v43  ;;  %vm4468_vm14 = vc.u32 %v15263_v1, %v15265_v46  ;;  %v4469_v2 = vadd.s32 1, %v15266_v54 }
 0x482   :  { %v4300_v29 = vxor.u32 2147483648, %v11139_v57  ;;  %v4171_v58 = vsub.s32 32, %v4170_v9  ;;  %vm4318_vm13 = vcmp.gt.s32.totalorder %v4317_v11, 0  ;;  %v4172_v63 = vshll.u32 %v15228_v10, %v4170_v9 }
 0x483   :  { %v4304_v56 = vsel %vm4302_vm9, %v4303_v32, %v11139_v57  ;;  %v9306_v16 = vsel %vm9304_vm4, %v4303_v32, %v11139_v57  ;;  %v4175_v59 = vsub.s32 4294967266, %v4170_v9  ;;  %v4319_v50 = vsel %vm4318_vm13, %v4317_v11, 0 }
 0x484   :  { %v4301_v34 = vsel %vm4299_vm2, %v11137_v18, %v4300_v29  ;;  %v9303_v55 = vsel %vm9301_vm7, %v11137_v18, %v4300_v29  ;;  %v4173_v36 = vshrl.u32 %v4155_v33, %v4171_v58  ;;  %v15295_v27 = vmul.f32 %v15074_v13, %v269_v60 }
 0x485   :  { %v4305_v44 = vsel %vm4298_vm5, %v4301_v34, %v4304_v56  ;;  %v9307_v31 = vsel %vm9300_vm3, %v9303_v55, %v9306_v16  ;;  %v4176_v39 = vadd.s32 127, %v4175_v59  ;;  %v4186_v14 = vsel %vm4101_vm11, %v4185_v47, %v15214_v15 }
 0x486   :  { %v4306_v42 = vsel %vm4295_vm8, nan, %v4305_v44  ;;  %v9308_v38 = vsel %vm4295_vm8, nan, %v9307_v31  ;;  %v4174_v10 = vor.u32 %v4173_v36, %v4172_v63  ;;  %v4466_v4 = vmul.u32 %v4459_v12, %v4450_v8 }
 0x487   :  { %5384 = vst [vmem:[#allocation2 + $0x250] sm:$0xff] %v4306_v42  ;;  %10376 = vst [vmem:[#allocation2 + $0x258] sm:$0xff] %v9308_v38  ;;  %v4321_v25 = vand.u32 31, %v4319_v50  ;;  %v4177_v21 = vshll.u32 %v4176_v39, 23  ;;  %v4470_v62 = vsel %vm4468_vm14, %v4469_v2, %v15266_v54  ;;  %vm15303_vm15 = vcmp.le.f32.partialorder %v4099_v0, 0.7853982 }
 0x488   :  { %v4471_v3 = vadd.s32 %v4470_v62, %v4466_v4  ;;  %v4188_v6 = vsel %vm15303_vm15, 0, %v4186_v14  ;;  %v4314_v15 = vand.u32 8388607, %v4307_v22  ;;  %v4622_v41 = vand.u32 2139095040, %v15295_v27 }
 0x489   :  { %v4322_v48 = vsub.s32 32, %v4321_v25  ;;  %v4178_v52 = vor.u32 4788187, %v4177_v21  ;;  %v4181_v17 = vcvt.s32.f32 %v4174_v10  ;;  %v4333_v49 = vshll.u32 %v11220_v28, %v4321_v25 }
 0x48a   :  { %v4472_v12 = vadd.s32 536870912, %v4471_v3  ;;  %v4320_v23 = vshrl.u32 %v4319_v50, 5  ;;  %v4324_v51 = vshll.u32 %v11217_v20, %v4321_v25  ;;  %v4327_v57 = vshll.u32 %v11218_v24, %v4321_v25 }
 0x48b   :  { %v4325_v5 = vshrl.u32 %v11218_v24, %v4322_v48  ;;  %v4328_v0 = vshrl.u32 %v11219_v26, %v4322_v48  ;;  %v4179_v19 = vand.u32 2147483647, %v4178_v52  ;;  %v4331_v7 = vshrl.u32 %v11220_v28, %v4322_v48 }
 0x48c   :  { %v4334_v18 = vshrl.u32 %v11221_v30, %v4322_v48  ;;  %v15317_v43 = vshrl.u32 %v4472_v12, 30  ;;  %v4330_v54 = vshll.u32 %v11219_v26, %v4321_v25  ;;  %v4337_v29 = vshrl.u32 %v11222_v37, %v4322_v48 }
 0x48d   :  { %v4182_v32 = vmul.f32 %v4181_v17, %v4179_v19  ;;  %v4315_v47 = vor.u32 8388608, %v4314_v15  ;;  %v4326_v56 = vor.u32 %v4325_v5, %v4324_v51  ;;  %v4329_v16 = vor.u32 %v4328_v0, %v4327_v57 }
 0x48e   :  { %v4335_v11 = vor.u32 %v4334_v18, %v4333_v49  ;;  %v4474_v33 = vshll.u32 %v15317_v43, 30  ;;  %v4332_v8 = vor.u32 %v4331_v7, %v4330_v54  ;;  %v4336_v34 = vshll.u32 %v11221_v30, %v4321_v25 }
 0x48f   :  { %v4183_v9 = vxor.u32 2147483648, %v4182_v32  ;;  %v4623_v55 = vshrl.u32 %v4622_v41, 23  ;;  %v4192_v58 = vadd.s32 3, %v4188_v6  ;;  %v15325_v60 = vand.u32 3, %v4188_v6 }
 0x490   :  { %v15327_v44 = vsub.s32 %v4471_v3, %v4474_v33  ;;  %vm4342_vm4 = vcmp.lt.s32.totalorder %v4320_v23, 4  ;;  %v4338_v63 = vor.u32 %v4337_v29, %v4336_v34  ;;  %vm4339_vm1 = vcmp.lt.s32.totalorder %v4320_v23, 1 }
 0x491   :  { %v4184_v31 = vsel %vm4101_vm11, %v4183_v9, %v4182_v32  ;;  %v4348_v59 = vsel %vm4342_vm4, %v4335_v11, 920167782  ;;  %vm4341_vm2 = vcmp.lt.s32.totalorder %v4320_v23, 3  ;;  %v4347_v36 = vsel %vm4339_vm1, %v4326_v56, %v4329_v16 }
 0x492   :  { %v4187_v42 = vsel %vm15303_vm15, %v15033_v61, %v4184_v31  ;;  %v4477_v38 = vsub.s32 0, %v15327_v44  ;;  %v4323_v39 = vshrl.u32 %v11217_v20, %v4322_v48  ;;  %v4349_v2 = vsel %vm4341_vm2, %v4332_v8, %v4348_v59 }
 0x493   :  { %11140 = vcosq.f32 %v4187_v42  ;;  %v10568_v50 = vadd.s32 4294967169, %v4623_v55  ;;  %vm4340_vm7 = vcmp.lt.s32.totalorder %v4320_v23, 2  ;;  %v4344_v14 = vsel %vm4342_vm4, %v4332_v8, 2102212464 }
 0x494   :  { %11142 = vsinq.f32 %v4187_v42  ;;  %v10561_v10 = vmin.u32 %v4477_v38, %v15327_v44  ;;  %v4350_v4 = vsel %vm4340_vm7, %v4347_v36, %v4349_v2  ;;  %v4351_v25 = vsel %vm4339_vm1, %v4329_v16, %v4332_v8 }
 0x495   :  { %v4352_v21 = vsel %vm4342_vm4, %v4338_v63, 1326507024  ;;  %v4355_v62 = vshll.u32 %v4315_v47, 8  ;;  %v4193_v35 = vand.u32 3, %v4192_v58  ;;  %vm4413_vm0 = vcmp.lt.s32.totalorder %v15077_v45, 0 }
 0x496   :  { %v4479_v3 = vclz %v10561_v10  ;;  %v4343_v48 = vsel %vm4339_vm1, %v4323_v39, %v4326_v56  ;;  %v4345_v52 = vsel %vm4341_vm2, %v4329_v16, %v4344_v14  ;;  %v4353_v6 = vsel %vm4341_vm2, %v4335_v11, %v4352_v21 }
 0x497   :  { %v15348_v15 = vmul.u32.u64.low %v4355_v62, %v4350_v4  ;;  %v15349_v41 = vmul.u32.u64.high %v4355_v62, %v4350_v4, %v15348_v15  ;;  %v4354_v12 = vsel %vm4340_vm7, %v4351_v25, %v4353_v6  ;;  %v4619_v5 = vand.u32 2147483647, %v15295_v27 }
 0x498   :  { %v10562_v17 = vadd.s32 4294967294, %v4479_v3  ;;  %v4629_v0 = vadd.s32 1, %v10568_v50  ;;  %vm9197_vm5 = vcmp.lt.s32.totalorder %v15325_v60, 2  ;;  %vm9198_vm3 = vcmp.eq.s32.totalorder %v15325_v60, 0 }
 0x499   :  { %vm9201_vm6 = vcmp.eq.s32.totalorder %v15325_v60, 2  ;;  %vm15359_vm8 = vcmp.le.f32.partialorder %v4411_v40, 0.7853982  ;;  %v15363_v7 = vmul.u32.u64.low %v4355_v62, %v4354_v12  ;;  %v15364_v49 = vmul.u32.u64.high %v4355_v62, %v4354_v12, %v15363_v7 }
 0x49a   :  { %vm4191_vm9 = vweird.f32 %v15033_v61  ;;  %vm4194_vm10 = vcmp.lt.s32.totalorder %v4193_v35, 2  ;;  %vm10563_vm11 = vcmp.lt.s32.totalorder %v10562_v17, 0  ;;  %v4346_v18 = vsel %vm4340_vm7, %v4343_v48, %v4345_v52 }
 0x49b   :  { %vm4630_vm12 = vcmp.gt.s32.totalorder %v4629_v0, 0  ;;  %v4482_v51 = vsel %vm10563_vm11, 0, %v10562_v17  ;;  %v4497_v57 = vsub.s32 4, %v15317_v43  ;;  %v4365_v32 = vadd.s32 1, %v15349_v41 }
 0x49c   :  { %v4631_v54 = vsel %vm4630_vm12, %v4629_v0, 0  ;;  %vm4195_vm13 = vcmp.eq.s32.totalorder %v4193_v35, 0  ;;  %v4467_v40 = vadd.s32 %v15265_v46, %v15263_v1  ;;  %v4483_v11 = vsub.s32 32, %v4482_v51 }
 0x49d   :  { %v4487_v29 = vsub.s32 4294967266, %v4482_v51  ;;  %v11141_v33 = vpop.eup %11140  ;;  %v4484_v47 = vshll.u32 %v15327_v44, %v4482_v51  ;;  %v4362_v56 = vmul.u32 %v4355_v62, %v4346_v18  ;;  %vm4364_vm14 = vc.u32 %v15364_v49, %v15348_v15 }
 0x49e   :  { %v4633_v23 = vand.u32 31, %v4631_v54  ;;  %v11143_v16 = vpop.eup %11142  ;;  %v4199_v9 = vxor.u32 2147483648, %v11141_v33  ;;  %v4485_v8 = vshrl.u32 %v4467_v40, %v4483_v11  ;;  %v4366_v55 = vsel %vm4364_vm14, %v4365_v32, %v15349_v41 }
 0x49f   :  { %v4488_v34 = vadd.s32 127, %v4487_v29  ;;  %v4196_v58 = vxor.u32 2147483648, %v11143_v16  ;;  %vm4198_vm15 = vcmp.eq.s32.totalorder %v4193_v35, 2  ;;  %v4498_v1 = vsel %vm4413_vm0, %v4497_v57, %v15317_v43 }
 0x4a0   :  { %v4367_v46 = vadd.s32 %v4366_v55, %v4362_v56  ;;  %v4200_v31 = vsel %vm4198_vm15, %v4199_v9, %v11143_v16  ;;  %v9203_v44 = vsel %vm9201_vm6, %v4199_v9, %v11143_v16  ;;  %v4486_v63 = vor.u32 %v4485_v8, %v4484_v47  ;;  %v264_v47 = vpop.permute.xlu0 %263 }
 0x4a1   :  { %v4489_v59 = vshll.u32 %v4488_v34, 23  ;;  %v4197_v42 = vsel %vm4195_vm13, %v11141_v33, %v4196_v58  ;;  %v9200_v38 = vsel %vm9198_vm3, %v11141_v33, %v4196_v58  ;;  %v4634_v39 = vsub.s32 32, %v4633_v23 }
 0x4a2   :  { %v4368_v36 = vadd.s32 536870912, %v4367_v46  ;;  %v4201_v2 = vsel %vm4194_vm10, %v4197_v42, %v4200_v31  ;;  %v9204_v50 = vsel %vm9197_vm5, %v9200_v38, %v9203_v44  ;;  %v4500_v10 = vsel %vm15359_vm8, 0, %v4498_v1 }
 0x4a3   :  { %v4490_v43 = vor.u32 4788187, %v4489_v59  ;;  %v4202_v14 = vsel %vm4191_vm9, nan, %v4201_v2  ;;  %v9205_v4 = vsel %vm4191_vm9, nan, %v9204_v50  ;;  %v4626_v21 = vand.u32 8388607, %v4619_v5 }
 0x4a4   :  { %v15393_v25 = vshrl.u32 %v4368_v36, 30  ;;  %5383 = vst [vmem:[#allocation2 + $0x240] sm:$0xff] %v4202_v14  ;;  %10375 = vst [vmem:[#allocation2 + $0x248] sm:$0xff] %v9205_v4  ;;  %v4493_v60 = vcvt.s32.f32 %v4486_v63  ;;  %v4504_v35 = vadd.s32 3, %v4500_v10  ;;  %v4637_v48 = vshrl.u32 %v11218_v24, %v4634_v39 }
 0x4a5   :  { %v4491_v62 = vand.u32 2147483647, %v4490_v43  ;;  %v15399_v6 = vand.u32 3, %v4500_v10  ;;  %v4640_v61 = vshrl.u32 %v11219_v26, %v4634_v39  ;;  %v4643_v41 = vshrl.u32 %v11220_v28, %v4634_v39 }
 0x4a6   :  { %v4370_v3 = vshll.u32 %v15393_v25, 30  ;;  %v4627_v12 = vor.u32 8388608, %v4626_v21  ;;  %v4636_v0 = vshll.u32 %v11217_v20, %v4633_v23  ;;  %v4646_v7 = vshrl.u32 %v11221_v30, %v4634_v39 }
 0x4a7   :  { %v4494_v52 = vmul.f32 %v4493_v60, %v4491_v62  ;;  %v4639_v51 = vshll.u32 %v11218_v24, %v4633_v23  ;;  %v4642_v57 = vshll.u32 %v11219_v26, %v4633_v23  ;;  %v4649_v32 = vshrl.u32 %v11222_v37, %v4634_v39 }
 0x4a8   :  { %v15403_v17 = vsub.s32 %v4367_v46, %v4370_v3  ;;  %v4632_v11 = vshrl.u32 %v4631_v54, 5  ;;  %v4638_v29 = vor.u32 %v4637_v48, %v4636_v0  ;;  %v4645_v33 = vshll.u32 %v11220_v28, %v4633_v23 }
 0x4a9   :  { %v4495_v18 = vxor.u32 2147483648, %v4494_v52  ;;  %v4641_v16 = vor.u32 %v4640_v61, %v4639_v51  ;;  %v4644_v9 = vor.u32 %v4643_v41, %v4642_v57  ;;  %v4648_v8 = vshll.u32 %v11221_v30, %v4633_v23  ;;  %v279_v61 = vpop.permute.xlu1 %278 }
 0x4aa   :  { %v4373_v40 = vsub.s32 0, %v15403_v17  ;;  %v15418_v55 = vand.u32 3, %v4504_v35  ;;  %vm4309_vm4 = vcmp.lt.s32.totalorder %v15201_v53, 0  ;;  %v4647_v58 = vor.u32 %v4646_v7, %v4645_v33 }
 0x4ab   :  { %v4496_v56 = vsel %vm4413_vm0, %v4495_v18, %v4494_v52  ;;  %v4650_v1 = vor.u32 %v4649_v32, %v4648_v8  ;;  %v15422_v46 = vshll.u32 %v4627_v12, 8  ;;  %v15425_v31 = vmul.f32 %v15074_v13, %v264_v47 }
 0x4ac   :  { %v4499_v34 = vsel %vm15359_vm8, %v15077_v45, %v4496_v56  ;;  %v10557_v54 = vmin.u32 %v4373_v40, %v15403_v17  ;;  %vm4651_vm1 = vcmp.lt.s32.totalorder %v4632_v11, 1  ;;  %vm4654_vm2 = vcmp.lt.s32.totalorder %v4632_v11, 4 }
 0x4ad   :  { %11144 = vcosq.f32 %v4499_v34  ;;  %v4393_v19 = vsub.s32 4, %v15393_v25  ;;  %v4635_v44 = vshrl.u32 %v11217_v20, %v4634_v39  ;;  %v4656_v63 = vsel %vm4654_vm2, %v4644_v9, 2102212464 }
 0x4ae   :  { %11146 = vsinq.f32 %v4499_v34  ;;  %v4375_v23 = vclz %v10557_v54  ;;  %v4659_v59 = vsel %vm4651_vm1, %v4638_v29, %v4641_v16  ;;  %vm15431_vm7 = vcmp.le.f32.partialorder %v4307_v22, 0.7853982 }
 0x4af   :  { %vm4653_vm0 = vcmp.lt.s32.totalorder %v4632_v11, 3  ;;  %v4660_v36 = vsel %vm4654_vm2, %v4647_v58, 920167782  ;;  %v4663_v2 = vsel %vm4651_vm1, %v4641_v16, %v4644_v9  ;;  %vm9510_vm5 = vcmp.eq.s32.totalorder %v15399_v6, 2 }
 0x4b0   :  { %v10558_v38 = vadd.s32 4294967294, %v4375_v23  ;;  %vm4652_vm3 = vcmp.lt.s32.totalorder %v4632_v11, 2  ;;  %v4655_v50 = vsel %vm4651_vm1, %v4635_v44, %v4638_v29  ;;  %v4661_v43 = vsel %vm4653_vm0, %v4644_v9, %v4660_v36 }
 0x4b1   :  { %v4664_v10 = vsel %vm4654_vm2, %v4650_v1, 1326507024  ;;  %vm4507_vm6 = vcmp.eq.s32.totalorder %v15418_v55, 0  ;;  %vm9507_vm8 = vcmp.eq.s32.totalorder %v15399_v6, 0  ;;  %v4657_v39 = vsel %vm4653_vm0, %v4641_v16, %v4656_v63 }
 0x4b2   :  { %vm10559_vm9 = vcmp.lt.s32.totalorder %v10558_v38, 0  ;;  %v4662_v22 = vsel %vm4652_vm3, %v4659_v59, %v4661_v43  ;;  %v4665_v14 = vsel %vm4653_vm0, %v4647_v58, %v4664_v10  ;;  %vm4506_vm10 = vcmp.lt.s32.totalorder %v15418_v55, 2 }
 0x4b3   :  { %vm9506_vm11 = vcmp.lt.s32.totalorder %v15399_v6, 2  ;;  %v4378_v4 = vsel %vm10559_vm9, 0, %v10558_v38  ;;  %v4666_v21 = vsel %vm4652_vm3, %v4663_v2, %v4665_v14  ;;  %vm4503_vm12 = vweird.f32 %v15077_v45 }
 0x4b4   :  { %v15443_v62 = vmul.u32.u64.low %v15422_v46, %v4662_v22  ;;  %v15444_v60 = vmul.u32.u64.high %v15422_v46, %v4662_v22, %v15443_v62  ;;  %v4363_v35 = vadd.s32 %v15348_v15, %v15364_v49  ;;  %v4379_v3 = vsub.s32 32, %v4378_v4 }
 0x4b5   :  { %v4383_v48 = vsub.s32 4294967266, %v4378_v4  ;;  %v4518_v52 = vand.u32 2139095040, %v15425_v31  ;;  %v4394_v41 = vsel %vm4309_vm4, %v4393_v19, %v15393_v25  ;;  %v4658_v12 = vsel %vm4652_vm3, %v4655_v50, %v4657_v39 }
 0x4b6   :  { %v15456_v0 = vmul.u32.u64.low %v15422_v46, %v4666_v21  ;;  %v15457_v7 = vmul.u32.u64.high %v15422_v46, %v4666_v21, %v15456_v0  ;;  %v4380_v18 = vshll.u32 %v15403_v17, %v4378_v4  ;;  %v4381_v51 = vshrl.u32 %v4363_v35, %v4379_v3 }
 0x4b7   :  { %v4384_v57 = vadd.s32 127, %v4383_v48  ;;  %v4519_v15 = vshrl.u32 %v4518_v52, 23  ;;  %v11145_v49 = vpop.eup %11144  ;;  %vm4510_vm13 = vcmp.eq.s32.totalorder %v15418_v55, 2  ;;  %v4677_v32 = vadd.s32 1, %v15444_v60 }
 0x4b8   :  { %v4515_v40 = vand.u32 2147483647, %v15425_v31  ;;  %v15464_v25 = vmul.f32 %v15074_v13, %v279_v61  ;;  %v11147_v11 = vpop.eup %11146  ;;  %v4511_v29 = vxor.u32 2147483648, %v11145_v49  ;;  %v4382_v33 = vor.u32 %v4381_v51, %v4380_v18 }
 0x4b9   :  { %v4385_v47 = vshll.u32 %v4384_v57, 23  ;;  %v10564_v56 = vadd.s32 4294967169, %v4519_v15  ;;  %v4508_v16 = vxor.u32 2147483648, %v11147_v11  ;;  %v4396_v17 = vsel %vm15431_vm7, 0, %v4394_v41 }
 0x4ba   :  { %v4674_v9 = vmul.u32 %v15422_v46, %v4658_v12  ;;  %vm4676_vm14 = vc.u32 %v15457_v7, %v15443_v62  ;;  %v4512_v8 = vsel %vm4510_vm13, %v4511_v29, %v11147_v11  ;;  %v9512_v34 = vsel %vm9510_vm5, %v4511_v29, %v11147_v11 }
 0x4bb   :  { %v4386_v13 = vor.u32 4788187, %v4385_v47  ;;  %v4389_v54 = vcvt.s32.f32 %v4382_v33  ;;  %v4509_v58 = vsel %vm4507_vm6, %v11145_v49, %v4508_v16  ;;  %v9509_v1 = vsel %vm9507_vm8, %v11145_v49, %v4508_v16 }
 0x4bc   :  { %v4678_v23 = vsel %vm4676_vm14, %v4677_v32, %v15444_v60  ;;  %v4525_v19 = vadd.s32 1, %v10564_v56  ;;  %v4513_v46 = vsel %vm4506_vm10, %v4509_v58, %v4512_v8  ;;  %v9513_v44 = vsel %vm9506_vm11, %v9509_v1, %v9512_v34 }
 0x4bd   :  { %v4387_v63 = vand.u32 2147483647, %v4386_v13  ;;  %v4679_v59 = vadd.s32 %v4678_v23, %v4674_v9  ;;  %v4514_v38 = vsel %vm4503_vm12, nan, %v4513_v46  ;;  %v9514_v36 = vsel %vm4503_vm12, nan, %v9513_v44 }
 0x4be   :  { %v4400_v2 = vadd.s32 3, %v4396_v17  ;;  %vm4526_vm15 = vcmp.gt.s32.totalorder %v4525_v19, 0  ;;  %5386 = vst [vmem:[#allocation2 + $0x270] sm:$0xff] %v4514_v38  ;;  %10378 = vst [vmem:[#allocation2 + $0x278] sm:$0xff] %v9514_v36  ;;  %v4522_v55 = vand.u32 8388607, %v4515_v40  ;;  %v4675_v9 = vadd.s32 %v15443_v62, %v15457_v7 }
 0x4bf   :  { %v4390_v50 = vmul.f32 %v4389_v54, %v4387_v63  ;;  %v4680_v43 = vadd.s32 536870912, %v4679_v59  ;;  %v4527_v10 = vsel %vm4526_vm15, %v4525_v19, 0  ;;  %v4830_v39 = vand.u32 2139095040, %v15464_v25 }
 0x4c0   :  { %v4529_v6 = vand.u32 31, %v4527_v10  ;;  %v15489_v4 = vand.u32 3, %v4396_v17  ;;  %vm4621_vm1 = vcmp.lt.s32.totalorder %v15295_v27, 0  ;;  %v15494_v60 = vand.u32 3, %v4400_v2 }
 0x4c1   :  { %v4391_v22 = vxor.u32 2147483648, %v4390_v50  ;;  %v4681_v14 = vshrl.u32 %v4680_v43, 30  ;;  %v4523_v3 = vor.u32 8388608, %v4522_v55  ;;  %v4831_v41 = vshrl.u32 %v4830_v39, 23 }
 0x4c2   :  { %v4530_v45 = vsub.s32 32, %v4529_v6  ;;  %vm15503_vm2 = vcmp.le.f32.partialorder %v4619_v5, 0.7853982  ;;  %v4532_v18 = vshll.u32 %v11217_v20, %v4529_v6  ;;  %v15511_v42 = vshrl.u32 %v4527_v10, 5 }
 0x4c3   :  { %v4392_v21 = vsel %vm4309_vm4, %v4391_v22, %v4390_v50  ;;  %v4682_v35 = vshll.u32 %v4681_v14, 30  ;;  %v4535_v57 = vshll.u32 %v11218_v24, %v4529_v6  ;;  %v4538_v15 = vshll.u32 %v11219_v26, %v4529_v6 }
 0x4c4   :  { %v4395_v48 = vsel %vm15431_vm7, %v15201_v53, %v4392_v21  ;;  %v4533_v52 = vshrl.u32 %v11218_v24, %v4530_v45  ;;  %v4536_v61 = vshrl.u32 %v11219_v26, %v4530_v45  ;;  %v4539_v51 = vshrl.u32 %v11220_v28, %v4530_v45 }
 0x4c5   :  { %11148 = vcosq.f32 %v4395_v48  ;;  %v15507_v0 = vsub.s32 %v4679_v59, %v4682_v35  ;;  %v4705_v32 = vsub.s32 4, %v4681_v14  ;;  %v4541_v11 = vshll.u32 %v11220_v28, %v4529_v6 }
 0x4c6   :  { %11150 = vsinq.f32 %v4395_v48  ;;  %v4534_v5 = vor.u32 %v4533_v52, %v4532_v18  ;;  %v4537_v29 = vor.u32 %v4536_v61, %v4535_v57  ;;  %v4542_v33 = vshrl.u32 %v11221_v30, %v4530_v45 }
 0x4c7   :  { %v4685_v49 = vsub.s32 0, %v15507_v0  ;;  %v4544_v47 = vshll.u32 %v11221_v30, %v4529_v6  ;;  %v4545_v56 = vshrl.u32 %v11222_v37, %v4530_v45  ;;  %vm4406_vm4 = vcmp.eq.s32.totalorder %v15494_v60, 2 }
 0x4c8   :  { %vm9407_vm7 = vcmp.eq.s32.totalorder %v15489_v4, 2  ;;  %v4540_v17 = vor.u32 %v4539_v51, %v4538_v15  ;;  %vm4403_vm0 = vcmp.eq.s32.totalorder %v15494_v60, 0  ;;  %vm9404_vm5 = vcmp.eq.s32.totalorder %v15489_v4, 0 }
 0x4c9   :  { %v10569_v16 = vmin.u32 %v4685_v49, %v15507_v0  ;;  %v4543_v8 = vor.u32 %v4542_v33, %v4541_v11  ;;  %v4546_v34 = vor.u32 %v4545_v56, %v4544_v47  ;;  %v15527_v13 = vshll.u32 %v4523_v3, 8 }
 0x4ca   :  { %vm4402_vm3 = vcmp.lt.s32.totalorder %v15494_v60, 2  ;;  %vm9403_vm6 = vcmp.lt.s32.totalorder %v15489_v4, 2  ;;  %v4706_v58 = vsel %vm4621_vm1, %v4705_v32, %v4681_v14  ;;  %vm4547_vm8 = vcmp.lt.s32.totalorder %v15511_v42, 1 }
 0x4cb   :  { %v4687_v54 = vclz %v10569_v16  ;;  %v10576_v1 = vadd.s32 4294967169, %v4831_v41  ;;  %vm4399_vm9 = vweird.f32 %v15201_v53  ;;  %v4531_v23 = vshrl.u32 %v11217_v20, %v4530_v45 }
 0x4cc   :  { %vm4549_vm10 = vcmp.lt.s32.totalorder %v15511_v42, 3  ;;  %vm4550_vm11 = vcmp.lt.s32.totalorder %v15511_v42, 4  ;;  %v4555_v62 = vsel %vm4547_vm8, %v4534_v5, %v4537_v29  ;;  %v4559_v44 = vsel %vm4547_vm8, %v4537_v29, %v4540_v17 }
 0x4cd   :  { %v10570_v7 = vadd.s32 4294967294, %v4687_v54  ;;  %v4552_v19 = vsel %vm4550_vm11, %v4540_v17, 2102212464  ;;  %v4556_v46 = vsel %vm4550_vm11, %v4543_v8, 920167782  ;;  %v4708_v63 = vsel %vm15503_vm2, 0, %v4706_v58  ;;  %v274_v54 = vpop.permute.xlu0 %273 }
 0x4ce   :  { %vm4548_vm12 = vcmp.lt.s32.totalorder %v15511_v42, 2  ;;  %v4557_v59 = vsel %vm4549_vm10, %v4540_v17, %v4556_v46  ;;  %v4560_v38 = vsel %vm4550_vm11, %v4546_v34, 1326507024  ;;  %v4551_v2 = vsel %vm4547_vm8, %v4531_v23, %v4534_v5 }
 0x4cf   :  { %v11149_v36 = vpop.eup %11148  ;;  %vm10571_vm13 = vcmp.lt.s32.totalorder %v10570_v7, 0  ;;  %v4553_v50 = vsel %vm4549_vm10, %v4537_v29, %v4552_v19  ;;  %v4561_v43 = vsel %vm4549_vm10, %v4543_v8, %v4560_v38  ;;  %v4558_v39 = vsel %vm4548_vm12, %v4555_v62, %v4557_v59  ;;  %v15590_v19 = vld [vmem:[%s16164_s1] ss:$0 sm:$0xff]  ;;  %s11223_s1 = smov [#allocation2]  }
 0x4d0   :  { %v11151_v55 = vpop.eup %11150  ;;  %v4407_v10 = vxor.u32 2147483648, %v11149_v36  ;;  %v4690_v6 = vsel %vm10571_vm13, 0, %v10570_v7  ;;  %v4562_v22 = vsel %vm4548_vm12, %v4559_v44, %v4561_v43  ;;  %v4554_v60 = vsel %vm4548_vm12, %v4551_v2, %v4553_v50  ;;  %s10392_s10 = sshll.u32 %s11223_s1, 4  ;;  %s10393_s10 = int_to_ptr.vmem [resolvable:$true] %s10392_s10 }
 0x4d1   :  { %v4404_v14 = vxor.u32 2147483648, %v11151_v55  ;;  %v4691_v45 = vsub.s32 32, %v4690_v6  ;;  %v4692_v21 = vshll.u32 %v15507_v0, %v4690_v6  ;;  %v4695_v35 = vsub.s32 4294967266, %v4690_v6  ;;  %s11192_s11 = scalar_lea.vmem %s10393_s10, 12288  ;;  %p11197_p1 = scmp.lt.s32.totalorder %s10393_s10, %s10393_s10 }
 0x4d2   :  { %v4408_v3 = vsel %vm4406_vm4, %v4407_v10, %v11151_v55  ;;  %v9409_v48 = vsel %vm9407_vm7, %v4407_v10, %v11151_v55  ;;  %v15557_v52 = vmul.u32.u64.low %v15527_v13, %v4562_v22  ;;  %v15558_v61 = vmul.u32.u64.high %v15527_v13, %v4562_v22, %v15557_v52  ;;  %p11193_p0 = scmp.ne.s32.totalorder %s10393_s10, %s11192_s11  ;;  %p11198_p2 = scmp.lt.s32.totalorder %s11192_s11, %s11192_s11 }
 0x4d3   :  { %v4405_v41 = vsel %vm4403_vm0, %v11149_v36, %v4404_v14  ;;  %v9406_v18 = vsel %vm9404_vm5, %v11149_v36, %v4404_v14  ;;  %v4693_v51 = vshrl.u32 %v4675_v9, %v4691_v45  ;;  %v4696_v57 = vadd.s32 127, %v4695_v35 }
 0x4d4   :  { %v4409_v0 = vsel %vm4402_vm3, %v4405_v41, %v4408_v3  ;;  %v9410_v15 = vsel %vm9403_vm6, %v9406_v18, %v9409_v48  ;;  %v15569_v49 = vmul.u32.u64.low %v15527_v13, %v4558_v39  ;;  %v15570_v32 = vmul.u32.u64.high %v15527_v13, %v4558_v39, %v15569_v49  ;;  %p11199_p3 = por %p11198_p2, %p11197_p1 }
 0x4d5   :  { %v4410_v5 = vsel %vm4399_vm9, nan, %v4409_v0  ;;  %v9411_v11 = vsel %vm4399_vm9, nan, %v9410_v15  ;;  %v4694_v29 = vor.u32 %v4693_v51, %v4692_v21  ;;  %v4697_v33 = vshll.u32 %v4696_v57, 23 }
 0x4d6   :  { %5385 = vst [vmem:[#allocation2 + $0x260] sm:$0xff] %v4410_v5  ;;  %10377 = vst [vmem:[#allocation2 + $0x268] sm:$0xff] %v9411_v11  ;;  %v4837_v4 = vadd.s32 1, %v10576_v1  ;;  %vm4572_vm14 = vc.u32 %v15558_v61, %v15569_v49  ;;  %v4712_v56 = vadd.s32 3, %v4708_v63  ;;  %v4573_v16 = vadd.s32 1, %v15570_v32  ;;  %p11200_p4 = pnand %p11199_p3, %p11193_p0 }
 0x4d7   :  { %v4698_v47 = vor.u32 4788187, %v4697_v33  ;;  %v4827_v17 = vand.u32 2147483647, %v15464_v25  ;;  %v4701_v9 = vcvt.s32.f32 %v4694_v29  ;;  %v4570_v8 = vmul.u32 %v15527_v13, %v4554_v60 }
 0x4d8   :  { %vm4838_vm15 = vcmp.gt.s32.totalorder %v4837_v4, 0  ;;  %v4574_v42 = vsel %vm4572_vm14, %v4573_v16, %v15570_v32  ;;  %v15593_v46 = vmul.f32 %v15590_v19, %v274_v54  ;;  %v15595_v44 = vand.u32 3, %v4712_v56 }
 0x4d9   :  { %v4699_v53 = vand.u32 2147483647, %v4698_v47  ;;  %v4839_v34 = vsel %vm4838_vm15, %v4837_v4, 0  ;;  %v4575_v23 = vadd.s32 %v4574_v42, %v4570_v8  ;;  %v4834_v62 = vand.u32 8388607, %v4827_v17 }
 0x4da   :  { %v4841_v58 = vand.u32 31, %v4839_v34  ;;  %v15597_v59 = vand.u32 3, %v4708_v63  ;;  %v15599_v36 = vshrl.u32 %v4839_v34, 5  ;;  %v4726_v41 = vand.u32 2139095040, %v15593_v46 }
 0x4db   :  { %v4702_v1 = vmul.f32 %v4701_v9, %v4699_v53  ;;  %v4576_v38 = vadd.s32 536870912, %v4575_v23  ;;  %v4723_v0 = vand.u32 2147483647, %v15593_v46  ;;  %v4835_v32 = vor.u32 8388608, %v4834_v62 }
 0x4dc   :  { %v4842_v7 = vsub.s32 32, %v4841_v58  ;;  %v4844_v22 = vshll.u32 %v11217_v20, %v4841_v58  ;;  %v4853_v14 = vshll.u32 %v11220_v28, %v4841_v58  ;;  %v4856_v45 = vshll.u32 %v11221_v30, %v4841_v58 }
 0x4dd   :  { %v4703_v13 = vxor.u32 2147483648, %v4702_v1  ;;  %v15606_v10 = vshrl.u32 %v4576_v38, 30  ;;  %v4847_v35 = vshll.u32 %v11218_v24, %v4841_v58  ;;  %v4850_v3 = vshll.u32 %v11219_v26, %v4841_v58 }
 0x4de   :  { %v4845_v2 = vshrl.u32 %v11218_v24, %v4842_v7  ;;  %v4848_v50 = vshrl.u32 %v11219_v26, %v4842_v7  ;;  %v4851_v43 = vshrl.u32 %v11220_v28, %v4842_v7  ;;  %v4854_v6 = vshrl.u32 %v11221_v30, %v4842_v7 }
 0x4df   :  { %v4704_v55 = vsel %vm4621_vm1, %v4703_v13, %v4702_v1  ;;  %v4857_v39 = vshrl.u32 %v11222_v37, %v4842_v7  ;;  %v4578_v21 = vshll.u32 %v15606_v10, 30  ;;  %vm9716_vm1 = vcmp.eq.s32.totalorder %v15597_v59, 2 }
 0x4e0   :  { %v4707_v63 = vsel %vm15503_vm2, %v15295_v27, %v4704_v55  ;;  %v4855_v48 = vor.u32 %v4854_v6, %v4853_v14  ;;  %v4846_v18 = vor.u32 %v4845_v2, %v4844_v22  ;;  %v4849_v51 = vor.u32 %v4848_v50, %v4847_v35 }
 0x4e1   :  { %11152 = vcosq.f32 %v4707_v63  ;;  %v4858_v52 = vor.u32 %v4857_v39, %v4856_v45  ;;  %v15620_v12 = vsub.s32 %v4575_v23, %v4578_v21  ;;  %v4852_v57 = vor.u32 %v4851_v43, %v4850_v3 }
 0x4e2   :  { %11154 = vsinq.f32 %v4707_v63  ;;  %vm4862_vm2 = vcmp.lt.s32.totalorder %v15599_v36, 4  ;;  %vm4715_vm4 = vcmp.eq.s32.totalorder %v15595_v44, 0  ;;  %vm9713_vm7 = vcmp.eq.s32.totalorder %v15597_v59, 0 }
 0x4e3   :  { %v4581_v15 = vsub.s32 0, %v15620_v12  ;;  %vm4859_vm0 = vcmp.lt.s32.totalorder %v15599_v36, 1  ;;  %v4868_v5 = vsel %vm4862_vm2, %v4855_v48, 920167782  ;;  %v4872_v11 = vsel %vm4862_vm2, %v4858_v52, 1326507024 }
 0x4e4   :  { %v4727_v29 = vshrl.u32 %v4726_v41, 23  ;;  %vm4714_vm5 = vcmp.lt.s32.totalorder %v15595_v44, 2  ;;  %vm9712_vm3 = vcmp.lt.s32.totalorder %v15597_v59, 2  ;;  %vm4861_vm6 = vcmp.lt.s32.totalorder %v15599_v36, 3 }
 0x4e5   :  { %v10565_v33 = vmin.u32 %v4581_v15, %v15620_v12  ;;  %v4867_v60 = vsel %vm4859_vm0, %v4846_v18, %v4849_v51  ;;  %v4871_v4 = vsel %vm4859_vm0, %v4849_v51, %v4852_v57  ;;  %vm4711_vm8 = vweird.f32 %v15295_v27 }
 0x4e6   :  { %v4843_v47 = vshrl.u32 %v11217_v20, %v4842_v7  ;;  %v4864_v56 = vsel %vm4862_vm2, %v4852_v57, 2102212464  ;;  %v4869_v16 = vsel %vm4861_vm6, %v4852_v57, %v4868_v5  ;;  %v4873_v53 = vsel %vm4861_vm6, %v4855_v48, %v4872_v11 }
 0x4e7   :  { %vm4718_vm9 = vcmp.eq.s32.totalorder %v15595_v44, 2  ;;  %v4583_v9 = vclz %v10565_v33  ;;  %vm4860_vm10 = vcmp.lt.s32.totalorder %v15599_v36, 2  ;;  %v4875_v8 = vshll.u32 %v4835_v32, 8 }
 0x4e8   :  { %vm4517_vm11 = vcmp.lt.s32.totalorder %v15425_v31, 0  ;;  %v4863_v34 = vsel %vm4859_vm0, %v4843_v47, %v4846_v18  ;;  %v4870_v54 = vsel %vm4860_vm10, %v4867_v60, %v4869_v16  ;;  %v4874_v42 = vsel %vm4860_vm10, %v4871_v4, %v4873_v53 }
 0x4e9   :  { %v10572_v58 = vadd.s32 4294967169, %v4727_v29  ;;  %v10566_v23 = vadd.s32 4294967294, %v4583_v9  ;;  %v4865_v62 = vsel %vm4861_vm6, %v4849_v51, %v4864_v56  ;;  %v4571_v39 = vadd.s32 %v15569_v49, %v15558_v61  ;;  %v289_v49 = vpop.permute.xlu1 %288 }
 0x4ea   :  { %v15654_v7 = vmul.u32.u64.low %v4875_v8, %v4874_v42  ;;  %v15655_v13 = vmul.u32.u64.high %v4875_v8, %v4874_v42, %v15654_v7  ;;  %v15657_v50 = vmul.u32.u64.low %v4875_v8, %v4870_v54  ;;  %v15658_v43 = vmul.u32.u64.high %v4875_v8, %v4870_v54, %v15657_v50 }
 0x4eb   :  { %v11153_v1 = vpop.eup %11152  ;;  %v4733_v55 = vadd.s32 1, %v10572_v58  ;;  %vm10567_vm12 = vcmp.lt.s32.totalorder %v10566_v23, 0  ;;  %v4601_v63 = vsub.s32 4, %v15606_v10  ;;  %v4866_v21 = vsel %vm4860_vm10, %v4863_v34, %v4865_v62 }
 0x4ec   :  { %v11155_v38 = vpop.eup %11154  ;;  %v4719_v2 = vxor.u32 2147483648, %v11153_v1  ;;  %v4586_v45 = vsel %vm10567_vm12, 0, %v10566_v23  ;;  %vm4884_vm14 = vc.u32 %v15655_v13, %v15657_v50  ;;  %v4885_v15 = vadd.s32 1, %v15658_v43 }
 0x4ed   :  { %v4716_v6 = vxor.u32 2147483648, %v11155_v38  ;;  %v4587_v61 = vsub.s32 32, %v4586_v45  ;;  %vm4734_vm13 = vcmp.gt.s32.totalorder %v4733_v55, 0  ;;  %v4588_v41 = vshll.u32 %v15620_v12, %v4586_v45 }
 0x4ee   :  { %v4720_v22 = vsel %vm4718_vm9, %v4719_v2, %v11155_v38  ;;  %v9718_v14 = vsel %vm9716_vm1, %v4719_v2, %v11155_v38  ;;  %v4591_v18 = vsub.s32 4294967266, %v4586_v45  ;;  %v4735_v59 = vsel %vm4734_vm13, %v4733_v55, 0 }
 0x4ef   :  { %v4717_v35 = vsel %vm4715_vm4, %v11153_v1, %v4716_v6  ;;  %v9715_v3 = vsel %vm9713_vm7, %v11153_v1, %v4716_v6  ;;  %v4589_v57 = vshrl.u32 %v4571_v39, %v4587_v61  ;;  %v15687_v32 = vmul.f32 %v15590_v19, %v289_v49 }
 0x4f0   :  { %v4721_v48 = vsel %vm4714_vm5, %v4717_v35, %v4720_v22  ;;  %v9719_v52 = vsel %vm9712_vm3, %v9715_v3, %v9718_v14  ;;  %v4592_v44 = vadd.s32 127, %v4591_v18  ;;  %v4602_v5 = vsel %vm4517_vm11, %v4601_v63, %v15606_v10 }
 0x4f1   :  { %v4722_v36 = vsel %vm4711_vm8, nan, %v4721_v48  ;;  %v9720_v51 = vsel %vm4711_vm8, nan, %v9719_v52  ;;  %v4590_v12 = vor.u32 %v4589_v57, %v4588_v41  ;;  %v4882_v27 = vmul.u32 %v4875_v8, %v4866_v21 }
 0x4f2   :  { %5388 = vst [vmem:[#allocation2 + $0x290] sm:$0xff] %v4722_v36  ;;  %10380 = vst [vmem:[#allocation2 + $0x298] sm:$0xff] %v9720_v51  ;;  %v4737_v11 = vand.u32 31, %v4735_v59  ;;  %v4593_v29 = vshll.u32 %v4592_v44, 23  ;;  %v4886_v33 = vsel %vm4884_vm14, %v4885_v15, %v15658_v43  ;;  %vm15695_vm15 = vcmp.le.f32.partialorder %v4515_v40, 0.7853982 }
 0x4f3   :  { %v4887_v4 = vadd.s32 %v4886_v33, %v4882_v27  ;;  %v4604_v16 = vsel %vm15695_vm15, 0, %v4602_v5  ;;  %v4730_v10 = vand.u32 8388607, %v4723_v0  ;;  %v5038_v53 = vand.u32 2139095040, %v15687_v32 }
 0x4f4   :  { %v4738_v47 = vsub.s32 32, %v4737_v11  ;;  %v4594_v56 = vor.u32 4788187, %v4593_v29  ;;  %v4597_v9 = vcvt.s32.f32 %v4590_v12  ;;  %v4749_v58 = vshll.u32 %v11220_v28, %v4737_v11 }
 0x4f5   :  { %v4888_v8 = vadd.s32 536870912, %v4887_v4  ;;  %v4736_v62 = vshrl.u32 %v4735_v59, 5  ;;  %v4740_v7 = vshll.u32 %v11217_v20, %v4737_v11  ;;  %v4743_v38 = vshll.u32 %v11218_v24, %v4737_v11 }
 0x4f6   :  { %v4741_v34 = vshrl.u32 %v11218_v24, %v4738_v47  ;;  %v4744_v40 = vshrl.u32 %v11219_v26, %v4738_v47  ;;  %v4595_v54 = vand.u32 2147483647, %v4594_v56  ;;  %v4747_v42 = vshrl.u32 %v11220_v28, %v4738_v47 }
 0x4f7   :  { %v4750_v1 = vshrl.u32 %v11221_v30, %v4738_v47  ;;  %v15709_v23 = vshrl.u32 %v4888_v8, 30  ;;  %v4746_v43 = vshll.u32 %v11219_v26, %v4737_v11  ;;  %v4753_v6 = vshrl.u32 %v11222_v37, %v4738_v47 }
 0x4f8   :  { %v4598_v2 = vmul.f32 %v4597_v9, %v4595_v54  ;;  %v4731_v63 = vor.u32 8388608, %v4730_v10  ;;  %v4742_v22 = vor.u32 %v4741_v34, %v4740_v7  ;;  %v4745_v14 = vor.u32 %v4744_v40, %v4743_v38 }
 0x4f9   :  { %v4751_v55 = vor.u32 %v4750_v1, %v4749_v58  ;;  %v4890_v39 = vshll.u32 %v15709_v23, 30  ;;  %v4748_v21 = vor.u32 %v4747_v42, %v4746_v43  ;;  %v4752_v35 = vshll.u32 %v11221_v30, %v4737_v11 }
 0x4fa   :  { %v4599_v45 = vxor.u32 2147483648, %v4598_v2  ;;  %v5039_v3 = vshrl.u32 %v5038_v53, 23  ;;  %v4608_v61 = vadd.s32 3, %v4604_v16  ;;  %v15717_v49 = vand.u32 3, %v4604_v16 }
 0x4fb   :  { %v15719_v48 = vsub.s32 %v4887_v4, %v4890_v39  ;;  %vm4758_vm1 = vcmp.lt.s32.totalorder %v4736_v62, 4  ;;  %v4754_v41 = vor.u32 %v4753_v6, %v4752_v35  ;;  %vm4755_vm2 = vcmp.lt.s32.totalorder %v4736_v62, 1 }
 0x4fc   :  { %v4600_v52 = vsel %vm4517_vm11, %v4599_v45, %v4598_v2  ;;  %v4764_v18 = vsel %vm4758_vm1, %v4751_v55, 920167782  ;;  %vm4757_vm4 = vcmp.lt.s32.totalorder %v4736_v62, 3  ;;  %v4763_v57 = vsel %vm4755_vm2, %v4742_v22, %v4745_v14 }
 0x4fd   :  { %v4603_v36 = vsel %vm15695_vm15, %v15425_v31, %v4600_v52  ;;  %v4893_v51 = vsub.s32 0, %v15719_v48  ;;  %v4739_v44 = vshrl.u32 %v11217_v20, %v4738_v47  ;;  %v4765_v15 = vsel %vm4757_vm4, %v4748_v21, %v4764_v18 }
 0x4fe   :  { %11156 = vcosq.f32 %v4603_v36  ;;  %v10584_v59 = vadd.s32 4294967169, %v5039_v3  ;;  %vm4756_vm7 = vcmp.lt.s32.totalorder %v4736_v62, 2  ;;  %v4760_v5 = vsel %vm4758_vm1, %v4748_v21, 2102212464 }
 0x4ff   :  { %11158 = vsinq.f32 %v4603_v36  ;;  %v10577_v12 = vmin.u32 %v4893_v51, %v15719_v48  ;;  %v4766_v27 = vsel %vm4756_vm7, %v4763_v57, %v4765_v15  ;;  %v4767_v11 = vsel %vm4755_vm2, %v4745_v14, %v4748_v21 }
 0x500   :  { %v4768_v29 = vsel %vm4758_vm1, %v4754_v41, 1326507024  ;;  %v4771_v33 = vshll.u32 %v4731_v63, 8  ;;  %v4609_v60 = vand.u32 3, %v4608_v61  ;;  %vm4829_vm0 = vcmp.lt.s32.totalorder %v15464_v25, 0 }
 0x501   :  { %v4895_v4 = vclz %v10577_v12  ;;  %v4759_v47 = vsel %vm4755_vm2, %v4739_v44, %v4742_v22  ;;  %v4761_v56 = vsel %vm4757_vm4, %v4745_v14, %v4760_v5  ;;  %v4769_v16 = vsel %vm4757_vm4, %v4751_v55, %v4768_v29 }
 0x502   :  { %v15740_v10 = vmul.u32.u64.low %v4771_v33, %v4766_v27  ;;  %v15741_v53 = vmul.u32.u64.high %v4771_v33, %v4766_v27, %v15740_v10  ;;  %v4770_v8 = vsel %vm4756_vm7, %v4767_v11, %v4769_v16  ;;  %v5035_v34 = vand.u32 2147483647, %v15687_v32 }
 0x503   :  { %v10578_v9 = vadd.s32 4294967294, %v4895_v4  ;;  %v5045_v40 = vadd.s32 1, %v10584_v59  ;;  %vm9609_vm5 = vcmp.lt.s32.totalorder %v15717_v49, 2  ;;  %vm9610_vm3 = vcmp.eq.s32.totalorder %v15717_v49, 0 }
 0x504   :  { %vm9613_vm6 = vcmp.eq.s32.totalorder %v15717_v49, 2  ;;  %vm15751_vm8 = vcmp.le.f32.partialorder %v4827_v17, 0.7853982  ;;  %v15755_v42 = vmul.u32.u64.low %v4771_v33, %v4770_v8  ;;  %v15756_v58 = vmul.u32.u64.high %v4771_v33, %v4770_v8, %v15755_v42 }
 0x505   :  { %vm4607_vm9 = vweird.f32 %v15425_v31  ;;  %vm4610_vm10 = vcmp.lt.s32.totalorder %v4609_v60, 2  ;;  %vm10579_vm11 = vcmp.lt.s32.totalorder %v10578_v9, 0  ;;  %v4762_v1 = vsel %vm4756_vm7, %v4759_v47, %v4761_v56 }
 0x506   :  { %vm5046_vm12 = vcmp.gt.s32.totalorder %v5045_v40, 0  ;;  %v4898_v7 = vsel %vm10579_vm11, 0, %v10578_v9  ;;  %v4913_v38 = vsub.s32 4, %v15709_v23  ;;  %v4781_v2 = vadd.s32 1, %v15741_v53 }
 0x507   :  { %v5047_v43 = vsel %vm5046_vm12, %v5045_v40, 0  ;;  %vm4611_vm13 = vcmp.eq.s32.totalorder %v4609_v60, 0  ;;  %v4883_v17 = vadd.s32 %v15657_v50, %v15655_v13  ;;  %v4899_v55 = vsub.s32 32, %v4898_v7 }
 0x508   :  { %v4903_v6 = vsub.s32 4294967266, %v4898_v7  ;;  %v11157_v39 = vpop.eup %11156  ;;  %v4900_v63 = vshll.u32 %v15719_v48, %v4898_v7  ;;  %v4778_v22 = vmul.u32 %v4771_v33, %v4762_v1  ;;  %vm4780_vm14 = vc.u32 %v15756_v58, %v15740_v10 }
 0x509   :  { %v5049_v62 = vand.u32 31, %v5047_v43  ;;  %v11159_v14 = vpop.eup %11158  ;;  %v4615_v45 = vxor.u32 2147483648, %v11157_v39  ;;  %v4901_v21 = vshrl.u32 %v4883_v17, %v4899_v55  ;;  %v4782_v3 = vsel %vm4780_vm14, %v4781_v2, %v15741_v53 }
 0x50a   :  { %v4904_v35 = vadd.s32 127, %v4903_v6  ;;  %v4612_v61 = vxor.u32 2147483648, %v11159_v14  ;;  %vm4614_vm15 = vcmp.eq.s32.totalorder %v4609_v60, 2  ;;  %v4914_v13 = vsel %vm4829_vm0, %v4913_v38, %v15709_v23 }
 0x50b   :  { %v4783_v50 = vadd.s32 %v4782_v3, %v4778_v22  ;;  %v4616_v52 = vsel %vm4614_vm15, %v4615_v45, %v11159_v14  ;;  %v9615_v48 = vsel %vm9613_vm6, %v4615_v45, %v11159_v14  ;;  %v4902_v41 = vor.u32 %v4901_v21, %v4900_v63  ;;  %v284_v63 = vpop.permute.xlu0 %283 }
 0x50c   :  { %v4905_v18 = vshll.u32 %v4904_v35, 23  ;;  %v4613_v36 = vsel %vm4611_vm13, %v11157_v39, %v4612_v61  ;;  %v9612_v51 = vsel %vm9610_vm3, %v11157_v39, %v4612_v61  ;;  %v5050_v44 = vsub.s32 32, %v5049_v62 }
 0x50d   :  { %v4784_v57 = vadd.s32 536870912, %v4783_v50  ;;  %v4617_v15 = vsel %vm4610_vm10, %v4613_v36, %v4616_v52  ;;  %v9616_v59 = vsel %vm9609_vm5, %v9612_v51, %v9615_v48  ;;  %v4916_v12 = vsel %vm15751_vm8, 0, %v4914_v13 }
 0x50e   :  { %v4906_v23 = vor.u32 4788187, %v4905_v18  ;;  %v4618_v5 = vsel %vm4607_vm9, nan, %v4617_v15  ;;  %v9617_v27 = vsel %vm4607_vm9, nan, %v9616_v59  ;;  %v5042_v29 = vand.u32 8388607, %v5035_v34 }
 0x50f   :  { %v15785_v11 = vshrl.u32 %v4784_v57, 30  ;;  %5387 = vst [vmem:[#allocation2 + $0x280] sm:$0xff] %v4618_v5  ;;  %10379 = vst [vmem:[#allocation2 + $0x288] sm:$0xff] %v9617_v27  ;;  %v4909_v49 = vcvt.s32.f32 %v4902_v41  ;;  %v4920_v60 = vadd.s32 3, %v4916_v12  ;;  %v5053_v47 = vshrl.u32 %v11218_v24, %v5050_v44 }
 0x510   :  { %v4907_v33 = vand.u32 2147483647, %v4906_v23  ;;  %v15791_v16 = vand.u32 3, %v4916_v12  ;;  %v5056_v31 = vshrl.u32 %v11219_v26, %v5050_v44  ;;  %v5059_v53 = vshrl.u32 %v11220_v28, %v5050_v44 }
 0x511   :  { %v4786_v4 = vshll.u32 %v15785_v11, 30  ;;  %v5043_v8 = vor.u32 8388608, %v5042_v29  ;;  %v5052_v40 = vshll.u32 %v11217_v20, %v5049_v62  ;;  %v5062_v42 = vshrl.u32 %v11221_v30, %v5050_v44 }
 0x512   :  { %v4910_v56 = vmul.f32 %v4909_v49, %v4907_v33  ;;  %v5055_v7 = vshll.u32 %v11218_v24, %v5049_v62  ;;  %v5058_v38 = vshll.u32 %v11219_v26, %v5049_v62  ;;  %v5065_v2 = vshrl.u32 %v11222_v37, %v5050_v44 }
 0x513   :  { %v15795_v9 = vsub.s32 %v4783_v50, %v4786_v4  ;;  %v5048_v55 = vshrl.u32 %v5047_v43, 5  ;;  %v5054_v6 = vor.u32 %v5053_v47, %v5052_v40  ;;  %v5061_v39 = vshll.u32 %v11220_v28, %v5049_v62 }
 0x514   :  { %v4911_v1 = vxor.u32 2147483648, %v4910_v56  ;;  %v5057_v14 = vor.u32 %v5056_v31, %v5055_v7  ;;  %v5060_v45 = vor.u32 %v5059_v53, %v5058_v38  ;;  %v5064_v21 = vshll.u32 %v11221_v30, %v5049_v62  ;;  %v299_v31 = vpop.permute.xlu1 %298 }
 0x515   :  { %v4789_v17 = vsub.s32 0, %v15795_v9  ;;  %v15810_v3 = vand.u32 3, %v4920_v60  ;;  %vm4725_vm1 = vcmp.lt.s32.totalorder %v15593_v46, 0  ;;  %v5063_v61 = vor.u32 %v5062_v42, %v5061_v39 }
 0x516   :  { %v4912_v22 = vsel %vm4829_vm0, %v4911_v1, %v4910_v56  ;;  %v5066_v13 = vor.u32 %v5065_v2, %v5064_v21  ;;  %v15814_v50 = vshll.u32 %v5043_v8, 8  ;;  %v15817_v52 = vmul.f32 %v15590_v19, %v284_v63 }
 0x517   :  { %v4915_v35 = vsel %vm15751_vm8, %v15464_v25, %v4912_v22  ;;  %v10573_v43 = vmin.u32 %v4789_v17, %v15795_v9  ;;  %vm5067_vm2 = vcmp.lt.s32.totalorder %v5048_v55, 1  ;;  %vm5070_vm4 = vcmp.lt.s32.totalorder %v5048_v55, 4 }
 0x518   :  { %11160 = vcosq.f32 %v4915_v35  ;;  %v4809_v54 = vsub.s32 4, %v15785_v11  ;;  %v5051_v48 = vshrl.u32 %v11217_v20, %v5050_v44  ;;  %v5072_v41 = vsel %vm5070_vm4, %v5060_v45, 2102212464 }
 0x519   :  { %11162 = vsinq.f32 %v4915_v35  ;;  %v4791_v62 = vclz %v10573_v43  ;;  %v5075_v18 = vsel %vm5067_vm2, %v5054_v6, %v5057_v14  ;;  %vm15823_vm7 = vcmp.le.f32.partialorder %v4723_v0, 0.7853982 }
 0x51a   :  { %vm5069_vm0 = vcmp.lt.s32.totalorder %v5048_v55, 3  ;;  %v5076_v57 = vsel %vm5070_vm4, %v5063_v61, 920167782  ;;  %v5079_v15 = vsel %vm5067_vm2, %v5057_v14, %v5060_v45  ;;  %vm9922_vm5 = vcmp.eq.s32.totalorder %v15791_v16, 2 }
 0x51b   :  { %v10574_v51 = vadd.s32 4294967294, %v4791_v62  ;;  %vm5068_vm3 = vcmp.lt.s32.totalorder %v5048_v55, 2  ;;  %v5071_v59 = vsel %vm5067_vm2, %v5051_v48, %v5054_v6  ;;  %v5077_v23 = vsel %vm5069_vm0, %v5060_v45, %v5076_v57 }
 0x51c   :  { %v5080_v12 = vsel %vm5070_vm4, %v5066_v13, 1326507024  ;;  %vm4923_vm6 = vcmp.eq.s32.totalorder %v15810_v3, 0  ;;  %vm9919_vm8 = vcmp.eq.s32.totalorder %v15791_v16, 0  ;;  %v5073_v44 = vsel %vm5069_vm0, %v5057_v14, %v5072_v41 }
 0x51d   :  { %vm10575_vm9 = vcmp.lt.s32.totalorder %v10574_v51, 0  ;;  %v5078_v0 = vsel %vm5068_vm3, %v5075_v18, %v5077_v23  ;;  %v5081_v5 = vsel %vm5069_vm0, %v5063_v61, %v5080_v12  ;;  %vm4922_vm10 = vcmp.lt.s32.totalorder %v15810_v3, 2 }
 0x51e   :  { %vm9918_vm11 = vcmp.lt.s32.totalorder %v15791_v16, 2  ;;  %v4794_v27 = vsel %vm10575_vm9, 0, %v10574_v51  ;;  %v5082_v29 = vsel %vm5068_vm3, %v5079_v15, %v5081_v5  ;;  %vm4919_vm12 = vweird.f32 %v15464_v25 }
 0x51f   :  { %v15835_v33 = vmul.u32.u64.low %v15814_v50, %v5078_v0  ;;  %v15836_v49 = vmul.u32.u64.high %v15814_v50, %v5078_v0, %v15835_v33  ;;  %v4779_v60 = vadd.s32 %v15740_v10, %v15756_v58  ;;  %v4795_v4 = vsub.s32 32, %v4794_v27 }
 0x520   :  { %v4799_v47 = vsub.s32 4294967266, %v4794_v27  ;;  %v4934_v56 = vand.u32 2139095040, %v15817_v52  ;;  %v4810_v53 = vsel %vm4725_vm1, %v4809_v54, %v15785_v11  ;;  %v5074_v8 = vsel %vm5068_vm3, %v5071_v59, %v5073_v44 }
 0x521   :  { %v15848_v40 = vmul.u32.u64.low %v15814_v50, %v5082_v29  ;;  %v15849_v42 = vmul.u32.u64.high %v15814_v50, %v5082_v29, %v15848_v40  ;;  %v4796_v1 = vshll.u32 %v15795_v9, %v4794_v27  ;;  %v4797_v7 = vshrl.u32 %v4779_v60, %v4795_v4 }
 0x522   :  { %v4800_v38 = vadd.s32 127, %v4799_v47  ;;  %v4935_v10 = vshrl.u32 %v4934_v56, 23  ;;  %v11161_v58 = vpop.eup %11160  ;;  %vm4926_vm13 = vcmp.eq.s32.totalorder %v15810_v3, 2  ;;  %v5093_v2 = vadd.s32 1, %v15836_v49 }
 0x523   :  { %v4931_v17 = vand.u32 2147483647, %v15817_v52  ;;  %v15856_v11 = vmul.f32 %v15590_v19, %v299_v31  ;;  %v11163_v55 = vpop.eup %11162  ;;  %v4927_v6 = vxor.u32 2147483648, %v11161_v58  ;;  %v4798_v39 = vor.u32 %v4797_v7, %v4796_v1 }
 0x524   :  { %v4801_v63 = vshll.u32 %v4800_v38, 23  ;;  %v10580_v22 = vadd.s32 4294967169, %v4935_v10  ;;  %v4924_v14 = vxor.u32 2147483648, %v11163_v55  ;;  %v4812_v9 = vsel %vm15823_vm7, 0, %v4810_v53 }
 0x525   :  { %v5090_v45 = vmul.u32 %v15814_v50, %v5074_v8  ;;  %vm5092_vm14 = vc.u32 %v15849_v42, %v15835_v33  ;;  %v4928_v21 = vsel %vm4926_vm13, %v4927_v6, %v11163_v55  ;;  %v9924_v35 = vsel %vm9922_vm5, %v4927_v6, %v11163_v55 }
 0x526   :  { %v4802_v43 = vor.u32 4788187, %v4801_v63  ;;  %v4805_v61 = vcvt.s32.f32 %v4798_v39  ;;  %v4925_v13 = vsel %vm4923_vm6, %v11161_v58, %v4924_v14  ;;  %v9921_v62 = vsel %vm9919_vm8, %v11161_v58, %v4924_v14 }
 0x527   :  { %v5094_v54 = vsel %vm5092_vm14, %v5093_v2, %v15836_v49  ;;  %v4941_v48 = vadd.s32 1, %v10580_v22  ;;  %v4929_v50 = vsel %vm4922_vm10, %v4925_v13, %v4928_v21  ;;  %v9925_v41 = vsel %vm9918_vm11, %v9921_v62, %v9924_v35 }
 0x528   :  { %v4803_v18 = vand.u32 2147483647, %v4802_v43  ;;  %v5095_v51 = vadd.s32 %v5094_v54, %v5090_v45  ;;  %v4930_v57 = vsel %vm4919_vm12, nan, %v4929_v50  ;;  %v9926_v15 = vsel %vm4919_vm12, nan, %v9925_v41 }
 0x529   :  { %v4816_v59 = vadd.s32 3, %v4812_v9  ;;  %vm4942_vm15 = vcmp.gt.s32.totalorder %v4941_v48, 0  ;;  %5390 = vst [vmem:[#allocation2 + $0x2b0] sm:$0xff] %v4930_v57  ;;  %10382 = vst [vmem:[#allocation2 + $0x2b8] sm:$0xff] %v9926_v15  ;;  %v4938_v3 = vand.u32 8388607, %v4931_v17  ;;  %v5091_v21 = vadd.s32 %v15835_v33, %v15849_v42 }
 0x52a   :  { %v4806_v23 = vmul.f32 %v4805_v61, %v4803_v18  ;;  %v5096_v12 = vadd.s32 536870912, %v5095_v51  ;;  %v4943_v44 = vsel %vm4942_vm15, %v4941_v48, 0  ;;  %v5246_v0 = vand.u32 2139095040, %v15856_v11 }
 0x52b   :  { %v4945_v16 = vand.u32 31, %v4943_v44  ;;  %v15881_v29 = vand.u32 3, %v4812_v9  ;;  %vm5037_vm2 = vcmp.lt.s32.totalorder %v15687_v32, 0  ;;  %v15886_v60 = vand.u32 3, %v4816_v59 }
 0x52c   :  { %v4807_v5 = vxor.u32 2147483648, %v4806_v23  ;;  %v5097_v27 = vshrl.u32 %v5096_v12, 30  ;;  %v4939_v47 = vor.u32 8388608, %v4938_v3  ;;  %v5247_v8 = vshrl.u32 %v5246_v0, 23 }
 0x52d   :  { %v4946_v25 = vsub.s32 32, %v4945_v16  ;;  %vm15895_vm4 = vcmp.le.f32.partialorder %v5035_v34, 0.7853982  ;;  %v4948_v7 = vshll.u32 %v11217_v20, %v4945_v16  ;;  %v15903_v36 = vshrl.u32 %v4943_v44, 5 }
 0x52e   :  { %v4808_v49 = vsel %vm4725_vm1, %v4807_v5, %v4806_v23  ;;  %v5098_v4 = vshll.u32 %v5097_v27, 30  ;;  %v4951_v10 = vshll.u32 %v11218_v24, %v4945_v16  ;;  %v4954_v58 = vshll.u32 %v11219_v26, %v4945_v16 }
 0x52f   :  { %v4811_v56 = vsel %vm15823_vm7, %v15593_v46, %v4808_v49  ;;  %v4949_v31 = vshrl.u32 %v11218_v24, %v4946_v25  ;;  %v4952_v53 = vshrl.u32 %v11219_v26, %v4946_v25  ;;  %v4955_v38 = vshrl.u32 %v11220_v28, %v4946_v25 }
 0x530   :  { %11164 = vcosq.f32 %v4811_v56  ;;  %v15899_v1 = vsub.s32 %v5095_v51, %v5098_v4  ;;  %v5121_v55 = vsub.s32 4, %v5097_v27  ;;  %v4957_v6 = vshll.u32 %v11220_v28, %v4945_v16 }
 0x531   :  { %11166 = vsinq.f32 %v4811_v56  ;;  %v4950_v34 = vor.u32 %v4949_v31, %v4948_v7  ;;  %v4953_v39 = vor.u32 %v4952_v53, %v4951_v10  ;;  %v4958_v63 = vshrl.u32 %v11221_v30, %v4946_v25 }
 0x532   :  { %v5101_v2 = vsub.s32 0, %v15899_v1  ;;  %v4960_v22 = vshll.u32 %v11221_v30, %v4945_v16  ;;  %v4961_v14 = vshrl.u32 %v11222_v37, %v4946_v25  ;;  %vm4822_vm1 = vcmp.eq.s32.totalorder %v15886_v60, 2 }
 0x533   :  { %vm9819_vm7 = vcmp.eq.s32.totalorder %v15881_v29, 2  ;;  %v4956_v45 = vor.u32 %v4955_v38, %v4954_v58  ;;  %vm4819_vm0 = vcmp.eq.s32.totalorder %v15886_v60, 0  ;;  %vm9816_vm5 = vcmp.eq.s32.totalorder %v15881_v29, 0 }
 0x534   :  { %v10585_v9 = vmin.u32 %v5101_v2, %v15899_v1  ;;  %v4959_v35 = vor.u32 %v4958_v63, %v4957_v6  ;;  %v4962_v43 = vor.u32 %v4961_v14, %v4960_v22  ;;  %v15919_v61 = vshll.u32 %v4939_v47, 8 }
 0x535   :  { %vm4818_vm3 = vcmp.lt.s32.totalorder %v15886_v60, 2  ;;  %vm9815_vm6 = vcmp.lt.s32.totalorder %v15881_v29, 2  ;;  %v5122_v62 = vsel %vm5037_vm2, %v5121_v55, %v5097_v27  ;;  %vm4963_vm8 = vcmp.lt.s32.totalorder %v15903_v36, 1 }
 0x536   :  { %v5103_v13 = vclz %v10585_v9  ;;  %v10592_v54 = vadd.s32 4294967169, %v5247_v8  ;;  %vm4815_vm9 = vweird.f32 %v15593_v46  ;;  %v4947_v48 = vshrl.u32 %v11217_v20, %v4946_v25 }
 0x537   :  { %vm4965_vm10 = vcmp.lt.s32.totalorder %v15903_v36, 3  ;;  %vm4966_vm11 = vcmp.lt.s32.totalorder %v15903_v36, 4  ;;  %v4971_v33 = vsel %vm4963_vm8, %v4950_v34, %v4953_v39  ;;  %v4975_v18 = vsel %vm4963_vm8, %v4953_v39, %v4956_v45 }
 0x538   :  { %v10586_v42 = vadd.s32 4294967294, %v5103_v13  ;;  %v4968_v50 = vsel %vm4966_vm11, %v4956_v45, 2102212464  ;;  %v4972_v41 = vsel %vm4966_vm11, %v4959_v35, 920167782  ;;  %v5124_v51 = vsel %vm15895_vm4, 0, %v5122_v62  ;;  %v294_v62 = vpop.permute.xlu0 %293 }
 0x539   :  { %vm4964_vm12 = vcmp.lt.s32.totalorder %v15903_v36, 2  ;;  %v4973_v57 = vsel %vm4965_vm10, %v4956_v45, %v4972_v41  ;;  %v4976_v15 = vsel %vm4966_vm11, %v4962_v43, 1326507024  ;;  %v4967_v23 = vsel %vm4963_vm8, %v4947_v48, %v4950_v34 }
 0x53a   :  { %v11165_v59 = vpop.eup %11164  ;;  %vm10587_vm13 = vcmp.lt.s32.totalorder %v10586_v42, 0  ;;  %v4969_v12 = vsel %vm4965_vm10, %v4953_v39, %v4968_v50  ;;  %v4977_v3 = vsel %vm4965_vm10, %v4959_v35, %v4976_v15  ;;  %v4974_v5 = vsel %vm4964_vm12, %v4971_v33, %v4973_v57 }
 0x53b   :  { %v11167_v44 = vpop.eup %11166  ;;  %v4823_v16 = vxor.u32 2147483648, %v11165_v59  ;;  %v5106_v0 = vsel %vm10587_vm13, 0, %v10586_v42  ;;  %v4978_v27 = vsel %vm4964_vm12, %v4975_v18, %v4977_v3  ;;  %v4970_v60 = vsel %vm4964_vm12, %v4967_v23, %v4969_v12 }
 0x53c   :  { %v4820_v25 = vxor.u32 2147483648, %v11167_v44  ;;  %v5107_v49 = vsub.s32 32, %v5106_v0  ;;  %v5108_v4 = vshll.u32 %v15899_v1, %v5106_v0  ;;  %v5111_v47 = vsub.s32 4294967266, %v5106_v0 }
 0x53d   :  { %v4824_v56 = vsel %vm4822_vm1, %v4823_v16, %v11167_v44  ;;  %v9821_v31 = vsel %vm9819_vm7, %v4823_v16, %v11167_v44  ;;  %v15949_v53 = vmul.u32.u64.low %v15919_v61, %v4978_v27  ;;  %v15950_v8 = vmul.u32.u64.high %v15919_v61, %v4978_v27, %v15949_v53 }
 0x53e   :  { %v4821_v7 = vsel %vm4819_vm0, %v11165_v59, %v4820_v25  ;;  %v9818_v38 = vsel %vm9816_vm5, %v11165_v59, %v4820_v25  ;;  %v5109_v10 = vshrl.u32 %v5091_v21, %v5107_v49  ;;  %v5112_v58 = vadd.s32 127, %v5111_v47 }
 0x53f   :  { %v4825_v1 = vsel %vm4818_vm3, %v4821_v7, %v4824_v56  ;;  %v9822_v2 = vsel %vm9815_vm6, %v9818_v38, %v9821_v31  ;;  %v15961_v55 = vmul.u32.u64.low %v15919_v61, %v4974_v5  ;;  %v15962_v34 = vmul.u32.u64.high %v15919_v61, %v4974_v5, %v15961_v55 }
 0x540   :  { %v4826_v6 = vsel %vm4815_vm9, nan, %v4825_v1  ;;  %v9823_v39 = vsel %vm4815_vm9, nan, %v9822_v2  ;;  %v5110_v63 = vor.u32 %v5109_v10, %v5108_v4  ;;  %v5113_v22 = vshll.u32 %v5112_v58, 23 }
 0x541   :  { %5389 = vst [vmem:[#allocation2 + $0x2a0] sm:$0xff] %v4826_v6  ;;  %10381 = vst [vmem:[#allocation2 + $0x2a8] sm:$0xff] %v9823_v39  ;;  %v5253_v29 = vadd.s32 1, %v10592_v54  ;;  %vm4988_vm14 = vc.u32 %v15950_v8, %v15961_v55  ;;  %v5128_v9 = vadd.s32 3, %v5124_v51  ;;  %v4989_v45 = vadd.s32 1, %v15962_v34 }
 0x542   :  { %v5114_v14 = vor.u32 4788187, %v5113_v22  ;;  %v5243_v21 = vand.u32 2147483647, %v15856_v11  ;;  %v5117_v35 = vcvt.s32.f32 %v5110_v63  ;;  %v4986_v43 = vmul.u32 %v15919_v61, %v4970_v60 }
 0x543   :  { %vm5254_vm15 = vcmp.gt.s32.totalorder %v5253_v29, 0  ;;  %v4990_v36 = vsel %vm4988_vm14, %v4989_v45, %v15962_v34  ;;  %v15980_v41 = vmul.f32 %v15590_v19, %v294_v62  ;;  %v15982_v57 = vand.u32 3, %v5128_v9 }
 0x544   :  { %v5115_v46 = vand.u32 2147483647, %v5114_v14  ;;  %v5255_v13 = vsel %vm5254_vm15, %v5253_v29, 0  ;;  %v4991_v33 = vadd.s32 %v4990_v36, %v4986_v43  ;;  %v5250_v42 = vand.u32 8388607, %v5243_v21 }
 0x545   :  { %v5257_v48 = vand.u32 31, %v5255_v13  ;;  %v15984_v15 = vand.u32 3, %v5124_v51  ;;  %v15986_v59 = vshrl.u32 %v5255_v13, 5  ;;  %v5142_v53 = vand.u32 2139095040, %v15980_v41 }
 0x546   :  { %v5118_v54 = vmul.f32 %v5117_v35, %v5115_v46  ;;  %v4992_v61 = vadd.s32 536870912, %v4991_v33  ;;  %v5251_v1 = vor.u32 8388608, %v5250_v42  ;;  %vm5130_vm0 = vcmp.lt.s32.totalorder %v15982_v57, 2 }
 0x547   :  { %v5258_v50 = vsub.s32 32, %v5257_v48  ;;  %v5260_v5 = vshll.u32 %v11217_v20, %v5257_v48  ;;  %v5269_v27 = vshll.u32 %v11220_v28, %v5257_v48  ;;  %v5272_v25 = vshll.u32 %v11221_v30, %v5257_v48 }
 0x548   :  { %v5119_v18 = vxor.u32 2147483648, %v5118_v54  ;;  %v15993_v16 = vshrl.u32 %v4992_v61, 30  ;;  %v5263_v4 = vshll.u32 %v11218_v24, %v5257_v48  ;;  %v5266_v47 = vshll.u32 %v11219_v26, %v5257_v48 }
 0x549   :  { %v5261_v23 = vshrl.u32 %v11218_v24, %v5258_v50  ;;  %v5264_v12 = vshrl.u32 %v11219_v26, %v5258_v50  ;;  %v5267_v3 = vshrl.u32 %v11220_v28, %v5258_v50  ;;  %v5270_v19 = vshrl.u32 %v11221_v30, %v5258_v50 }
 0x54a   :  { %v5120_v44 = vsel %vm5037_vm2, %v5119_v18, %v5118_v54  ;;  %v5273_v0 = vshrl.u32 %v11222_v37, %v5258_v50  ;;  %v4994_v49 = vshll.u32 %v15993_v16, 30  ;;  %vm10128_vm2 = vcmp.eq.s32.totalorder %v15984_v15, 2 }
 0x54b   :  { %v5123_v51 = vsel %vm15895_vm4, %v15687_v32, %v5120_v44  ;;  %v5271_v56 = vor.u32 %v5270_v19, %v5269_v27  ;;  %v5262_v7 = vor.u32 %v5261_v23, %v5260_v5  ;;  %v5265_v38 = vor.u32 %v5264_v12, %v5263_v4 }
 0x54c   :  { %11168 = vcosq.f32 %v5123_v51  ;;  %v5274_v31 = vor.u32 %v5273_v0, %v5272_v25  ;;  %v16007_v40 = vsub.s32 %v4991_v33, %v4994_v49  ;;  %v5268_v10 = vor.u32 %v5267_v3, %v5266_v47 }
 0x54d   :  { %11170 = vsinq.f32 %v5123_v51  ;;  %vm5278_vm4 = vcmp.lt.s32.totalorder %v15986_v59, 4  ;;  %vm10125_vm1 = vcmp.eq.s32.totalorder %v15984_v15, 0  ;;  %vm5275_vm7 = vcmp.lt.s32.totalorder %v15986_v59, 1 }
 0x54e   :  { %v4997_v58 = vsub.s32 0, %v16007_v40  ;;  %v5284_v2 = vsel %vm5278_vm4, %v5271_v56, 920167782  ;;  %v5288_v34 = vsel %vm5278_vm4, %v5274_v31, 1326507024  ;;  %v5143_v6 = vshrl.u32 %v5142_v53, 23 }
 0x54f   :  { %vm10124_vm5 = vcmp.lt.s32.totalorder %v15984_v15, 2  ;;  %vm5277_vm3 = vcmp.lt.s32.totalorder %v15986_v59, 3  ;;  %v5283_v63 = vsel %vm5275_vm7, %v5262_v7, %v5265_v38  ;;  %v5287_v22 = vsel %vm5275_vm7, %v5265_v38, %v5268_v10 }
 0x550   :  { %v10581_v39 = vmin.u32 %v4997_v58, %v16007_v40  ;;  %vm5127_vm6 = vweird.f32 %v15687_v32  ;;  %v5259_v60 = vshrl.u32 %v11217_v20, %v5258_v50  ;;  %v5280_v29 = vsel %vm5278_vm4, %v5268_v10, 2102212464 }
 0x551   :  { %v5285_v14 = vsel %vm5277_vm3, %v5268_v10, %v5284_v2  ;;  %v5289_v9 = vsel %vm5277_vm3, %v5271_v56, %v5288_v34  ;;  %vm5131_vm8 = vcmp.eq.s32.totalorder %v15982_v57, 0  ;;  %vm5276_vm9 = vcmp.lt.s32.totalorder %v15986_v59, 2 }
 0x552   :  { %v4999_v45 = vclz %v10581_v39  ;;  %v5291_v46 = vshll.u32 %v5251_v1, 8  ;;  %v5279_v35 = vsel %vm5275_vm7, %v5259_v60, %v5262_v7  ;;  %v5286_v43 = vsel %vm5276_vm9, %v5283_v63, %v5285_v14 }
 0x553   :  { %v5290_v13 = vsel %vm5276_vm9, %v5287_v22, %v5289_v9  ;;  %v10588_v62 = vadd.s32 4294967169, %v5143_v6  ;;  %v5281_v54 = vsel %vm5277_vm3, %v5265_v38, %v5280_v29  ;;  %vm5134_vm10 = vcmp.eq.s32.totalorder %v15982_v57, 2 }
 0x554   :  { %v10582_v48 = vadd.s32 4294967294, %v4999_v45  ;;  %v16038_v33 = vmul.u32.u64.low %v5291_v46, %v5290_v13  ;;  %v16039_v42 = vmul.u32.u64.high %v5291_v46, %v5290_v13, %v16038_v33  ;;  %v4987_v44 = vadd.s32 %v15961_v55, %v15950_v8 }
 0x555   :  { %v16041_v61 = vmul.u32.u64.low %v5291_v46, %v5286_v43  ;;  %v16042_v23 = vmul.u32.u64.high %v5291_v46, %v5286_v43, %v16041_v61  ;;  %v5149_v12 = vadd.s32 1, %v10588_v62  ;;  %v5282_v5 = vsel %vm5276_vm9, %v5279_v35, %v5281_v54 }
 0x556   :  { %v11169_v36 = vpop.eup %11168  ;;  %vm10583_vm11 = vcmp.lt.s32.totalorder %v10582_v48, 0  ;;  %v5139_v15 = vand.u32 2147483647, %v15980_v41  ;;  %v5298_v38 = vmul.u32 %v5291_v46, %v5282_v5  ;;  %v5017_v6 = vsub.s32 4, %v15993_v16 }
 0x557   :  { %v11171_v50 = vpop.eup %11170  ;;  %v5135_v18 = vxor.u32 2147483648, %v11169_v36  ;;  %v5002_v51 = vsel %vm10583_vm11, 0, %v10582_v48  ;;  %vm5150_vm12 = vcmp.gt.s32.totalorder %v5149_v12, 0  ;;  %vm5300_vm13 = vc.u32 %v16039_v42, %v16041_v61 }
 0x558   :  { %v5132_v3 = vxor.u32 2147483648, %v11171_v50  ;;  %v5003_v49 = vsub.s32 32, %v5002_v51  ;;  %v5004_v4 = vshll.u32 %v16007_v40, %v5002_v51  ;;  %v5007_v47 = vsub.s32 4294967266, %v5002_v51 }
 0x559   :  { %v5136_v19 = vsel %vm5134_vm10, %v5135_v18, %v11171_v50  ;;  %v10130_v0 = vsel %vm10128_vm2, %v5135_v18, %v11171_v50  ;;  %v5301_v53 = vadd.s32 1, %v16042_v23  ;;  %v5151_v7 = vsel %vm5150_vm12, %v5149_v12, 0 }
 0x55a   :  { %v5133_v27 = vsel %vm5131_vm8, %v11169_v36, %v5132_v3  ;;  %v10127_v25 = vsel %vm10125_vm1, %v11169_v36, %v5132_v3  ;;  %v5005_v31 = vshrl.u32 %v4987_v44, %v5003_v49  ;;  %v5008_v57 = vadd.s32 127, %v5007_v47 }
 0x55b   :  { %v5137_v8 = vsel %vm5130_vm0, %v5133_v27, %v5136_v19  ;;  %v10131_v55 = vsel %vm10124_vm5, %v10127_v25, %v10130_v0  ;;  %v5153_v10 = vand.u32 31, %v5151_v7  ;;  %v5302_v1 = vsel %vm5300_vm13, %v5301_v53, %v16042_v23 }
 0x55c   :  { %v5138_v59 = vsel %vm5127_vm6, nan, %v5137_v8  ;;  %v10132_v56 = vsel %vm5127_vm6, nan, %v10131_v55  ;;  %v5006_v40 = vor.u32 %v5005_v31, %v5004_v4  ;;  %v5009_v58 = vshll.u32 %v5008_v57, 23 }
 0x55d   :  { %5392 = vst [vmem:[#allocation2 + $0x2d0] sm:$0xff] %v5138_v59  ;;  %10384 = vst [vmem:[#allocation2 + $0x2d8] sm:$0xff] %v10132_v56  ;;  %v5303_v32 = vadd.s32 %v5302_v1, %v5298_v38  ;;  %v5154_v2 = vsub.s32 32, %v5153_v10  ;;  %v5146_v39 = vand.u32 8388607, %v5139_v15  ;;  %v5165_v45 = vshll.u32 %v11220_v28, %v5153_v10 }
 0x55e   :  { %v5010_v34 = vor.u32 4788187, %v5009_v58  ;;  %v5013_v63 = vcvt.s32.f32 %v5006_v40  ;;  %v5152_v43 = vshrl.u32 %v5151_v7, 5  ;;  %v5156_v13 = vshll.u32 %v11217_v20, %v5153_v10 }
 0x55f   :  { %v5304_v22 = vadd.s32 536870912, %v5303_v32  ;;  %v5157_v60 = vshrl.u32 %v11218_v24, %v5154_v2  ;;  %v5160_v29 = vshrl.u32 %v11219_v26, %v5154_v2  ;;  %v5163_v9 = vshrl.u32 %v11220_v28, %v5154_v2 }
 0x560   :  { %v5011_v14 = vand.u32 2147483647, %v5010_v34  ;;  %v5166_v46 = vshrl.u32 %v11221_v30, %v5154_v2  ;;  %v5159_v62 = vshll.u32 %v11218_v24, %v5153_v10  ;;  %v5162_v48 = vshll.u32 %v11219_v26, %v5153_v10 }
 0x561   :  { %v16078_v35 = vshrl.u32 %v5304_v22, 30  ;;  %v5169_v33 = vshrl.u32 %v11222_v37, %v5154_v2  ;;  %vm16086_vm14 = vcmp.le.f32.partialorder %v4931_v17, 0.7853982  ;;  %v5158_v18 = vor.u32 %v5157_v60, %v5156_v13 }
 0x562   :  { %v5014_v36 = vmul.f32 %v5013_v63, %v5011_v14  ;;  %v5167_v54 = vor.u32 %v5166_v46, %v5165_v45  ;;  %v5161_v23 = vor.u32 %v5160_v29, %v5159_v62  ;;  %vm4933_vm15 = vcmp.lt.s32.totalorder %v15817_v52, 0 }
 0x563   :  { %v5306_v28 = vshll.u32 %v16078_v35, 30  ;;  %v5164_v24 = vor.u32 %v5163_v9, %v5162_v48  ;;  %v5168_v3 = vshll.u32 %v11221_v30, %v5153_v10  ;;  %v5018_v26 = vsel %vm4933_vm15, %v5017_v6, %v15993_v16 }
 0x564   :  { %v5015_v12 = vxor.u32 2147483648, %v5014_v36  ;;  %v5147_v37 = vor.u32 8388608, %v5146_v39  ;;  %vm5174_vm2 = vcmp.lt.s32.totalorder %v5152_v43, 4  ;;  %vm5171_vm4 = vcmp.lt.s32.totalorder %v5152_v43, 1 }
 0x565   :  { %v5307_v44 = vsub.s32 %v5303_v32, %v5306_v28  ;;  %v5170_v17 = vor.u32 %v5169_v33, %v5168_v3  ;;  %v5180_v0 = vsel %vm5174_vm2, %v5167_v54, 920167782  ;;  %vm5173_vm1 = vcmp.lt.s32.totalorder %v5152_v43, 3 }
 0x566   :  { %v5016_v19 = vsel %vm4933_vm15, %v5015_v12, %v5014_v36  ;;  %v5179_v27 = vsel %vm5171_vm4, %v5158_v18, %v5161_v23  ;;  %v5020_v30 = vsel %vm16086_vm14, 0, %v5018_v26  ;;  %v5155_v16 = vshrl.u32 %v11217_v20, %v5154_v2 }
 0x567   :  { %v5019_v51 = vsel %vm16086_vm14, %v15817_v52, %v5016_v19  ;;  %v5309_v5 = vsub.s32 0, %v5307_v44  ;;  %v5181_v25 = vsel %vm5173_vm1, %v5164_v24, %v5180_v0  ;;  %vm5172_vm7 = vcmp.lt.s32.totalorder %v5152_v43, 2 }
 0x568   :  { %11172 = vcosq.f32 %v5019_v51  ;;  %v5176_v8 = vsel %vm5174_vm2, %v5164_v24, 2102212464  ;;  %v5182_v55 = vsel %vm5172_vm7, %v5179_v27, %v5181_v25  ;;  %v5183_v4 = vsel %vm5171_vm4, %v5161_v23, %v5164_v24 }
 0x569   :  { %11174 = vsinq.f32 %v5019_v51  ;;  %v10593_v49 = vmin.u32 %v5309_v5, %v5307_v44  ;;  %v5184_v47 = vsel %vm5174_vm2, %v5170_v17, 1326507024  ;;  %v5187_v59 = vshll.u32 %v5147_v37, 8 }
 0x56a   :  { %v5024_v56 = vadd.s32 3, %v5020_v30  ;;  %v10020_v31 = vand.u32 3, %v5020_v30  ;;  %v5175_v53 = vsel %vm5171_vm4, %v5155_v16, %v5158_v18  ;;  %v5177_v20 = vsel %vm5173_vm1, %v5161_v23, %v5176_v8 }
 0x56b   :  { %v5311_v57 = vclz %v10593_v49  ;;  %v5185_v7 = vsel %vm5173_vm1, %v5167_v54, %v5184_v47  ;;  %v16110_v40 = vmul.u32.u64.low %v5187_v59, %v5182_v55  ;;  %v16111_v38 = vmul.u32.u64.high %v5187_v59, %v5182_v55, %v16110_v40 }
 0x56c   :  { %v5186_v58 = vsel %vm5172_vm7, %v5183_v4, %v5185_v7  ;;  %v5178_v2 = vsel %vm5172_vm7, %v5175_v53, %v5177_v20  ;;  %v5025_v34 = vand.u32 3, %v5024_v56  ;;  %vm10021_vm5 = vcmp.lt.s32.totalorder %v10020_v31, 2 }
 0x56d   :  { %v10594_v10 = vadd.s32 4294967294, %v5311_v57  ;;  %v16115_v1 = vmul.u32.u64.low %v5187_v59, %v5186_v58  ;;  %v16116_v32 = vmul.u32.u64.high %v5187_v59, %v5186_v58, %v16115_v1  ;;  %v5197_v39 = vadd.s32 1, %v16111_v38 }
 0x56e   :  { %vm10022_vm3 = vcmp.eq.s32.totalorder %v10020_v31, 0  ;;  %v5299_v63 = vadd.s32 %v16041_v61, %v16039_v42  ;;  %vm10025_vm6 = vcmp.eq.s32.totalorder %v10020_v31, 2  ;;  %v5194_v9 = vmul.u32 %v5187_v59, %v5178_v2 }
 0x56f   :  { %vm10595_vm0 = vcmp.lt.s32.totalorder %v10594_v10, 0  ;;  %vm5196_vm8 = vc.u32 %v16116_v32, %v16110_v40  ;;  %vm5027_vm9 = vcmp.eq.s32.totalorder %v5025_v34, 0  ;;  %vm5030_vm10 = vcmp.eq.s32.totalorder %v5025_v34, 2 }
 0x570   :  { %v5314_v6 = vsel %vm10595_vm0, 0, %v10594_v10  ;;  %v5198_v62 = vsel %vm5196_vm8, %v5197_v39, %v16111_v38  ;;  %vm5026_vm11 = vcmp.lt.s32.totalorder %v5025_v34, 2  ;;  %vm5023_vm12 = vweird.f32 %v15817_v52 }
 0x571   :  { %v5315_v22 = vsub.s32 32, %v5314_v6  ;;  %v5319_v60 = vsub.s32 4294967266, %v5314_v6  ;;  %v5316_v14 = vshll.u32 %v5307_v44, %v5314_v6  ;;  %v5199_v48 = vadd.s32 %v5198_v62, %v5194_v9 }
 0x572   :  { %v11173_v29 = vpop.eup %11172  ;;  %v5329_v51 = vsub.s32 4, %v16078_v35  ;;  %vm5245_vm13 = vcmp.lt.s32.totalorder %v15856_v11, 0  ;;  %vm5244_vm14 = vcmp.le.f32.partialorder %v5243_v21, 0.7853982  ;;  %v5195_v56 = vadd.s32 %v16110_v40, %v16116_v32 }
 0x573   :  { %v11175_v45 = vpop.eup %11174  ;;  %v5031_v46 = vxor.u32 2147483648, %v11173_v29  ;;  %v5317_v43 = vshrl.u32 %v5299_v63, %v5315_v22  ;;  %v5320_v13 = vadd.s32 127, %v5319_v60  ;;  %v5200_v18 = vadd.s32 536870912, %v5199_v48 }
 0x574   :  { %v5028_v36 = vxor.u32 2147483648, %v11175_v45  ;;  %v5330_v16 = vsel %vm5245_vm13, %v5329_v51, %v16078_v35  ;;  %vm5335_vm2 = vweird.f32 %v15856_v11  ;;  %vm5140_vm8 = vcmp.le.f32.partialorder %v5139_v15, 0.7853982 }
 0x575   :  { %v5032_v42 = vsel %vm5030_vm10, %v5031_v46, %v11175_v45  ;;  %v10027_v61 = vsel %vm10025_vm6, %v5031_v46, %v11175_v45  ;;  %v5318_v54 = vor.u32 %v5317_v43, %v5316_v14  ;;  %v5321_v33 = vshll.u32 %v5320_v13, 23 }
 0x576   :  { %v5029_v50 = vsel %vm5027_vm9, %v11173_v29, %v5028_v36  ;;  %v10024_v28 = vsel %vm10022_vm3, %v11173_v29, %v5028_v36  ;;  %v16128_v44 = vshrl.u32 %v5200_v18, 30  ;;  %v5332_v8 = vsel %vm5244_vm14, 0, %v5330_v16 }
 0x577   :  { %v5033_v23 = vsel %vm5026_vm11, %v5029_v50, %v5032_v42  ;;  %v10028_v12 = vsel %vm10021_vm5, %v10024_v28, %v10027_v61  ;;  %v5322_v24 = vor.u32 4788187, %v5321_v33  ;;  %v5325_v19 = vcvt.s32.f32 %v5318_v54 }
 0x578   :  { %v5034_v3 = vsel %vm5023_vm12, nan, %v5033_v23  ;;  %v10029_v26 = vsel %vm5023_vm12, nan, %v10028_v12  ;;  %v5202_v17 = vshll.u32 %v16128_v44, 30  ;;  %v5336_v47 = vadd.s32 3, %v5332_v8 }
 0x579   :  { %5391 = vst [vmem:[#allocation2 + $0x2c0] sm:$0xff] %v5034_v3  ;;  %10383 = vst [vmem:[#allocation2 + $0x2c8] sm:$0xff] %v10029_v26  ;;  %v5323_v37 = vand.u32 2147483647, %v5322_v24  ;;  %v10329_v53 = vand.u32 3, %v5332_v8  ;;  %v5225_v43 = vsub.s32 4, %v16128_v44 }
 0x57a   :  { %v5203_v5 = vsub.s32 %v5199_v48, %v5202_v17  ;;  %v5337_v21 = vand.u32 3, %v5336_v47  ;;  %vm5141_vm6 = vcmp.lt.s32.totalorder %v15980_v41, 0 }
 0x57b   :  { %v5326_v0 = vmul.f32 %v5325_v19, %v5323_v37  ;;  %vm10331_vm1 = vcmp.eq.s32.totalorder %v10329_v53, 0  ;;  %vm10334_vm7 = vcmp.eq.s32.totalorder %v10329_v53, 2  ;;  %vm10330_vm3 = vcmp.lt.s32.totalorder %v10329_v53, 2 }
 0x57c   :  { %v5205_v52 = vsub.s32 0, %v5203_v5  ;;  %vm5342_vm4 = vcmp.eq.s32.totalorder %v5337_v21, 2  ;;  %vm5339_vm0 = vcmp.eq.s32.totalorder %v5337_v21, 0  ;;  %vm5338_vm5 = vcmp.lt.s32.totalorder %v5337_v21, 2 }
 0x57d   :  { %v5327_v27 = vxor.u32 2147483648, %v5326_v0  ;;  %v5226_v36 = vsel %vm5141_vm6, %v5225_v43, %v16128_v44 }
 0x57e   :  { %v10589_v49 = vmin.u32 %v5205_v52, %v5203_v5  ;;  %v5228_v42 = vsel %vm5140_vm8, 0, %v5226_v36 }
 0x57f   :  { %v5328_v30 = vsel %vm5245_vm13, %v5327_v27, %v5326_v0  ;;  %v10226_v54 = vand.u32 3, %v5228_v42 }
 0x580   :  { %v5331_v25 = vsel %vm5244_vm14, %v15856_v11, %v5328_v30  ;;  %v5207_v55 = vclz %v10589_v49  ;;  %v5232_v11 = vadd.s32 3, %v5228_v42 }
 0x581   :  { %11176 = vcosq.f32 %v5331_v25  ;;  %vm10231_vm10 = vcmp.eq.s32.totalorder %v10226_v54, 2  ;;  %vm10228_vm12 = vcmp.eq.s32.totalorder %v10226_v54, 0  ;;  %vm10227_vm14 = vcmp.lt.s32.totalorder %v10226_v54, 2 }
 0x582   :  { %11178 = vsinq.f32 %v5331_v25  ;;  %v10590_v4 = vadd.s32 4294967294, %v5207_v55  ;;  %v5233_v61 = vand.u32 3, %v5232_v11 }
 0x584   :  { %vm10591_vm15 = vcmp.lt.s32.totalorder %v10590_v4, 0  ;;  %vm5238_vm9 = vcmp.eq.s32.totalorder %v5233_v61, 2  ;;  %vm5235_vm11 = vcmp.eq.s32.totalorder %v5233_v61, 0  ;;  %vm5234_vm13 = vcmp.lt.s32.totalorder %v5233_v61, 2 }
 0x585   :  { %v5210_v59 = vsel %vm10591_vm15, 0, %v10590_v4  ;;  %vm5231_vm15 = vweird.f32 %v15980_v41 }
 0x586   :  { %v5211_v31 = vsub.s32 32, %v5210_v59  ;;  %v5215_v57 = vsub.s32 4294967266, %v5210_v59  ;;  %v5212_v20 = vshll.u32 %v5203_v5, %v5210_v59 }
 0x588   :  { %v5213_v35 = vshrl.u32 %v5195_v56, %v5211_v31  ;;  %v5216_v7 = vadd.s32 127, %v5215_v57 }
 0x58a   :  { %v5214_v1 = vor.u32 %v5213_v35, %v5212_v20  ;;  %v5217_v2 = vshll.u32 %v5216_v7, 23 }
 0x58b   :  { %v11177_v38 = vpop.eup %11176 }
 0x58c   :  { %v11179_v10 = vpop.eup %11178  ;;  %v5343_v58 = vxor.u32 2147483648, %v11177_v38  ;;  %v5218_v6 = vor.u32 4788187, %v5217_v2  ;;  %v5221_v14 = vcvt.s32.f32 %v5214_v1 }
 0x58d   :  { %v5340_v34 = vxor.u32 2147483648, %v11179_v10 }
 0x58e   :  { %v5344_v40 = vsel %vm5342_vm4, %v5343_v58, %v11179_v10  ;;  %v10336_v32 = vsel %vm10334_vm7, %v5343_v58, %v11179_v10  ;;  %v5219_v29 = vand.u32 2147483647, %v5218_v6 }
 0x58f   :  { %v5341_v39 = vsel %vm5339_vm0, %v11177_v38, %v5340_v34  ;;  %v10333_v63 = vsel %vm10331_vm1, %v11177_v38, %v5340_v34 }
 0x590   :  { %v5345_v22 = vsel %vm5338_vm5, %v5341_v39, %v5344_v40  ;;  %v10337_v60 = vsel %vm10330_vm3, %v10333_v63, %v10336_v32  ;;  %v5222_v46 = vmul.f32 %v5221_v14, %v5219_v29 }
 0x591   :  { %v5346_v9 = vsel %vm5335_vm2, nan, %v5345_v22  ;;  %v10338_v45 = vsel %vm5335_vm2, nan, %v10337_v60 }
 0x592   :  { %5394 = vst [vmem:[#allocation2 + $0x2f0] sm:$0xff] %v5346_v9  ;;  %10386 = vst [vmem:[#allocation2 + $0x2f8] sm:$0xff] %v10338_v45  ;;  %v5223_v13 = vxor.u32 2147483648, %v5222_v46 }
 0x594   :  { %v5224_v62 = vsel %vm5141_vm6, %v5223_v13, %v5222_v46 }
 0x595   :  { %v5227_v48 = vsel %vm5140_vm8, %v15980_v41, %v5224_v62 }
 0x596   :  { %11180 = vcosq.f32 %v5227_v48 }
 0x597   :  { %11182 = vsinq.f32 %v5227_v48 }
 0x5a0   :  { %v11181_v33 = vpop.eup %11180 }
 0x5a1   :  { %v11183_v50 = vpop.eup %11182  ;;  %v5239_v28 = vxor.u32 2147483648, %v11181_v33 }
 0x5a2   :  { %v5236_v18 = vxor.u32 2147483648, %v11183_v50 }
 0x5a3   :  { %v5240_v15 = vsel %vm5238_vm9, %v5239_v28, %v11183_v50  ;;  %v10233_v23 = vsel %vm10231_vm10, %v5239_v28, %v11183_v50 }
 0x5a4   :  { %v5237_v12 = vsel %vm5235_vm11, %v11181_v33, %v5236_v18  ;;  %v10230_v24 = vsel %vm10228_vm12, %v11181_v33, %v5236_v18 }
 0x5a5   :  { %v5241_v3 = vsel %vm5234_vm13, %v5237_v12, %v5240_v15  ;;  %v10234_v26 = vsel %vm10227_vm14, %v10230_v24, %v10233_v23 }
 0x5a6   :  { %v5242_v44 = vsel %vm5231_vm15, nan, %v5241_v3  ;;  %v10235_v37 = vsel %vm5231_vm15, nan, %v10234_v26 }
 0x5a7   :  { %5393 = vst [vmem:[#allocation2 + $0x2e0] sm:$0xff] %v5242_v44  ;;  %10385 = vst [vmem:[#allocation2 + $0x2e8] sm:$0xff] %v10235_v37 }
 0x5a8   :  { %11203 = shalt.err (!%p11200_p4)
}
 0x5a9   :  { %s11204_s14 = scalar_lea.hbm %s16165_s2, 12288 }
 0x5aa   :  { %p11205_p5 = scmp.ne.s32.totalorder %s16165_s2, %s11204_s14  ;;  %p11208_p6 = scmp.lt.u32.totalorder %s11204_s14, %s16165_s2 }
 0x5ac   :  { %p11210_p7 = pnand %p11208_p6, %p11205_p5 }
 0x5ae   :  { %11213 = shalt.err (!%p11210_p7)
}
 0x5af   :  { %s11224_s19 = smov 256   ;;  %s11225_s20 = smov 16  }
 0x5b0   :  { %10398 = dma.vmem_to_hbm [thread:$0]  %s10393_s10, 12288, %s16165_s2, [#allocation3], %s11224_s19, %s11224_s19, %s11225_s20  }
 0x5b1   :  { %11214 = dma.done.wait [#allocation3], 12288  }
 0x5b2   :  { %11215 = vsyncadd [#allocation3], 4294955008 }
 0x5b3   :  { %10402 = vsyncpa [#allocation3], 1 }

</bundles_post_ra>
